<compile_context>
chip_gen: v5e
topology: v5e:2x2
jax: 0.10.0
libtpu: 0.0.40
codegen_flags: <defaults>
</compile_context>

<pallas_src>
import functools

import jax
import jax.numpy as jnp
from jax.experimental import pallas as pl
from jax.experimental.pallas import tpu as pltpu

CPAD = 128   # padded channel / contraction width (lane dimension)
K = 5        # fused "same" kernel size (3x3 convs zero-padded to 5x5)
C_IN = 3
C_MID = 65   # 50 + 10 + 5 concatenated channels


# ----------------------------------------------------------------------------
# Fused Pallas kernel: both conv stages for B batch elements per grid step.
#   cols_ref : (B, H*W, 128)     bf16  stage-1 im2col operand (75 cols + ones)
#   w1_ref   : (128, 128)        bf16  stage-1 fused weight (row 75 = bias)
#   w2_ref   : (5, 640, 128)     bf16  stage-2 kw-folded weight (row = kw*128+c)
#   b2_ref   : (1, 128)          f32
#   o_ref    : (B, H*W, 128)     bf16  stage-2 output (channels 65.. are junk)
#   y1_ref   : (B, H+4, W+4, 128) f32  VMEM scratch (spatially padded y1)
#   slab_ref : (B, (H+4)*W, 640) bf16 VMEM scratch (kw-folded wide slab)
#   acc_ref  : (B*H*W, 128)      f32  VMEM scratch (stage-2 accumulator)
# ----------------------------------------------------------------------------
def _prep3_kernel(cols_ref, w1_ref, w2_ref, b2_ref, o_ref,
                  y1_ref, slab_ref, acc_ref, *, H, W, B):
    HW = H * W
    pad = K // 2
    Hp, Wp = H + K - 1, W + K - 1
    KC = K * CPAD

    # ---------------- Stage 1: one im2col matmul (bias folded in) ------------
    y1 = jnp.maximum(
        jnp.dot(cols_ref[...].reshape(B * HW, CPAD), w1_ref[...],
                preferred_element_type=jnp.float32),
        0.0).reshape(B, H, W, CPAD)

    for b in range(B):
        # Zero ONLY the 2-pixel halo ring; the interior is overwritten below.
        # Do NOT gate this on program_id==0: with "parallel" semantics the
        # second TensorCore's private scratch would keep a dirty halo (v7x).
        y1_ref[b, 0:pad, :, :] = jnp.zeros((pad, Wp, CPAD), jnp.float32)
        y1_ref[b, pad + H:Hp, :, :] = jnp.zeros((pad, Wp, CPAD), jnp.float32)
        y1_ref[b, pad:pad + H, 0:pad, :] = jnp.zeros((H, pad, CPAD), jnp.float32)
        y1_ref[b, pad:pad + H, pad + W:Wp, :] = jnp.zeros((H, pad, CPAD),
                                                          jnp.float32)
        y1_ref[b, pad:pad + H, pad:pad + W, :] = y1[b]

        # kw-folded wide slab: lane block kw <- kw-shifted window of padded y1.
        # y1 stays f32 so the sublane (W-axis) shift needs no bf16 repacking;
        # the bf16 cast rides the copy.
        for kw in range(K):
            y1win = y1_ref[b, :, kw:kw + W, :]                 # (Hp, W, 128) f32
            slab_ref[b, :, kw * CPAD:(kw + 1) * CPAD] = (
                y1win.astype(slab_ref.dtype).reshape(Hp * W, CPAD))

    # ------------- Stage 2: 5 matmuls over a 640-deep contraction ------------
    for kh in range(K):
        patch = slab_ref[:, pl.ds(kh * W, HW), :].reshape(B * HW, KC)
        contrib = jnp.dot(patch, w2_ref[kh], preferred_element_type=jnp.float32)
        if kh == 0:
            acc_ref[...] = contrib
        else:
            acc_ref[...] = acc_ref[...] + contrib

    # Bias + ReLU + bf16 cast fused into the single output store.
    o_ref[...] = jnp.maximum(acc_ref[...] + b2_ref[...], 0.0
                             ).reshape(B, HW, CPAD).astype(o_ref.dtype)


# ----------------------------------------------------------------------------
# Host-side parameter fusion & im2col (pure layout prep feeding the kernel)
# ----------------------------------------------------------------------------
def _pad3x3_to_5x5(w):
    # OIHW: a 3x3 "same" conv == a 5x5 "same" conv with a zero outer tap ring.
    if w.shape[-1] == 3:
        w = jnp.pad(w, ((0, 0), (0, 0), (1, 1), (1, 1)))
    return w


def _fuse_stage1(p):
    w = jnp.concatenate([_pad3x3_to_5x5(p["conv1_w"]),
                         _pad3x3_to_5x5(p["conv2_w"]),
                         _pad3x3_to_5x5(p["conv3_w"])], axis=0)      # (65,3,5,5)
    w = jnp.transpose(w, (2, 3, 1, 0)).reshape(K * K * C_IN, C_MID)  # rows=(kh,kw,c)
    b = jnp.concatenate([p["conv1_b"], p["conv2_b"], p["conv3_b"]])  # (65,)
    w = jnp.concatenate([w, b[None, :]], axis=0)                     # row 75 = bias
    w = jnp.pad(w, ((0, CPAD - (K * K * C_IN + 1)), (0, CPAD - C_MID)))
    return w.astype(jnp.bfloat16)


def _fuse_stage2(p):
    w = jnp.concatenate([_pad3x3_to_5x5(p["conv4_w"]),
                         _pad3x3_to_5x5(p["conv5_w"]),
                         _pad3x3_to_5x5(p["conv6_w"])], axis=0)      # (65,65,5,5)
    w = jnp.transpose(w, (2, 3, 1, 0))                               # (kh,kw,ci,co)
    w = jnp.pad(w, ((0, 0), (0, 0), (0, CPAD - C_MID), (0, CPAD - C_MID)))
    w = w.reshape(K, K * CPAD, CPAD)          # row index within 640 = kw*128+ci
    b = jnp.concatenate([p["conv4_b"], p["conv5_b"], p["conv6_b"]])
    b = jnp.pad(b, (0, CPAD - C_MID)).reshape(1, CPAD)
    return w.astype(jnp.bfloat16), b.astype(jnp.float32)


def _im2col_stage1(x_nhwc):
    """(N, H, W, 3) -> (N, H*W, 128) bf16, cols=(kh,kw,c); column 75 = ones."""
    N, H, W, C = x_nhwc.shape
    pad = K // 2
    xp = jnp.pad(x_nhwc, ((0, 0), (pad, pad), (pad, pad), (0, 0)))
    cols = jnp.concatenate(
        [xp[:, kh:kh + H, kw:kw + W, :] for kh in range(K) for kw in range(K)],
        axis=-1)                                                     # (N,H,W,75)
    ones = jnp.ones(cols.shape[:-1] + (1,), cols.dtype)              # bias lane
    cols = jnp.concatenate([cols, ones], axis=-1)                    # (N,H,W,76)
    cols = jnp.pad(cols, ((0, 0), (0, 0), (0, 0), (0, CPAD - (K * K * C + 1))))
    return cols.reshape(N, H * W, CPAD).astype(jnp.bfloat16)


def _pick_block_batch(n):
    """Largest divisor <= 4 of n that still leaves >= 2 grid steps (megacore)."""
    best = 1
    for d in range(1, min(n, 4) + 1):
        if n % d == 0 and n // d >= 2:
            best = d
    return best


# ----------------------------------------------------------------------------
# Forward pass (NCHW in / NCHW out, matching the PyTorch module)
# ----------------------------------------------------------------------------
def prep_network3(x, params, *, block_batch=None):
    N, C, H, W = x.shape
    assert C == C_IN
    HW = H * W
    Hp, Wp = H + K - 1, W + K - 1
    if block_batch is None:
        block_batch = _pick_block_batch(N)
    assert N % block_batch == 0
    B = block_batch

    w1 = _fuse_stage1(params)
    w2, b2 = _fuse_stage2(params)
    cols = _im2col_stage1(jnp.transpose(x, (0, 2, 3, 1)))

    kernel = functools.partial(_prep3_kernel, H=H, W=W, B=B)
    y2 = pl.pallas_call(
        kernel,
        out_shape=jax.ShapeDtypeStruct((N, HW, CPAD), jnp.bfloat16),
        grid=(N // B,),
        in_specs=[
            pl.BlockSpec((B, HW, CPAD), lambda n: (n, 0, 0)),          # cols
            pl.BlockSpec((CPAD, CPAD), lambda n: (0, 0)),              # w1
            pl.BlockSpec((K, K * CPAD, CPAD), lambda n: (0, 0, 0)),    # w2 (wide)
            pl.BlockSpec((1, CPAD), lambda n: (0, 0)),                 # b2
        ],
        out_specs=pl.BlockSpec((B, HW, CPAD), lambda n: (n, 0, 0)),
        scratch_shapes=[
            pltpu.VMEM((B, Hp, Wp, CPAD), jnp.float32),   # padded y1 (f32)
            pltpu.VMEM((B, Hp * W, K * CPAD), jnp.bfloat16),  # kw-folded slab
            pltpu.VMEM((B * HW, CPAD), jnp.float32),      # stage-2 accumulator
        ],
        compiler_params=pltpu.CompilerParams(
            dimension_semantics=("parallel",)),
    )(cols, w1, w2, b2)

    y2 = y2.reshape(N, H, W, CPAD)[..., :C_MID]
    return jnp.transpose(y2, (0, 3, 1, 2)).astype(jnp.float32)       # (N,65,H,W)


# ----------------------------------------------------------------------------
# Parameter construction (deterministic, PyTorch-default-style init bounds)
# ----------------------------------------------------------------------------
_CONV_SHAPES = {
    "conv1": (50, 3, 3, 3),
    "conv2": (10, 3, 3, 3),
    "conv3": (5, 3, 5, 5),
    "conv4": (50, 65, 3, 3),
    "conv5": (10, 65, 3, 3),
    "conv6": (5, 65, 5, 5),
}


def make_params(key):
    params = {}
    for name, shp in _CONV_SHAPES.items():
        key, kw_, kb_ = jax.random.split(key, 3)
        fan_in = shp[1] * shp[2] * shp[3]
        bound = 1.0 / (fan_in ** 0.5)
        params[name + "_w"] = jax.random.uniform(kw_, shp, jnp.float32, -bound, bound)
        params[name + "_b"] = jax.random.uniform(kb_, (shp[0],), jnp.float32, -bound, bound)
    return params


# ----------------------------------------------------------------------------
# Pure-JAX reference (for a sanity check)
# ----------------------------------------------------------------------------
def _ref_conv(x, w, b, pad):
    y = jax.lax.conv_general_dilated(
        x, w, window_strides=(1, 1), padding=((pad, pad), (pad, pad)),
        dimension_numbers=("NCHW", "OIHW", "NCHW"))
    return jax.nn.relu(y + b[None, :, None, None])


def prep_network3_ref(x, p):
    o1 = _ref_conv(x, p["conv1_w"], p["conv1_b"], 1)
    o2 = _ref_conv(x, p["conv2_w"], p["conv2_b"], 1)
    o3 = _ref_conv(x, p["conv3_w"], p["conv3_b"], 2)
    cat = jnp.concatenate([o1, o2, o3], axis=1)
    o4 = _ref_conv(cat, p["conv4_w"], p["conv4_b"], 1)
    o5 = _ref_conv(cat, p["conv5_w"], p["conv5_b"], 1)
    o6 = _ref_conv(cat, p["conv6_w"], p["conv6_b"], 2)
    return jnp.concatenate([o4, o5, o6], axis=1)


if __name__ == "__main__":
    key = jax.random.PRNGKey(0)
    key, kx = jax.random.split(key)
    N, C, H, W = 2, 3, 16, 16
    x = jax.random.normal(kx, (N, C, H, W), jnp.float32)
    params = make_params(key)

    out = jax.jit(prep_network3)(x, params)
    out = jax.block_until_ready(out)
    assert out.shape == (N, 65, H, W), out.shape

    ref = prep_network3_ref(x, params)
    # Loose tolerance: bf16 MXU operands + bf16 output vs XLA f32 conv.
    assert jnp.allclose(out, ref, atol=6e-2, rtol=6e-2), float(
        jnp.max(jnp.abs(out - ref)))

    print("KERNEL_OK")
</pallas_src>

<mosaic_0001>
module attributes {stable_mosaic.version = 11 : i64} {
  func.func @_prep3_kernel(%arg0: i32, %arg1: memref<1x256x128xbf16, #tpu.memory_space<vmem>>, %arg2: memref<128x128xbf16, #tpu.memory_space<vmem>>, %arg3: memref<5x640x128xbf16, #tpu.memory_space<vmem>>, %arg4: memref<1x128xf32, #tpu.memory_space<vmem>>, %arg5: memref<1x256x128xbf16, #tpu.memory_space<vmem>>, %arg6: memref<1x20x20x128xf32, #tpu.memory_space<vmem>>, %arg7: memref<1x320x640xbf16, #tpu.memory_space<vmem>>, %arg8: memref<256x128xf32, #tpu.memory_space<vmem>>) attributes {dimension_semantics = [#tpu.dimension_semantics<parallel>], iteration_bounds = array<i64: 2>, scalar_prefetch = 0 : i64, scratch_operands = 3 : i64, tpu.core_type = #tpu.core_type<tc>, window_params = [{transform_indices = @transform_0, window_bounds = array<i64: 1, 256, 128>}, {pipeline_mode = #tpu.pipeline_mode<synchronous>, transform_indices = @transform_1, window_bounds = array<i64: 128, 128>}, {pipeline_mode = #tpu.pipeline_mode<synchronous>, transform_indices = @transform_2, window_bounds = array<i64: 5, 640, 128>}, {pipeline_mode = #tpu.pipeline_mode<synchronous>, transform_indices = @transform_3, window_bounds = array<i64: 1, 128>}, {transform_indices = @transform_4, window_bounds = array<i64: 1, 256, 128>}]} {
    %c0 = arith.constant 0 : index
    %c0_0 = arith.constant 0 : index
    %c0_1 = arith.constant 0 : index
    %0 = vector.load %arg1[%c0, %c0_0, %c0_1] : memref<1x256x128xbf16, #tpu.memory_space<vmem>>, vector<1x256x128xbf16>
    %1 = vector.shape_cast %0 : vector<1x256x128xbf16> to vector<256x128xbf16>
    %c0_2 = arith.constant 0 : index
    %c0_3 = arith.constant 0 : index
    %2 = vector.load %arg2[%c0_2, %c0_3] : memref<128x128xbf16, #tpu.memory_space<vmem>>, vector<128x128xbf16>
    %cst = arith.constant dense<0.000000e+00> : vector<256x128xf32>
    %3 = tpu.matmul %1, %2, %cst {dimension_numbers = #tpu.dot_dimension_numbers<[1], [0], [0], [1], [0, 0, 1, 1], [], []>} : vector<256x128xbf16>, vector<128x128xbf16>, vector<256x128xf32> -> vector<256x128xf32>
    %cst_4 = arith.constant 0.000000e+00 : f32
    %4 = vector.broadcast %cst_4 : f32 to vector<256x128xf32>
    %5 = arith.maximumf %3, %4 : vector<256x128xf32>
    %6 = vector.shape_cast %5 : vector<256x128xf32> to vector<1x16x16x128xf32>
    %cst_5 = arith.constant 0.000000e+00 : f32
    %7 = vector.broadcast %cst_5 : f32 to vector<2x20x128xf32>
    %c0_6 = arith.constant 0 : index
    %c0_7 = arith.constant 0 : index
    %c0_8 = arith.constant 0 : index
    %c0_9 = arith.constant 0 : index
    %8 = vector.load %arg6[%c0_6, %c0_7, %c0_8, %c0_9] : memref<1x20x20x128xf32, #tpu.memory_space<vmem>>, vector<1x2x20x128xf32>
    %9 = vector.shape_cast %8 : vector<1x2x20x128xf32> to vector<2x20x128xf32>
    %10 = vector.shape_cast %7 : vector<2x20x128xf32> to vector<1x2x20x128xf32>
    tpu.vector_store %arg6[%c0_6, %c0_7, %c0_8, %c0_9], %10 {strides = array<i32>} : memref<1x20x20x128xf32, #tpu.memory_space<vmem>>, vector<1x2x20x128xf32>,
    %cst_10 = arith.constant 0.000000e+00 : f32
    %11 = vector.broadcast %cst_10 : f32 to vector<2x20x128xf32>
    %c0_11 = arith.constant 0 : index
    %c18 = arith.constant 18 : index
    %c0_12 = arith.constant 0 : index
    %c0_13 = arith.constant 0 : index
    %12 = vector.load %arg6[%c0_11, %c18, %c0_12, %c0_13] : memref<1x20x20x128xf32, #tpu.memory_space<vmem>>, vector<1x2x20x128xf32>
    %13 = vector.shape_cast %12 : vector<1x2x20x128xf32> to vector<2x20x128xf32>
    %14 = vector.shape_cast %11 : vector<2x20x128xf32> to vector<1x2x20x128xf32>
    tpu.vector_store %arg6[%c0_11, %c18, %c0_12, %c0_13], %14 {strides = array<i32>} : memref<1x20x20x128xf32, #tpu.memory_space<vmem>>, vector<1x2x20x128xf32>,
    %cst_14 = arith.constant 0.000000e+00 : f32
    %15 = vector.broadcast %cst_14 : f32 to vector<16x2x128xf32>
    %c0_15 = arith.constant 0 : index
    %c2 = arith.constant 2 : index
    %c0_16 = arith.constant 0 : index
    %c0_17 = arith.constant 0 : index
    %16 = vector.load %arg6[%c0_15, %c2, %c0_16, %c0_17] : memref<1x20x20x128xf32, #tpu.memory_space<vmem>>, vector<1x16x2x128xf32>
    %17 = vector.shape_cast %16 : vector<1x16x2x128xf32> to vector<16x2x128xf32>
    %18 = vector.shape_cast %15 : vector<16x2x128xf32> to vector<1x16x2x128xf32>
    tpu.vector_store %arg6[%c0_15, %c2, %c0_16, %c0_17], %18 {strides = array<i32>} : memref<1x20x20x128xf32, #tpu.memory_space<vmem>>, vector<1x16x2x128xf32>,
    %cst_18 = arith.constant 0.000000e+00 : f32
    %19 = vector.broadcast %cst_18 : f32 to vector<16x2x128xf32>
    %c0_19 = arith.constant 0 : index
    %c2_20 = arith.constant 2 : index
    %c18_21 = arith.constant 18 : index
    %c0_22 = arith.constant 0 : index
    %20 = vector.load %arg6[%c0_19, %c2_20, %c18_21, %c0_22] : memref<1x20x20x128xf32, #tpu.memory_space<vmem>>, vector<1x16x2x128xf32>
    %21 = vector.shape_cast %20 : vector<1x16x2x128xf32> to vector<16x2x128xf32>
    %22 = vector.shape_cast %19 : vector<16x2x128xf32> to vector<1x16x2x128xf32>
    tpu.vector_store %arg6[%c0_19, %c2_20, %c18_21, %c0_22], %22 {strides = array<i32>} : memref<1x20x20x128xf32, #tpu.memory_space<vmem>>, vector<1x16x2x128xf32>,
    %23 = vector.shape_cast %6 : vector<1x16x16x128xf32> to vector<16x16x128xf32>
    %c0_23 = arith.constant 0 : index
    %c2_24 = arith.constant 2 : index
    %c2_25 = arith.constant 2 : index
    %c0_26 = arith.constant 0 : index
    %24 = vector.load %arg6[%c0_23, %c2_24, %c2_25, %c0_26] : memref<1x20x20x128xf32, #tpu.memory_space<vmem>>, vector<1x16x16x128xf32>
    %25 = vector.shape_cast %24 : vector<1x16x16x128xf32> to vector<16x16x128xf32>
    %26 = vector.shape_cast %23 : vector<16x16x128xf32> to vector<1x16x16x128xf32>
    tpu.vector_store %arg6[%c0_23, %c2_24, %c2_25, %c0_26], %26 {strides = array<i32>} : memref<1x20x20x128xf32, #tpu.memory_space<vmem>>, vector<1x16x16x128xf32>,
    %c0_27 = arith.constant 0 : index
    %c0_28 = arith.constant 0 : index
    %c0_29 = arith.constant 0 : index
    %c0_30 = arith.constant 0 : index
    %27 = vector.load %arg6[%c0_27, %c0_28, %c0_29, %c0_30] : memref<1x20x20x128xf32, #tpu.memory_space<vmem>>, vector<1x20x16x128xf32>
    %28 = vector.shape_cast %27 : vector<1x20x16x128xf32> to vector<20x16x128xf32>
    %29 = arith.truncf %28 : vector<20x16x128xf32> to vector<20x16x128xbf16>
    %30 = vector.shape_cast %29 : vector<20x16x128xbf16> to vector<320x128xbf16>
    %c0_31 = arith.constant 0 : index
    %c0_32 = arith.constant 0 : index
    %c0_33 = arith.constant 0 : index
    %31 = vector.load %arg7[%c0_31, %c0_32, %c0_33] : memref<1x320x640xbf16, #tpu.memory_space<vmem>>, vector<1x320x128xbf16>
    %32 = vector.shape_cast %31 : vector<1x320x128xbf16> to vector<320x128xbf16>
    %33 = vector.shape_cast %30 : vector<320x128xbf16> to vector<1x320x128xbf16>
    tpu.vector_store %arg7[%c0_31, %c0_32, %c0_33], %33 {strides = array<i32>} : memref<1x320x640xbf16, #tpu.memory_space<vmem>>, vector<1x320x128xbf16>,
    %c0_34 = arith.constant 0 : index
    %c0_35 = arith.constant 0 : index
    %c1 = arith.constant 1 : index
    %c0_36 = arith.constant 0 : index
    %34 = vector.load %arg6[%c0_34, %c0_35, %c1, %c0_36] : memref<1x20x20x128xf32, #tpu.memory_space<vmem>>, vector<1x20x16x128xf32>
    %35 = vector.shape_cast %34 : vector<1x20x16x128xf32> to vector<20x16x128xf32>
    %36 = arith.truncf %35 : vector<20x16x128xf32> to vector<20x16x128xbf16>
    %37 = vector.shape_cast %36 : vector<20x16x128xbf16> to vector<320x128xbf16>
    %c0_37 = arith.constant 0 : index
    %c0_38 = arith.constant 0 : index
    %c128 = arith.constant 128 : index
    %38 = vector.load %arg7[%c0_37, %c0_38, %c128] : memref<1x320x640xbf16, #tpu.memory_space<vmem>>, vector<1x320x128xbf16>
    %39 = vector.shape_cast %38 : vector<1x320x128xbf16> to vector<320x128xbf16>
    %40 = vector.shape_cast %37 : vector<320x128xbf16> to vector<1x320x128xbf16>
    tpu.vector_store %arg7[%c0_37, %c0_38, %c128], %40 {strides = array<i32>} : memref<1x320x640xbf16, #tpu.memory_space<vmem>>, vector<1x320x128xbf16>,
    %c0_39 = arith.constant 0 : index
    %c0_40 = arith.constant 0 : index
    %c2_41 = arith.constant 2 : index
    %c0_42 = arith.constant 0 : index
    %41 = vector.load %arg6[%c0_39, %c0_40, %c2_41, %c0_42] : memref<1x20x20x128xf32, #tpu.memory_space<vmem>>, vector<1x20x16x128xf32>
    %42 = vector.shape_cast %41 : vector<1x20x16x128xf32> to vector<20x16x128xf32>
    %43 = arith.truncf %42 : vector<20x16x128xf32> to vector<20x16x128xbf16>
    %44 = vector.shape_cast %43 : vector<20x16x128xbf16> to vector<320x128xbf16>
    %c0_43 = arith.constant 0 : index
    %c0_44 = arith.constant 0 : index
    %c256 = arith.constant 256 : index
    %45 = vector.load %arg7[%c0_43, %c0_44, %c256] : memref<1x320x640xbf16, #tpu.memory_space<vmem>>, vector<1x320x128xbf16>
    %46 = vector.shape_cast %45 : vector<1x320x128xbf16> to vector<320x128xbf16>
    %47 = vector.shape_cast %44 : vector<320x128xbf16> to vector<1x320x128xbf16>
    tpu.vector_store %arg7[%c0_43, %c0_44, %c256], %47 {strides = array<i32>} : memref<1x320x640xbf16, #tpu.memory_space<vmem>>, vector<1x320x128xbf16>,
    %c0_45 = arith.constant 0 : index
    %c0_46 = arith.constant 0 : index
    %c3 = arith.constant 3 : index
    %c0_47 = arith.constant 0 : index
    %48 = vector.load %arg6[%c0_45, %c0_46, %c3, %c0_47] : memref<1x20x20x128xf32, #tpu.memory_space<vmem>>, vector<1x20x16x128xf32>
    %49 = vector.shape_cast %48 : vector<1x20x16x128xf32> to vector<20x16x128xf32>
    %50 = arith.truncf %49 : vector<20x16x128xf32> to vector<20x16x128xbf16>
    %51 = vector.shape_cast %50 : vector<20x16x128xbf16> to vector<320x128xbf16>
    %c0_48 = arith.constant 0 : index
    %c0_49 = arith.constant 0 : index
    %c384 = arith.constant 384 : index
    %52 = vector.load %arg7[%c0_48, %c0_49, %c384] : memref<1x320x640xbf16, #tpu.memory_space<vmem>>, vector<1x320x128xbf16>
    %53 = vector.shape_cast %52 : vector<1x320x128xbf16> to vector<320x128xbf16>
    %54 = vector.shape_cast %51 : vector<320x128xbf16> to vector<1x320x128xbf16>
    tpu.vector_store %arg7[%c0_48, %c0_49, %c384], %54 {strides = array<i32>} : memref<1x320x640xbf16, #tpu.memory_space<vmem>>, vector<1x320x128xbf16>,
    %c0_50 = arith.constant 0 : index
    %c0_51 = arith.constant 0 : index
    %c4 = arith.constant 4 : index
    %c0_52 = arith.constant 0 : index
    %55 = vector.load %arg6[%c0_50, %c0_51, %c4, %c0_52] : memref<1x20x20x128xf32, #tpu.memory_space<vmem>>, vector<1x20x16x128xf32>
    %56 = vector.shape_cast %55 : vector<1x20x16x128xf32> to vector<20x16x128xf32>
    %57 = arith.truncf %56 : vector<20x16x128xf32> to vector<20x16x128xbf16>
    %58 = vector.shape_cast %57 : vector<20x16x128xbf16> to vector<320x128xbf16>
    %c0_53 = arith.constant 0 : index
    %c0_54 = arith.constant 0 : index
    %c512 = arith.constant 512 : index
    %59 = vector.load %arg7[%c0_53, %c0_54, %c512] : memref<1x320x640xbf16, #tpu.memory_space<vmem>>, vector<1x320x128xbf16>
    %60 = vector.shape_cast %59 : vector<1x320x128xbf16> to vector<320x128xbf16>
    %61 = vector.shape_cast %58 : vector<320x128xbf16> to vector<1x320x128xbf16>
    tpu.vector_store %arg7[%c0_53, %c0_54, %c512], %61 {strides = array<i32>} : memref<1x320x640xbf16, #tpu.memory_space<vmem>>, vector<1x320x128xbf16>,
    %c0_55 = arith.constant 0 : index
    %c0_56 = arith.constant 0 : index
    %c0_57 = arith.constant 0 : index
    %62 = vector.load %arg7[%c0_55, %c0_56, %c0_57] : memref<1x320x640xbf16, #tpu.memory_space<vmem>>, vector<1x256x640xbf16>
    %63 = vector.shape_cast %62 : vector<1x256x640xbf16> to vector<256x640xbf16>
    %c0_58 = arith.constant 0 : index
    %c0_59 = arith.constant 0 : index
    %c0_60 = arith.constant 0 : index
    %64 = vector.load %arg3[%c0_58, %c0_59, %c0_60] : memref<5x640x128xbf16, #tpu.memory_space<vmem>>, vector<1x640x128xbf16>
    %65 = vector.shape_cast %64 : vector<1x640x128xbf16> to vector<640x128xbf16>
    %cst_61 = arith.constant dense<0.000000e+00> : vector<256x128xf32>
    %66 = tpu.matmul %63, %65, %cst_61 {dimension_numbers = #tpu.dot_dimension_numbers<[1], [0], [0], [1], [0, 0, 1, 1], [], []>} : vector<256x640xbf16>, vector<640x128xbf16>, vector<256x128xf32> -> vector<256x128xf32>
    %c0_62 = arith.constant 0 : index
    %c0_63 = arith.constant 0 : index
    %67 = vector.load %arg8[%c0_62, %c0_63] : memref<256x128xf32, #tpu.memory_space<vmem>>, vector<256x128xf32>
    tpu.vector_store %arg8[%c0_62, %c0_63], %66 {strides = array<i32>} : memref<256x128xf32, #tpu.memory_space<vmem>>, vector<256x128xf32>,
    %c0_64 = arith.constant 0 : index
    %c16 = arith.constant 16 : index
    %c0_65 = arith.constant 0 : index
    %68 = vector.load %arg7[%c0_64, %c16, %c0_65] : memref<1x320x640xbf16, #tpu.memory_space<vmem>>, vector<1x256x640xbf16>
    %69 = vector.shape_cast %68 : vector<1x256x640xbf16> to vector<256x640xbf16>
    %c1_66 = arith.constant 1 : index
    %c0_67 = arith.constant 0 : index
    %c0_68 = arith.constant 0 : index
    %70 = vector.load %arg3[%c1_66, %c0_67, %c0_68] : memref<5x640x128xbf16, #tpu.memory_space<vmem>>, vector<1x640x128xbf16>
    %71 = vector.shape_cast %70 : vector<1x640x128xbf16> to vector<640x128xbf16>
    %cst_69 = arith.constant dense<0.000000e+00> : vector<256x128xf32>
    %72 = tpu.matmul %69, %71, %cst_69 {dimension_numbers = #tpu.dot_dimension_numbers<[1], [0], [0], [1], [0, 0, 1, 1], [], []>} : vector<256x640xbf16>, vector<640x128xbf16>, vector<256x128xf32> -> vector<256x128xf32>
    %c0_70 = arith.constant 0 : index
    %c0_71 = arith.constant 0 : index
    %73 = vector.load %arg8[%c0_70, %c0_71] : memref<256x128xf32, #tpu.memory_space<vmem>>, vector<256x128xf32>
    %74 = arith.addf %73, %72 : vector<256x128xf32>
    %c0_72 = arith.constant 0 : index
    %c0_73 = arith.constant 0 : index
    %75 = vector.load %arg8[%c0_72, %c0_73] : memref<256x128xf32, #tpu.memory_space<vmem>>, vector<256x128xf32>
    tpu.vector_store %arg8[%c0_72, %c0_73], %74 {strides = array<i32>} : memref<256x128xf32, #tpu.memory_space<vmem>>, vector<256x128xf32>,
    %c0_74 = arith.constant 0 : index
    %c32 = arith.constant 32 : index
    %c0_75 = arith.constant 0 : index
    %76 = vector.load %arg7[%c0_74, %c32, %c0_75] : memref<1x320x640xbf16, #tpu.memory_space<vmem>>, vector<1x256x640xbf16>
    %77 = vector.shape_cast %76 : vector<1x256x640xbf16> to vector<256x640xbf16>
    %c2_76 = arith.constant 2 : index
    %c0_77 = arith.constant 0 : index
    %c0_78 = arith.constant 0 : index
    %78 = vector.load %arg3[%c2_76, %c0_77, %c0_78] : memref<5x640x128xbf16, #tpu.memory_space<vmem>>, vector<1x640x128xbf16>
    %79 = vector.shape_cast %78 : vector<1x640x128xbf16> to vector<640x128xbf16>
    %cst_79 = arith.constant dense<0.000000e+00> : vector<256x128xf32>
    %80 = tpu.matmul %77, %79, %cst_79 {dimension_numbers = #tpu.dot_dimension_numbers<[1], [0], [0], [1], [0, 0, 1, 1], [], []>} : vector<256x640xbf16>, vector<640x128xbf16>, vector<256x128xf32> -> vector<256x128xf32>
    %c0_80 = arith.constant 0 : index
    %c0_81 = arith.constant 0 : index
    %81 = vector.load %arg8[%c0_80, %c0_81] : memref<256x128xf32, #tpu.memory_space<vmem>>, vector<256x128xf32>
    %82 = arith.addf %81, %80 : vector<256x128xf32>
    %c0_82 = arith.constant 0 : index
    %c0_83 = arith.constant 0 : index
    %83 = vector.load %arg8[%c0_82, %c0_83] : memref<256x128xf32, #tpu.memory_space<vmem>>, vector<256x128xf32>
    tpu.vector_store %arg8[%c0_82, %c0_83], %82 {strides = array<i32>} : memref<256x128xf32, #tpu.memory_space<vmem>>, vector<256x128xf32>,
    %c0_84 = arith.constant 0 : index
    %c48 = arith.constant 48 : index
    %c0_85 = arith.constant 0 : index
    %84 = vector.load %arg7[%c0_84, %c48, %c0_85] : memref<1x320x640xbf16, #tpu.memory_space<vmem>>, vector<1x256x640xbf16>
    %85 = vector.shape_cast %84 : vector<1x256x640xbf16> to vector<256x640xbf16>
    %c3_86 = arith.constant 3 : index
    %c0_87 = arith.constant 0 : index
    %c0_88 = arith.constant 0 : index
    %86 = vector.load %arg3[%c3_86, %c0_87, %c0_88] : memref<5x640x128xbf16, #tpu.memory_space<vmem>>, vector<1x640x128xbf16>
    %87 = vector.shape_cast %86 : vector<1x640x128xbf16> to vector<640x128xbf16>
    %cst_89 = arith.constant dense<0.000000e+00> : vector<256x128xf32>
    %88 = tpu.matmul %85, %87, %cst_89 {dimension_numbers = #tpu.dot_dimension_numbers<[1], [0], [0], [1], [0, 0, 1, 1], [], []>} : vector<256x640xbf16>, vector<640x128xbf16>, vector<256x128xf32> -> vector<256x128xf32>
    %c0_90 = arith.constant 0 : index
    %c0_91 = arith.constant 0 : index
    %89 = vector.load %arg8[%c0_90, %c0_91] : memref<256x128xf32, #tpu.memory_space<vmem>>, vector<256x128xf32>
    %90 = arith.addf %89, %88 : vector<256x128xf32>
    %c0_92 = arith.constant 0 : index
    %c0_93 = arith.constant 0 : index
    %91 = vector.load %arg8[%c0_92, %c0_93] : memref<256x128xf32, #tpu.memory_space<vmem>>, vector<256x128xf32>
    tpu.vector_store %arg8[%c0_92, %c0_93], %90 {strides = array<i32>} : memref<256x128xf32, #tpu.memory_space<vmem>>, vector<256x128xf32>,
    %c0_94 = arith.constant 0 : index
    %c64 = arith.constant 64 : index
    %c0_95 = arith.constant 0 : index
    %92 = vector.load %arg7[%c0_94, %c64, %c0_95] : memref<1x320x640xbf16, #tpu.memory_space<vmem>>, vector<1x256x640xbf16>
    %93 = vector.shape_cast %92 : vector<1x256x640xbf16> to vector<256x640xbf16>
    %c4_96 = arith.constant 4 : index
    %c0_97 = arith.constant 0 : index
    %c0_98 = arith.constant 0 : index
    %94 = vector.load %arg3[%c4_96, %c0_97, %c0_98] : memref<5x640x128xbf16, #tpu.memory_space<vmem>>, vector<1x640x128xbf16>
    %95 = vector.shape_cast %94 : vector<1x640x128xbf16> to vector<640x128xbf16>
    %cst_99 = arith.constant dense<0.000000e+00> : vector<256x128xf32>
    %96 = tpu.matmul %93, %95, %cst_99 {dimension_numbers = #tpu.dot_dimension_numbers<[1], [0], [0], [1], [0, 0, 1, 1], [], []>} : vector<256x640xbf16>, vector<640x128xbf16>, vector<256x128xf32> -> vector<256x128xf32>
    %c0_100 = arith.constant 0 : index
    %c0_101 = arith.constant 0 : index
    %97 = vector.load %arg8[%c0_100, %c0_101] : memref<256x128xf32, #tpu.memory_space<vmem>>, vector<256x128xf32>
    %98 = arith.addf %97, %96 : vector<256x128xf32>
    %c0_102 = arith.constant 0 : index
    %c0_103 = arith.constant 0 : index
    %99 = vector.load %arg8[%c0_102, %c0_103] : memref<256x128xf32, #tpu.memory_space<vmem>>, vector<256x128xf32>
    tpu.vector_store %arg8[%c0_102, %c0_103], %98 {strides = array<i32>} : memref<256x128xf32, #tpu.memory_space<vmem>>, vector<256x128xf32>,
    %c0_104 = arith.constant 0 : index
    %c0_105 = arith.constant 0 : index
    %100 = vector.load %arg8[%c0_104, %c0_105] : memref<256x128xf32, #tpu.memory_space<vmem>>, vector<256x128xf32>
    %c0_106 = arith.constant 0 : index
    %c0_107 = arith.constant 0 : index
    %101 = vector.load %arg4[%c0_106, %c0_107] : memref<1x128xf32, #tpu.memory_space<vmem>>, vector<1x128xf32>
    %102 = vector.broadcast %101 : vector<1x128xf32> to vector<256x128xf32>
    %103 = arith.addf %100, %102 : vector<256x128xf32>
    %cst_108 = arith.constant 0.000000e+00 : f32
    %104 = vector.broadcast %cst_108 : f32 to vector<256x128xf32>
    %105 = arith.maximumf %103, %104 : vector<256x128xf32>
    %106 = vector.shape_cast %105 : vector<256x128xf32> to vector<1x256x128xf32>
    %107 = arith.truncf %106 : vector<1x256x128xf32> to vector<1x256x128xbf16>
    %c0_109 = arith.constant 0 : index
    %c0_110 = arith.constant 0 : index
    %c0_111 = arith.constant 0 : index
    %108 = vector.load %arg5[%c0_109, %c0_110, %c0_111] : memref<1x256x128xbf16, #tpu.memory_space<vmem>>, vector<1x256x128xbf16>
    tpu.vector_store %arg5[%c0_109, %c0_110, %c0_111], %107 {strides = array<i32>} : memref<1x256x128xbf16, #tpu.memory_space<vmem>>, vector<1x256x128xbf16>,
    return
  }
  func.func @transform_0(%arg0: i32) -> (i32, i32, i32) {
    %c0_i32 = arith.constant 0 : i32
    %c0_i32_0 = arith.constant 0 : i32
    %c0_i32_1 = arith.constant 0 : i32
    return %arg0, %c0_i32, %c0_i32_0 : i32, i32, i32
  }
  func.func @transform_1(%arg0: i32) -> (i32, i32) {
    %c0_i32 = arith.constant 0 : i32
    %c0_i32_0 = arith.constant 0 : i32
    %c0_i32_1 = arith.constant 0 : i32
    return %c0_i32, %c0_i32_0 : i32, i32
  }
  func.func @transform_2(%arg0: i32) -> (i32, i32, i32) {
    %c0_i32 = arith.constant 0 : i32
    %c0_i32_0 = arith.constant 0 : i32
    %c0_i32_1 = arith.constant 0 : i32
    %c0_i32_2 = arith.constant 0 : i32
    return %c0_i32, %c0_i32_0, %c0_i32_1 : i32, i32, i32
  }
  func.func @transform_3(%arg0: i32) -> (i32, i32) {
    %c0_i32 = arith.constant 0 : i32
    %c0_i32_0 = arith.constant 0 : i32
    %c0_i32_1 = arith.constant 0 : i32
    return %c0_i32, %c0_i32_0 : i32, i32
  }
  func.func @transform_4(%arg0: i32) -> (i32, i32, i32) {
    %c0_i32 = arith.constant 0 : i32
    %c0_i32_0 = arith.constant 0 : i32
    %c0_i32_1 = arith.constant 0 : i32
    return %arg0, %c0_i32, %c0_i32_0 : i32, i32, i32
  }
}

</mosaic_0001>

<bundles_post_ra>
// kernel: prep_network3.1
= control target key start
LH: loop header
LB: loop body
LE: loop exit
PB: predicated region body
PF: predicated region fallthrough
CT: control target
= control target key end

     0   :  { %s11824_s15 = smov 0   ;;  %s14501_s0 = inlined_call_operand.vmem [shape: bf16[2,256,128], index: 0, kind: input, shape index: {}]   ;;  %s14502_s1 = inlined_call_operand.vmem [shape: bf16[128,128], index: 1, kind: input, shape index: {}]   ;;  %s14503_s2 = inlined_call_operand.vmem [shape: bf16[5,640,128], index: 2, kind: input, shape index: {}]   ;;  %s14504_s3 = inlined_call_operand.vmem [shape: f32[1,128], index: 3, kind: input, shape index: {}]   ;;  %s14505_s4 = inlined_call_operand.vmem [shape: bf16[2,256,128], index: 4, kind: output, shape index: {}]  }
   0x1 LB: > { %s8213_s16 = sadd.s32 4294967295, %s11795_s15   ;;  %p8217_p0 = scmp.ge.s32.totalorder %s11795_s15, 1  ;;  %s11795_s15 = sphi %s11824_s15, %s14_s15  }
   0x2   : > { %p162_p1 = scmp.lt.s32.totalorder %s11795_s15, 3 }
   0x4   : > { %p163_p2 = pnand %p8217_p0, %p162_p1 }
   0x6   : > { %166 = sbr.rel (%p163_p2) target bundleno = 2162 (0x872), region = 36 }
   0xb   : > { %v11065_v0 = vld [vmem:[%s14502_s1 + $0x38] sm:$0xff]  ;;  %v11064_v1 = vld [vmem:[%s14502_s1 + $0x30] sm:$0xff]  ;;  %v11063_v2 = vld [vmem:[%s14502_s1 + $0x28] sm:$0xff]  ;;  %p188_p3 = scmp.lt.s32.totalorder %s8213_s16, 1  ;;  %v11797_v33 = vmov 0.0   ;;  %v11798_v40 = vmov 0.0|0.0  }
   0xc   : > { %390 = vmatpush.bf16.msra.mxu0 %v11065_v0  ;;  %11761 = vmatpush.bf16.msra.mxu2 %v11065_v0  ;;  %v11062_v3 = vld [vmem:[%s14502_s1 + $0x20] sm:$0xff]  ;;  %v11061_v4 = vld [vmem:[%s14502_s1 + $0x18] sm:$0xff]  ;;  %v11060_v5 = vld [vmem:[%s14502_s1 + $0x10] sm:$0xff]  ;;  %511 = vst [vmem:[#allocation2] sm:$0xff] %v11797_v33 }
   0xd   : > { %s15119_s16 = smov (!%p188_p3, %s8213_s16), 1  ;;  %v11059_v6 = vld [vmem:[%s14502_s1 + $0x8] sm:$0xff]  ;;  %v11058_v7 = vld [vmem:[%s14502_s1] sm:$0xff]  ;;  %v11153_v16 = vld [vmem:[%s14503_s2 + $0x38] sm:$0xff]  ;;  %512 = vst [vmem:[#allocation2 + $0x8] sm:$0xff] %v11797_v33 }
   0xe   : > { %s11040_s5 = sshll.u32 %s15119_s16, 7  ;;  %2021 = vmatpush.bf16.msra.mxu1 %v11153_v16  ;;  %11769 = vmatpush.bf16.msra.mxu3 %v11153_v16  ;;  %v11152_v19 = vld [vmem:[%s14503_s2 + $0x30] sm:$0xff]  ;;  %v11161_v20 = vld [vmem:[%s14503_s2 + $0x78] sm:$0xff]  ;;  %v11151_v22 = vld [vmem:[%s14503_s2 + $0x28] sm:$0xff]  ;;  %513 = vst [vmem:[#allocation2 + $0x10] sm:$0xf] %v11797_v33 }
   0xf   : > { %s11864_s10 = scalar_lea.vmem %s14501_s0, %s11040_s5  ;;  %v11177_v21 = vld [vmem:[%s14503_s2 + $0xf8] sm:$0xff]  ;;  %v11160_v23 = vld [vmem:[%s14503_s2 + $0x70] sm:$0xff]  ;;  %v11150_v25 = vld [vmem:[%s14503_s2 + $0x20] sm:$0xff]  ;;  %514 = vst [vmem:[#allocation2 + $0x18] sm:$0xff] %v11797_v33  ;;  %s14305_s27 = scalar_lea.vmem %s14505_s4, %s11040_s5 }
  0x10   : > { %391 = vmatpush.bf16.msra.mxu0 %v11064_v1  ;;  %11762 = vmatpush.bf16.msra.mxu2 %v11064_v1  ;;  %v11042_v8 = vld [vmem:[%s11864_s10] sm:$0xff]  ;;  %v11043_v10 = vld [vmem:[%s11864_s10 + $0x8] sm:$0xff]  ;;  %v11044_v12 = vld [vmem:[%s11864_s10 + $0x10] sm:$0xff]  ;;  %515 = vst [vmem:[#allocation2 + $0x20] sm:$0xff] %v11797_v33 }
  0x11   : > { %v11050_v9 = vld [vmem:[%s11864_s10 + $0x40] sm:$0xff]  ;;  %v11051_v11 = vld [vmem:[%s11864_s10 + $0x48] sm:$0xff]  ;;  %v11052_v13 = vld [vmem:[%s11864_s10 + $0x50] sm:$0xff]  ;;  %516 = vst [vmem:[#allocation2 + $0x28] sm:$0xf] %v11797_v33 }
  0x12   : > { %v11045_v14 = vld [vmem:[%s11864_s10 + $0x18] sm:$0xff]  ;;  %v11046_v17 = vld [vmem:[%s11864_s10 + $0x20] sm:$0xff]  ;;  %2022 = vmatpush.bf16.msra.mxu1 %v11152_v19  ;;  %v11176_v24 = vld [vmem:[%s14503_s2 + $0xf0] sm:$0xff]  ;;  %11770 = vmatpush.bf16.msra.mxu3 %v11152_v19  ;;  %669 = vst [vmem:[#allocation3] sm:$0xf] %v11798_v40 }
  0x13   : > { %v11053_v15 = vld [vmem:[%s11864_s10 + $0x58] sm:$0xff]  ;;  %v11054_v18 = vld [vmem:[%s11864_s10 + $0x60] sm:$0xff]  ;;  %v11159_v26 = vld [vmem:[%s14503_s2 + $0x68] sm:$0xff]  ;;  %670 = vst [vmem:[#allocation3 + $0x14] sm:$0xf] %v11798_v40 }
  0x14   : > { %392 = vmatpush.bf16.msra.mxu0 %v11063_v2  ;;  %11763 = vmatpush.bf16.msra.mxu2 %v11063_v2  ;;  %v11175_v27 = vld [vmem:[%s14503_s2 + $0xe8] sm:$0xff]  ;;  %v11149_v28 = vld [vmem:[%s14503_s2 + $0x18] sm:$0xff]  ;;  %v11158_v29 = vld [vmem:[%s14503_s2 + $0x60] sm:$0xff]  ;;  %518 = vst [vmem:[#allocation2 + $0x1b0] sm:$0xff] %v11797_v33 }
  0x15   : > { %v11174_v30 = vld [vmem:[%s14503_s2 + $0xe0] sm:$0xff]  ;;  %v11047_v31 = vld [vmem:[%s11864_s10 + $0x28] sm:$0xff]  ;;  %v11148_v34 = vld [vmem:[%s14503_s2 + $0x10] sm:$0xff]  ;;  %519 = vst [vmem:[#allocation2 + $0x1b8] sm:$0xff] %v11797_v33 }
  0x16   : > { %2023 = vmatpush.bf16.msra.mxu1 %v11151_v22  ;;  %11771 = vmatpush.bf16.msra.mxu3 %v11151_v22  ;;  %v11055_v32 = vld [vmem:[%s11864_s10 + $0x68] sm:$0xff]  ;;  %v11157_v35 = vld [vmem:[%s14503_s2 + $0x58] sm:$0xff]  ;;  %v11156_v38 = vld [vmem:[%s14503_s2 + $0x50] sm:$0xff]  ;;  %520 = vst [vmem:[#allocation2 + $0x1c0] sm:$0xf] %v11797_v33 }
  0x17   : > { %v11173_v36 = vld [vmem:[%s14503_s2 + $0xd8] sm:$0xff]  ;;  %v11147_v37 = vld [vmem:[%s14503_s2 + $0x8] sm:$0xff]  ;;  %v11172_v39 = vld [vmem:[%s14503_s2 + $0xd0] sm:$0xff]  ;;  %521 = vst [vmem:[#allocation2 + $0x1c8] sm:$0xff] %v11797_v33 }
  0x18   : > { %393 = vmatpush.bf16.msra.mxu0 %v11062_v3  ;;  %11764 = vmatpush.bf16.msra.mxu2 %v11062_v3  ;;  %v11146_v41 = vld [vmem:[%s14503_s2] sm:$0xff]  ;;  %v11155_v42 = vld [vmem:[%s14503_s2 + $0x48] sm:$0xff]  ;;  %522 = vst [vmem:[#allocation2 + $0x1d0] sm:$0xff] %v11797_v33  ;;  %v11048_v46 = vld [vmem:[%s11864_s10 + $0x30] sm:$0xff] }
  0x19   : > { %v11171_v43 = vld [vmem:[%s14503_s2 + $0xc8] sm:$0xff]  ;;  %v8320_v44 = vld [vmem:[#allocation3] sm:$0xf]  ;;  %523 = vst [vmem:[#allocation2 + $0x1d8] sm:$0xf] %v11797_v33  ;;  %v11056_v48 = vld [vmem:[%s11864_s10 + $0x70] sm:$0xff] }
  0x1a   : > { %2024 = vmatpush.bf16.msra.mxu1 %v11150_v25  ;;  %11772 = vmatpush.bf16.msra.mxu3 %v11150_v25  ;;  %v11068_v45 = vld [vmem:[#allocation3 + $0x10] sm:$0xf0]  ;;  %525 = vst [vmem:[#allocation2 + $0x30] sm:$0x3] %v11797_v33  ;;  %v11154_v49 = vld [vmem:[%s14503_s2 + $0x40] sm:$0xff]  ;;  %v11049_v51 = vld [vmem:[%s11864_s10 + $0x38] sm:$0xff] }
  0x1b   : > { %v8321_v47 = vor.u32 %v11068_v45, %v8320_v44  ;;  %526 = vst [vmem:[#allocation2 + $0x48] sm:$0x3] %v11797_v33  ;;  %v11170_v50 = vld [vmem:[%s14503_s2 + $0xc0] sm:$0xff]  ;;  %v11057_v52 = vld [vmem:[%s11864_s10 + $0x78] sm:$0xff]  ;;  %v710_v54 = vld [vmem:[#allocation2 + $0x9] sm:$0xff] }
  0x1c   : > { %394 = vmatpush.bf16.msra.mxu0 %v11061_v4  ;;  %11765 = vmatpush.bf16.msra.mxu2 %v11061_v4  ;;  %527 = vst [vmem:[#allocation2 + $0x60] sm:$0x3] %v11797_v33  ;;  %v709_v53 = vld [vmem:[#allocation2 + $0x1] sm:$0xff]  ;;  %v950_v57 = vld [vmem:[#allocation2 + $0xb] sm:$0xff]  ;;  %v750_v58 = vpack.c.bf16 %v710_v54, %v710_v54  ;;  %v711_v61 = vld [vmem:[#allocation2 + $0x19] sm:$0xff] }
  0x1d   : > { %528 = vst [vmem:[#allocation2 + $0x78] sm:$0x3] %v11797_v33  ;;  %v949_v55 = vld [vmem:[#allocation2 + $0x3] sm:$0xff]  ;;  %v749_v56 = vpack.c.bf16 %v709_v53, %v709_v53  ;;  %v990_v60 = vpack.c.bf16 %v950_v57, %v950_v57  ;;  %v751_v0 = vpack.c.bf16 %v711_v61, %v711_v61  ;;  %v951_v1 = vld [vmem:[#allocation2 + $0x1b] sm:$0xff] }
  0x1e   : > { %2025 = vmatpush.bf16.msra.mxu1 %v11149_v28  ;;  %11773 = vmatpush.bf16.msra.mxu3 %v11149_v28  ;;  %529 = vst [vmem:[#allocation2 + $0x90] sm:$0x3] %v11797_v33  ;;  %v989_v59 = vpack.c.bf16 %v949_v55, %v949_v55  ;;  %v712_v62 = vld [vmem:[#allocation2 + $0x21] sm:$0xff] }
  0x1f   : > { %530 = vst [vmem:[#allocation2 + $0xa8] sm:$0x3] %v11797_v33  ;;  %v952_v3 = vld [vmem:[#allocation2 + $0x23] sm:$0xff]  ;;  %v752_v4 = vpack.c.bf16 %v712_v62, %v712_v62 }
  0x20   : > { %395 = vmatpush.bf16.msra.mxu0 %v11060_v5  ;;  %11766 = vmatpush.bf16.msra.mxu2 %v11060_v5  ;;  %531 = vst [vmem:[#allocation2 + $0xc0] sm:$0x3] %v11797_v33 }
  0x21   : > { %532 = vst [vmem:[#allocation2 + $0xd8] sm:$0x3] %v11797_v33 }
  0x22   : > { %2026 = vmatpush.bf16.msra.mxu1 %v11148_v34  ;;  %11774 = vmatpush.bf16.msra.mxu3 %v11148_v34  ;;  %533 = vst [vmem:[#allocation2 + $0xf0] sm:$0x3] %v11797_v33 }
  0x23   : > { %534 = vst [vmem:[#allocation2 + $0x108] sm:$0x3] %v11797_v33 }
  0x24   : > { %396 = vmatpush.bf16.msra.mxu0 %v11059_v6  ;;  %11767 = vmatpush.bf16.msra.mxu2 %v11059_v6  ;;  %535 = vst [vmem:[#allocation2 + $0x120] sm:$0x3] %v11797_v33  ;;  %v991_v6 = vpack.c.bf16 %v951_v1, %v951_v1 }
  0x25   : > { %536 = vst [vmem:[#allocation2 + $0x138] sm:$0x3] %v11797_v33 }
  0x26   : > { %2027 = vmatpush.bf16.msra.mxu1 %v11147_v37  ;;  %11775 = vmatpush.bf16.msra.mxu3 %v11147_v37  ;;  %537 = vst [vmem:[#allocation2 + $0x150] sm:$0x3] %v11797_v33 }
  0x27   : > { %538 = vst [vmem:[#allocation2 + $0x168] sm:$0x3] %v11797_v33 }
  0x28   : > { %397 = vmatpush.bf16.msra.mxu0 %v11058_v7  ;;  %11768 = vmatpush.bf16.msra.mxu2 %v11058_v7  ;;  %539 = vst [vmem:[#allocation2 + $0x180] sm:$0x3] %v11797_v33 }
  0x29   : > { %540 = vst [vmem:[#allocation2 + $0x198] sm:$0x3] %v11797_v33 }
  0x2a   : > { %2028 = vmatpush.bf16.msra.mxu1 %v11146_v41  ;;  %11776 = vmatpush.bf16.msra.mxu3 %v11146_v41  ;;  %541 = vst [vmem:[#allocation2 + $0x42] sm:$0x3] %v11797_v33 }
  0x2b   : > { %398 = vmatmul.bf16.vlgmr.msra.gmra.mxu0 %v11042_v8  ;;  %438 = vmatmul.bf16.vlgmr.msra.gmra.mxu2 %v11050_v9  ;;  %542 = vst [vmem:[#allocation2 + $0x5a] sm:$0x3] %v11797_v33  ;;  %v992_v8 = vpack.c.bf16 %v952_v3, %v952_v3 }
  0x2c   : > { %2110 = vmatpush.bf16.msrb.mxu2 %v11161_v20  ;;  %2288 = vmatpush.bf16.msrb.mxu0 %v11177_v21  ;;  %543 = vst [vmem:[#allocation2 + $0x72] sm:$0x3] %v11797_v33 }
  0x2d   : > { %2029 = vmatmul.bf16.vlgmr.msra.gmra.mxu1 %v8321_v47  ;;  %544 = vst [vmem:[#allocation2 + $0x8a] sm:$0x3] %v11797_v33 }
  0x2e   : > { %545 = vst [vmem:[#allocation2 + $0xa2] sm:$0x3] %v11797_v33 }
  0x2f   : > { %546 = vst [vmem:[#allocation2 + $0xba] sm:$0x3] %v11797_v33 }
  0x30   : > { %2111 = vmatpush.bf16.msrb.mxu2 %v11160_v23  ;;  %2289 = vmatpush.bf16.msrb.mxu0 %v11176_v24  ;;  %547 = vst [vmem:[#allocation2 + $0xd2] sm:$0x3] %v11797_v33 }
  0x31   : > { %548 = vst [vmem:[#allocation2 + $0xea] sm:$0x3] %v11797_v33 }
  0x32   : > { %549 = vst [vmem:[#allocation2 + $0x102] sm:$0x3] %v11797_v33 }
  0x33   : > { %550 = vst [vmem:[#allocation2 + $0x11a] sm:$0x3] %v11797_v33 }
  0x34   : > { %2112 = vmatpush.bf16.msrb.mxu2 %v11159_v26  ;;  %2290 = vmatpush.bf16.msrb.mxu0 %v11175_v27  ;;  %551 = vst [vmem:[#allocation2 + $0x132] sm:$0x3] %v11797_v33 }
  0x35   : > { %552 = vst [vmem:[#allocation2 + $0x14a] sm:$0x3] %v11797_v33 }
  0x36   : > { %553 = vst [vmem:[#allocation2 + $0x162] sm:$0x3] %v11797_v33 }
  0x37   : > { %554 = vst [vmem:[#allocation2 + $0x17a] sm:$0x3] %v11797_v33 }
  0x38   : > { %2113 = vmatpush.bf16.msrb.mxu2 %v11158_v29  ;;  %2291 = vmatpush.bf16.msrb.mxu0 %v11174_v30  ;;  %555 = vst [vmem:[#allocation2 + $0x192] sm:$0x3] %v11797_v33 }
  0x39   : > { %556 = vst [vmem:[#allocation2 + $0x1aa] sm:$0x3] %v11797_v33 }
  0x3a   : > { %789 = vst [vmem:[#allocation3 + $0x4] sm:$0xf] %v749_v56 }
  0x3b   : > { %403 = vmatmul.bf16.gmra.mxu0 %v11043_v10  ;;  %443 = vmatmul.bf16.gmra.mxu2 %v11051_v11  ;;  %790 = vst [vmem:[#allocation3 + $0x18] sm:$0xf] %v750_v58 }
  0x3c   : > { %2114 = vmatpush.bf16.msrb.mxu2 %v11157_v35  ;;  %2292 = vmatpush.bf16.msrb.mxu0 %v11173_v36  ;;  %1029 = vst [vmem:[#allocation3 + $0xc] sm:$0xf] %v989_v59 }
  0x3d   : > { %1030 = vst [vmem:[#allocation3 + $0x20] sm:$0xf] %v990_v60 }
  0x3e   : > { %671 = vst [vmem:[#allocation3 + $0x28] sm:$0xf] %v11798_v40 }
  0x3f   : > { %672 = vst [vmem:[#allocation3 + $0x3c] sm:$0xf] %v11798_v40 }
  0x40   : > { %2115 = vmatpush.bf16.msrb.mxu2 %v11156_v38  ;;  %2293 = vmatpush.bf16.msrb.mxu0 %v11172_v39  ;;  %791 = vst [vmem:[#allocation3 + $0x2c] sm:$0xf] %v751_v0 }
  0x41   : > { %v11066_v7 = vld [vmem:[#allocation3 + $0x4] sm:$0xf]  ;;  %792 = vst [vmem:[#allocation3 + $0x40] sm:$0xf] %v752_v4 }
  0x42   : > { %v8322_v9 = vld [vmem:[#allocation3 + $0x14] sm:$0xf0]  ;;  %1031 = vst [vmem:[#allocation3 + $0x34] sm:$0xf] %v991_v6 }
  0x43   : > { %v8325_v10 = vor.u32 %v11066_v7, %v8322_v9  ;;  %v11067_v11 = vld [vmem:[#allocation3 + $0xc] sm:$0xf]  ;;  %1032 = vst [vmem:[#allocation3 + $0x48] sm:$0xf] %v992_v8 }
  0x44   : > { %2116 = vmatpush.bf16.msrb.mxu2 %v11155_v42  ;;  %2294 = vmatpush.bf16.msrb.mxu0 %v11171_v43 }
  0x46   : > { %v11073_v20 = vld [vmem:[#allocation3 + $0x38] sm:$0xf0] }
  0x47   : > { %v11071_v35 = vld [vmem:[#allocation3 + $0x2c] sm:$0xf] }
  0x48   : > { %2117 = vmatpush.bf16.msrb.mxu2 %v11154_v49  ;;  %2295 = vmatpush.bf16.msrb.mxu0 %v11170_v50  ;;  %v8342_v36 = vld [vmem:[#allocation3 + $0x3c] sm:$0xf0] }
  0x49   : > { %v11072_v37 = vld [vmem:[#allocation3 + $0x34] sm:$0xf] }
  0x4a   : > { %v8350_v38 = vld [vmem:[#allocation3 + $0x44] sm:$0xf0] }
  0x4b   : > { %408 = vmatmul.bf16.gmra.mxu0 %v11044_v12  ;;  %448 = vmatmul.bf16.gmra.mxu2 %v11052_v13  ;;  %v8330_v13 = vld [vmem:[#allocation3 + $0x1c] sm:$0xf0] }
  0x5b   : > { %413 = vmatmul.bf16.gmra.mxu0 %v11045_v14  ;;  %453 = vmatmul.bf16.gmra.mxu2 %v11053_v15  ;;  %v8333_v15 = vor.u32 %v11067_v11, %v8330_v13 }
  0x6b   : > { %418 = vmatmul.bf16.gmra.mxu0 %v11046_v17  ;;  %458 = vmatmul.bf16.gmra.mxu2 %v11054_v18  ;;  %v8340_v17 = vld [vmem:[#allocation3 + $0x28] sm:$0xf] }
  0x6c   : > { %v8341_v23 = vor.u32 %v11073_v20, %v8340_v17 }
  0x6e   : > { %2034 = vmatmul.bf16.gmra.mxu1 %v8341_v23 }
  0x7b   : > { %423 = vmatmul.bf16.gmra.mxu0 %v11047_v31  ;;  %463 = vmatmul.bf16.gmra.mxu2 %v11055_v32 }
  0x8b   : > { %428 = vmatmul.bf16.gmra.mxu0 %v11048_v46  ;;  %468 = vmatmul.bf16.gmra.mxu2 %v11056_v48  ;;  %v8345_v48 = vor.u32 %v11071_v35, %v8342_v36 }
  0x9b   : > { %433 = vmatmul.bf16.gmra.mxu0 %v11049_v51  ;;  %473 = vmatmul.bf16.gmra.mxu2 %v11057_v52  ;;  %v8353_v51 = vor.u32 %v11072_v37, %v8350_v38 }
  0xa8   : > { %v399_v63 = vpop.f32.mrf.mxu0 }
  0xa9   : > { %v479_v2 = vmax.f32 %v399_v63, 0.0 }
  0xab   : > { %557 = vst [vmem:[#allocation2 + $0x32] sm:$0xff] %v479_v2  ;;  %v873_v5 = vpack.c.bf16 %v479_v2, %v479_v2  ;;  %2118 = vmatmul.bf16.vlgmr.msrb.gmra.mxu2 %v8325_v10  ;;  %2296 = vmatmul.bf16.vlgmr.msrb.gmra.mxu0 %v8333_v15 }
  0xad   : > { %913 = vst [vmem:[#allocation3 + $0x58] sm:$0xf] %v873_v5 }
  0xae   : > { %v439_v12 = vpop.f32.mrf.mxu2 }
  0xaf   : > { %v495_v14 = vmax.f32 %v439_v12, 0.0 }
  0xb0   : > { %v401_v16 = vpop.f32.mrf.mxu0 }
  0xb1   : > { %573 = vst [vmem:[#allocation2 + $0xf2] sm:$0xff] %v495_v14  ;;  %v889_v18 = vpack.c.bf16 %v495_v14, %v495_v14  ;;  %v480_v19 = vmax.f32 %v401_v16, 0.0 }
  0xb2   : > { %v593_v21 = vld [vmem:[#allocation2 + $0x30] sm:$0xff] }
  0xb3   : > { %v713_v22 = vld [vmem:[#allocation2 + $0x31] sm:$0xff]  ;;  %v633_v24 = vpack.c.bf16 %v593_v21, %v593_v21  ;;  %929 = vst [vmem:[#allocation3 + $0x198] sm:$0xf] %v889_v18  ;;  %v874_v26 = vpack.c.bf16 %v480_v19, %v480_v19 }
  0xb4   : > { %v753_v25 = vpack.c.bf16 %v713_v22, %v713_v22  ;;  %558 = vst [vmem:[#allocation2 + $0x3a] sm:$0xff] %v480_v19 }
  0xb5   : > { %673 = vst [vmem:[#allocation3 + $0x50] sm:$0xf] %v633_v24 }
  0xb6   : > { %793 = vst [vmem:[#allocation3 + $0x54] sm:$0xf] %v753_v25  ;;  %v441_v27 = vpop.f32.mrf.mxu2 }
  0xb7   : > { %914 = vst [vmem:[#allocation3 + $0x6c] sm:$0xf] %v874_v26  ;;  %v496_v28 = vmax.f32 %v441_v27, 0.0 }
  0xb8   : > { %v609_v29 = vld [vmem:[#allocation2 + $0xf0] sm:$0xff]  ;;  %v404_v31 = vpop.f32.mrf.mxu0 }
  0xb9   : > { %v729_v30 = vld [vmem:[#allocation2 + $0xf1] sm:$0xff]  ;;  %v649_v32 = vpack.c.bf16 %v609_v29, %v609_v29  ;;  %574 = vst [vmem:[#allocation2 + $0xfa] sm:$0xff] %v496_v28  ;;  %v890_v34 = vpack.c.bf16 %v496_v28, %v496_v28  ;;  %v481_v1 = vmax.f32 %v404_v31, 0.0 }
  0xba   : > { %v769_v33 = vpack.c.bf16 %v729_v30, %v729_v30 }
  0xbb   : > { %689 = vst [vmem:[#allocation3 + $0x190] sm:$0xf] %v649_v32  ;;  %v594_v39 = vld [vmem:[#allocation2 + $0x38] sm:$0xff]  ;;  %2123 = vmatmul.bf16.gmra.mxu2 %v8345_v48  ;;  %2301 = vmatmul.bf16.gmra.mxu0 %v8353_v51  ;;  %v875_v8 = vpack.c.bf16 %v481_v1, %v481_v1 }
  0xbc   : > { %v714_v40 = vld [vmem:[#allocation2 + $0x39] sm:$0xff]  ;;  %809 = vst [vmem:[#allocation3 + $0x194] sm:$0xf] %v769_v33  ;;  %v634_v42 = vpack.c.bf16 %v594_v39, %v594_v39  ;;  %v8360_v3 = vld [vmem:[#allocation3 + $0x50] sm:$0xf] }
  0xbd   : > { %v953_v41 = vld [vmem:[#allocation2 + $0x33] sm:$0xff]  ;;  %v754_v43 = vpack.c.bf16 %v714_v40, %v714_v40  ;;  %v954_v44 = vld [vmem:[#allocation2 + $0x3b] sm:$0xff]  ;;  %930 = vst [vmem:[#allocation3 + $0x1ac] sm:$0xf] %v890_v34 }
  0xbe   : > { %v993_v45 = vpack.c.bf16 %v953_v41, %v953_v41  ;;  %v1073_v46 = vld [vmem:[#allocation2 + $0x34] sm:$0xff]  ;;  %v1074_v47 = vld [vmem:[#allocation2 + $0x3c] sm:$0xff]  ;;  %v994_v49 = vpack.c.bf16 %v954_v44, %v954_v44  ;;  %674 = vst [vmem:[#allocation3 + $0x64] sm:$0xf] %v634_v42  ;;  %v444_v52 = vpop.f32.mrf.mxu2 }
  0xbf   : > { %v1113_v50 = vpack.c.bf16 %v1073_v46, %v1073_v46  ;;  %v1114_v53 = vpack.c.bf16 %v1074_v47, %v1074_v47  ;;  %794 = vst [vmem:[#allocation3 + $0x68] sm:$0xf] %v754_v43  ;;  %v497_v5 = vmax.f32 %v444_v52, 0.0  ;;  %v11076_v17 = vld [vmem:[#allocation3 + $0x54] sm:$0xf] }
  0xc0   : > { %1033 = vst [vmem:[#allocation3 + $0x5c] sm:$0xf] %v993_v45  ;;  %v730_v54 = vld [vmem:[#allocation2 + $0xf9] sm:$0xff]  ;;  %v406_v56 = vpop.f32.mrf.mxu0 }
  0xc1   : > { %v969_v55 = vld [vmem:[#allocation2 + $0xf3] sm:$0xff]  ;;  %1034 = vst [vmem:[#allocation3 + $0x70] sm:$0xf] %v994_v49  ;;  %v770_v57 = vpack.c.bf16 %v730_v54, %v730_v54  ;;  %v970_v58 = vld [vmem:[#allocation2 + $0xfb] sm:$0xff]  ;;  %v482_v9 = vmax.f32 %v406_v56, 0.0  ;;  %v891_v12 = vpack.c.bf16 %v497_v5, %v497_v5 }
  0xc2   : > { %v1009_v59 = vpack.c.bf16 %v969_v55, %v969_v55  ;;  %v1089_v60 = vld [vmem:[#allocation2 + $0xf4] sm:$0xff]  ;;  %v1090_v61 = vld [vmem:[#allocation2 + $0xfc] sm:$0xff]  ;;  %1153 = vst [vmem:[#allocation3 + $0x60] sm:$0xf] %v1113_v50  ;;  %v1010_v63 = vpack.c.bf16 %v970_v58, %v970_v58 }
  0xc3   : > { %v610_v62 = vld [vmem:[#allocation2 + $0xf8] sm:$0xff]  ;;  %1154 = vst [vmem:[#allocation3 + $0x74] sm:$0xf] %v1114_v53  ;;  %v1129_v0 = vpack.c.bf16 %v1089_v60, %v1089_v60  ;;  %v1130_v2 = vpack.c.bf16 %v1090_v61, %v1090_v61  ;;  %v876_v14 = vpack.c.bf16 %v482_v9, %v482_v9 }
  0xc4   : > { %810 = vst [vmem:[#allocation3 + $0x1a8] sm:$0xf] %v770_v57  ;;  %v650_v4 = vpack.c.bf16 %v610_v62, %v610_v62 }
  0xc5   : > { %1049 = vst [vmem:[#allocation3 + $0x19c] sm:$0xf] %v1009_v59  ;;  %v11078_v6 = vld [vmem:[#allocation3 + $0x60] sm:$0xf0] }
  0xc6   : > { %1050 = vst [vmem:[#allocation3 + $0x1b0] sm:$0xf] %v1010_v63  ;;  %v8361_v7 = vor.u32 %v11078_v6, %v8360_v3  ;;  %v446_v10 = vpop.f32.mrf.mxu2  ;;  %v8362_v16 = vld [vmem:[#allocation3 + $0x64] sm:$0xf0] }
  0xc7   : > { %1169 = vst [vmem:[#allocation3 + $0x1a0] sm:$0xf] %v1129_v0  ;;  %v498_v13 = vmax.f32 %v446_v10, 0.0  ;;  %v11077_v19 = vld [vmem:[#allocation3 + $0x5c] sm:$0xf]  ;;  %v8365_v21 = vor.u32 %v11076_v17, %v8362_v16 }
  0xc8   : > { %1170 = vst [vmem:[#allocation3 + $0x1b4] sm:$0xf] %v1130_v2  ;;  %2039 = vmatmul.bf16.gmra.mxu1 %v8361_v7  ;;  %v409_v11 = vpop.f32.mrf.mxu0  ;;  %v8370_v20 = vld [vmem:[#allocation3 + $0x6c] sm:$0xf0] }
  0xc9   : > { %690 = vst [vmem:[#allocation3 + $0x1a4] sm:$0xf] %v650_v4  ;;  %v483_v15 = vmax.f32 %v409_v11, 0.0  ;;  %v892_v18 = vpack.c.bf16 %v498_v13, %v498_v13  ;;  %v8373_v23 = vor.u32 %v11077_v19, %v8370_v20 }
  0xca   : > { %559 = vst [vmem:[#allocation2 + $0x4a] sm:$0xff] %v481_v1 }
  0xcb   : > { %915 = vst [vmem:[#allocation3 + $0x80] sm:$0xf] %v875_v8  ;;  %v877_v22 = vpack.c.bf16 %v483_v15, %v483_v15  ;;  %2128 = vmatmul.bf16.gmra.mxu2 %v8365_v21  ;;  %2306 = vmatmul.bf16.gmra.mxu0 %v8373_v23 }
  0xcc   : > { %575 = vst [vmem:[#allocation2 + $0x10a] sm:$0xff] %v497_v5 }
  0xcd   : > { %931 = vst [vmem:[#allocation3 + $0x1c0] sm:$0xf] %v891_v12 }
  0xce   : > { %560 = vst [vmem:[#allocation2 + $0x52] sm:$0xff] %v482_v9  ;;  %v449_v28 = vpop.f32.mrf.mxu2 }
  0xcf   : > { %916 = vst [vmem:[#allocation3 + $0x94] sm:$0xf] %v876_v14  ;;  %v499_v60 = vmax.f32 %v449_v28, 0.0 }
  0xd0   : > { %576 = vst [vmem:[#allocation2 + $0x112] sm:$0xff] %v498_v13  ;;  %v411_v46 = vpop.f32.mrf.mxu0 }
  0xd1   : > { %v595_v24 = vld [vmem:[#allocation2 + $0x48] sm:$0xff]  ;;  %932 = vst [vmem:[#allocation3 + $0x1d4] sm:$0xf] %v892_v18  ;;  %v484_v5 = vmax.f32 %v411_v46, 0.0  ;;  %v893_v10 = vpack.c.bf16 %v499_v60, %v499_v60 }
  0xd2   : > { %v715_v25 = vld [vmem:[#allocation2 + $0x49] sm:$0xff]  ;;  %v635_v26 = vpack.c.bf16 %v595_v24, %v595_v24  ;;  %561 = vst [vmem:[#allocation2 + $0x62] sm:$0xff] %v483_v15 }
  0xd3   : > { %v755_v27 = vpack.c.bf16 %v715_v25, %v715_v25  ;;  %v611_v29 = vld [vmem:[#allocation2 + $0x108] sm:$0xff]  ;;  %917 = vst [vmem:[#allocation3 + $0xa8] sm:$0xf] %v877_v22  ;;  %v878_v13 = vpack.c.bf16 %v484_v5, %v484_v5 }
  0xd4   : > { %v731_v30 = vld [vmem:[#allocation2 + $0x109] sm:$0xff]  ;;  %675 = vst [vmem:[#allocation3 + $0x78] sm:$0xf] %v635_v26  ;;  %v651_v31 = vpack.c.bf16 %v611_v29, %v611_v29 }
  0xd5   : > { %v771_v32 = vpack.c.bf16 %v731_v30, %v731_v30  ;;  %795 = vst [vmem:[#allocation3 + $0x7c] sm:$0xf] %v755_v27  ;;  %v596_v33 = vld [vmem:[#allocation2 + $0x50] sm:$0xff] }
  0xd6   : > { %v716_v34 = vld [vmem:[#allocation2 + $0x51] sm:$0xff]  ;;  %691 = vst [vmem:[#allocation3 + $0x1b8] sm:$0xf] %v651_v31  ;;  %v636_v36 = vpack.c.bf16 %v596_v33, %v596_v33  ;;  %v451_v55 = vpop.f32.mrf.mxu2 }
  0xd7   : > { %v955_v35 = vld [vmem:[#allocation2 + $0x4b] sm:$0xff]  ;;  %v756_v37 = vpack.c.bf16 %v716_v34, %v716_v34  ;;  %v956_v38 = vld [vmem:[#allocation2 + $0x53] sm:$0xff]  ;;  %811 = vst [vmem:[#allocation3 + $0x1bc] sm:$0xf] %v771_v32  ;;  %v500_v11 = vmax.f32 %v451_v55, 0.0 }
  0xd8   : > { %v995_v39 = vpack.c.bf16 %v955_v35, %v955_v35  ;;  %v1075_v40 = vld [vmem:[#allocation2 + $0x4c] sm:$0xff]  ;;  %v1076_v41 = vld [vmem:[#allocation2 + $0x54] sm:$0xff]  ;;  %v996_v42 = vpack.c.bf16 %v956_v38, %v956_v38  ;;  %676 = vst [vmem:[#allocation3 + $0x8c] sm:$0xf] %v636_v36  ;;  %v414_v8 = vpop.f32.mrf.mxu0 }
  0xd9   : > { %v732_v43 = vld [vmem:[#allocation2 + $0x111] sm:$0xff]  ;;  %v1115_v44 = vpack.c.bf16 %v1075_v40, %v1075_v40  ;;  %v1116_v47 = vpack.c.bf16 %v1076_v41, %v1076_v41  ;;  %796 = vst [vmem:[#allocation3 + $0x90] sm:$0xf] %v756_v37  ;;  %v597_v57 = vld [vmem:[#allocation2 + $0x60] sm:$0xff]  ;;  %v485_v14 = vmax.f32 %v414_v8, 0.0  ;;  %v894_v16 = vpack.c.bf16 %v500_v11, %v500_v11 }
  0xda   : > { %v971_v45 = vld [vmem:[#allocation2 + $0x10b] sm:$0xff]  ;;  %v972_v48 = vld [vmem:[#allocation2 + $0x113] sm:$0xff]  ;;  %1035 = vst [vmem:[#allocation3 + $0x84] sm:$0xf] %v995_v39  ;;  %v772_v49 = vpack.c.bf16 %v732_v43, %v732_v43  ;;  %v717_v59 = vld [vmem:[#allocation2 + $0x61] sm:$0xff]  ;;  %v637_v0 = vpack.c.bf16 %v597_v57, %v597_v57 }
  0xdb   : > { %v1091_v50 = vld [vmem:[#allocation2 + $0x10c] sm:$0xff]  ;;  %1036 = vst [vmem:[#allocation3 + $0x98] sm:$0xf] %v996_v42  ;;  %v1011_v51 = vpack.c.bf16 %v971_v45, %v971_v45  ;;  %v1092_v52 = vld [vmem:[#allocation2 + $0x114] sm:$0xff]  ;;  %v1012_v54 = vpack.c.bf16 %v972_v48, %v972_v48  ;;  %v757_v4 = vpack.c.bf16 %v717_v59, %v717_v59  ;;  %v879_v18 = vpack.c.bf16 %v485_v14, %v485_v14 }
  0xdc   : > { %1155 = vst [vmem:[#allocation3 + $0x88] sm:$0xf] %v1115_v44  ;;  %v612_v53 = vld [vmem:[#allocation2 + $0x110] sm:$0xff]  ;;  %v1131_v56 = vpack.c.bf16 %v1091_v50, %v1091_v50  ;;  %v1132_v58 = vpack.c.bf16 %v1092_v52, %v1092_v52  ;;  %v8380_v62 = vld [vmem:[#allocation3 + $0x78] sm:$0xf] }
  0xdd   : > { %1156 = vst [vmem:[#allocation3 + $0x9c] sm:$0xf] %v1116_v47  ;;  %v652_v61 = vpack.c.bf16 %v612_v53, %v612_v53  ;;  %v11081_v2 = vld [vmem:[#allocation3 + $0x7c] sm:$0xf] }
  0xde   : > { %812 = vst [vmem:[#allocation3 + $0x1d0] sm:$0xf] %v772_v49  ;;  %v454_v15 = vpop.f32.mrf.mxu2 }
  0xdf   : > { %1051 = vst [vmem:[#allocation3 + $0x1c4] sm:$0xf] %v1011_v51  ;;  %v11083_v63 = vld [vmem:[#allocation3 + $0x88] sm:$0xf0]  ;;  %v501_v17 = vmax.f32 %v454_v15, 0.0 }
  0xe0   : > { %1052 = vst [vmem:[#allocation3 + $0x1d8] sm:$0xf] %v1012_v54  ;;  %v8381_v1 = vor.u32 %v11083_v63, %v8380_v62  ;;  %v8382_v3 = vld [vmem:[#allocation3 + $0x8c] sm:$0xf0]  ;;  %v416_v20 = vpop.f32.mrf.mxu0 }
  0xe1   : > { %1171 = vst [vmem:[#allocation3 + $0x1c8] sm:$0xf] %v1131_v56  ;;  %v8385_v6 = vor.u32 %v11081_v2, %v8382_v3  ;;  %v11082_v7 = vld [vmem:[#allocation3 + $0x84] sm:$0xf]  ;;  %v895_v19 = vpack.c.bf16 %v501_v17, %v501_v17 }
  0xe2   : > { %1172 = vst [vmem:[#allocation3 + $0x1dc] sm:$0xf] %v1132_v58  ;;  %2044 = vmatmul.bf16.gmra.mxu1 %v8381_v1  ;;  %v8390_v9 = vld [vmem:[#allocation3 + $0x94] sm:$0xf0] }
  0xe3   : > { %692 = vst [vmem:[#allocation3 + $0x1cc] sm:$0xf] %v652_v61  ;;  %2133 = vmatmul.bf16.gmra.mxu2 %v8385_v6  ;;  %v8393_v12 = vor.u32 %v11082_v7, %v8390_v9  ;;  %v486_v61 = vmax.f32 %v416_v20, 0.0 }
  0xe4   : > { %677 = vst [vmem:[#allocation3 + $0xa0] sm:$0xf] %v637_v0 }
  0xe5   : > { %797 = vst [vmem:[#allocation3 + $0xa4] sm:$0xf] %v757_v4  ;;  %2311 = vmatmul.bf16.gmra.mxu0 %v8393_v12 }
  0xe6   : > { %577 = vst [vmem:[#allocation2 + $0x122] sm:$0xff] %v499_v60  ;;  %v456_v46 = vpop.f32.mrf.mxu2 }
  0xe7   : > { %933 = vst [vmem:[#allocation3 + $0x1e8] sm:$0xf] %v893_v10  ;;  %v502_v2 = vmax.f32 %v456_v46, 0.0 }
  0xe8   : > { %562 = vst [vmem:[#allocation2 + $0x6a] sm:$0xff] %v484_v5  ;;  %v419_v47 = vpop.f32.mrf.mxu0  ;;  %v880_v5 = vpack.c.bf16 %v486_v61, %v486_v61 }
  0xe9   : > { %918 = vst [vmem:[#allocation3 + $0xbc] sm:$0xf] %v878_v13  ;;  %v487_v7 = vmax.f32 %v419_v47, 0.0  ;;  %v896_v10 = vpack.c.bf16 %v502_v2, %v502_v2 }
  0xea   : > { %578 = vst [vmem:[#allocation2 + $0x12a] sm:$0xff] %v500_v11 }
  0xeb   : > { %934 = vst [vmem:[#allocation3 + $0x1fc] sm:$0xf] %v894_v16  ;;  %v8400_v3 = vld [vmem:[#allocation3 + $0xa0] sm:$0xf]  ;;  %v881_v12 = vpack.c.bf16 %v487_v7, %v487_v7 }
  0xec   : > { %563 = vst [vmem:[#allocation2 + $0x7a] sm:$0xff] %v485_v14  ;;  %v11086_v52 = vld [vmem:[#allocation3 + $0xa4] sm:$0xf] }
  0xed   : > { %v613_v21 = vld [vmem:[#allocation2 + $0x120] sm:$0xff]  ;;  %919 = vst [vmem:[#allocation3 + $0xd0] sm:$0xf] %v879_v18 }
  0xee   : > { %v733_v22 = vld [vmem:[#allocation2 + $0x121] sm:$0xff]  ;;  %v653_v23 = vpack.c.bf16 %v613_v21, %v613_v21  ;;  %579 = vst [vmem:[#allocation2 + $0x13a] sm:$0xff] %v501_v17  ;;  %v459_v8 = vpop.f32.mrf.mxu2 }
  0xef   : > { %v773_v24 = vpack.c.bf16 %v733_v22, %v733_v22  ;;  %v598_v25 = vld [vmem:[#allocation2 + $0x68] sm:$0xff]  ;;  %935 = vst [vmem:[#allocation3 + $0x210] sm:$0xf] %v895_v19  ;;  %v503_v11 = vmax.f32 %v459_v8, 0.0 }
  0xf0   : > { %v718_v26 = vld [vmem:[#allocation2 + $0x69] sm:$0xff]  ;;  %693 = vst [vmem:[#allocation3 + $0x1e0] sm:$0xf] %v653_v23  ;;  %v638_v38 = vpack.c.bf16 %v598_v25, %v598_v25  ;;  %v421_v9 = vpop.f32.mrf.mxu0 }
  0xf1   : > { %v957_v27 = vld [vmem:[#allocation2 + $0x63] sm:$0xff]  ;;  %v758_v28 = vpack.c.bf16 %v718_v26, %v718_v26  ;;  %v958_v29 = vld [vmem:[#allocation2 + $0x6b] sm:$0xff]  ;;  %813 = vst [vmem:[#allocation3 + $0x1e4] sm:$0xf] %v773_v24  ;;  %v488_v13 = vmax.f32 %v421_v9, 0.0  ;;  %v897_v14 = vpack.c.bf16 %v503_v11, %v503_v11 }
  0xf2   : > { %v997_v30 = vpack.c.bf16 %v957_v27, %v957_v27  ;;  %v1077_v31 = vld [vmem:[#allocation2 + $0x64] sm:$0xff]  ;;  %v1078_v32 = vld [vmem:[#allocation2 + $0x6c] sm:$0xff]  ;;  %v998_v33 = vpack.c.bf16 %v958_v29, %v958_v29  ;;  %678 = vst [vmem:[#allocation3 + $0xb4] sm:$0xf] %v638_v38 }
  0xf3   : > { %v1117_v34 = vpack.c.bf16 %v1077_v31, %v1077_v31  ;;  %v734_v35 = vld [vmem:[#allocation2 + $0x129] sm:$0xff]  ;;  %798 = vst [vmem:[#allocation3 + $0xb8] sm:$0xf] %v758_v28  ;;  %v1118_v36 = vpack.c.bf16 %v1078_v32, %v1078_v32  ;;  %v599_v49 = vld [vmem:[#allocation2 + $0x78] sm:$0xff]  ;;  %v882_v15 = vpack.c.bf16 %v488_v13, %v488_v13 }
  0xf4   : > { %v973_v37 = vld [vmem:[#allocation2 + $0x123] sm:$0xff]  ;;  %1037 = vst [vmem:[#allocation3 + $0xac] sm:$0xf] %v997_v30  ;;  %v974_v39 = vld [vmem:[#allocation2 + $0x12b] sm:$0xff]  ;;  %v774_v40 = vpack.c.bf16 %v734_v35, %v734_v35  ;;  %v719_v51 = vld [vmem:[#allocation2 + $0x79] sm:$0xff]  ;;  %v639_v56 = vpack.c.bf16 %v599_v49, %v599_v49 }
  0xf5   : > { %1038 = vst [vmem:[#allocation3 + $0xc0] sm:$0xf] %v998_v33  ;;  %v1093_v41 = vld [vmem:[#allocation2 + $0x124] sm:$0xff]  ;;  %v1013_v42 = vpack.c.bf16 %v973_v37, %v973_v37  ;;  %v1094_v43 = vld [vmem:[#allocation2 + $0x12c] sm:$0xff]  ;;  %v1014_v45 = vpack.c.bf16 %v974_v39, %v974_v39  ;;  %v615_v54 = vld [vmem:[#allocation2 + $0x138] sm:$0xff]  ;;  %v759_v60 = vpack.c.bf16 %v719_v51, %v719_v51 }
  0xf6   : > { %1157 = vst [vmem:[#allocation3 + $0xb0] sm:$0xf] %v1117_v34  ;;  %v614_v44 = vld [vmem:[#allocation2 + $0x128] sm:$0xff]  ;;  %v1133_v48 = vpack.c.bf16 %v1093_v41, %v1093_v41  ;;  %v1134_v50 = vpack.c.bf16 %v1094_v43, %v1094_v43  ;;  %v735_v57 = vld [vmem:[#allocation2 + $0x139] sm:$0xff]  ;;  %v655_v63 = vpack.c.bf16 %v615_v54, %v615_v54  ;;  %v461_v31 = vpop.f32.mrf.mxu2 }
  0xf7   : > { %1158 = vst [vmem:[#allocation3 + $0xc4] sm:$0xf] %v1118_v36  ;;  %v654_v53 = vpack.c.bf16 %v614_v44, %v614_v44  ;;  %v775_v1 = vpack.c.bf16 %v735_v57, %v735_v57 }
  0xf8   : > { %814 = vst [vmem:[#allocation3 + $0x1f8] sm:$0xf] %v774_v40 }
  0xf9   : > { %1053 = vst [vmem:[#allocation3 + $0x1ec] sm:$0xf] %v1013_v42  ;;  %v11088_v4 = vld [vmem:[#allocation3 + $0xb0] sm:$0xf0] }
  0xfa   : > { %v8402_v55 = vld [vmem:[#allocation3 + $0xb4] sm:$0xf0]  ;;  %1054 = vst [vmem:[#allocation3 + $0x200] sm:$0xf] %v1014_v45  ;;  %v8401_v6 = vor.u32 %v11088_v4, %v8400_v3 }
  0xfb   : > { %v8405_v58 = vor.u32 %v11086_v52, %v8402_v55  ;;  %v11087_v59 = vld [vmem:[#allocation3 + $0xac] sm:$0xf]  ;;  %1173 = vst [vmem:[#allocation3 + $0x1f0] sm:$0xf] %v1133_v48  ;;  %v424_v48 = vpop.f32.mrf.mxu0 }
  0xfc   : > { %v8410_v62 = vld [vmem:[#allocation3 + $0xbc] sm:$0xf0]  ;;  %1174 = vst [vmem:[#allocation3 + $0x204] sm:$0xf] %v1134_v50  ;;  %2049 = vmatmul.bf16.gmra.mxu1 %v8401_v6  ;;  %v504_v6 = vmax.f32 %v461_v31, 0.0  ;;  %v489_v9 = vmax.f32 %v424_v48, 0.0 }
  0xfd   : > { %2138 = vmatmul.bf16.gmra.mxu2 %v8405_v58  ;;  %v8413_v0 = vor.u32 %v11087_v59, %v8410_v62  ;;  %694 = vst [vmem:[#allocation3 + $0x1f4] sm:$0xf] %v654_v53 }
  0xfe   : > { %679 = vst [vmem:[#allocation3 + $0xc8] sm:$0xf] %v639_v56 }
  0xff   : > { %2316 = vmatmul.bf16.gmra.mxu0 %v8413_v0  ;;  %799 = vst [vmem:[#allocation3 + $0xcc] sm:$0xf] %v759_v60  ;;  %v464_v60 = vpop.f32.mrf.mxu2 }
 0x100   : > { %695 = vst [vmem:[#allocation3 + $0x208] sm:$0xf] %v655_v63 }
 0x101   : > { %815 = vst [vmem:[#allocation3 + $0x20c] sm:$0xf] %v775_v1 }
 0x102   : > { %564 = vst [vmem:[#allocation2 + $0x82] sm:$0xff] %v486_v61 }
 0x103   : > { %920 = vst [vmem:[#allocation3 + $0xe4] sm:$0xf] %v880_v5 }
 0x104   : > { %580 = vst [vmem:[#allocation2 + $0x142] sm:$0xff] %v502_v2 }
 0x105   : > { %936 = vst [vmem:[#allocation3 + $0x224] sm:$0xf] %v896_v10  ;;  %v8420_v59 = vld [vmem:[#allocation3 + $0xc8] sm:$0xf]  ;;  %v426_v10 = vpop.f32.mrf.mxu0 }
 0x106   : > { %565 = vst [vmem:[#allocation2 + $0x92] sm:$0xff] %v487_v7  ;;  %v11091_v42 = vld [vmem:[#allocation3 + $0xcc] sm:$0xf] }
 0x107   : > { %921 = vst [vmem:[#allocation3 + $0xf8] sm:$0xf] %v881_v12  ;;  %v898_v12 = vpack.c.bf16 %v504_v6, %v504_v6 }
 0x108   : > { %581 = vst [vmem:[#allocation2 + $0x152] sm:$0xff] %v503_v11  ;;  %v11185_v11 = vld [vmem:[%s14503_s2 + $0x138] sm:$0xff] }
 0x109   : > { %v600_v16 = vld [vmem:[#allocation2 + $0x80] sm:$0xff]  ;;  %937 = vst [vmem:[#allocation3 + $0x238] sm:$0xf] %v897_v14  ;;  %2377 = vmatpush.bf16.msrb.mxu1 %v11185_v11  ;;  %v883_v14 = vpack.c.bf16 %v489_v9, %v489_v9 }
 0x10a   : > { %v720_v17 = vld [vmem:[#allocation2 + $0x81] sm:$0xff]  ;;  %566 = vst [vmem:[#allocation2 + $0x9a] sm:$0xff] %v488_v13  ;;  %v640_v29 = vpack.c.bf16 %v600_v16, %v600_v16  ;;  %v505_v13 = vmax.f32 %v464_v60, 0.0  ;;  %v466_v16 = vpop.f32.mrf.mxu2 }
 0x10b   : > { %v959_v18 = vld [vmem:[#allocation2 + $0x7b] sm:$0xff]  ;;  %v760_v19 = vpack.c.bf16 %v720_v17, %v720_v17  ;;  %v960_v20 = vld [vmem:[#allocation2 + $0x83] sm:$0xff]  ;;  %922 = vst [vmem:[#allocation3 + $0x10c] sm:$0xf] %v882_v15  ;;  %v490_v15 = vmax.f32 %v426_v10, 0.0  ;;  %v506_v17 = vmax.f32 %v466_v16, 0.0 }
 0x10c   : > { %v999_v21 = vpack.c.bf16 %v959_v18, %v959_v18  ;;  %v1079_v22 = vld [vmem:[#allocation2 + $0x7c] sm:$0xff]  ;;  %v1080_v23 = vld [vmem:[#allocation2 + $0x84] sm:$0xff]  ;;  %v1000_v24 = vpack.c.bf16 %v960_v20, %v960_v20  ;;  %680 = vst [vmem:[#allocation3 + $0xdc] sm:$0xf] %v640_v29  ;;  %v11184_v18 = vld [vmem:[%s14503_s2 + $0x130] sm:$0xff] }
 0x10d   : > { %v1119_v25 = vpack.c.bf16 %v1079_v22, %v1079_v22  ;;  %v736_v26 = vld [vmem:[#allocation2 + $0x141] sm:$0xff]  ;;  %800 = vst [vmem:[#allocation3 + $0xe0] sm:$0xf] %v760_v19  ;;  %v1120_v27 = vpack.c.bf16 %v1080_v23, %v1080_v23  ;;  %v601_v39 = vld [vmem:[#allocation2 + $0x90] sm:$0xff]  ;;  %v899_v19 = vpack.c.bf16 %v505_v13, %v505_v13  ;;  %2378 = vmatpush.bf16.msrb.mxu1 %v11184_v18  ;;  %v12011_v31 = vpop.f32.mrf.mxu0 }
 0x10e   : > { %v975_v28 = vld [vmem:[#allocation2 + $0x13b] sm:$0xff]  ;;  %1039 = vst [vmem:[#allocation3 + $0xd4] sm:$0xf] %v999_v21  ;;  %v976_v30 = vld [vmem:[#allocation2 + $0x143] sm:$0xff]  ;;  %v776_v32 = vpack.c.bf16 %v736_v26, %v736_v26  ;;  %v721_v41 = vld [vmem:[#allocation2 + $0x91] sm:$0xff]  ;;  %v641_v46 = vpack.c.bf16 %v601_v39, %v601_v39 }
 0x10f   : > { %1040 = vst [vmem:[#allocation3 + $0xe8] sm:$0xf] %v1000_v24  ;;  %v1095_v33 = vld [vmem:[#allocation2 + $0x13c] sm:$0xff]  ;;  %v1015_v34 = vpack.c.bf16 %v975_v28, %v975_v28  ;;  %v1096_v35 = vld [vmem:[#allocation2 + $0x144] sm:$0xff]  ;;  %v1016_v37 = vpack.c.bf16 %v976_v30, %v976_v30  ;;  %v617_v44 = vld [vmem:[#allocation2 + $0x150] sm:$0xff]  ;;  %v761_v51 = vpack.c.bf16 %v721_v41, %v721_v41  ;;  %v884_v24 = vpack.c.bf16 %v490_v15, %v490_v15 }
 0x110   : > { %1159 = vst [vmem:[#allocation3 + $0xd8] sm:$0xf] %v1119_v25  ;;  %v616_v36 = vld [vmem:[#allocation2 + $0x140] sm:$0xff]  ;;  %v1135_v38 = vpack.c.bf16 %v1095_v33, %v1095_v33  ;;  %v1136_v40 = vpack.c.bf16 %v1096_v35, %v1096_v35  ;;  %v737_v47 = vld [vmem:[#allocation2 + $0x151] sm:$0xff]  ;;  %v657_v54 = vpack.c.bf16 %v617_v44, %v617_v44  ;;  %v900_v28 = vpack.c.bf16 %v506_v17, %v506_v17 }
 0x111   : > { %1160 = vst [vmem:[#allocation3 + $0xec] sm:$0xf] %v1120_v27  ;;  %v656_v43 = vpack.c.bf16 %v616_v36, %v616_v36  ;;  %v722_v52 = vld [vmem:[#allocation2 + $0x99] sm:$0xff]  ;;  %v777_v57 = vpack.c.bf16 %v737_v47, %v737_v47  ;;  %v11183_v27 = vld [vmem:[%s14503_s2 + $0x128] sm:$0xff] }
 0x112   : > { %816 = vst [vmem:[#allocation3 + $0x220] sm:$0xf] %v776_v32  ;;  %v961_v55 = vld [vmem:[#allocation2 + $0x93] sm:$0xff]  ;;  %v962_v58 = vld [vmem:[#allocation2 + $0x9b] sm:$0xff]  ;;  %v762_v61 = vpack.c.bf16 %v722_v52, %v722_v52  ;;  %2379 = vmatpush.bf16.msrb.mxu1 %v11183_v27 }
 0x113   : > { %1055 = vst [vmem:[#allocation3 + $0x214] sm:$0xf] %v1015_v34  ;;  %v1081_v62 = vld [vmem:[#allocation2 + $0x94] sm:$0xff]  ;;  %v11093_v63 = vld [vmem:[#allocation3 + $0xd8] sm:$0xf0]  ;;  %v1001_v0 = vpack.c.bf16 %v961_v55, %v961_v55  ;;  %v1002_v4 = vpack.c.bf16 %v962_v58, %v962_v58  ;;  %v11182_v44 = vld [vmem:[%s14503_s2 + $0x120] sm:$0xff] }
 0x114   : > { %v8422_v45 = vld [vmem:[#allocation3 + $0xdc] sm:$0xf0]  ;;  %1056 = vst [vmem:[#allocation3 + $0x228] sm:$0xf] %v1016_v37  ;;  %v8421_v2 = vor.u32 %v11093_v63, %v8420_v59  ;;  %v602_v3 = vld [vmem:[#allocation2 + $0x98] sm:$0xff]  ;;  %v1121_v5 = vpack.c.bf16 %v1081_v62, %v1081_v62 }
 0x115   : > { %v8425_v49 = vor.u32 %v11091_v42, %v8422_v45  ;;  %v11092_v50 = vld [vmem:[#allocation3 + $0xd4] sm:$0xf]  ;;  %1175 = vst [vmem:[#allocation3 + $0x218] sm:$0xf] %v1135_v38  ;;  %v1082_v1 = vld [vmem:[#allocation2 + $0x9c] sm:$0xff]  ;;  %v642_v8 = vpack.c.bf16 %v602_v3, %v602_v3 }
 0x116   : > { %v8430_v53 = vld [vmem:[#allocation3 + $0xe4] sm:$0xf0]  ;;  %1176 = vst [vmem:[#allocation3 + $0x22c] sm:$0xf] %v1136_v40  ;;  %2054 = vmatmul.bf16.gmra.mxu1 %v8421_v2  ;;  %v1122_v7 = vpack.c.bf16 %v1082_v1, %v1082_v1  ;;  %v11181_v52 = vld [vmem:[%s14503_s2 + $0x118] sm:$0xff] }
 0x117   : > { %2143 = vmatmul.bf16.gmra.mxu2 %v8425_v49  ;;  %v8433_v56 = vor.u32 %v11092_v50, %v8430_v53  ;;  %696 = vst [vmem:[#allocation3 + $0x21c] sm:$0xf] %v656_v43  ;;  %v469_v49 = vpop.f32.mrf.mxu2  ;;  %2380 = vmatpush.bf16.msrb.mxu1 %v11182_v44 }
 0x118   : > { %681 = vst [vmem:[#allocation3 + $0xf0] sm:$0xf] %v641_v46 }
 0x119   : > { %2321 = vmatmul.bf16.gmra.mxu0 %v8433_v56  ;;  %801 = vst [vmem:[#allocation3 + $0xf4] sm:$0xf] %v761_v51 }
 0x11a   : > { %697 = vst [vmem:[#allocation3 + $0x230] sm:$0xf] %v657_v54 }
 0x11b   : > { %817 = vst [vmem:[#allocation3 + $0x234] sm:$0xf] %v777_v57  ;;  %2381 = vmatpush.bf16.msrb.mxu1 %v11181_v52 }
 0x11c   : > { %802 = vst [vmem:[#allocation3 + $0x108] sm:$0xf] %v762_v61  ;;  %v431_v61 = vpop.f32.mrf.mxu0 }
 0x11d   : > { %1041 = vst [vmem:[#allocation3 + $0xfc] sm:$0xf] %v1001_v0  ;;  %v11180_v0 = vld [vmem:[%s14503_s2 + $0x110] sm:$0xff]  ;;  %v492_v27 = vmax.f32 %v431_v61, 0.0 }
 0x11e   : > { %1042 = vst [vmem:[#allocation3 + $0x110] sm:$0xf] %v1002_v4 }
 0x11f   : > { %1161 = vst [vmem:[#allocation3 + $0x100] sm:$0xf] %v1121_v5  ;;  %v8440_v29 = vld [vmem:[#allocation3 + $0xf0] sm:$0xf]  ;;  %2382 = vmatpush.bf16.msrb.mxu1 %v11180_v0 }
 0x120   : > { %1162 = vst [vmem:[#allocation3 + $0x114] sm:$0xf] %v1122_v7  ;;  %v11096_v20 = vld [vmem:[#allocation3 + $0xf4] sm:$0xf] }
 0x121   : > { %682 = vst [vmem:[#allocation3 + $0x104] sm:$0xf] %v642_v8 }
 0x122   : > { %582 = vst [vmem:[#allocation2 + $0x15a] sm:$0xff] %v504_v6 }
 0x123   : > { %938 = vst [vmem:[#allocation3 + $0x24c] sm:$0xf] %v898_v12  ;;  %v8442_v21 = vld [vmem:[#allocation3 + $0x104] sm:$0xf0] }
 0x124   : > { %567 = vst [vmem:[#allocation2 + $0xaa] sm:$0xff] %v489_v9  ;;  %v8445_v22 = vor.u32 %v11096_v20, %v8442_v21  ;;  %v11097_v23 = vld [vmem:[#allocation3 + $0xfc] sm:$0xf]  ;;  %v471_v9 = vpop.f32.mrf.mxu2  ;;  %v434_v20 = vpop.f32.mrf.mxu0 }
 0x125   : > { %923 = vst [vmem:[#allocation3 + $0x120] sm:$0xf] %v883_v14  ;;  %v8450_v25 = vld [vmem:[#allocation3 + $0x10c] sm:$0xf0] }
 0x126   : > { %583 = vst [vmem:[#allocation2 + $0x16a] sm:$0xff] %v505_v13  ;;  %v8453_v26 = vor.u32 %v11097_v23, %v8450_v25 }
 0x127   : > { %2148 = vmatmul.bf16.gmra.mxu2 %v8445_v22  ;;  %939 = vst [vmem:[#allocation3 + $0x260] sm:$0xf] %v899_v19  ;;  %v507_v19 = vmax.f32 %v469_v49, 0.0 }
 0x128   : > { %568 = vst [vmem:[#allocation2 + $0xb2] sm:$0xff] %v490_v15  ;;  %v11098_v30 = vld [vmem:[#allocation3 + $0x100] sm:$0xf0] }
 0x129   : > { %2326 = vmatmul.bf16.gmra.mxu0 %v8453_v26  ;;  %v618_v32 = vld [vmem:[#allocation2 + $0x158] sm:$0xff]  ;;  %924 = vst [vmem:[#allocation3 + $0x134] sm:$0xf] %v884_v24  ;;  %v8441_v35 = vor.u32 %v11098_v30, %v8440_v29  ;;  %v11179_v30 = vld [vmem:[%s14503_s2 + $0x108] sm:$0xff] }
 0x12a   : > { %v738_v33 = vld [vmem:[#allocation2 + $0x159] sm:$0xff]  ;;  %584 = vst [vmem:[#allocation2 + $0x172] sm:$0xff] %v506_v17  ;;  %v658_v47 = vpack.c.bf16 %v618_v32, %v618_v32  ;;  %v491_v17 = vmax.f32 %v12011_v31, 0.0  ;;  %v901_v31 = vpack.c.bf16 %v507_v19, %v507_v19  ;;  %v508_v32 = vmax.f32 %v471_v9, 0.0  ;;  %2383 = vmatpush.bf16.msrb.mxu1 %v11179_v30  ;;  %v11168_v30 = vld [vmem:[%s14503_s2 + $0xb0] sm:$0xff] }
 0x12b   : > { %v977_v34 = vld [vmem:[#allocation2 + $0x153] sm:$0xff]  ;;  %v778_v36 = vpack.c.bf16 %v738_v33, %v738_v33  ;;  %v978_v37 = vld [vmem:[#allocation2 + $0x15b] sm:$0xff]  ;;  %v603_v43 = vld [vmem:[#allocation2 + $0xa8] sm:$0xff]  ;;  %940 = vst [vmem:[#allocation3 + $0x274] sm:$0xf] %v900_v28  ;;  %2059 = vmatmul.bf16.gmra.mxu1 %v8441_v35 }
 0x12c   : > { %v1017_v38 = vpack.c.bf16 %v977_v34, %v977_v34  ;;  %v1097_v39 = vld [vmem:[#allocation2 + $0x154] sm:$0xff]  ;;  %v1098_v40 = vld [vmem:[#allocation2 + $0x15c] sm:$0xff]  ;;  %v1018_v41 = vpack.c.bf16 %v978_v37, %v978_v37  ;;  %v723_v46 = vld [vmem:[#allocation2 + $0xa9] sm:$0xff]  ;;  %v643_v50 = vpack.c.bf16 %v603_v43, %v603_v43  ;;  %698 = vst [vmem:[#allocation3 + $0x244] sm:$0xf] %v658_v47  ;;  %v885_v26 = vpack.c.bf16 %v491_v17, %v491_v17  ;;  %v12026_v33 = vpop.f32.mrf.mxu2  ;;  %v2030_v47 = vpop.f32.mrf.mxu1 }
 0x12d   : > { %v1137_v42 = vpack.c.bf16 %v1097_v39, %v1097_v39  ;;  %818 = vst [vmem:[#allocation3 + $0x248] sm:$0xf] %v778_v36  ;;  %v1138_v45 = vpack.c.bf16 %v1098_v40, %v1098_v40  ;;  %v619_v48 = vld [vmem:[#allocation2 + $0x168] sm:$0xff]  ;;  %v763_v53 = vpack.c.bf16 %v723_v46, %v723_v46  ;;  %v886_v36 = vpack.c.bf16 %v492_v27, %v492_v27  ;;  %v11178_v39 = vld [vmem:[%s14503_s2 + $0x100] sm:$0xff] }
 0x12e   : > { %1057 = vst [vmem:[#allocation3 + $0x23c] sm:$0xf] %v1017_v38  ;;  %v739_v51 = vld [vmem:[#allocation2 + $0x169] sm:$0xff]  ;;  %v659_v55 = vpack.c.bf16 %v619_v48, %v619_v48  ;;  %v493_v38 = vmax.f32 %v434_v20, 0.0  ;;  %v902_v40 = vpack.c.bf16 %v508_v32, %v508_v32  ;;  %2384 = vmatpush.bf16.msrb.mxu1 %v11178_v39 }
 0x12f   : > { %1058 = vst [vmem:[#allocation3 + $0x250] sm:$0xf] %v1018_v41  ;;  %v724_v54 = vld [vmem:[#allocation2 + $0xb1] sm:$0xff]  ;;  %v779_v57 = vpack.c.bf16 %v739_v51, %v739_v51  ;;  %v12031_v41 = vpop.f32.mrf.mxu0  ;;  %v1069_v39 = vld [vmem:[#allocation2 + $0x4] sm:$0xff] }
 0x130   : > { %1177 = vst [vmem:[#allocation3 + $0x240] sm:$0xf] %v1137_v42  ;;  %v963_v56 = vld [vmem:[#allocation2 + $0xab] sm:$0xff]  ;;  %v964_v58 = vld [vmem:[#allocation2 + $0xb3] sm:$0xff]  ;;  %v764_v59 = vpack.c.bf16 %v724_v54, %v724_v54  ;;  %v887_v42 = vpack.c.bf16 %v493_v38, %v493_v38 }
 0x131   : > { %1178 = vst [vmem:[#allocation3 + $0x254] sm:$0xf] %v1138_v45  ;;  %v1083_v60 = vld [vmem:[#allocation2 + $0xac] sm:$0xff]  ;;  %v1003_v62 = vpack.c.bf16 %v963_v56, %v963_v56  ;;  %v1084_v63 = vld [vmem:[#allocation2 + $0xb4] sm:$0xff]  ;;  %v1004_v2 = vpack.c.bf16 %v964_v58, %v964_v58 }
 0x132   : > { %683 = vst [vmem:[#allocation3 + $0x118] sm:$0xf] %v643_v50  ;;  %v604_v1 = vld [vmem:[#allocation2 + $0xb0] sm:$0xff]  ;;  %v1123_v3 = vpack.c.bf16 %v1083_v60, %v1083_v60  ;;  %v1124_v5 = vpack.c.bf16 %v1084_v63, %v1084_v63 }
 0x133   : > { %803 = vst [vmem:[#allocation3 + $0x11c] sm:$0xf] %v763_v53  ;;  %v740_v4 = vld [vmem:[#allocation2 + $0x171] sm:$0xff]  ;;  %v644_v7 = vpack.c.bf16 %v604_v1, %v604_v1 }
 0x134   : > { %699 = vst [vmem:[#allocation3 + $0x258] sm:$0xf] %v659_v55  ;;  %v979_v6 = vld [vmem:[#allocation2 + $0x16b] sm:$0xff]  ;;  %v980_v8 = vld [vmem:[#allocation2 + $0x173] sm:$0xff]  ;;  %v780_v10 = vpack.c.bf16 %v740_v4, %v740_v4  ;;  %v12033_v50 = vpop.f32.mrf.mxu2 }
 0x135   : > { %819 = vst [vmem:[#allocation3 + $0x25c] sm:$0xf] %v779_v57  ;;  %v1099_v11 = vld [vmem:[#allocation2 + $0x16c] sm:$0xff]  ;;  %v1019_v12 = vpack.c.bf16 %v979_v6, %v979_v6  ;;  %v1100_v13 = vld [vmem:[#allocation2 + $0x174] sm:$0xff]  ;;  %v1020_v15 = vpack.c.bf16 %v980_v8, %v980_v8 }
 0x136   : > { %804 = vst [vmem:[#allocation3 + $0x130] sm:$0xf] %v764_v59  ;;  %v620_v14 = vld [vmem:[#allocation2 + $0x170] sm:$0xff]  ;;  %v1139_v16 = vpack.c.bf16 %v1099_v11, %v1099_v11  ;;  %v1140_v18 = vpack.c.bf16 %v1100_v13, %v1100_v13  ;;  %v12037_v11 = vpop.f32.mrf.mxu1 }
 0x137   : > { %1043 = vst [vmem:[#allocation3 + $0x124] sm:$0xf] %v1003_v62  ;;  %v660_v21 = vpack.c.bf16 %v620_v14, %v620_v14  ;;  %v11169_v14 = vld [vmem:[%s14503_s2 + $0xb8] sm:$0xff] }
 0x138   : > { %1044 = vst [vmem:[#allocation3 + $0x138] sm:$0xf] %v1004_v2  ;;  %v12035_v2 = vpop.f32.mrf.mxu0  ;;  %2199 = vmatpush.bf16.msrb.mxu3 %v11169_v14 }
 0x139   : > { %1163 = vst [vmem:[#allocation3 + $0x128] sm:$0xf] %v1123_v3  ;;  %v8460_v34 = vld [vmem:[#allocation3 + $0x118] sm:$0xf] }
 0x13a   : > { %1164 = vst [vmem:[#allocation3 + $0x13c] sm:$0xf] %v1124_v5  ;;  %v11101_v22 = vld [vmem:[#allocation3 + $0x11c] sm:$0xf] }
 0x13b   : > { %684 = vst [vmem:[#allocation3 + $0x12c] sm:$0xf] %v644_v7 }
 0x13c   : > { %820 = vst [vmem:[#allocation3 + $0x270] sm:$0xf] %v780_v10  ;;  %2200 = vmatpush.bf16.msrb.mxu3 %v11168_v30 }
 0x13d   : > { %1059 = vst [vmem:[#allocation3 + $0x264] sm:$0xf] %v1019_v12  ;;  %v8462_v23 = vld [vmem:[#allocation3 + $0x12c] sm:$0xf0] }
 0x13e   : > { %1060 = vst [vmem:[#allocation3 + $0x278] sm:$0xf] %v1020_v15  ;;  %v8465_v24 = vor.u32 %v11101_v22, %v8462_v23  ;;  %v11102_v25 = vld [vmem:[#allocation3 + $0x124] sm:$0xf]  ;;  %v2119_v15 = vpop.f32.mrf.mxu2 }
 0x13f   : > { %1179 = vst [vmem:[#allocation3 + $0x268] sm:$0xf] %v1139_v16  ;;  %v8470_v28 = vld [vmem:[#allocation3 + $0x134] sm:$0xf0] }
 0x140   : > { %1180 = vst [vmem:[#allocation3 + $0x27c] sm:$0xf] %v1140_v18  ;;  %2153 = vmatmul.bf16.gmra.mxu2 %v8465_v24  ;;  %v8473_v29 = vor.u32 %v11102_v25, %v8470_v28  ;;  %v509_v18 = vmax.f32 %v12026_v33, 0.0  ;;  %v494_v28 = vmax.f32 %v12031_v41, 0.0  ;;  %v510_v33 = vmax.f32 %v12033_v50, 0.0  ;;  %v1070_v41 = vld [vmem:[#allocation2 + $0xc] sm:$0xff] }
 0x141   : > { %700 = vst [vmem:[#allocation3 + $0x26c] sm:$0xf] %v660_v21 }
 0x142   : > { %569 = vst [vmem:[#allocation2 + $0xc2] sm:$0xff] %v491_v17  ;;  %v11103_v35 = vld [vmem:[#allocation3 + $0x128] sm:$0xf0]  ;;  %2331 = vmatmul.bf16.gmra.mxu0 %v8473_v29 }
 0x143   : > { %925 = vst [vmem:[#allocation3 + $0x148] sm:$0xf] %v885_v26  ;;  %v8461_v37 = vor.u32 %v11103_v35, %v8460_v34  ;;  %v12045_v26 = vpop.f32.mrf.mxu0 }
 0x144   : > { %585 = vst [vmem:[#allocation2 + $0x182] sm:$0xff] %v507_v19  ;;  %v12043_v19 = vadd.f32 %v2119_v15, %v2030_v47  ;;  %v1110_v47 = vpack.c.bf16 %v1070_v41, %v1070_v41 }
 0x145   : > { %941 = vst [vmem:[#allocation3 + $0x288] sm:$0xf] %v901_v31  ;;  %2064 = vmatmul.bf16.gmra.mxu1 %v8461_v37  ;;  %v888_v37 = vpack.c.bf16 %v494_v28, %v494_v28 }
 0x146   : > { %570 = vst [vmem:[#allocation2 + $0xca] sm:$0xff] %v492_v27 }
 0x147   : > { %926 = vst [vmem:[#allocation3 + $0x15c] sm:$0xf] %v886_v36  ;;  %v2035_v36 = vpop.f32.mrf.mxu1 }
 0x148   : > { %586 = vst [vmem:[#allocation2 + $0x18a] sm:$0xff] %v508_v32  ;;  %v903_v32 = vpack.c.bf16 %v509_v18, %v509_v18 }
 0x149   : > { %v605_v43 = vld [vmem:[#allocation2 + $0xc0] sm:$0xff]  ;;  %942 = vst [vmem:[#allocation3 + $0x29c] sm:$0xf] %v902_v40  ;;  %v12052_v40 = vpop.f32.mrf.mxu2 }
 0x14a   : > { %v725_v44 = vld [vmem:[#allocation2 + $0xc1] sm:$0xff]  ;;  %v645_v45 = vpack.c.bf16 %v605_v43, %v605_v43  ;;  %571 = vst [vmem:[#allocation2 + $0xda] sm:$0xff] %v493_v38 }
 0x14b   : > { %v765_v46 = vpack.c.bf16 %v725_v44, %v725_v44  ;;  %v621_v48 = vld [vmem:[#allocation2 + $0x180] sm:$0xff]  ;;  %927 = vst [vmem:[#allocation3 + $0x170] sm:$0xf] %v887_v42  ;;  %v904_v42 = vpack.c.bf16 %v510_v33, %v510_v33  ;;  %v1109_v44 = vpack.c.bf16 %v1069_v39, %v1069_v39 }
 0x14c   : > { %v741_v49 = vld [vmem:[#allocation2 + $0x181] sm:$0xff]  ;;  %685 = vst [vmem:[#allocation3 + $0x140] sm:$0xf] %v645_v45  ;;  %v661_v51 = vpack.c.bf16 %v621_v48, %v621_v48 }
 0x14d   : > { %v781_v52 = vpack.c.bf16 %v741_v49, %v741_v49  ;;  %805 = vst [vmem:[#allocation3 + $0x144] sm:$0xf] %v765_v46  ;;  %v606_v53 = vld [vmem:[#allocation2 + $0xc8] sm:$0xff]  ;;  %v1071_v43 = vld [vmem:[#allocation2 + $0x1c] sm:$0xff]  ;;  %v12054_v46 = vpop.f32.mrf.mxu0 }
 0x14e   : > { %v726_v54 = vld [vmem:[#allocation2 + $0xc9] sm:$0xff]  ;;  %701 = vst [vmem:[#allocation3 + $0x280] sm:$0xf] %v661_v51  ;;  %v646_v3 = vpack.c.bf16 %v606_v53, %v606_v53  ;;  %v1111_v48 = vpack.c.bf16 %v1071_v43, %v1071_v43 }
 0x14f   : > { %v965_v55 = vld [vmem:[#allocation2 + $0xc3] sm:$0xff]  ;;  %v766_v56 = vpack.c.bf16 %v726_v54, %v726_v54  ;;  %v966_v57 = vld [vmem:[#allocation2 + $0xcb] sm:$0xff]  ;;  %821 = vst [vmem:[#allocation3 + $0x284] sm:$0xf] %v781_v52  ;;  %v12056_v50 = vpop.f32.mrf.mxu1 }
 0x150   : > { %v1005_v58 = vpack.c.bf16 %v965_v55, %v965_v55  ;;  %v1085_v59 = vld [vmem:[#allocation2 + $0xc4] sm:$0xff]  ;;  %v1086_v60 = vld [vmem:[#allocation2 + $0xcc] sm:$0xff]  ;;  %v1006_v61 = vpack.c.bf16 %v966_v57, %v966_v57  ;;  %686 = vst [vmem:[#allocation3 + $0x154] sm:$0xf] %v646_v3 }
 0x151   : > { %v1125_v62 = vpack.c.bf16 %v1085_v59, %v1085_v59  ;;  %v622_v63 = vld [vmem:[#allocation2 + $0x188] sm:$0xff]  ;;  %806 = vst [vmem:[#allocation3 + $0x158] sm:$0xf] %v766_v56  ;;  %v1126_v0 = vpack.c.bf16 %v1086_v60, %v1086_v60  ;;  %v607_v13 = vld [vmem:[#allocation2 + $0xd8] sm:$0xff]  ;;  %v2124_v53 = vpop.f32.mrf.mxu2 }
 0x152   : > { %v742_v1 = vld [vmem:[#allocation2 + $0x189] sm:$0xff]  ;;  %1045 = vst [vmem:[#allocation3 + $0x14c] sm:$0xf] %v1005_v58  ;;  %v662_v5 = vpack.c.bf16 %v622_v63, %v622_v63  ;;  %v727_v17 = vld [vmem:[#allocation2 + $0xd9] sm:$0xff]  ;;  %v647_v23 = vpack.c.bf16 %v607_v13, %v607_v13  ;;  %v12058_v56 = vadd.f32 %v2124_v53, %v2035_v36 }
 0x153   : > { %v981_v4 = vld [vmem:[#allocation2 + $0x183] sm:$0xff]  ;;  %1046 = vst [vmem:[#allocation3 + $0x160] sm:$0xf] %v1006_v61  ;;  %v982_v6 = vld [vmem:[#allocation2 + $0x18b] sm:$0xff]  ;;  %v782_v7 = vpack.c.bf16 %v742_v1, %v742_v1  ;;  %v767_v27 = vpack.c.bf16 %v727_v17, %v727_v17 }
 0x154   : > { %1165 = vst [vmem:[#allocation3 + $0x150] sm:$0xf] %v1125_v62  ;;  %v1101_v8 = vld [vmem:[#allocation2 + $0x184] sm:$0xff]  ;;  %v1021_v9 = vpack.c.bf16 %v981_v4, %v981_v4  ;;  %v1102_v10 = vld [vmem:[#allocation2 + $0x18c] sm:$0xff]  ;;  %v1022_v12 = vpack.c.bf16 %v982_v6, %v982_v6  ;;  %v8480_v34 = vld [vmem:[#allocation3 + $0x140] sm:$0xf] }
 0x155   : > { %1166 = vst [vmem:[#allocation3 + $0x164] sm:$0xf] %v1126_v0  ;;  %v1141_v16 = vpack.c.bf16 %v1101_v8, %v1101_v8  ;;  %v1142_v20 = vpack.c.bf16 %v1102_v10, %v1102_v10  ;;  %v11106_v21 = vld [vmem:[#allocation3 + $0x144] sm:$0xf]  ;;  %v12060_v1 = vpop.f32.mrf.mxu0 }
 0x156   : > { %702 = vst [vmem:[#allocation3 + $0x294] sm:$0xf] %v662_v5  ;;  %v1072_v45 = vld [vmem:[#allocation2 + $0x24] sm:$0xff] }
 0x157   : > { %822 = vst [vmem:[#allocation3 + $0x298] sm:$0xf] %v782_v7  ;;  %v11108_v35 = vld [vmem:[#allocation3 + $0x150] sm:$0xf0]  ;;  %v1112_v49 = vpack.c.bf16 %v1072_v45, %v1072_v45  ;;  %v11166_v45 = vld [vmem:[%s14503_s2 + $0xa0] sm:$0xff] }
 0x158   : > { %v8482_v22 = vld [vmem:[#allocation3 + $0x154] sm:$0xf0]  ;;  %1061 = vst [vmem:[#allocation3 + $0x28c] sm:$0xf] %v1021_v9  ;;  %v8481_v38 = vor.u32 %v11108_v35, %v8480_v34 }
 0x159   : > { %v8485_v24 = vor.u32 %v11106_v21, %v8482_v22  ;;  %v11107_v25 = vld [vmem:[#allocation3 + $0x14c] sm:$0xf]  ;;  %1062 = vst [vmem:[#allocation3 + $0x2a0] sm:$0xf] %v1022_v12  ;;  %v12065_v21 = vpop.f32.mrf.mxu2 }
 0x15a   : > { %v8490_v29 = vld [vmem:[#allocation3 + $0x15c] sm:$0xf0]  ;;  %1181 = vst [vmem:[#allocation3 + $0x290] sm:$0xf] %v1141_v16  ;;  %2069 = vmatmul.bf16.vlgmr.msra.gmra.mxu3 %v8481_v38  ;;  %v11167_v12 = vld [vmem:[%s14503_s2 + $0xa8] sm:$0xff]  ;;  %v2040_v16 = vpop.f32.mrf.mxu1 }
 0x15b   : > { %2158 = vmatmul.bf16.gmra.mxu2 %v8485_v24  ;;  %v8493_v31 = vor.u32 %v11107_v25, %v8490_v29  ;;  %1182 = vst [vmem:[#allocation3 + $0x2a4] sm:$0xf] %v1142_v20  ;;  %2201 = vmatpush.bf16.msrb.mxu3 %v11167_v12  ;;  %v8542_v12 = vld [vmem:[#allocation3 + $0x1cc] sm:$0xf0] }
 0x15c   : > { %687 = vst [vmem:[#allocation3 + $0x168] sm:$0xf] %v647_v23 }
 0x15d   : > { %2336 = vmatmul.bf16.gmra.mxu0 %v8493_v31  ;;  %807 = vst [vmem:[#allocation3 + $0x16c] sm:$0xf] %v767_v27  ;;  %v12067_v27 = vpop.f32.mrf.mxu0 }
 0x15e   : > { %587 = vst [vmem:[#allocation2 + $0x19a] sm:$0xff] %v509_v18 }
 0x15f   : > { %943 = vst [vmem:[#allocation3 + $0x2b0] sm:$0xf] %v903_v32  ;;  %2202 = vmatpush.bf16.msrb.mxu3 %v11166_v45  ;;  %v8560_v45 = vld [vmem:[#allocation3 + $0x1e0] sm:$0xf] }
 0x160   : > { %572 = vst [vmem:[#allocation2 + $0xe2] sm:$0xff] %v494_v28 }
 0x161   : > { %928 = vst [vmem:[#allocation3 + $0x184] sm:$0xf] %v888_v37  ;;  %v2129_v36 = vpop.f32.mrf.mxu2 }
 0x162   : > { %588 = vst [vmem:[#allocation2 + $0x1a2] sm:$0xff] %v510_v33  ;;  %v12069_v35 = vpop.f32.mrf.mxu1  ;;  %v12071_v39 = vadd.f32 %v2129_v36, %v2040_v16  ;;  %v11126_v36 = vld [vmem:[#allocation3 + $0x1e4] sm:$0xf] }
 0x163   : > { %944 = vst [vmem:[#allocation3 + $0x2c4] sm:$0xf] %v904_v42  ;;  %v8500_v37 = vld [vmem:[#allocation3 + $0x168] sm:$0xf] }
 0x164   : > { %1149 = vst [vmem:[#allocation3 + $0x10] sm:$0xf] %v1109_v44  ;;  %v11111_v29 = vld [vmem:[#allocation3 + $0x16c] sm:$0xf] }
 0x165   : > { %v623_v51 = vld [vmem:[#allocation2 + $0x198] sm:$0xff]  ;;  %1150 = vst [vmem:[#allocation3 + $0x24] sm:$0xf] %v1110_v47  ;;  %v12073_v44 = vpop.f32.mrf.mxu0 }
 0x166   : > { %v743_v52 = vld [vmem:[#allocation2 + $0x199] sm:$0xff]  ;;  %v663_v54 = vpack.c.bf16 %v623_v51, %v623_v51  ;;  %1151 = vst [vmem:[#allocation3 + $0x38] sm:$0xf] %v1111_v48  ;;  %v11116_v51 = vld [vmem:[#allocation3 + $0x194] sm:$0xf] }
 0x167   : > { %v783_v55 = vpack.c.bf16 %v743_v52, %v743_v52  ;;  %v608_v57 = vld [vmem:[#allocation2 + $0xe0] sm:$0xff]  ;;  %1152 = vst [vmem:[#allocation3 + $0x4c] sm:$0xf] %v1112_v49  ;;  %v8522_v52 = vld [vmem:[#allocation3 + $0x1a4] sm:$0xf0] }
 0x168   : > { %v728_v58 = vld [vmem:[#allocation2 + $0xe1] sm:$0xff]  ;;  %703 = vst [vmem:[#allocation3 + $0x2a8] sm:$0xf] %v663_v54  ;;  %v648_v8 = vpack.c.bf16 %v608_v57, %v608_v57  ;;  %v11117_v54 = vld [vmem:[#allocation3 + $0x19c] sm:$0xf]  ;;  %v8525_v57 = vor.u32 %v11116_v51, %v8522_v52 }
 0x169   : > { %v967_v59 = vld [vmem:[#allocation2 + $0xdb] sm:$0xff]  ;;  %v768_v60 = vpack.c.bf16 %v728_v58, %v728_v58  ;;  %v968_v61 = vld [vmem:[#allocation2 + $0xe3] sm:$0xff]  ;;  %823 = vst [vmem:[#allocation3 + $0x2ac] sm:$0xf] %v783_v55  ;;  %v12078_v49 = vpop.f32.mrf.mxu2  ;;  %v8530_v55 = vld [vmem:[#allocation3 + $0x1ac] sm:$0xf0] }
 0x16a   : > { %v1007_v62 = vpack.c.bf16 %v967_v59, %v967_v59  ;;  %v1087_v63 = vld [vmem:[#allocation2 + $0xdc] sm:$0xff]  ;;  %v1088_v0 = vld [vmem:[#allocation2 + $0xe4] sm:$0xff]  ;;  %v1008_v3 = vpack.c.bf16 %v968_v61, %v968_v61  ;;  %688 = vst [vmem:[#allocation3 + $0x17c] sm:$0xf] %v648_v8  ;;  %v2045_v48 = vpop.f32.mrf.mxu1  ;;  %v8520_v58 = vld [vmem:[#allocation3 + $0x190] sm:$0xf] }
 0x16b   : > { %v1127_v4 = vpack.c.bf16 %v1087_v63, %v1087_v63  ;;  %v624_v5 = vld [vmem:[#allocation2 + $0x1a0] sm:$0xff]  ;;  %808 = vst [vmem:[#allocation3 + $0x180] sm:$0xf] %v768_v60  ;;  %v1128_v6 = vpack.c.bf16 %v1088_v0, %v1088_v0  ;;  %v8336_v10 = vld [vmem:[#allocation3 + $0x10] sm:$0xf]  ;;  %v8533_v60 = vor.u32 %v11117_v54, %v8530_v55 }
 0x16c   : > { %v744_v7 = vld [vmem:[#allocation2 + $0x1a1] sm:$0xff]  ;;  %1047 = vst [vmem:[#allocation3 + $0x174] sm:$0xf] %v1007_v62  ;;  %v664_v13 = vpack.c.bf16 %v624_v5, %v624_v5 }
 0x16d   : > { %v983_v9 = vld [vmem:[#allocation2 + $0x19b] sm:$0xff]  ;;  %1048 = vst [vmem:[#allocation3 + $0x188] sm:$0xf] %v1008_v3  ;;  %v984_v14 = vld [vmem:[#allocation2 + $0x1a3] sm:$0xff]  ;;  %v784_v17 = vpack.c.bf16 %v744_v7, %v744_v7  ;;  %v12080_v53 = vpop.f32.mrf.mxu0 }
 0x16e   : > { %v11070_v15 = vld [vmem:[#allocation3 + $0x20] sm:$0xf0]  ;;  %1167 = vst [vmem:[#allocation3 + $0x178] sm:$0xf] %v1127_v4  ;;  %v1103_v18 = vld [vmem:[#allocation2 + $0x19c] sm:$0xff]  ;;  %v1023_v22 = vpack.c.bf16 %v983_v9, %v983_v9  ;;  %v1024_v24 = vpack.c.bf16 %v984_v14, %v984_v14 }
 0x16f   : > { %v8337_v20 = vor.u32 %v11070_v15, %v8336_v10  ;;  %1168 = vst [vmem:[#allocation3 + $0x18c] sm:$0xf] %v1128_v6  ;;  %v1104_v23 = vld [vmem:[#allocation2 + $0x1a4] sm:$0xff]  ;;  %v1143_v25 = vpack.c.bf16 %v1103_v18, %v1103_v18  ;;  %v8356_v42 = vld [vmem:[#allocation3 + $0x38] sm:$0xf] }
 0x170   : > { %704 = vst [vmem:[#allocation3 + $0x2bc] sm:$0xf] %v664_v13  ;;  %v1144_v28 = vpack.c.bf16 %v1104_v23, %v1104_v23  ;;  %v11075_v43 = vld [vmem:[#allocation3 + $0x48] sm:$0xf0]  ;;  %v11118_v59 = vld [vmem:[#allocation3 + $0x1a0] sm:$0xf0] }
 0x171   : > { %2385 = vmatmul.bf16.vlgmr.msrb.gmra.mxu1 %v8337_v20  ;;  %824 = vst [vmem:[#allocation3 + $0x2c0] sm:$0xf] %v784_v17  ;;  %v11113_v38 = vld [vmem:[#allocation3 + $0x178] sm:$0xf0]  ;;  %v8357_v47 = vor.u32 %v11075_v43, %v8356_v42  ;;  %v2134_v62 = vpop.f32.mrf.mxu2  ;;  %v8521_v0 = vor.u32 %v11118_v59, %v8520_v58  ;;  %v8376_v5 = vld [vmem:[#allocation3 + $0x60] sm:$0xf] }
 0x172   : > { %v8502_v30 = vld [vmem:[#allocation3 + $0x17c] sm:$0xf0]  ;;  %1063 = vst [vmem:[#allocation3 + $0x2b4] sm:$0xf] %v1023_v22  ;;  %v8501_v41 = vor.u32 %v11113_v38, %v8500_v37  ;;  %v12082_v61 = vpop.f32.mrf.mxu1  ;;  %v12084_v63 = vadd.f32 %v2134_v62, %v2045_v48  ;;  %v11165_v4 = vld [vmem:[%s14503_s2 + $0x98] sm:$0xff] }
 0x173   : > { %v8505_v31 = vor.u32 %v11111_v29, %v8502_v30  ;;  %v11112_v32 = vld [vmem:[#allocation3 + $0x174] sm:$0xf]  ;;  %1064 = vst [vmem:[#allocation3 + $0x2c8] sm:$0xf] %v1024_v24  ;;  %2203 = vmatpush.bf16.msrb.mxu3 %v11165_v4  ;;  %v11121_v10 = vld [vmem:[#allocation3 + $0x1bc] sm:$0xf] }
 0x174   : > { %v8510_v33 = vld [vmem:[#allocation3 + $0x184] sm:$0xf0]  ;;  %1183 = vst [vmem:[#allocation3 + $0x2b8] sm:$0xf] %v1143_v25  ;;  %2074 = vmatmul.bf16.gmra.mxu3 %v8501_v41  ;;  %v11080_v6 = vld [vmem:[#allocation3 + $0x70] sm:$0xf0]  ;;  %v8545_v16 = vor.u32 %v11121_v10, %v8542_v12 }
 0x175   : > { %2163 = vmatmul.bf16.gmra.mxu2 %v8505_v31  ;;  %v8513_v34 = vor.u32 %v11112_v32, %v8510_v33  ;;  %14506 = vst [vmem:[#allocation5_spill] sm:$0xff] %v12069_v35  ;;  %v12086_v3 = vpop.f32.mrf.mxu0  ;;  %v8377_v8 = vor.u32 %v11080_v6, %v8376_v5  ;;  %v11122_v14 = vld [vmem:[#allocation3 + $0x1c4] sm:$0xf]  ;;  %v8550_v15 = vld [vmem:[#allocation3 + $0x1d4] sm:$0xf0]  ;;  %v11164_v29 = vld [vmem:[%s14503_s2 + $0x90] sm:$0xff] }
 0x176   : > { %1184 = vst [vmem:[#allocation3 + $0x2cc] sm:$0xf] %v1144_v28  ;;  %v8540_v17 = vld [vmem:[#allocation3 + $0x1b8] sm:$0xf]  ;;  %v11123_v18 = vld [vmem:[#allocation3 + $0x1c8] sm:$0xf0]  ;;  %v8553_v20 = vor.u32 %v11122_v14, %v8550_v15 }
 0x177   : > { %2341 = vmatmul.bf16.gmra.mxu0 %v8513_v34  ;;  %14507 = vst [vmem:[#allocation6_spill] sm:$0xff] %v12073_v44  ;;  %v8541_v25 = vor.u32 %v11123_v18, %v8540_v17  ;;  %v8396_v30 = vld [vmem:[#allocation3 + $0x88] sm:$0xf]  ;;  %v11085_v31 = vld [vmem:[#allocation3 + $0x98] sm:$0xf0]  ;;  %2204 = vmatpush.bf16.msrb.mxu3 %v11164_v29  ;;  %v11272_v14 = vld [vmem:[%s14503_s2 + $0x170] sm:$0xff] }
 0x178   : > { %14508 = vst [vmem:[#allocation7_spill] sm:$0xff] %v12078_v49  ;;  %v8397_v32 = vor.u32 %v11085_v31, %v8396_v30  ;;  %v8562_v37 = vld [vmem:[#allocation3 + $0x1f4] sm:$0xf0]  ;;  %v11127_v38 = vld [vmem:[#allocation3 + $0x1ec] sm:$0xf]  ;;  %v11288_v15 = vld [vmem:[%s14503_s2 + $0x1f0] sm:$0xff] }
 0x179   : > { %14509 = vst [vmem:[#allocation8_spill] sm:$0xff] %v12080_v53  ;;  %v12091_v9 = vpop.f32.mrf.mxu2  ;;  %v8570_v41 = vld [vmem:[#allocation3 + $0x1fc] sm:$0xf0]  ;;  %v8565_v42 = vor.u32 %v11126_v36, %v8562_v37  ;;  %v8416_v58 = vld [vmem:[#allocation3 + $0xb0] sm:$0xf]  ;;  %v11273_v6 = vld [vmem:[%s14503_s2 + $0x178] sm:$0xff] }
 0x17a   : > { %14510 = vst [vmem:[#allocation9_spill] sm:$0xff] %v12082_v61  ;;  %v2050_v7 = vpop.f32.mrf.mxu1  ;;  %v8573_v48 = vor.u32 %v11127_v38, %v8570_v41  ;;  %v11090_v59 = vld [vmem:[#allocation3 + $0xc0] sm:$0xf0]  ;;  %v11131_v4 = vld [vmem:[#allocation3 + $0x20c] sm:$0xf]  ;;  %3331 = vmatpush.bf16.msra.mxu2 %v11273_v6 }
 0x17b   : > { %14511 = vst [vmem:[#allocation10_spill] sm:$0xff] %v12086_v3  ;;  %v8582_v5 = vld [vmem:[#allocation3 + $0x21c] sm:$0xf0]  ;;  %v8590_v10 = vld [vmem:[#allocation3 + $0x224] sm:$0xf0] }
 0x17c   : > { %14512 = vst [vmem:[#allocation11_spill] sm:$0xff] %v12091_v9  ;;  %v8580_v17 = vld [vmem:[#allocation3 + $0x208] sm:$0xf]  ;;  %v11133_v18 = vld [vmem:[#allocation3 + $0x218] sm:$0xf0] }
 0x17d   : > { %v12093_v13 = vpop.f32.mrf.mxu0  ;;  %v11287_v30 = vld [vmem:[%s14503_s2 + $0x1e8] sm:$0xff]  ;;  %v8581_v31 = vor.u32 %v11133_v18, %v8580_v17  ;;  %v8436_v36 = vld [vmem:[#allocation3 + $0xd8] sm:$0xf]  ;;  %v11268_v18 = vld [vmem:[%s14503_s2 + $0x150] sm:$0xff] }
 0x17e   : > { %14513 = vst [vmem:[#allocation12_spill] sm:$0xff] %v12093_v13  ;;  %3332 = vmatpush.bf16.msra.mxu2 %v11272_v14  ;;  %v11095_v37 = vld [vmem:[#allocation3 + $0xe8] sm:$0xf0]  ;;  %v11109_v13 = vld [vmem:[#allocation3 + $0x158] sm:$0xf0] }
 0x17f   : > { %v8437_v41 = vor.u32 %v11095_v37, %v8436_v36  ;;  %v830_v6 = vld [vmem:[#allocation2 + $0xa] sm:$0xff]  ;;  %v8456_v36 = vld [vmem:[#allocation3 + $0x100] sm:$0xf]  ;;  %v11100_v37 = vld [vmem:[#allocation3 + $0x110] sm:$0xf0] }
 0x180   : > { %v11119_v44 = vld [vmem:[#allocation3 + $0x1a8] sm:$0xf0] }
 0x181   : > { %2390 = vmatmul.bf16.gmra.mxu1 %v8357_v47  ;;  %v2139_v23 = vpop.f32.mrf.mxu2  ;;  %v11128_v47 = vld [vmem:[#allocation3 + $0x1f0] sm:$0xf0] }
 0x182   : > { %v12095_v22 = vpop.f32.mrf.mxu1  ;;  %v12097_v24 = vadd.f32 %v2139_v23, %v2050_v7  ;;  %v8561_v54 = vor.u32 %v11128_v47, %v8560_v45  ;;  %v11289_v7 = vld [vmem:[%s14503_s2 + $0x1f8] sm:$0xff]  ;;  %v11270_v45 = vld [vmem:[%s14503_s2 + $0x160] sm:$0xff] }
 0x183   : > { %14514 = vst [vmem:[#allocation13_spill] sm:$0xff] %v12095_v22  ;;  %3509 = vmatpush.bf16.msra.mxu0 %v11289_v7  ;;  %v11286_v47 = vld [vmem:[%s14503_s2 + $0x1e0] sm:$0xff] }
 0x184   : > { %2079 = vmatmul.bf16.gmra.mxu3 %v8521_v0 }
 0x185   : > { %2168 = vmatmul.bf16.gmra.mxu2 %v8525_v57  ;;  %v12099_v28 = vpop.f32.mrf.mxu0  ;;  %v11163_v57 = vld [vmem:[%s14503_s2 + $0x88] sm:$0xff] }
 0x186   : > { %14515 = vst [vmem:[#allocation14_spill] sm:$0xff] %v12099_v28  ;;  %2205 = vmatpush.bf16.msrb.mxu3 %v11163_v57  ;;  %v11137_v57 = vld [vmem:[#allocation3 + $0x23c] sm:$0xf] }
 0x187   : > { %2346 = vmatmul.bf16.gmra.mxu0 %v8533_v60  ;;  %v8417_v60 = vor.u32 %v11090_v59, %v8416_v58  ;;  %v8610_v58 = vld [vmem:[#allocation3 + $0x24c] sm:$0xf0] }
 0x188   : > { %3510 = vmatpush.bf16.msra.mxu0 %v11288_v15  ;;  %v8613_v14 = vor.u32 %v11137_v57, %v8610_v58  ;;  %v11284_v15 = vld [vmem:[%s14503_s2 + $0x1d0] sm:$0xff]  ;;  %v11141_v57 = vld [vmem:[#allocation3 + $0x25c] sm:$0xf] }
 0x189   : > { %v12104_v34 = vpop.f32.mrf.mxu2  ;;  %v8622_v58 = vld [vmem:[#allocation3 + $0x26c] sm:$0xf0] }
 0x18a   : > { %14516 = vst [vmem:[#allocation15_spill] sm:$0xff] %v12104_v34 }
 0x18c   : > { %3511 = vmatpush.bf16.msra.mxu0 %v11287_v30 }
 0x190   : > { %3512 = vmatpush.bf16.msra.mxu0 %v11286_v47 }
 0x191   : > { %2395 = vmatmul.bf16.gmra.mxu1 %v8377_v8  ;;  %v11132_v8 = vld [vmem:[#allocation3 + $0x214] sm:$0xf] }
 0x193   : > { %v2055_v33 = vpop.f32.mrf.mxu1 }
 0x194   : > { %2084 = vmatmul.bf16.gmra.mxu3 %v8541_v25  ;;  %v11271_v25 = vld [vmem:[%s14503_s2 + $0x168] sm:$0xff] }
 0x195   : > { %2173 = vmatmul.bf16.gmra.mxu2 %v8545_v16  ;;  %v8585_v16 = vor.u32 %v11131_v4, %v8582_v5  ;;  %v829_v5 = vld [vmem:[#allocation2 + $0x2] sm:$0xff] }
 0x196   : > { %v12106_v43 = vpop.f32.mrf.mxu0  ;;  %3333 = vmatpush.bf16.msra.mxu2 %v11271_v25  ;;  %v869_v7 = vpack.c.bf16 %v829_v5, %v829_v5  ;;  %v832_v25 = vld [vmem:[#allocation2 + $0x22] sm:$0xff]  ;;  %v8630_v5 = vld [vmem:[#allocation3 + $0x274] sm:$0xf0] }
 0x197   : > { %2351 = vmatmul.bf16.gmra.mxu0 %v8553_v20  ;;  %14517 = vst [vmem:[#allocation16_spill] sm:$0xff] %v12106_v43  ;;  %v8593_v20 = vor.u32 %v11132_v8, %v8590_v10  ;;  %v870_v8 = vpack.c.bf16 %v830_v6, %v830_v6  ;;  %v8600_v10 = vld [vmem:[#allocation3 + $0x230] sm:$0xf]  ;;  %v8625_v6 = vor.u32 %v11141_v57, %v8622_v58 }
 0x198   : > { %909 = vst [vmem:[#allocation3 + $0x8] sm:$0xf] %v869_v7  ;;  %v8620_v7 = vld [vmem:[#allocation3 + $0x258] sm:$0xf] }
 0x199   : > { %910 = vst [vmem:[#allocation3 + $0x1c] sm:$0xf] %v870_v8  ;;  %v11143_v8 = vld [vmem:[#allocation3 + $0x268] sm:$0xf0] }
 0x19a   : > { %v2144_v51 = vpop.f32.mrf.mxu2  ;;  %3334 = vmatpush.bf16.msra.mxu2 %v11270_v45  ;;  %v11283_v45 = vld [vmem:[%s14503_s2 + $0x1c8] sm:$0xff] }
 0x19b   : > { %v12108_v52 = vadd.f32 %v2144_v51, %v2055_v33  ;;  %v12110_v55 = vpop.f32.mrf.mxu1  ;;  %v11162_v33 = vld [vmem:[%s14503_s2 + $0x80] sm:$0xff]  ;;  %v8602_v51 = vld [vmem:[#allocation3 + $0x244] sm:$0xf0] }
 0x19c   : > { %14518 = vst [vmem:[#allocation17_spill] sm:$0xff] %v12110_v55  ;;  %2206 = vmatpush.bf16.msrb.mxu3 %v11162_v33  ;;  %v872_v33 = vpack.c.bf16 %v832_v25, %v832_v25  ;;  %v8880_v25 = vld [vmem:[#allocation3 + $0x28] sm:$0xf] }
 0x19e   : > { %v12115_v62 = vpop.f32.mrf.mxu0  ;;  %912 = vst [vmem:[#allocation3 + $0x44] sm:$0xf] %v872_v33 }
 0x19f   : > { %14519 = vst [vmem:[#allocation18_spill] sm:$0xff] %v12115_v62 }
 0x1a1   : > { %2400 = vmatmul.bf16.gmra.mxu1 %v8397_v32 }
 0x1a2   : > { %v12117_v0 = vpop.f32.mrf.mxu2 }
 0x1a3   : > { %14520 = vst [vmem:[#allocation19_spill] sm:$0xff] %v12117_v0 }
 0x1a4   : > { %2089 = vmatmul.bf16.gmra.mxu3 %v8561_v54  ;;  %v11285_v54 = vld [vmem:[%s14503_s2 + $0x1d8] sm:$0xff] }
 0x1a5   : > { %2178 = vmatmul.bf16.gmra.mxu2 %v8565_v42  ;;  %3513 = vmatpush.bf16.msra.mxu0 %v11285_v54  ;;  %v11282_v54 = vld [vmem:[%s14503_s2 + $0x1c0] sm:$0xff] }
 0x1a6   : > { %v12139_v32 = vpop.f32.mrf.mxu0 }
 0x1a7   : > { %2356 = vmatmul.bf16.gmra.mxu0 %v8573_v48  ;;  %14521 = vst [vmem:[#allocation20_spill] sm:$0xff] %v12139_v32  ;;  %v11136_v48 = vld [vmem:[#allocation3 + $0x234] sm:$0xf] }
 0x1a8   : > { %v2060_v12 = vpop.f32.mrf.mxu1  ;;  %v8605_v4 = vor.u32 %v11136_v48, %v8602_v51  ;;  %v8457_v48 = vor.u32 %v11100_v37, %v8456_v36  ;;  %v11266_v51 = vld [vmem:[%s14503_s2 + $0x140] sm:$0xff] }
 0x1a9   : > { %3514 = vmatpush.bf16.msra.mxu0 %v11284_v15  ;;  %v11189_v37 = vld [vmem:[#allocation3 + $0x40] sm:$0xf0] }
 0x1aa   : > { %v2149_v23 = vpop.f32.mrf.mxu2 }
 0x1ab   : > { %v12134_v29 = vadd.f32 %v2149_v23, %v2060_v12  ;;  %v11138_v12 = vld [vmem:[#allocation3 + $0x240] sm:$0xf0]  ;;  %v831_v23 = vld [vmem:[#allocation2 + $0x1a] sm:$0xff] }
 0x1ac   : > { %v8601_v30 = vor.u32 %v11138_v12, %v8600_v10 }
 0x1ad   : > { %3515 = vmatpush.bf16.msra.mxu0 %v11283_v45 }
 0x1ae   : > { %v12157_v59 = vpop.f32.mrf.mxu0 }
 0x1af   : > { %14524 = vst [vmem:[#allocation23_spill] sm:$0xff] %v12157_v59  ;;  %v11209_v59 = vld [vmem:[#allocation3 + $0xe0] sm:$0xf0] }
 0x1b0   : > { %v12144_v38 = vpop.f32.mrf.mxu1 }
 0x1b1   : > { %2405 = vmatmul.bf16.gmra.mxu1 %v8417_v60  ;;  %14522 = vst [vmem:[#allocation21_spill] sm:$0xff] %v12144_v38  ;;  %v11269_v60 = vld [vmem:[%s14503_s2 + $0x158] sm:$0xff]  ;;  %3516 = vmatpush.bf16.msra.mxu0 %v11282_v54 }
 0x1b2   : > { %v12146_v42 = vpop.f32.mrf.mxu2  ;;  %3335 = vmatpush.bf16.msra.mxu2 %v11269_v60  ;;  %v11281_v60 = vld [vmem:[%s14503_s2 + $0x1b8] sm:$0xff] }
 0x1b3   : > { %14523 = vst [vmem:[#allocation22_spill] sm:$0xff] %v12146_v42  ;;  %3420 = vmatpush.bf16.msra.mxu3 %v11281_v60  ;;  %v11089_v42 = vld [vmem:[#allocation3 + $0xb8] sm:$0xf0] }
 0x1b4   : > { %2094 = vmatmul.bf16.gmra.mxu3 %v8581_v31  ;;  %v871_v31 = vpack.c.bf16 %v831_v23, %v831_v23 }
 0x1b5   : > { %2183 = vmatmul.bf16.gmra.mxu2 %v8585_v16 }
 0x1b6   : > { %3336 = vmatpush.bf16.msra.mxu2 %v11268_v18  ;;  %911 = vst [vmem:[#allocation3 + $0x30] sm:$0xf] %v871_v31  ;;  %v11105_v18 = vld [vmem:[#allocation3 + $0x138] sm:$0xf0] }
 0x1b7   : > { %2361 = vmatmul.bf16.gmra.mxu0 %v8593_v20 }
 0x1bd   : > { %v8888_v36 = vld [vmem:[#allocation3 + $0x30] sm:$0xf] }
 0x1be   : > { %v8889_v57 = vor.u32 %v11189_v37, %v8888_v36 }
 0x1bf   : > { %v12176_v47 = vpop.f32.mrf.mxu0 }
 0x1c0   : > { %14525 = vst [vmem:[#allocation24_spill] sm:$0xff] %v12176_v47 }
 0x1c1   : > { %2410 = vmatmul.bf16.gmra.mxu1 %v8437_v41  ;;  %v11267_v41 = vld [vmem:[%s14503_s2 + $0x148] sm:$0xff] }
 0x1c2   : > { %v2065_v16 = vpop.f32.mrf.mxu1  ;;  %3337 = vmatpush.bf16.msra.mxu2 %v11267_v41 }
 0x1c3   : > { %v2154_v17 = vpop.f32.mrf.mxu2 }
 0x1c4   : > { %v12168_v20 = vadd.f32 %v2154_v17, %v2065_v16  ;;  %2099 = vmatmul.bf16.gmra.mxu3 %v8601_v30  ;;  %v8621_v16 = vor.u32 %v11143_v8, %v8620_v7  ;;  %v8476_v17 = vld [vmem:[#allocation3 + $0x128] sm:$0xf]  ;;  %v11188_v30 = vld [vmem:[#allocation3 + $0x38] sm:$0xf0]  ;;  %v11110_v7 = vld [vmem:[#allocation3 + $0x160] sm:$0xf0] }
 0x1c5   : > { %2188 = vmatmul.bf16.gmra.mxu2 %v8605_v4  ;;  %v11142_v4 = vld [vmem:[#allocation3 + $0x264] sm:$0xf]  ;;  %v8477_v23 = vor.u32 %v11105_v18, %v8476_v17  ;;  %v8881_v41 = vor.u32 %v11188_v30, %v8880_v25  ;;  %v11280_v18 = vld [vmem:[%s14503_s2 + $0x1b0] sm:$0xff]  ;;  %v11194_v25 = vld [vmem:[#allocation3 + $0x68] sm:$0xf0] }
 0x1c6   : > { %3338 = vmatpush.bf16.msra.mxu2 %v11266_v51  ;;  %v8633_v10 = vor.u32 %v11142_v4, %v8630_v5  ;;  %v11069_v51 = vld [vmem:[#allocation3 + $0x18] sm:$0xf0]  ;;  %v11193_v17 = vld [vmem:[#allocation3 + $0x60] sm:$0xf0]  ;;  %3421 = vmatpush.bf16.msra.mxu3 %v11280_v18  ;;  %v8348_v30 = vld [vmem:[#allocation3 + $0x30] sm:$0xf] }
 0x1c7   : > { %2366 = vmatmul.bf16.gmra.mxu0 %v8613_v14  ;;  %v11297_v14 = vld [vmem:[%s14503_s2 + $0x238] sm:$0xff]  ;;  %v12192_v15 = vpop.f32.mrf.mxu0 }
 0x1c8   : > { %14527 = vst [vmem:[#allocation26_spill] sm:$0xff] %v12192_v15  ;;  %3598 = vmatpush.bf16.msra.mxu1 %v11297_v14 }
 0x1ca   : > { %v12196_v45 = vpop.f32.mrf.mxu1 }
 0x1cb   : > { %v12187_v12 = vpop.f32.mrf.mxu2  ;;  %14529 = vst [vmem:[#allocation28_spill] sm:$0xff] %v12196_v45 }
 0x1cc   : > { %14526 = vst [vmem:[#allocation25_spill] sm:$0xff] %v12187_v12 }
 0x1d1   : > { %2415 = vmatmul.bf16.gmra.mxu1 %v8457_v48  ;;  %v8328_v48 = vld [vmem:[#allocation3 + $0x8] sm:$0xf] }
 0x1d2   : > { %v8329_v60 = vor.u32 %v11069_v51, %v8328_v48 }
 0x1d4   : > { %2104 = vmatmul.bf16.gmra.mxu3 %v8621_v16 }
 0x1d5   : > { %2193 = vmatmul.bf16.gmra.mxu2 %v8625_v6  ;;  %v8496_v6 = vld [vmem:[#allocation3 + $0x150] sm:$0xf] }
 0x1d6   : > { %v8497_v16 = vor.u32 %v11110_v7, %v8496_v6  ;;  %v11115_v6 = vld [vmem:[#allocation3 + $0x188] sm:$0xf0] }
 0x1d7   : > { %2371 = vmatmul.bf16.gmra.mxu0 %v8633_v10 }
 0x1da   : > { %v12194_v33 = vpop.f32.mrf.mxu0 }
 0x1db   : > { %14528 = vst [vmem:[#allocation27_spill] sm:$0xff] %v12194_v33 }
 0x1dd   : > { %v2070_v54 = vpop.f32.mrf.mxu3 }
 0x1de   : > { %v2159_v31 = vpop.f32.mrf.mxu2 }
 0x1df   : > { %v12198_v58 = vadd.f32 %v2159_v31, %v2070_v54  ;;  %v11074_v31 = vld [vmem:[#allocation3 + $0x40] sm:$0xf0]  ;;  %v11296_v54 = vld [vmem:[%s14503_s2 + $0x230] sm:$0xff] }
 0x1e0   : > { %3599 = vmatpush.bf16.msra.mxu1 %v11296_v54 }
 0x1e1   : > { %2420 = vmatmul.bf16.gmra.mxu1 %v8477_v23  ;;  %v8900_v23 = vld [vmem:[#allocation3 + $0x50] sm:$0xf] }
 0x1e2   : > { %v12200_v5 = vpop.f32.mrf.mxu0  ;;  %v8901_v36 = vor.u32 %v11193_v17, %v8900_v23 }
 0x1e3   : > { %14530 = vst [vmem:[#allocation29_spill] sm:$0xff] %v12200_v5 }
 0x1e4   : > { %2207 = vmatmul.bf16.vlgmr.msrb.gmra.mxu3 %v8329_v60 }
 0x1e5   : > { %3339 = vmatmul.bf16.vlgmr.msra.gmra.mxu2 %v8881_v41  ;;  %v2072_v8 = vpop.f32.mrf.mxu3  ;;  %v8908_v41 = vld [vmem:[#allocation3 + $0x58] sm:$0xf] }
 0x1e6   : > { %v2161_v4 = vpop.f32.mrf.mxu2  ;;  %v8909_v51 = vor.u32 %v11194_v25, %v8908_v41  ;;  %v11198_v25 = vld [vmem:[#allocation3 + $0x88] sm:$0xf0]  ;;  %v11199_v41 = vld [vmem:[#allocation3 + $0x90] sm:$0xf0] }
 0x1e7   : > { %3517 = vmatmul.bf16.vlgmr.msra.gmra.mxu0 %v8889_v57  ;;  %v12202_v10 = vadd.f32 %v2161_v4, %v2072_v8  ;;  %v8349_v57 = vor.u32 %v11074_v31, %v8348_v30  ;;  %v8516_v4 = vld [vmem:[#allocation3 + $0x178] sm:$0xf] }
 0x1e8   : > { %v8517_v17 = vor.u32 %v11115_v6, %v8516_v4  ;;  %v8368_v4 = vld [vmem:[#allocation3 + $0x58] sm:$0xf] }
 0x1ee   : > { %v12204_v14 = vpop.f32.mrf.mxu1 }
 0x1f1   : > { %2425 = vmatmul.bf16.gmra.mxu1 %v8497_v16 }
 0x1f4   : > { %v12209_v37 = vpop.f32.mrf.mxu0  ;;  %2212 = vmatmul.bf16.gmra.mxu3 %v8349_v57 }
 0x1f5   : > { %14531 = vst [vmem:[#allocation30_spill] sm:$0xff] %v12209_v37  ;;  %3344 = vmatmul.bf16.gmra.mxu2 %v8901_v36  ;;  %v8920_v36 = vld [vmem:[#allocation3 + $0x78] sm:$0xf]  ;;  %v11079_v37 = vld [vmem:[#allocation3 + $0x68] sm:$0xf0] }
 0x1f6   : > { %v12211_v48 = vpop.f32.mrf.mxu1  ;;  %v8921_v30 = vor.u32 %v11198_v25, %v8920_v36 }
 0x1f7   : > { %3522 = vmatmul.bf16.gmra.mxu0 %v8909_v51  ;;  %v2075_v16 = vpop.f32.mrf.mxu3  ;;  %v8928_v51 = vld [vmem:[#allocation3 + $0x80] sm:$0xf] }
 0x1f8   : > { %v2164_v60 = vpop.f32.mrf.mxu2 }
 0x1f9   : > { %v12220_v18 = vadd.f32 %v2164_v60, %v2075_v16  ;;  %v8369_v60 = vor.u32 %v11079_v37, %v8368_v4  ;;  %v8536_v16 = vld [vmem:[#allocation3 + $0x1a0] sm:$0xf]  ;;  %v8948_v4 = vld [vmem:[#allocation3 + $0xa8] sm:$0xf] }
 0x1fa   : > { %v8940_v37 = vld [vmem:[#allocation3 + $0xa0] sm:$0xf] }
 0x1fc   : > { %v12216_v7 = vpop.f32.mrf.mxu0 }
 0x1fd   : > { %14532 = vst [vmem:[#allocation31_spill] sm:$0xff] %v12216_v7  ;;  %v8929_v7 = vor.u32 %v11199_v41, %v8928_v51  ;;  %v11203_v41 = vld [vmem:[#allocation3 + $0xb0] sm:$0xf0] }
 0x1fe   : > { %v12218_v8 = vpop.f32.mrf.mxu1  ;;  %v8941_v51 = vor.u32 %v11203_v41, %v8940_v37  ;;  %v8556_v37 = vld [vmem:[#allocation3 + $0x1c8] sm:$0xf] }
 0x1ff   : > { %v2077_v57 = vpop.f32.mrf.mxu3 }
 0x200   : > { %v2166_v23 = vpop.f32.mrf.mxu2 }
 0x201   : > { %2430 = vmatmul.bf16.gmra.mxu1 %v8517_v17  ;;  %v12226_v5 = vadd.f32 %v2166_v23, %v2077_v57  ;;  %v11120_v17 = vld [vmem:[#allocation3 + $0x1b0] sm:$0xf0]  ;;  %v11204_v23 = vld [vmem:[#allocation3 + $0xb8] sm:$0xf0] }
 0x204   : > { %v12222_v31 = vpop.f32.mrf.mxu0  ;;  %2217 = vmatmul.bf16.gmra.mxu3 %v8369_v60 }
 0x205   : > { %14533 = vst [vmem:[#allocation32_spill] sm:$0xff] %v12222_v31  ;;  %3349 = vmatmul.bf16.gmra.mxu2 %v8921_v30  ;;  %v8537_v31 = vor.u32 %v11120_v17, %v8536_v16  ;;  %v11084_v16 = vld [vmem:[#allocation3 + $0x90] sm:$0xf0] }
 0x206   : > { %v12224_v54 = vpop.f32.mrf.mxu1 }
 0x207   : > { %3527 = vmatmul.bf16.gmra.mxu0 %v8929_v7  ;;  %v2080_v36 = vpop.f32.mrf.mxu3  ;;  %v11279_v7 = vld [vmem:[%s14503_s2 + $0x1a8] sm:$0xff] }
 0x208   : > { %v2169_v6 = vpop.f32.mrf.mxu2  ;;  %3422 = vmatpush.bf16.msra.mxu3 %v11279_v7 }
 0x209   : > { %v12232_v15 = vadd.f32 %v2169_v6, %v2080_v36  ;;  %v8949_v6 = vor.u32 %v11204_v23, %v8948_v4  ;;  %v8388_v36 = vld [vmem:[#allocation3 + $0x80] sm:$0xf] }
 0x20a   : > { %v8389_v7 = vor.u32 %v11084_v16, %v8388_v36  ;;  %v8968_v16 = vld [vmem:[#allocation3 + $0xd0] sm:$0xf] }
 0x20c   : > { %v12228_v33 = vpop.f32.mrf.mxu0 }
 0x20d   : > { %14534 = vst [vmem:[#allocation33_spill] sm:$0xff] %v12228_v33 }
 0x20e   : > { %v12230_v25 = vpop.f32.mrf.mxu1 }
 0x20f   : > { %14535 = vst [vmem:[#allocation34_spill] sm:$0xff] %v12230_v25  ;;  %v2082_v33 = vpop.f32.mrf.mxu3 }
 0x210   : > { %v2171_v30 = vpop.f32.mrf.mxu2 }
 0x211   : > { %2435 = vmatmul.bf16.gmra.mxu1 %v8537_v31  ;;  %v11295_v31 = vld [vmem:[%s14503_s2 + $0x228] sm:$0xff]  ;;  %v12244_v17 = vadd.f32 %v2171_v30, %v2082_v33  ;;  %v11208_v33 = vld [vmem:[#allocation3 + $0xd8] sm:$0xf0] }
 0x212   : > { %3600 = vmatpush.bf16.msra.mxu1 %v11295_v31  ;;  %v8960_v30 = vld [vmem:[#allocation3 + $0xc8] sm:$0xf] }
 0x214   : > { %v12237_v57 = vpop.f32.mrf.mxu0  ;;  %2222 = vmatmul.bf16.gmra.mxu3 %v8389_v7 }
 0x215   : > { %14536 = vst [vmem:[#allocation35_spill] sm:$0xff] %v12237_v57  ;;  %3354 = vmatmul.bf16.gmra.mxu2 %v8941_v51  ;;  %v11125_v57 = vld [vmem:[#allocation3 + $0x1d8] sm:$0xf0] }
 0x216   : > { %v12239_v60 = vpop.f32.mrf.mxu1  ;;  %v8557_v23 = vor.u32 %v11125_v57, %v8556_v37  ;;  %v8408_v57 = vld [vmem:[#allocation3 + $0xa8] sm:$0xf] }
 0x217   : > { %14537 = vst [vmem:[#allocation36_spill] sm:$0xff] %v12239_v60  ;;  %3532 = vmatmul.bf16.gmra.mxu0 %v8949_v6  ;;  %v2085_v51 = vpop.f32.mrf.mxu3  ;;  %v8961_v6 = vor.u32 %v11208_v33, %v8960_v30 }
 0x218   : > { %v2174_v41 = vpop.f32.mrf.mxu2 }
 0x219   : > { %v12250_v4 = vadd.f32 %v2174_v41, %v2085_v51  ;;  %v8409_v41 = vor.u32 %v11089_v42, %v8408_v57  ;;  %v8576_v51 = vld [vmem:[#allocation3 + $0x1f0] sm:$0xf]  ;;  %v8988_v57 = vld [vmem:[#allocation3 + $0xf8] sm:$0xf] }
 0x21a   : > { %v8980_v42 = vld [vmem:[#allocation3 + $0xf0] sm:$0xf] }
 0x21c   : > { %v12246_v12 = vpop.f32.mrf.mxu0 }
 0x21d   : > { %14538 = vst [vmem:[#allocation37_spill] sm:$0xff] %v12246_v12  ;;  %v8969_v12 = vor.u32 %v11209_v59, %v8968_v16  ;;  %v11213_v59 = vld [vmem:[#allocation3 + $0x100] sm:$0xf0] }
 0x21e   : > { %v12248_v45 = vpop.f32.mrf.mxu1  ;;  %v8981_v16 = vor.u32 %v11213_v59, %v8980_v42  ;;  %v8596_v42 = vld [vmem:[#allocation3 + $0x218] sm:$0xf] }
 0x21f   : > { %14539 = vst [vmem:[#allocation38_spill] sm:$0xff] %v12248_v45  ;;  %v2087_v7 = vpop.f32.mrf.mxu3  ;;  %v8910_v45 = vld [vmem:[#allocation3 + $0x6c] sm:$0xf0] }
 0x220   : > { %v2176_v47 = vpop.f32.mrf.mxu2 }
 0x221   : > { %2440 = vmatmul.bf16.gmra.mxu1 %v8557_v23  ;;  %v12256_v38 = vadd.f32 %v2176_v47, %v2087_v7  ;;  %v11130_v23 = vld [vmem:[#allocation3 + $0x200] sm:$0xf0] }
 0x222   : > { %v11278_v47 = vld [vmem:[%s14503_s2 + $0x1a0] sm:$0xff] }
 0x223   : > { %3423 = vmatpush.bf16.msra.mxu3 %v11278_v47 }
 0x224   : > { %v12252_v31 = vpop.f32.mrf.mxu0  ;;  %2227 = vmatmul.bf16.gmra.mxu3 %v8409_v41 }
 0x225   : > { %14540 = vst [vmem:[#allocation39_spill] sm:$0xff] %v12252_v31  ;;  %3359 = vmatmul.bf16.gmra.mxu2 %v8961_v6  ;;  %v8577_v31 = vor.u32 %v11130_v23, %v8576_v51  ;;  %v11094_v51 = vld [vmem:[#allocation3 + $0xe0] sm:$0xf0] }
 0x226   : > { %v12254_v36 = vpop.f32.mrf.mxu1 }
 0x227   : > { %14541 = vst [vmem:[#allocation40_spill] sm:$0xff] %v12254_v36  ;;  %3537 = vmatmul.bf16.gmra.mxu0 %v8969_v12  ;;  %v2090_v30 = vpop.f32.mrf.mxu3  ;;  %v11214_v12 = vld [vmem:[#allocation3 + $0x108] sm:$0xf0] }
 0x228   : > { %v2179_v37 = vpop.f32.mrf.mxu2 }
 0x229   : > { %v12262_v62 = vadd.f32 %v2179_v37, %v2090_v30  ;;  %v8989_v37 = vor.u32 %v11214_v12, %v8988_v57  ;;  %v8428_v30 = vld [vmem:[#allocation3 + $0xd0] sm:$0xf] }
 0x22a   : > { %v8429_v47 = vor.u32 %v11094_v51, %v8428_v30  ;;  %v9000_v51 = vld [vmem:[#allocation3 + $0x118] sm:$0xf] }
 0x22c   : > { %v12258_v32 = vpop.f32.mrf.mxu0 }
 0x22d   : > { %14542 = vst [vmem:[#allocation41_spill] sm:$0xff] %v12258_v32 }
 0x22e   : > { %v12260_v33 = vpop.f32.mrf.mxu1 }
 0x22f   : > { %14543 = vst [vmem:[#allocation42_spill] sm:$0xff] %v12260_v33  ;;  %v2092_v32 = vpop.f32.mrf.mxu3  ;;  %v11104_v33 = vld [vmem:[#allocation3 + $0x130] sm:$0xf0] }
 0x230   : > { %v2181_v6 = vpop.f32.mrf.mxu2 }
 0x231   : > { %2445 = vmatmul.bf16.gmra.mxu1 %v8577_v31  ;;  %v11294_v31 = vld [vmem:[%s14503_s2 + $0x220] sm:$0xff]  ;;  %v12274_v23 = vadd.f32 %v2181_v6, %v2092_v32  ;;  %v11293_v32 = vld [vmem:[%s14503_s2 + $0x218] sm:$0xff] }
 0x232   : > { %3601 = vmatpush.bf16.msra.mxu1 %v11294_v31  ;;  %v11219_v31 = vld [vmem:[#allocation3 + $0x130] sm:$0xf0] }
 0x234   : > { %v12267_v7 = vpop.f32.mrf.mxu0  ;;  %2232 = vmatmul.bf16.gmra.mxu3 %v8429_v47  ;;  %v11292_v47 = vld [vmem:[%s14503_s2 + $0x210] sm:$0xff] }
 0x235   : > { %14544 = vst [vmem:[#allocation43_spill] sm:$0xff] %v12267_v7  ;;  %3364 = vmatmul.bf16.gmra.mxu2 %v8981_v16  ;;  %v11135_v7 = vld [vmem:[#allocation3 + $0x228] sm:$0xf0] }
 0x236   : > { %v12269_v41 = vpop.f32.mrf.mxu1  ;;  %v8597_v12 = vor.u32 %v11135_v7, %v8596_v42  ;;  %3602 = vmatpush.bf16.msra.mxu1 %v11293_v32  ;;  %v9008_v7 = vld [vmem:[#allocation3 + $0x120] sm:$0xf] }
 0x237   : > { %14545 = vst [vmem:[#allocation44_spill] sm:$0xff] %v12269_v41  ;;  %3542 = vmatmul.bf16.gmra.mxu0 %v8989_v37  ;;  %v2095_v16 = vpop.f32.mrf.mxu3  ;;  %v11218_v37 = vld [vmem:[#allocation3 + $0x128] sm:$0xf0]  ;;  %v11140_v41 = vld [vmem:[#allocation3 + $0x250] sm:$0xf0] }
 0x238   : > { %v2184_v59 = vpop.f32.mrf.mxu2  ;;  %v9001_v30 = vor.u32 %v11218_v37, %v9000_v51  ;;  %v8448_v37 = vld [vmem:[#allocation3 + $0xf8] sm:$0xf] }
 0x239   : > { %v12280_v57 = vadd.f32 %v2184_v59, %v2095_v16  ;;  %v11099_v16 = vld [vmem:[#allocation3 + $0x108] sm:$0xf0] }
 0x23a   : > { %3603 = vmatpush.bf16.msra.mxu1 %v11292_v47  ;;  %v8449_v51 = vor.u32 %v11099_v16, %v8448_v37  ;;  %v9020_v37 = vld [vmem:[#allocation3 + $0x140] sm:$0xf] }
 0x23c   : > { %v12276_v0 = vpop.f32.mrf.mxu0 }
 0x23d   : > { %14546 = vst [vmem:[#allocation45_spill] sm:$0xff] %v12276_v0 }
 0x23e   : > { %v12278_v55 = vpop.f32.mrf.mxu1 }
 0x23f   : > { %14547 = vst [vmem:[#allocation46_spill] sm:$0xff] %v12278_v55  ;;  %v2097_v42 = vpop.f32.mrf.mxu3  ;;  %v9009_v55 = vor.u32 %v11219_v31, %v9008_v7 }
 0x240   : > { %v2186_v6 = vpop.f32.mrf.mxu2 }
 0x241   : > { %2450 = vmatmul.bf16.gmra.mxu1 %v8597_v12  ;;  %v11291_v12 = vld [vmem:[%s14503_s2 + $0x208] sm:$0xff]  ;;  %v12295_v32 = vadd.f32 %v2186_v6, %v2097_v42 }
 0x242   : > { %3604 = vmatpush.bf16.msra.mxu1 %v11291_v12  ;;  %v11223_v12 = vld [vmem:[#allocation3 + $0x150] sm:$0xf0] }
 0x244   : > { %v12288_v0 = vpop.f32.mrf.mxu0  ;;  %2237 = vmatmul.bf16.gmra.mxu3 %v8449_v51  ;;  %v11224_v51 = vld [vmem:[#allocation3 + $0x158] sm:$0xf0] }
 0x245   : > { %14548 = vst [vmem:[#allocation47_spill] sm:$0xff] %v12288_v0  ;;  %3369 = vmatmul.bf16.gmra.mxu2 %v9001_v30  ;;  %v8616_v0 = vld [vmem:[#allocation3 + $0x240] sm:$0xf] }
 0x246   : > { %v12290_v59 = vpop.f32.mrf.mxu1  ;;  %v11290_v30 = vld [vmem:[%s14503_s2 + $0x200] sm:$0xff]  ;;  %v8617_v6 = vor.u32 %v11140_v41, %v8616_v0 }
 0x247   : > { %14549 = vst [vmem:[#allocation48_spill] sm:$0xff] %v12290_v59  ;;  %3547 = vmatmul.bf16.gmra.mxu0 %v9009_v55  ;;  %v2100_v7 = vpop.f32.mrf.mxu3  ;;  %3605 = vmatpush.bf16.msra.mxu1 %v11290_v30  ;;  %v11277_v55 = vld [vmem:[%s14503_s2 + $0x198] sm:$0xff]  ;;  %v9021_v59 = vor.u32 %v11223_v12, %v9020_v37 }
 0x248   : > { %v2189_v43 = vpop.f32.mrf.mxu2  ;;  %3424 = vmatpush.bf16.msra.mxu3 %v11277_v55  ;;  %v11145_v55 = vld [vmem:[#allocation3 + $0x278] sm:$0xf0] }
 0x249   : > { %v12307_v42 = vadd.f32 %v2189_v43, %v2100_v7  ;;  %v8468_v43 = vld [vmem:[#allocation3 + $0x120] sm:$0xf]  ;;  %v8636_v7 = vld [vmem:[#allocation3 + $0x268] sm:$0xf] }
 0x24a   : > { %v8469_v0 = vor.u32 %v11104_v33, %v8468_v43  ;;  %v9048_v33 = vld [vmem:[#allocation3 + $0x170] sm:$0xf] }
 0x24c   : > { %v12300_v31 = vpop.f32.mrf.mxu0 }
 0x24d   : > { %14550 = vst [vmem:[#allocation49_spill] sm:$0xff] %v12300_v31  ;;  %v9028_v31 = vld [vmem:[#allocation3 + $0x148] sm:$0xf] }
 0x24e   : > { %v12302_v47 = vpop.f32.mrf.mxu1  ;;  %v9029_v34 = vor.u32 %v11224_v51, %v9028_v31  ;;  %v11228_v31 = vld [vmem:[#allocation3 + $0x178] sm:$0xf0]  ;;  %v11229_v51 = vld [vmem:[#allocation3 + $0x180] sm:$0xf0] }
 0x24f   : > { %14551 = vst [vmem:[#allocation50_spill] sm:$0xff] %v12302_v47  ;;  %v2102_v30 = vpop.f32.mrf.mxu3 }
 0x250   : > { %v2191_v16 = vpop.f32.mrf.mxu2 }
 0x251   : > { %2455 = vmatmul.bf16.gmra.mxu1 %v8617_v6  ;;  %v12313_v22 = vadd.f32 %v2191_v16, %v2102_v30  ;;  %v9040_v16 = vld [vmem:[#allocation3 + $0x168] sm:$0xf] }
 0x252   : > { %v9041_v30 = vor.u32 %v11228_v31, %v9040_v16 }
 0x254   : > { %v12309_v28 = vpop.f32.mrf.mxu0  ;;  %2242 = vmatmul.bf16.gmra.mxu3 %v8469_v0 }
 0x255   : > { %14552 = vst [vmem:[#allocation51_spill] sm:$0xff] %v12309_v28  ;;  %3374 = vmatmul.bf16.gmra.mxu2 %v9021_v59  ;;  %v8637_v28 = vor.u32 %v11145_v55, %v8636_v7  ;;  %v8488_v7 = vld [vmem:[#allocation3 + $0x148] sm:$0xf]  ;;  %v11187_v55 = vld [vmem:[#allocation3 + $0x34] sm:$0xf] }
 0x256   : > { %v12311_v47 = vpop.f32.mrf.mxu1 }
 0x257   : > { %14553 = vst [vmem:[#allocation52_spill] sm:$0xff] %v12311_v47  ;;  %3552 = vmatmul.bf16.gmra.mxu0 %v9029_v34  ;;  %v2105_v37 = vpop.f32.mrf.mxu3 }
 0x258   : > { %v2194_v41 = vpop.f32.mrf.mxu2 }
 0x259   : > { %v12319_v47 = vadd.f32 %v2194_v41, %v2105_v37  ;;  %v8489_v41 = vor.u32 %v11109_v13, %v8488_v7  ;;  %v8890_v37 = vld [vmem:[#allocation3 + $0x44] sm:$0xf0] }
 0x25a   : > { %v8893_v31 = vor.u32 %v11187_v55, %v8890_v37 }
 0x25c   : > { %v12315_v6 = vpop.f32.mrf.mxu0 }
 0x25d   : > { %14554 = vst [vmem:[#allocation53_spill] sm:$0xff] %v12315_v6  ;;  %v9049_v6 = vor.u32 %v11229_v51, %v9048_v33  ;;  %v11276_v51 = vld [vmem:[%s14503_s2 + $0x190] sm:$0xff]  ;;  %v9068_v33 = vld [vmem:[#allocation3 + $0x198] sm:$0xf] }
 0x25e   : > { %v12317_v12 = vpop.f32.mrf.mxu1  ;;  %3425 = vmatpush.bf16.msra.mxu3 %v11276_v51  ;;  %v11192_v51 = vld [vmem:[#allocation3 + $0x5c] sm:$0xf] }
 0x25f   : > { %14555 = vst [vmem:[#allocation54_spill] sm:$0xff] %v12317_v12  ;;  %v2107_v0 = vpop.f32.mrf.mxu3  ;;  %v8913_v61 = vor.u32 %v11192_v51, %v8910_v45  ;;  %v11197_v51 = vld [vmem:[#allocation3 + $0x84] sm:$0xf] }
 0x260   : > { %v2196_v59 = vpop.f32.mrf.mxu2 }
 0x261   : > { %2460 = vmatmul.bf16.gmra.mxu1 %v8637_v28  ;;  %v12325_v12 = vadd.f32 %v2196_v59, %v2107_v0  ;;  %v11234_v0 = vld [vmem:[#allocation3 + $0x1a8] sm:$0xf0] }
 0x262   : > { %v9069_v3 = vor.u32 %v11234_v0, %v9068_v33  ;;  %v9080_v33 = vld [vmem:[#allocation3 + $0x1b8] sm:$0xf]  ;;  %v11239_v0 = vld [vmem:[#allocation3 + $0x1d0] sm:$0xf0] }
 0x264   : > { %v12321_v34 = vpop.f32.mrf.mxu0  ;;  %2247 = vmatmul.bf16.gmra.mxu3 %v8489_v41 }
 0x265   : > { %3379 = vmatmul.bf16.gmra.mxu2 %v9041_v30  ;;  %v11233_v30 = vld [vmem:[#allocation3 + $0x1a0] sm:$0xf0] }
 0x266   : > { %v12323_v43 = vpop.f32.mrf.mxu1 }
 0x267   : > { %14556 = vst [vmem:[#allocation55_spill] sm:$0xff] %v12323_v43  ;;  %3557 = vmatmul.bf16.gmra.mxu0 %v9049_v6  ;;  %v2208_v43 = vpop.f32.mrf.mxu3  ;;  %v9060_v6 = vld [vmem:[#allocation3 + $0x190] sm:$0xf] }
 0x268   : > { %v12327_v28 = vpop.f32.mrf.mxu2  ;;  %v12337_v59 = vadd.f32 %v2208_v43, %v12043_v19  ;;  %v9061_v7 = vor.u32 %v11233_v30, %v9060_v6  ;;  %v8508_v19 = vld [vmem:[#allocation3 + $0x170] sm:$0xf] }
 0x26c   : > { %v12329_v16 = vpop.f32.mrf.mxu0 }
 0x26e   : > { %v12331_v36 = vpop.f32.mrf.mxu1 }
 0x26f   : > { %14557 = vst [vmem:[#allocation56_spill] sm:$0xff] %v12331_v36  ;;  %v12345_v37 = vpop.f32.mrf.mxu3  ;;  %v11114_v36 = vld [vmem:[#allocation3 + $0x180] sm:$0xf0] }
 0x270   : > { %v12339_v13 = vpop.f32.mrf.mxu2  ;;  %v8509_v43 = vor.u32 %v11114_v36, %v8508_v19  ;;  %v9088_v36 = vld [vmem:[#allocation3 + $0x1c0] sm:$0xf] }
 0x271   : > { %3606 = vmatmul.bf16.vlgmr.msra.gmra.mxu1 %v8893_v31  ;;  %v9089_v45 = vor.u32 %v11239_v0, %v9088_v36  ;;  %v11243_v36 = vld [vmem:[#allocation3 + $0x1f0] sm:$0xf0]  ;;  %v9108_v0 = vld [vmem:[#allocation3 + $0x1e8] sm:$0xf] }
 0x274   : > { %v12341_v41 = vpop.f32.mrf.mxu0  ;;  %2252 = vmatmul.bf16.gmra.mxu3 %v8509_v43 }
 0x275   : > { %3384 = vmatmul.bf16.gmra.mxu2 %v9061_v7 }
 0x276   : > { %v12343_v55 = vpop.f32.mrf.mxu1 }
 0x277   : > { %14558 = vst [vmem:[#allocation57_spill] sm:$0xff] %v12343_v55  ;;  %3562 = vmatmul.bf16.gmra.mxu0 %v9069_v3  ;;  %v2213_v30 = vpop.f32.mrf.mxu3  ;;  %v11238_v3 = vld [vmem:[#allocation3 + $0x1c8] sm:$0xf0] }
 0x278   : > { %v12347_v31 = vpop.f32.mrf.mxu2  ;;  %v12354_v55 = vadd.f32 %v2213_v30, %v12058_v56  ;;  %v9081_v19 = vor.u32 %v11238_v3, %v9080_v33  ;;  %v8930_v30 = vld [vmem:[#allocation3 + $0x94] sm:$0xf0] }
 0x279   : > { %v8933_v49 = vor.u32 %v11197_v51, %v8930_v30  ;;  %v11124_v51 = vld [vmem:[#allocation3 + $0x1d0] sm:$0xf0]  ;;  %v11202_v30 = vld [vmem:[#allocation3 + $0xac] sm:$0xf] }
 0x27c   : > { %v12349_v9 = vpop.f32.mrf.mxu0 }
 0x27e   : > { %v12351_v6 = vpop.f32.mrf.mxu1 }
 0x27f   : > { %14559 = vst [vmem:[#allocation58_spill] sm:$0xff] %v12351_v6  ;;  %v12362_v60 = vpop.f32.mrf.mxu3  ;;  %v8528_v6 = vld [vmem:[#allocation3 + $0x198] sm:$0xf] }
 0x280   : > { %v12356_v7 = vpop.f32.mrf.mxu2  ;;  %v8529_v56 = vor.u32 %v11119_v44, %v8528_v6  ;;  %v9100_v6 = vld [vmem:[#allocation3 + $0x1e0] sm:$0xf] }
 0x281   : > { %3611 = vmatmul.bf16.gmra.mxu1 %v8913_v61 }
 0x284   : > { %v12358_v43 = vpop.f32.mrf.mxu0  ;;  %2257 = vmatmul.bf16.gmra.mxu3 %v8529_v56  ;;  %v9101_v56 = vor.u32 %v11243_v36, %v9100_v6 }
 0x285   : > { %14560 = vst [vmem:[#allocation59_spill] sm:$0xff] %v12358_v43  ;;  %3389 = vmatmul.bf16.gmra.mxu2 %v9081_v19  ;;  %v8548_v43 = vld [vmem:[#allocation3 + $0x1c0] sm:$0xf] }
 0x286   : > { %v12360_v53 = vpop.f32.mrf.mxu1 }
 0x287   : > { %14561 = vst [vmem:[#allocation60_spill] sm:$0xff] %v12360_v53  ;;  %3567 = vmatmul.bf16.gmra.mxu0 %v9089_v45  ;;  %v2218_v3 = vpop.f32.mrf.mxu3  ;;  %v11275_v53 = vld [vmem:[%s14503_s2 + $0x188] sm:$0xff]  ;;  %v11244_v45 = vld [vmem:[#allocation3 + $0x1f8] sm:$0xf0] }
 0x288   : > { %v12364_v61 = vpop.f32.mrf.mxu2  ;;  %v12374_v19 = vadd.f32 %v2218_v3, %v12071_v39  ;;  %3426 = vmatpush.bf16.msra.mxu3 %v11275_v53  ;;  %v9109_v39 = vor.u32 %v11244_v45, %v9108_v0  ;;  %v8549_v53 = vor.u32 %v11124_v51, %v8548_v43  ;;  %v8950_v3 = vld [vmem:[#allocation3 + $0xbc] sm:$0xf0]  ;;  %v9120_v0 = vld [vmem:[#allocation3 + $0x208] sm:$0xf]  ;;  %v11248_v45 = vld [vmem:[#allocation3 + $0x218] sm:$0xf0] }
 0x289   : > { %v9128_v43 = vld [vmem:[#allocation3 + $0x210] sm:$0xf]  ;;  %v9121_v51 = vor.u32 %v11248_v45, %v9120_v0 }
 0x28c   : > { %v12366_v25 = vpop.f32.mrf.mxu0 }
 0x28d   : > { %14562 = vst [vmem:[#allocation61_spill] sm:$0xff] %v12366_v25 }
 0x28e   : > { %v12368_v33 = vpop.f32.mrf.mxu1 }
 0x28f   : > { %14563 = vst [vmem:[#allocation62_spill] sm:$0xff] %v12368_v33  ;;  %v12382_v35 = vpop.f32.mrf.mxu3 }
 0x290   : > { %v12376_v44 = vpop.f32.mrf.mxu2  ;;  %14567 = vst [vmem:[#allocation66_spill] sm:$0xff] %v12382_v35 }
 0x291   : > { %3616 = vmatmul.bf16.gmra.mxu1 %v8933_v49  ;;  %14564 = vst [vmem:[#allocation63_spill] sm:$0xff] %v12376_v44 }
 0x294   : > { %v12378_v25 = vpop.f32.mrf.mxu0  ;;  %2262 = vmatmul.bf16.gmra.mxu3 %v8549_v53 }
 0x295   : > { %14565 = vst [vmem:[#allocation64_spill] sm:$0xff] %v12378_v25  ;;  %3394 = vmatmul.bf16.gmra.mxu2 %v9101_v56  ;;  %v8953_v25 = vor.u32 %v11202_v30, %v8950_v3  ;;  %v11249_v56 = vld [vmem:[#allocation3 + $0x220] sm:$0xf0]  ;;  %v11207_v3 = vld [vmem:[#allocation3 + $0xd4] sm:$0xf] }
 0x296   : > { %v12380_v33 = vpop.f32.mrf.mxu1  ;;  %v9129_v30 = vor.u32 %v11249_v56, %v9128_v43  ;;  %v11253_v43 = vld [vmem:[#allocation3 + $0x240] sm:$0xf0]  ;;  %v9148_v56 = vld [vmem:[#allocation3 + $0x238] sm:$0xf] }
 0x297   : > { %14566 = vst [vmem:[#allocation65_spill] sm:$0xff] %v12380_v33  ;;  %3572 = vmatmul.bf16.gmra.mxu0 %v9109_v39  ;;  %v2223_v36 = vpop.f32.mrf.mxu3 }
 0x298   : > { %v12384_v49 = vpop.f32.mrf.mxu2  ;;  %v12391_v33 = vadd.f32 %v2223_v36, %v12084_v63  ;;  %v8970_v36 = vld [vmem:[#allocation3 + $0xe4] sm:$0xf0] }
 0x299   : > { %14568 = vst [vmem:[#allocation67_spill] sm:$0xff] %v12384_v49  ;;  %v11129_v49 = vld [vmem:[#allocation3 + $0x1f8] sm:$0xf0] }
 0x29c   : > { %v12386_v44 = vpop.f32.mrf.mxu0 }
 0x29d   : > { %14569 = vst [vmem:[#allocation68_spill] sm:$0xff] %v12386_v44 }
 0x29e   : > { %v12388_v6 = vpop.f32.mrf.mxu1 }
 0x29f   : > { %14570 = vst [vmem:[#allocation69_spill] sm:$0xff] %v12388_v6  ;;  %v12399_v44 = vpop.f32.mrf.mxu3  ;;  %v8568_v6 = vld [vmem:[#allocation3 + $0x1e8] sm:$0xf] }
 0x2a0   : > { %v12393_v35 = vpop.f32.mrf.mxu2  ;;  %v8569_v63 = vor.u32 %v11129_v49, %v8568_v6  ;;  %v9140_v6 = vld [vmem:[#allocation3 + $0x230] sm:$0xf] }
 0x2a1   : > { %3621 = vmatmul.bf16.gmra.mxu1 %v8953_v25  ;;  %14571 = vst [vmem:[#allocation70_spill] sm:$0xff] %v12393_v35 }
 0x2a4   : > { %v12395_v39 = vpop.f32.mrf.mxu0  ;;  %2267 = vmatmul.bf16.gmra.mxu3 %v8569_v63  ;;  %v9141_v63 = vor.u32 %v11253_v43, %v9140_v6  ;;  %v11400_v6 = vld [vmem:[%s14503_s2 + $0x2f0] sm:$0xff] }
 0x2a5   : > { %14572 = vst [vmem:[#allocation71_spill] sm:$0xff] %v12395_v39  ;;  %3399 = vmatmul.bf16.gmra.mxu2 %v9121_v51  ;;  %v8973_v39 = vor.u32 %v11207_v3, %v8970_v36  ;;  %v11401_v3 = vld [vmem:[%s14503_s2 + $0x2f8] sm:$0xff]  ;;  %v11304_v43 = vld [vmem:[%s14503_s2 + $0x270] sm:$0xff] }
 0x2a6   : > { %v12397_v53 = vpop.f32.mrf.mxu1  ;;  %4794 = vmatpush.bf16.msrb.mxu0 %v11401_v3 }
 0x2a7   : > { %14573 = vst [vmem:[#allocation72_spill] sm:$0xff] %v12397_v53  ;;  %3577 = vmatmul.bf16.gmra.mxu0 %v9129_v30  ;;  %v2228_v45 = vpop.f32.mrf.mxu3  ;;  %v11274_v53 = vld [vmem:[%s14503_s2 + $0x180] sm:$0xff]  ;;  %v11254_v30 = vld [vmem:[#allocation3 + $0x248] sm:$0xf0] }
 0x2a8   : > { %v12401_v25 = vpop.f32.mrf.mxu2  ;;  %v12411_v51 = vadd.f32 %v2228_v45, %v12097_v24  ;;  %3427 = vmatpush.bf16.msra.mxu3 %v11274_v53  ;;  %v8588_v53 = vld [vmem:[#allocation3 + $0x210] sm:$0xf]  ;;  %v11134_v45 = vld [vmem:[#allocation3 + $0x220] sm:$0xf0] }
 0x2aa   : > { %4795 = vmatpush.bf16.msrb.mxu0 %v11400_v6  ;;  %v11398_v6 = vld [vmem:[%s14503_s2 + $0x2e0] sm:$0xff] }
 0x2ac   : > { %v12403_v35 = vpop.f32.mrf.mxu0 }
 0x2ad   : > { %14574 = vst [vmem:[#allocation73_spill] sm:$0xff] %v12403_v35  ;;  %v9149_v35 = vor.u32 %v11254_v30, %v9148_v56  ;;  %v11303_v56 = vld [vmem:[%s14503_s2 + $0x268] sm:$0xff] }
 0x2ae   : > { %v12405_v0 = vpop.f32.mrf.mxu1 }
 0x2af   : > { %14575 = vst [vmem:[#allocation74_spill] sm:$0xff] %v12405_v0  ;;  %v11305_v0 = vld [vmem:[%s14503_s2 + $0x278] sm:$0xff] }
 0x2b0   : > { %v12413_v49 = vpop.f32.mrf.mxu2  ;;  %3687 = vmatpush.bf16.msrb.mxu2 %v11305_v0  ;;  %v11399_v0 = vld [vmem:[%s14503_s2 + $0x2e8] sm:$0xff] }
 0x2b1   : > { %3626 = vmatmul.bf16.gmra.mxu1 %v8973_v39  ;;  %14576 = vst [vmem:[#allocation75_spill] sm:$0xff] %v12413_v49  ;;  %v12425_v39 = vpop.f32.mrf.mxu3  ;;  %4796 = vmatpush.bf16.msrb.mxu0 %v11399_v0  ;;  %v9168_v0 = vld [vmem:[#allocation3 + $0x260] sm:$0xf] }
 0x2b2   : > { %14579 = vst [vmem:[#allocation78_spill] sm:$0xff] %v12425_v39  ;;  %v11306_v39 = vld [vmem:[#allocation3 + $0x54] sm:$0xf] }
 0x2b4   : > { %v12421_v36 = vpop.f32.mrf.mxu0  ;;  %3688 = vmatpush.bf16.msrb.mxu2 %v11304_v43 }
 0x2b5   : > { %14577 = vst [vmem:[#allocation76_spill] sm:$0xff] %v12421_v36  ;;  %3404 = vmatmul.bf16.gmra.mxu2 %v9141_v63  ;;  %v8589_v36 = vor.u32 %v11134_v45, %v8588_v53  ;;  %v8990_v63 = vld [vmem:[#allocation3 + $0x10c] sm:$0xf0]  ;;  %v11302_v45 = vld [vmem:[%s14503_s2 + $0x260] sm:$0xff]  ;;  %4797 = vmatpush.bf16.msrb.mxu0 %v11398_v6  ;;  %v11139_v6 = vld [vmem:[#allocation3 + $0x248] sm:$0xf0] }
 0x2b6   : > { %v12423_v24 = vpop.f32.mrf.mxu1 }
 0x2b7   : > { %14578 = vst [vmem:[#allocation77_spill] sm:$0xff] %v12423_v24  ;;  %3582 = vmatmul.bf16.gmra.mxu0 %v9149_v35  ;;  %2272 = vmatmul.bf16.gmra.mxu3 %v8589_v36  ;;  %v11212_v24 = vld [vmem:[#allocation3 + $0xfc] sm:$0xf] }
 0x2b8   : > { %v12433_v49 = vpop.f32.mrf.mxu2  ;;  %v8993_v53 = vor.u32 %v11212_v24, %v8990_v63  ;;  %3689 = vmatpush.bf16.msrb.mxu2 %v11303_v56  ;;  %v11259_v24 = vld [vmem:[#allocation3 + $0x270] sm:$0xf0]  ;;  %v11301_v63 = vld [vmem:[%s14503_s2 + $0x258] sm:$0xff] }
 0x2b9   : > { %14580 = vst [vmem:[#allocation79_spill] sm:$0xff] %v12433_v49  ;;  %v2233_v35 = vpop.f32.mrf.mxu3  ;;  %v11397_v56 = vld [vmem:[%s14503_s2 + $0x2d8] sm:$0xff]  ;;  %v9169_v49 = vor.u32 %v11259_v24, %v9168_v0  ;;  %v11299_v0 = vld [vmem:[%s14503_s2 + $0x248] sm:$0xff] }
 0x2ba   : > { %v12446_v36 = vadd.f32 %v2233_v35, %v12108_v52  ;;  %4798 = vmatpush.bf16.msrb.mxu0 %v11397_v56  ;;  %v11395_v24 = vld [vmem:[%s14503_s2 + $0x2c8] sm:$0xff] }
 0x2bc   : > { %v12441_v30 = vpop.f32.mrf.mxu0  ;;  %14583 = vst [vmem:[#allocation82_spill] sm:$0xff] %v12446_v36  ;;  %3690 = vmatpush.bf16.msrb.mxu2 %v11302_v45  ;;  %v8608_v36 = vld [vmem:[#allocation3 + $0x238] sm:$0xf] }
 0x2bd   : > { %14581 = vst [vmem:[#allocation80_spill] sm:$0xff] %v12441_v30  ;;  %v9160_v30 = vld [vmem:[#allocation3 + $0x258] sm:$0xf]  ;;  %v8609_v45 = vor.u32 %v11139_v6, %v8608_v36 }
 0x2be   : > { %v12443_v3 = vpop.f32.mrf.mxu1 }
 0x2bf   : > { %14582 = vst [vmem:[#allocation81_spill] sm:$0xff] %v12443_v3  ;;  %v11258_v3 = vld [vmem:[#allocation3 + $0x268] sm:$0xf0] }
 0x2c0   : > { %v12454_v43 = vpop.f32.mrf.mxu2  ;;  %v9161_v52 = vor.u32 %v11258_v3, %v9160_v30  ;;  %v11396_v30 = vld [vmem:[%s14503_s2 + $0x2d0] sm:$0xff]  ;;  %3691 = vmatpush.bf16.msrb.mxu2 %v11301_v63 }
 0x2c1   : > { %3631 = vmatmul.bf16.gmra.mxu1 %v8993_v53  ;;  %14584 = vst [vmem:[#allocation83_spill] sm:$0xff] %v12454_v43  ;;  %v12466_v43 = vpop.f32.mrf.mxu3  ;;  %v11300_v3 = vld [vmem:[%s14503_s2 + $0x250] sm:$0xff]  ;;  %4799 = vmatpush.bf16.msrb.mxu0 %v11396_v30  ;;  %v11298_v30 = vld [vmem:[%s14503_s2 + $0x240] sm:$0xff] }
 0x2c2   : > { %14587 = vst [vmem:[#allocation86_spill] sm:$0xff] %v12466_v43  ;;  %v11409_v43 = vld [vmem:[%s14503_s2 + $0x338] sm:$0xff] }
 0x2c3   : > { %4883 = vmatpush.bf16.msrb.mxu1 %v11409_v43 }
 0x2c4   : > { %v12462_v35 = vpop.f32.mrf.mxu0  ;;  %3692 = vmatpush.bf16.msrb.mxu2 %v11300_v3  ;;  %v11394_v3 = vld [vmem:[%s14503_s2 + $0x2c0] sm:$0xff] }
 0x2c5   : > { %14585 = vst [vmem:[#allocation84_spill] sm:$0xff] %v12462_v35  ;;  %3409 = vmatmul.bf16.gmra.mxu2 %v9161_v52  ;;  %v9010_v52 = vld [vmem:[#allocation3 + $0x134] sm:$0xf0]  ;;  %4800 = vmatpush.bf16.msrb.mxu0 %v11395_v24 }
 0x2c6   : > { %v12464_v53 = vpop.f32.mrf.mxu1 }
 0x2c7   : > { %14586 = vst [vmem:[#allocation85_spill] sm:$0xff] %v12464_v53  ;;  %3587 = vmatmul.bf16.gmra.mxu0 %v9169_v49  ;;  %2277 = vmatmul.bf16.gmra.mxu3 %v8609_v45  ;;  %v11217_v53 = vld [vmem:[#allocation3 + $0x124] sm:$0xf] }
 0x2c8   : > { %v12474_v35 = vpop.f32.mrf.mxu2  ;;  %v9013_v36 = vor.u32 %v11217_v53, %v9010_v52  ;;  %3693 = vmatpush.bf16.msrb.mxu2 %v11299_v0  ;;  %v11393_v53 = vld [vmem:[%s14503_s2 + $0x2b8] sm:$0xff] }
 0x2c9   : > { %14588 = vst [vmem:[#allocation87_spill] sm:$0xff] %v12474_v35  ;;  %v2238_v49 = vpop.f32.mrf.mxu3  ;;  %4801 = vmatpush.bf16.msrb.mxu0 %v11394_v3  ;;  %v11264_v52 = vld [vmem:[#allocation3 + $0x298] sm:$0xf0]  ;;  %4705 = vmatpush.bf16.msrb.mxu3 %v11393_v53 }
 0x2ca   : > { %v12487_v6 = vadd.f32 %v2238_v49, %v12134_v29  ;;  %v9188_v29 = vld [vmem:[#allocation3 + $0x288] sm:$0xf] }
 0x2cb   : > { %v9189_v35 = vor.u32 %v11264_v52, %v9188_v29  ;;  %v8896_v52 = vld [vmem:[#allocation3 + $0x38] sm:$0xf] }
 0x2cc   : > { %v12482_v63 = vpop.f32.mrf.mxu0  ;;  %14591 = vst [vmem:[#allocation90_spill] sm:$0xff] %v12487_v6  ;;  %3694 = vmatpush.bf16.msrb.mxu2 %v11298_v30 }
 0x2cd   : > { %14589 = vst [vmem:[#allocation88_spill] sm:$0xff] %v12482_v63  ;;  %v9180_v63 = vld [vmem:[#allocation3 + $0x280] sm:$0xf] }
 0x2ce   : > { %v12484_v56 = vpop.f32.mrf.mxu1 }
 0x2cf   : > { %14590 = vst [vmem:[#allocation89_spill] sm:$0xff] %v12484_v56  ;;  %v11263_v56 = vld [vmem:[#allocation3 + $0x290] sm:$0xf0] }
 0x2d0   : > { %v12495_v45 = vpop.f32.mrf.mxu2  ;;  %v9181_v0 = vor.u32 %v11263_v56, %v9180_v63  ;;  %v11222_v63 = vld [vmem:[#allocation3 + $0x14c] sm:$0xf]  ;;  %v9030_v56 = vld [vmem:[#allocation3 + $0x15c] sm:$0xf0] }
 0x2d1   : > { %3636 = vmatmul.bf16.gmra.mxu1 %v9013_v36  ;;  %14592 = vst [vmem:[#allocation91_spill] sm:$0xff] %v12495_v45  ;;  %v12504_v6 = vpop.f32.mrf.mxu3  ;;  %v8628_v36 = vld [vmem:[#allocation3 + $0x260] sm:$0xf]  ;;  %v11144_v45 = vld [vmem:[#allocation3 + $0x270] sm:$0xf0] }
 0x2d2   : > { %14595 = vst [vmem:[#allocation94_spill] sm:$0xff] %v12504_v6  ;;  %v8629_v3 = vor.u32 %v11144_v45, %v8628_v36  ;;  %v9033_v6 = vor.u32 %v11222_v63, %v9030_v56  ;;  %v9442_v45 = vld [vmem:[#allocation3 + $0x64] sm:$0xf0]  ;;  %v11186_v36 = vld [vmem:[#allocation3 + $0x2c] sm:$0xf] }
 0x2d3   : > { %v9445_v63 = vor.u32 %v11306_v39, %v9442_v45  ;;  %v9050_v56 = vld [vmem:[#allocation3 + $0x184] sm:$0xf0]  ;;  %v8916_v39 = vld [vmem:[#allocation3 + $0x60] sm:$0xf]  ;;  %v11392_v45 = vld [vmem:[%s14503_s2 + $0x2b0] sm:$0xff] }
 0x2d4   : > { %v12500_v24 = vpop.f32.mrf.mxu0  ;;  %4706 = vmatpush.bf16.msrb.mxu3 %v11392_v45  ;;  %v11232_v45 = vld [vmem:[#allocation3 + $0x19c] sm:$0xf] }
 0x2d5   : > { %14593 = vst [vmem:[#allocation92_spill] sm:$0xff] %v12500_v24  ;;  %3414 = vmatmul.bf16.gmra.mxu2 %v9181_v0  ;;  %v11190_v0 = vld [vmem:[#allocation3 + $0x48] sm:$0xf0] }
 0x2d6   : > { %v12502_v49 = vpop.f32.mrf.mxu1  ;;  %v8897_v43 = vor.u32 %v11190_v0, %v8896_v52 }
 0x2d7   : > { %14594 = vst [vmem:[#allocation93_spill] sm:$0xff] %v12502_v49  ;;  %3592 = vmatmul.bf16.gmra.mxu0 %v9189_v35  ;;  %2282 = vmatmul.bf16.gmra.mxu3 %v8629_v3  ;;  %v8882_v3 = vld [vmem:[#allocation3 + $0x3c] sm:$0xf0] }
 0x2d8   : > { %v12509_v53 = vpop.f32.mrf.mxu2 }
 0x2d9   : > { %14596 = vst [vmem:[#allocation95_spill] sm:$0xff] %v12509_v53  ;;  %v2243_v24 = vpop.f32.mrf.mxu3 }
 0x2da   : > { %v12516_v29 = vadd.f32 %v2243_v24, %v12168_v20  ;;  %v8885_v20 = vor.u32 %v11186_v36, %v8882_v3  ;;  %v9462_v36 = vld [vmem:[#allocation3 + $0x8c] sm:$0xf0] }
 0x2dc   : > { %v12511_v30 = vpop.f32.mrf.mxu0  ;;  %14599 = vst [vmem:[#allocation98_spill] sm:$0xff] %v12516_v29 }
 0x2dd   : > { %14597 = vst [vmem:[#allocation96_spill] sm:$0xff] %v12511_v30 }
 0x2de   : > { %v12513_v49 = vpop.f32.mrf.mxu1 }
 0x2df   : > { %14598 = vst [vmem:[#allocation97_spill] sm:$0xff] %v12513_v49 }
 0x2e0   : > { %v12518_v35 = vpop.f32.mrf.mxu2 }
 0x2e1   : > { %3641 = vmatmul.bf16.gmra.mxu1 %v9033_v6  ;;  %14600 = vst [vmem:[#allocation99_spill] sm:$0xff] %v12518_v35  ;;  %v12524_v49 = vpop.f32.mrf.mxu3  ;;  %v11227_v6 = vld [vmem:[#allocation3 + $0x174] sm:$0xf] }
 0x2e2   : > { %14603 = vst [vmem:[#allocation102_spill] sm:$0xff] %v12524_v49 }
 0x2e4   : > { %v12520_v53 = vpop.f32.mrf.mxu0 }
 0x2e5   : > { %14601 = vst [vmem:[#allocation100_spill] sm:$0xff] %v12520_v53  ;;  %3695 = vmatmul.bf16.vlgmr.msrb.gmra.mxu2 %v8897_v43  ;;  %v9053_v53 = vor.u32 %v11227_v6, %v9050_v56  ;;  %v11195_v43 = vld [vmem:[#allocation3 + $0x70] sm:$0xf0] }
 0x2e6   : > { %v12522_v30 = vpop.f32.mrf.mxu1  ;;  %v8917_v3 = vor.u32 %v11195_v43, %v8916_v39 }
 0x2e7   : > { %14602 = vst [vmem:[#allocation101_spill] sm:$0xff] %v12522_v30  ;;  %4802 = vmatmul.bf16.vlgmr.msrb.gmra.mxu0 %v9445_v63  ;;  %3428 = vmatmul.bf16.vlgmr.msra.gmra.mxu3 %v8885_v20  ;;  %v11311_v20 = vld [vmem:[#allocation3 + $0x7c] sm:$0xf] }
 0x2e8   : > { %v12526_v24 = vpop.f32.mrf.mxu2 }
 0x2e9   : > { %14604 = vst [vmem:[#allocation103_spill] sm:$0xff] %v12526_v24  ;;  %v2248_v35 = vpop.f32.mrf.mxu3 }
 0x2ea   : > { %v12533_v29 = vadd.f32 %v2248_v35, %v12198_v58  ;;  %v8902_v58 = vld [vmem:[#allocation3 + $0x64] sm:$0xf0]  ;;  %v11408_v35 = vld [vmem:[%s14503_s2 + $0x330] sm:$0xff] }
 0x2eb   : > { %4884 = vmatpush.bf16.msrb.mxu1 %v11408_v35 }
 0x2ec   : > { %v12528_v52 = vpop.f32.mrf.mxu0  ;;  %14606 = vst [vmem:[#allocation105_spill] sm:$0xff] %v12533_v29 }
 0x2ed   : > { %14605 = vst [vmem:[#allocation104_spill] sm:$0xff] %v12528_v52 }
 0x2ee   : > { %v12530_v0 = vpop.f32.mrf.mxu1 }
 0x2f0   : > { %v12535_v30 = vpop.f32.mrf.mxu2 }
 0x2f1   : > { %3646 = vmatmul.bf16.gmra.mxu1 %v9053_v53  ;;  %14607 = vst [vmem:[#allocation106_spill] sm:$0xff] %v12535_v30  ;;  %v2250_v6 = vpop.f32.mrf.mxu3  ;;  %v9465_v53 = vor.u32 %v11311_v20, %v9462_v36  ;;  %v11191_v30 = vld [vmem:[#allocation3 + $0x54] sm:$0xf] }
 0x2f2   : > { %v12548_v56 = vadd.f32 %v2250_v6, %v12202_v10  ;;  %v8905_v39 = vor.u32 %v11191_v30, %v8902_v58  ;;  %v8936_v6 = vld [vmem:[#allocation3 + $0x88] sm:$0xf]  ;;  %v9482_v30 = vld [vmem:[#allocation3 + $0xb4] sm:$0xf0] }
 0x2f4   : > { %v12540_v63 = vpop.f32.mrf.mxu0  ;;  %14609 = vst [vmem:[#allocation108_spill] sm:$0xff] %v12548_v56  ;;  %v8922_v56 = vld [vmem:[#allocation3 + $0x8c] sm:$0xf0] }
 0x2f5   : > { %14608 = vst [vmem:[#allocation107_spill] sm:$0xff] %v12540_v63  ;;  %3700 = vmatmul.bf16.gmra.mxu2 %v8917_v3  ;;  %v9070_v63 = vld [vmem:[#allocation3 + $0x1ac] sm:$0xf0] }
 0x2f6   : > { %v12542_v52 = vpop.f32.mrf.mxu1  ;;  %v9073_v20 = vor.u32 %v11232_v45, %v9070_v63 }
 0x2f7   : > { %4807 = vmatmul.bf16.gmra.mxu0 %v9465_v53  ;;  %3433 = vmatmul.bf16.gmra.mxu3 %v8905_v39  ;;  %v11200_v53 = vld [vmem:[#allocation3 + $0x98] sm:$0xf0]  ;;  %v11316_v39 = vld [vmem:[#allocation3 + $0xa4] sm:$0xf] }
 0x2f8   : > { %v12550_v43 = vpop.f32.mrf.mxu2  ;;  %v8937_v58 = vor.u32 %v11200_v53, %v8936_v6  ;;  %v9485_v49 = vor.u32 %v11316_v39, %v9482_v30  ;;  %v9090_v6 = vld [vmem:[#allocation3 + $0x1d4] sm:$0xf0]  ;;  %v9502_v30 = vld [vmem:[#allocation3 + $0xdc] sm:$0xf0] }
 0x2f9   : > { %14610 = vst [vmem:[#allocation109_spill] sm:$0xff] %v12550_v43  ;;  %v2253_v36 = vpop.f32.mrf.mxu3 }
 0x2fa   : > { %v12557_v24 = vadd.f32 %v2253_v36, %v12220_v18  ;;  %v11196_v18 = vld [vmem:[#allocation3 + $0x7c] sm:$0xf] }
 0x2fb   : > { %v8925_v45 = vor.u32 %v11196_v18, %v8922_v56  ;;  %v11391_v56 = vld [vmem:[%s14503_s2 + $0x2a8] sm:$0xff] }
 0x2fc   : > { %v12552_v29 = vpop.f32.mrf.mxu0  ;;  %14612 = vst [vmem:[#allocation111_spill] sm:$0xff] %v12557_v24  ;;  %4707 = vmatpush.bf16.msrb.mxu3 %v11391_v56  ;;  %v11242_v56 = vld [vmem:[#allocation3 + $0x1ec] sm:$0xf] }
 0x2fd   : > { %14611 = vst [vmem:[#allocation110_spill] sm:$0xff] %v12552_v29 }
 0x2fe   : > { %v12554_v3 = vpop.f32.mrf.mxu1 }
 0x300   : > { %v12559_v10 = vpop.f32.mrf.mxu2 }
 0x301   : > { %3651 = vmatmul.bf16.gmra.mxu1 %v9073_v20  ;;  %14613 = vst [vmem:[#allocation112_spill] sm:$0xff] %v12559_v10  ;;  %v2255_v29 = vpop.f32.mrf.mxu3  ;;  %v11237_v20 = vld [vmem:[#allocation3 + $0x1c4] sm:$0xf] }
 0x302   : > { %v12566_v63 = vadd.f32 %v2255_v29, %v12226_v5  ;;  %v9093_v24 = vor.u32 %v11237_v20, %v9090_v6  ;;  %v8956_v29 = vld [vmem:[#allocation3 + $0xb0] sm:$0xf] }
 0x304   : > { %v12561_v35 = vpop.f32.mrf.mxu0  ;;  %14615 = vst [vmem:[#allocation114_spill] sm:$0xff] %v12566_v63 }
 0x305   : > { %14614 = vst [vmem:[#allocation113_spill] sm:$0xff] %v12561_v35  ;;  %3705 = vmatmul.bf16.gmra.mxu2 %v8937_v58 }
 0x306   : > { %v12563_v43 = vpop.f32.mrf.mxu1 }
 0x307   : > { %4812 = vmatmul.bf16.gmra.mxu0 %v9485_v49  ;;  %3438 = vmatmul.bf16.gmra.mxu3 %v8925_v45  ;;  %v11205_v49 = vld [vmem:[#allocation3 + $0xc0] sm:$0xf0]  ;;  %v11321_v45 = vld [vmem:[#allocation3 + $0xcc] sm:$0xf] }
 0x308   : > { %v12568_v36 = vpop.f32.mrf.mxu2  ;;  %v8957_v39 = vor.u32 %v11205_v49, %v8956_v29 }
 0x309   : > { %14616 = vst [vmem:[#allocation115_spill] sm:$0xff] %v12568_v36  ;;  %v2258_v10 = vpop.f32.mrf.mxu3 }
 0x30a   : > { %v12575_v58 = vadd.f32 %v2258_v10, %v12232_v15  ;;  %v8942_v15 = vld [vmem:[#allocation3 + $0xb4] sm:$0xf0]  ;;  %v11407_v10 = vld [vmem:[%s14503_s2 + $0x328] sm:$0xff] }
 0x30b   : > { %4885 = vmatpush.bf16.msrb.mxu1 %v11407_v10 }
 0x30c   : > { %v12570_v53 = vpop.f32.mrf.mxu0  ;;  %14618 = vst [vmem:[#allocation117_spill] sm:$0xff] %v12575_v58 }
 0x30d   : > { %14617 = vst [vmem:[#allocation116_spill] sm:$0xff] %v12570_v53 }
 0x30e   : > { %v12572_v35 = vpop.f32.mrf.mxu1 }
 0x310   : > { %v12577_v5 = vpop.f32.mrf.mxu2 }
 0x311   : > { %3656 = vmatmul.bf16.gmra.mxu1 %v9093_v24  ;;  %14619 = vst [vmem:[#allocation118_spill] sm:$0xff] %v12577_v5  ;;  %v2260_v20 = vpop.f32.mrf.mxu3  ;;  %v9505_v24 = vor.u32 %v11321_v45, %v9502_v30  ;;  %v11201_v5 = vld [vmem:[#allocation3 + $0xa4] sm:$0xf] }
 0x312   : > { %v12590_v6 = vadd.f32 %v2260_v20, %v12244_v17  ;;  %v8945_v29 = vor.u32 %v11201_v5, %v8942_v15  ;;  %v8976_v20 = vld [vmem:[#allocation3 + $0xd8] sm:$0xf]  ;;  %v9522_v5 = vld [vmem:[#allocation3 + $0x104] sm:$0xf0] }
 0x314   : > { %v12582_v18 = vpop.f32.mrf.mxu0  ;;  %14621 = vst [vmem:[#allocation120_spill] sm:$0xff] %v12590_v6  ;;  %v8962_v6 = vld [vmem:[#allocation3 + $0xdc] sm:$0xf0] }
 0x315   : > { %14620 = vst [vmem:[#allocation119_spill] sm:$0xff] %v12582_v18  ;;  %3710 = vmatmul.bf16.gmra.mxu2 %v8957_v39  ;;  %v9110_v18 = vld [vmem:[#allocation3 + $0x1fc] sm:$0xf0] }
 0x316   : > { %v12584_v53 = vpop.f32.mrf.mxu1  ;;  %v9113_v45 = vor.u32 %v11242_v56, %v9110_v18 }
 0x317   : > { %4817 = vmatmul.bf16.gmra.mxu0 %v9505_v24  ;;  %3443 = vmatmul.bf16.gmra.mxu3 %v8945_v29  ;;  %v11210_v24 = vld [vmem:[#allocation3 + $0xe8] sm:$0xf0]  ;;  %v11326_v29 = vld [vmem:[#allocation3 + $0xf4] sm:$0xf] }
 0x318   : > { %v12592_v49 = vpop.f32.mrf.mxu2  ;;  %v8977_v15 = vor.u32 %v11210_v24, %v8976_v20  ;;  %v9525_v63 = vor.u32 %v11326_v29, %v9522_v5  ;;  %v9130_v20 = vld [vmem:[#allocation3 + $0x224] sm:$0xf0]  ;;  %v9542_v5 = vld [vmem:[#allocation3 + $0x12c] sm:$0xf0] }
 0x319   : > { %14622 = vst [vmem:[#allocation121_spill] sm:$0xff] %v12592_v49  ;;  %v2263_v30 = vpop.f32.mrf.mxu3 }
 0x31a   : > { %v12599_v36 = vadd.f32 %v2263_v30, %v12250_v4  ;;  %v11206_v4 = vld [vmem:[#allocation3 + $0xcc] sm:$0xf] }
 0x31b   : > { %v8965_v56 = vor.u32 %v11206_v4, %v8962_v6  ;;  %v11390_v6 = vld [vmem:[%s14503_s2 + $0x2a0] sm:$0xff] }
 0x31c   : > { %v12594_v58 = vpop.f32.mrf.mxu0  ;;  %14624 = vst [vmem:[#allocation123_spill] sm:$0xff] %v12599_v36  ;;  %4708 = vmatpush.bf16.msrb.mxu3 %v11390_v6  ;;  %v11252_v6 = vld [vmem:[#allocation3 + $0x23c] sm:$0xf] }
 0x31d   : > { %14623 = vst [vmem:[#allocation122_spill] sm:$0xff] %v12594_v58 }
 0x31e   : > { %v12596_v39 = vpop.f32.mrf.mxu1 }
 0x320   : > { %v12601_v17 = vpop.f32.mrf.mxu2 }
 0x321   : > { %3661 = vmatmul.bf16.gmra.mxu1 %v9113_v45  ;;  %14625 = vst [vmem:[#allocation124_spill] sm:$0xff] %v12601_v17  ;;  %v2265_v58 = vpop.f32.mrf.mxu3  ;;  %v11247_v45 = vld [vmem:[#allocation3 + $0x214] sm:$0xf] }
 0x322   : > { %v12608_v18 = vadd.f32 %v2265_v58, %v12256_v38  ;;  %v9133_v36 = vor.u32 %v11247_v45, %v9130_v20  ;;  %v8996_v58 = vld [vmem:[#allocation3 + $0x100] sm:$0xf] }
 0x324   : > { %v12603_v10 = vpop.f32.mrf.mxu0  ;;  %14627 = vst [vmem:[#allocation126_spill] sm:$0xff] %v12608_v18 }
 0x325   : > { %14626 = vst [vmem:[#allocation125_spill] sm:$0xff] %v12603_v10  ;;  %3715 = vmatmul.bf16.gmra.mxu2 %v8977_v15 }
 0x326   : > { %v12605_v49 = vpop.f32.mrf.mxu1 }
 0x327   : > { %4822 = vmatmul.bf16.gmra.mxu0 %v9525_v63  ;;  %3448 = vmatmul.bf16.gmra.mxu3 %v8965_v56  ;;  %v11215_v63 = vld [vmem:[#allocation3 + $0x110] sm:$0xf0]  ;;  %v11331_v56 = vld [vmem:[#allocation3 + $0x11c] sm:$0xf] }
 0x328   : > { %v12610_v30 = vpop.f32.mrf.mxu2  ;;  %v8997_v29 = vor.u32 %v11215_v63, %v8996_v58 }
 0x329   : > { %14628 = vst [vmem:[#allocation127_spill] sm:$0xff] %v12610_v30  ;;  %v2268_v17 = vpop.f32.mrf.mxu3 }
 0x32a   : > { %v12617_v15 = vadd.f32 %v2268_v17, %v12262_v62  ;;  %v8982_v62 = vld [vmem:[#allocation3 + $0x104] sm:$0xf0]  ;;  %v11406_v17 = vld [vmem:[%s14503_s2 + $0x320] sm:$0xff] }
 0x32b   : > { %4886 = vmatpush.bf16.msrb.mxu1 %v11406_v17 }
 0x32c   : > { %v12612_v24 = vpop.f32.mrf.mxu0  ;;  %14630 = vst [vmem:[#allocation129_spill] sm:$0xff] %v12617_v15 }
 0x32d   : > { %14629 = vst [vmem:[#allocation128_spill] sm:$0xff] %v12612_v24 }
 0x32e   : > { %v12614_v10 = vpop.f32.mrf.mxu1 }
 0x330   : > { %v12619_v38 = vpop.f32.mrf.mxu2 }
 0x331   : > { %3666 = vmatmul.bf16.gmra.mxu1 %v9133_v36  ;;  %14631 = vst [vmem:[#allocation130_spill] sm:$0xff] %v12619_v38  ;;  %v2270_v45 = vpop.f32.mrf.mxu3  ;;  %v9545_v36 = vor.u32 %v11331_v56, %v9542_v5  ;;  %v11211_v38 = vld [vmem:[#allocation3 + $0xf4] sm:$0xf] }
 0x332   : > { %v12632_v20 = vadd.f32 %v2270_v45, %v12274_v23  ;;  %v8985_v58 = vor.u32 %v11211_v38, %v8982_v62  ;;  %v11405_v23 = vld [vmem:[%s14503_s2 + $0x318] sm:$0xff]  ;;  %v9016_v45 = vld [vmem:[#allocation3 + $0x128] sm:$0xf] }
 0x333   : > { %v11220_v62 = vld [vmem:[#allocation3 + $0x138] sm:$0xf0]  ;;  %4887 = vmatpush.bf16.msrb.mxu1 %v11405_v23  ;;  %v11403_v23 = vld [vmem:[%s14503_s2 + $0x308] sm:$0xff] }
 0x334   : > { %v12624_v4 = vpop.f32.mrf.mxu0  ;;  %14633 = vst [vmem:[#allocation132_spill] sm:$0xff] %v12632_v20  ;;  %v9017_v17 = vor.u32 %v11220_v62, %v9016_v45 }
 0x335   : > { %14632 = vst [vmem:[#allocation131_spill] sm:$0xff] %v12624_v4  ;;  %3720 = vmatmul.bf16.gmra.mxu2 %v8997_v29  ;;  %v9150_v4 = vld [vmem:[#allocation3 + $0x24c] sm:$0xf0] }
 0x336   : > { %v12626_v24 = vpop.f32.mrf.mxu1  ;;  %v9153_v56 = vor.u32 %v11252_v6, %v9150_v4 }
 0x337   : > { %4827 = vmatmul.bf16.gmra.mxu0 %v9545_v36  ;;  %3453 = vmatmul.bf16.gmra.mxu3 %v8985_v58  ;;  %v9562_v36 = vld [vmem:[#allocation3 + $0x154] sm:$0xf0] }
 0x338   : > { %v12634_v63 = vpop.f32.mrf.mxu2 }
 0x339   : > { %14634 = vst [vmem:[#allocation133_spill] sm:$0xff] %v12634_v63 }
 0x33a   : > { %v2273_v5 = vpop.f32.mrf.mxu3 }
 0x33b   : > { %v12641_v30 = vadd.f32 %v2273_v5, %v12280_v57  ;;  %v9002_v57 = vld [vmem:[#allocation3 + $0x12c] sm:$0xf0] }
 0x33c   : > { %v12636_v15 = vpop.f32.mrf.mxu0  ;;  %v11404_v5 = vld [vmem:[%s14503_s2 + $0x310] sm:$0xff] }
 0x33d   : > { %14635 = vst [vmem:[#allocation134_spill] sm:$0xff] %v12636_v15  ;;  %v11336_v15 = vld [vmem:[#allocation3 + $0x144] sm:$0xf]  ;;  %4888 = vmatpush.bf16.msrb.mxu1 %v11404_v5 }
 0x33e   : > { %v12638_v29 = vpop.f32.mrf.mxu1  ;;  %14636 = vst [vmem:[#allocation135_spill] sm:$0xff] %v12641_v30  ;;  %v9565_v6 = vor.u32 %v11336_v15, %v9562_v36  ;;  %v9170_v15 = vld [vmem:[#allocation3 + $0x274] sm:$0xf0]  ;;  %v11341_v30 = vld [vmem:[#allocation3 + $0x16c] sm:$0xf] }
 0x340   : > { %v12646_v38 = vpop.f32.mrf.mxu2 }
 0x341   : > { %3671 = vmatmul.bf16.gmra.mxu1 %v9153_v56  ;;  %14637 = vst [vmem:[#allocation136_spill] sm:$0xff] %v12646_v38  ;;  %v11216_v38 = vld [vmem:[#allocation3 + $0x11c] sm:$0xf] }
 0x342   : > { %v2275_v4 = vpop.f32.mrf.mxu3  ;;  %v9005_v45 = vor.u32 %v11216_v38, %v9002_v57  ;;  %4889 = vmatpush.bf16.msrb.mxu1 %v11403_v23  ;;  %v9036_v23 = vld [vmem:[#allocation3 + $0x150] sm:$0xf] }
 0x343   : > { %v12656_v56 = vadd.f32 %v2275_v4, %v12295_v32  ;;  %v11402_v4 = vld [vmem:[%s14503_s2 + $0x300] sm:$0xff] }
 0x344   : > { %v12648_v58 = vpop.f32.mrf.mxu0 }
 0x345   : > { %14638 = vst [vmem:[#allocation137_spill] sm:$0xff] %v12648_v58  ;;  %3725 = vmatmul.bf16.gmra.mxu2 %v9017_v17  ;;  %v11257_v17 = vld [vmem:[#allocation3 + $0x264] sm:$0xf] }
 0x346   : > { %v12650_v63 = vpop.f32.mrf.mxu1  ;;  %14639 = vst [vmem:[#allocation138_spill] sm:$0xff] %v12656_v56  ;;  %v9173_v38 = vor.u32 %v11257_v17, %v9170_v15  ;;  %4890 = vmatpush.bf16.msrb.mxu1 %v11402_v4  ;;  %v11221_v15 = vld [vmem:[#allocation3 + $0x144] sm:$0xf] }
 0x347   : > { %4832 = vmatmul.bf16.gmra.mxu0 %v9565_v6  ;;  %3458 = vmatmul.bf16.gmra.mxu3 %v9005_v45  ;;  %v11389_v6 = vld [vmem:[%s14503_s2 + $0x298] sm:$0xff]  ;;  %v11225_v45 = vld [vmem:[#allocation3 + $0x160] sm:$0xf0] }
 0x348   : > { %v12661_v62 = vpop.f32.mrf.mxu2  ;;  %4709 = vmatpush.bf16.msrb.mxu3 %v11389_v6  ;;  %v11262_v6 = vld [vmem:[#allocation3 + $0x28c] sm:$0xf] }
 0x349   : > { %14640 = vst [vmem:[#allocation139_spill] sm:$0xff] %v12661_v62  ;;  %v9037_v62 = vor.u32 %v11225_v45, %v9036_v23 }
 0x34a   : > { %v2278_v32 = vpop.f32.mrf.mxu3 }
 0x34b   : > { %v12674_v57 = vadd.f32 %v2278_v32, %v12307_v42 }
 0x34c   : > { %v12663_v36 = vpop.f32.mrf.mxu0 }
 0x34d   : > { %14641 = vst [vmem:[#allocation140_spill] sm:$0xff] %v12663_v36  ;;  %v9582_v36 = vld [vmem:[#allocation3 + $0x17c] sm:$0xf0] }
 0x34e   : > { %v12665_v58 = vpop.f32.mrf.mxu1  ;;  %14643 = vst [vmem:[#allocation142_spill] sm:$0xff] %v12674_v57  ;;  %v9585_v17 = vor.u32 %v11341_v30, %v9582_v36  ;;  %v11230_v30 = vld [vmem:[#allocation3 + $0x188] sm:$0xf0]  ;;  %v9602_v36 = vld [vmem:[#allocation3 + $0x1a4] sm:$0xf0] }
 0x34f   : > { %14642 = vst [vmem:[#allocation141_spill] sm:$0xff] %v12665_v58  ;;  %v9022_v58 = vld [vmem:[#allocation3 + $0x154] sm:$0xf0] }
 0x350   : > { %v12676_v5 = vpop.f32.mrf.mxu2  ;;  %v9025_v32 = vor.u32 %v11221_v15, %v9022_v58  ;;  %v11346_v58 = vld [vmem:[#allocation3 + $0x194] sm:$0xf] }
 0x351   : > { %3676 = vmatmul.bf16.gmra.mxu1 %v9173_v38  ;;  %14644 = vst [vmem:[#allocation143_spill] sm:$0xff] %v12676_v5  ;;  %v9190_v38 = vld [vmem:[#allocation3 + $0x29c] sm:$0xf0] }
 0x352   : > { %v2280_v18 = vpop.f32.mrf.mxu3  ;;  %v9193_v5 = vor.u32 %v11262_v6, %v9190_v38  ;;  %v11309_v38 = vld [vmem:[#allocation3 + $0x68] sm:$0xf0] }
 0x353   : > { %v12683_v42 = vadd.f32 %v2280_v18, %v12313_v22  ;;  %v9056_v18 = vld [vmem:[#allocation3 + $0x178] sm:$0xf] }
 0x354   : > { %v12678_v56 = vpop.f32.mrf.mxu0 }
 0x355   : > { %14645 = vst [vmem:[#allocation144_spill] sm:$0xff] %v12678_v56  ;;  %3730 = vmatmul.bf16.gmra.mxu2 %v9037_v62 }
 0x356   : > { %v12680_v20 = vpop.f32.mrf.mxu1  ;;  %14646 = vst [vmem:[#allocation145_spill] sm:$0xff] %v12683_v42  ;;  %v9605_v42 = vor.u32 %v11346_v58, %v9602_v36  ;;  %v9076_v58 = vld [vmem:[#allocation3 + $0x1a0] sm:$0xf]  ;;  %v11235_v36 = vld [vmem:[#allocation3 + $0x1b0] sm:$0xf0] }
 0x357   : > { %4837 = vmatmul.bf16.gmra.mxu0 %v9585_v17  ;;  %3463 = vmatmul.bf16.gmra.mxu3 %v9025_v32  ;;  %v9057_v17 = vor.u32 %v11230_v30, %v9056_v18  ;;  %v9448_v30 = vld [vmem:[#allocation3 + $0x58] sm:$0xf] }
 0x358   : > { %v12685_v4 = vpop.f32.mrf.mxu2 }
 0x359   : > { %14647 = vst [vmem:[#allocation146_spill] sm:$0xff] %v12685_v4  ;;  %v9042_v4 = vld [vmem:[#allocation3 + $0x17c] sm:$0xf0] }
 0x35a   : > { %v2283_v56 = vpop.f32.mrf.mxu3 }
 0x35b   : > { %v12692_v62 = vadd.f32 %v2283_v56, %v12319_v47  ;;  %v11226_v47 = vld [vmem:[#allocation3 + $0x16c] sm:$0xf] }
 0x35c   : > { %v12687_v23 = vpop.f32.mrf.mxu0  ;;  %v9045_v56 = vor.u32 %v11226_v47, %v9042_v4 }
 0x35d   : > { %14648 = vst [vmem:[#allocation147_spill] sm:$0xff] %v12687_v23 }
 0x35e   : > { %v12689_v45 = vpop.f32.mrf.mxu1  ;;  %14649 = vst [vmem:[#allocation148_spill] sm:$0xff] %v12692_v62  ;;  %v9449_v62 = vor.u32 %v11309_v38, %v9448_v30 }
 0x360   : > { %v12694_v22 = vpop.f32.mrf.mxu2 }
 0x361   : > { %3681 = vmatmul.bf16.gmra.mxu1 %v9193_v5  ;;  %14650 = vst [vmem:[#allocation149_spill] sm:$0xff] %v12694_v22 }
 0x362   : > { %v2285_v23 = vpop.f32.mrf.mxu3 }
 0x363   : > { %v12701_v6 = vadd.f32 %v2285_v23, %v12325_v12  ;;  %v11388_v12 = vld [vmem:[%s14503_s2 + $0x290] sm:$0xff] }
 0x364   : > { %v12696_v15 = vpop.f32.mrf.mxu0  ;;  %4710 = vmatpush.bf16.msrb.mxu3 %v11388_v12  ;;  %v9062_v12 = vld [vmem:[#allocation3 + $0x1a4] sm:$0xf0] }
 0x365   : > { %14651 = vst [vmem:[#allocation150_spill] sm:$0xff] %v12696_v15  ;;  %3735 = vmatmul.bf16.gmra.mxu2 %v9057_v17  ;;  %v2122_v17 = vadd.f32 %v12052_v40, %v12037_v11 }
 0x366   : > { %v12698_v32 = vpop.f32.mrf.mxu1 }
 0x367   : > { %4842 = vmatmul.bf16.gmra.mxu0 %v9605_v42  ;;  %3468 = vmatmul.bf16.gmra.mxu3 %v9045_v56  ;;  %v2298_v42 = vadd.f32 %v12035_v2, %v12337_v59  ;;  %v9077_v56 = vor.u32 %v11235_v36, %v9076_v58  ;;  %v2211_v38 = vadd.f32 %v12345_v37, %v2122_v17 }
 0x368   : > { %v3696_v5 = vpop.f32.mrf.mxu2 }
 0x369   : > { %v2387_v30 = vadd.f32 %v12204_v14, %v2298_v42 }
 0x36a   : > { %v3429_v15 = vpop.f32.mrf.mxu3 }
 0x36b   : > { %v3430_v57 = vadd.f32 %v3429_v15, %v12327_v28  ;;  %v11351_v28 = vld [vmem:[#allocation3 + $0x1bc] sm:$0xf]  ;;  %v9622_v15 = vld [vmem:[#allocation3 + $0x1cc] sm:$0xf0] }
 0x36c   : > { %v12703_v22 = vpop.f32.mrf.mxu0 }
 0x36d   : > { %14652 = vst [vmem:[#allocation151_spill] sm:$0xff] %v12703_v22  ;;  %v3519_v4 = vadd.f32 %v12321_v34, %v3430_v57  ;;  %v9625_v22 = vor.u32 %v11351_v28, %v9622_v15  ;;  %v9468_v28 = vld [vmem:[#allocation3 + $0x80] sm:$0xf]  ;;  %v2303_v15 = vadd.f32 %v12054_v46, %v12354_v55 }
 0x36e   : > { %v12705_v18 = vpop.f32.mrf.mxu1 }
 0x36f   : > { %v3608_v47 = vadd.f32 %v12530_v0, %v3519_v4  ;;  %v2300_v0 = vadd.f32 %v12045_v26, %v2211_v38  ;;  %v11314_v4 = vld [vmem:[#allocation3 + $0x90] sm:$0xf0]  ;;  %v2127_v38 = vadd.f32 %v12065_v21, %v12056_v50 }
 0x370   : > { %v3698_v23 = vpop.f32.mrf.mxu2  ;;  %v9469_v26 = vor.u32 %v11314_v4, %v9468_v28  ;;  %v11319_v4 = vld [vmem:[#allocation3 + $0xb8] sm:$0xf0] }
 0x371   : > { %4891 = vmatmul.bf16.vlgmr.msrb.gmra.mxu1 %v9449_v62  ;;  %v3697_v2 = vadd.f32 %v3696_v5, %v3608_v47  ;;  %v11231_v62 = vld [vmem:[#allocation3 + $0x194] sm:$0xf]  ;;  %v2389_v58 = vadd.f32 %v12211_v48, %v2300_v0  ;;  %v9096_v48 = vld [vmem:[#allocation3 + $0x1c8] sm:$0xf]  ;;  %v11236_v0 = vld [vmem:[#allocation3 + $0x1bc] sm:$0xf] }
 0x372   : > { %v3431_v57 = vpop.f32.mrf.mxu3  ;;  %v9065_v14 = vor.u32 %v11231_v62, %v9062_v12  ;;  %v2216_v12 = vadd.f32 %v12362_v60, %v2127_v38  ;;  %v14658_v38 = vld [vmem:[#allocation5_spill] sm:$0xff] }
 0x373   : > { %v12723_v11 = vadd.f32 %v3697_v2, %v2387_v30  ;;  %v3432_v40 = vadd.f32 %v3431_v57, %v12339_v13  ;;  %v11356_v2 = vld [vmem:[#allocation3 + $0x1e4] sm:$0xf]  ;;  %v9642_v57 = vld [vmem:[#allocation3 + $0x1f4] sm:$0xf0] }
 0x374   : > { %v12719_v59 = vpop.f32.mrf.mxu0 }
 0x375   : > { %3740 = vmatmul.bf16.gmra.mxu2 %v9077_v56  ;;  %14653 = vst [vmem:[#allocation152_spill] sm:$0xff] %v12723_v11  ;;  %v3521_v37 = vadd.f32 %v12329_v16, %v3432_v40  ;;  %v11369_v11 = vld [vmem:[#allocation3 + $0x248] sm:$0xf0] }
 0x376   : > { %v12721_v34 = vpop.f32.mrf.mxu1 }
 0x377   : > { %4847 = vmatmul.bf16.gmra.mxu0 %v9625_v22  ;;  %v3610_v42 = vadd.f32 %v12542_v52, %v3521_v37  ;;  %3473 = vmatmul.bf16.gmra.mxu3 %v9065_v14  ;;  %v9082_v37 = vld [vmem:[#allocation3 + $0x1cc] sm:$0xf0]  ;;  %v9645_v14 = vor.u32 %v11356_v2, %v9642_v57 }
 0x378   : > { %v3701_v5 = vpop.f32.mrf.mxu2 }
 0x379   : > { %v3699_v36 = vadd.f32 %v3698_v23, %v3610_v42  ;;  %v11240_v23 = vld [vmem:[#allocation3 + $0x1d8] sm:$0xf0] }
 0x37a   : > { %v3434_v13 = vpop.f32.mrf.mxu3  ;;  %v9097_v62 = vor.u32 %v11240_v23, %v9096_v48  ;;  %v9116_v48 = vld [vmem:[#allocation3 + $0x1f0] sm:$0xf]  ;;  %v11245_v23 = vld [vmem:[#allocation3 + $0x200] sm:$0xf0] }
 0x37b   : > { %v12734_v22 = vadd.f32 %v3699_v36, %v2389_v58  ;;  %v3435_v16 = vadd.f32 %v3434_v13, %v12347_v31  ;;  %v2392_v31 = vadd.f32 %v12218_v8, %v2303_v15  ;;  %v9085_v8 = vor.u32 %v11236_v0, %v9082_v37 }
 0x37c   : > { %v12730_v17 = vpop.f32.mrf.mxu0  ;;  %v2308_v15 = vadd.f32 %v12067_v27, %v12374_v19 }
 0x37d   : > { %14654 = vst [vmem:[#allocation153_spill] sm:$0xff] %v12734_v22  ;;  %v3524_v52 = vadd.f32 %v12341_v41, %v3435_v16 }
 0x37e   : > { %v12732_v47 = vpop.f32.mrf.mxu1 }
 0x37f   : > { %v3613_v30 = vadd.f32 %v12554_v3, %v3524_v52  ;;  %v2305_v3 = vadd.f32 %v12060_v1, %v2216_v12  ;;  %v9117_v12 = vor.u32 %v11245_v23, %v9116_v48  ;;  %v9508_v23 = vld [vmem:[#allocation3 + $0xd0] sm:$0xf] }
 0x380   : > { %v3703_v56 = vpop.f32.mrf.mxu2 }
 0x381   : > { %4896 = vmatmul.bf16.gmra.mxu1 %v9469_v26  ;;  %v3702_v40 = vadd.f32 %v3701_v5, %v3613_v30  ;;  %v2394_v58 = vadd.f32 %v12224_v54, %v2305_v3  ;;  %v9488_v26 = vld [vmem:[#allocation3 + $0xa8] sm:$0xf]  ;;  %v14657_v54 = vld [vmem:[#allocation59_spill] sm:$0xff]  ;;  %v9102_v3 = vld [vmem:[#allocation3 + $0x1f4] sm:$0xf0] }
 0x382   : > { %v3436_v41 = vpop.f32.mrf.mxu3  ;;  %v9489_v1 = vor.u32 %v11319_v4, %v9488_v26  ;;  %v14659_v30 = vld [vmem:[#allocation7_spill] sm:$0xff]  ;;  %v14664_v4 = vld [vmem:[#allocation6_spill] sm:$0xff] }
 0x383   : > { %v12749_v50 = vadd.f32 %v3702_v40, %v2392_v31  ;;  %v3437_v21 = vadd.f32 %v3436_v41, %v12356_v7  ;;  %v2132_v2 = vadd.f32 %v14659_v30, %v14658_v38  ;;  %v14660_v31 = vld [vmem:[#allocation66_spill] sm:$0xff] }
 0x384   : > { %v12745_v46 = vpop.f32.mrf.mxu0  ;;  %v14661_v41 = vld [vmem:[#allocation34_spill] sm:$0xff] }
 0x385   : > { %3745 = vmatmul.bf16.gmra.mxu2 %v9097_v62  ;;  %14655 = vst [vmem:[#allocation154_spill] sm:$0xff] %v12749_v50  ;;  %v3526_v60 = vadd.f32 %v12349_v9, %v3437_v21  ;;  %v9662_v62 = vld [vmem:[#allocation3 + $0x21c] sm:$0xf0]  ;;  %v2221_v40 = vadd.f32 %v14660_v31, %v2132_v2  ;;  %v2397_v0 = vadd.f32 %v14661_v41, %v2308_v15  ;;  %v11241_v21 = vld [vmem:[#allocation3 + $0x1e4] sm:$0xf] }
 0x386   : > { %v12747_v55 = vpop.f32.mrf.mxu1  ;;  %v9136_v41 = vld [vmem:[#allocation3 + $0x218] sm:$0xf]  ;;  %v14775_v50 = vld [vmem:[#allocation69_spill] sm:$0xff] }
 0x387   : > { %4852 = vmatmul.bf16.gmra.mxu0 %v9645_v14  ;;  %v3615_v42 = vadd.f32 %v12563_v43, %v3526_v60  ;;  %3478 = vmatmul.bf16.gmra.mxu3 %v9085_v8  ;;  %v11387_v43 = vld [vmem:[%s14503_s2 + $0x288] sm:$0xff] }
 0x388   : > { %v3706_v5 = vpop.f32.mrf.mxu2  ;;  %4711 = vmatpush.bf16.msrb.mxu3 %v11387_v43  ;;  %v14666_v43 = vld [vmem:[#allocation36_spill] sm:$0xff] }
 0x389   : > { %v3704_v36 = vadd.f32 %v3703_v56, %v3615_v42 }
 0x38a   : > { %v3439_v7 = vpop.f32.mrf.mxu3 }
 0x38b   : > { %v12760_v16 = vadd.f32 %v3704_v36, %v2394_v58  ;;  %v3440_v9 = vadd.f32 %v3439_v7, %v12364_v61  ;;  %v11361_v61 = vld [vmem:[#allocation3 + $0x20c] sm:$0xf]  ;;  %v2310_v58 = vadd.f32 %v14664_v4, %v2221_v40  ;;  %v14665_v36 = vld [vmem:[#allocation61_spill] sm:$0xff]  ;;  %v9105_v7 = vor.u32 %v11241_v21, %v9102_v3  ;;  %v11366_v3 = vld [vmem:[#allocation3 + $0x234] sm:$0xf] }
 0x38c   : > { %v12756_v28 = vpop.f32.mrf.mxu0  ;;  %v9665_v60 = vor.u32 %v11361_v61, %v9662_v62  ;;  %v14669_v62 = vld [vmem:[#allocation8_spill] sm:$0xff]  ;;  %v14673_v4 = vld [vmem:[#allocation38_spill] sm:$0xff] }
 0x38d   : > { %14656 = vst [vmem:[#allocation155_spill] sm:$0xff] %v12760_v16  ;;  %v3529_v52 = vadd.f32 %v14657_v54, %v3440_v9  ;;  %v11324_v9 = vld [vmem:[#allocation3 + $0xe0] sm:$0xf0]  ;;  %v2399_v15 = vadd.f32 %v14666_v43, %v2310_v58 }
 0x38e   : > { %v12758_v13 = vpop.f32.mrf.mxu1  ;;  %v9509_v2 = vor.u32 %v11324_v9, %v9508_v23  ;;  %v9122_v9 = vld [vmem:[#allocation3 + $0x21c] sm:$0xf0]  ;;  %v14676_v23 = vld [vmem:[#allocation10_spill] sm:$0xff] }
 0x38f   : > { %v3618_v57 = vadd.f32 %v12572_v35, %v3529_v52  ;;  %v14663_v35 = vld [vmem:[#allocation63_spill] sm:$0xff] }
 0x390   : > { %v3708_v56 = vpop.f32.mrf.mxu2 }
 0x391   : > { %4901 = vmatmul.bf16.gmra.mxu1 %v9489_v1  ;;  %v3707_v27 = vadd.f32 %v3706_v5, %v3618_v57  ;;  %v14668_v57 = vld [vmem:[#allocation67_spill] sm:$0xff] }
 0x392   : > { %v3441_v14 = vpop.f32.mrf.mxu3 }
 0x393   : > { %v12778_v8 = vadd.f32 %v3707_v27, %v2397_v0  ;;  %v3442_v42 = vadd.f32 %v3441_v14, %v14663_v35  ;;  %v14671_v0 = vld [vmem:[#allocation9_spill] sm:$0xff]  ;;  %v14672_v27 = vld [vmem:[#allocation11_spill] sm:$0xff] }
 0x394   : > { %v12774_v19 = vpop.f32.mrf.mxu0  ;;  %v2137_v14 = vadd.f32 %v14672_v27, %v14671_v0  ;;  %v9528_v0 = vld [vmem:[#allocation3 + $0xf8] sm:$0xf] }
 0x395   : > { %3750 = vmatmul.bf16.gmra.mxu2 %v9117_v12  ;;  %14662 = vst [vmem:[#allocation59_spill] sm:$0xff] %v12778_v8  ;;  %v3531_v26 = vadd.f32 %v14665_v36, %v3442_v42  ;;  %v2313_v12 = vadd.f32 %v14669_v62, %v12391_v33  ;;  %v11329_v62 = vld [vmem:[#allocation3 + $0x108] sm:$0xf0]  ;;  %v11359_v8 = vld [vmem:[#allocation3 + $0x1f8] sm:$0xf0] }
 0x396   : > { %v12776_v37 = vpop.f32.mrf.mxu1  ;;  %v2226_v42 = vadd.f32 %v12399_v44, %v2137_v14  ;;  %v14677_v44 = vld [vmem:[#allocation68_spill] sm:$0xff] }
 0x397   : > { %4857 = vmatmul.bf16.gmra.mxu0 %v9665_v60  ;;  %v3620_v1 = vadd.f32 %v12584_v53, %v3531_v26  ;;  %3483 = vmatmul.bf16.gmra.mxu3 %v9105_v7  ;;  %v14670_v53 = vld [vmem:[#allocation64_spill] sm:$0xff]  ;;  %v9682_v60 = vld [vmem:[#allocation3 + $0x244] sm:$0xf0]  ;;  %v2402_v58 = vadd.f32 %v14673_v4, %v2313_v12 }
 0x398   : > { %v3711_v5 = vpop.f32.mrf.mxu2  ;;  %v9685_v43 = vor.u32 %v11366_v3, %v9682_v60  ;;  %v14678_v12 = vld [vmem:[#allocation40_spill] sm:$0xff] }
 0x399   : > { %v3709_v54 = vadd.f32 %v3708_v56, %v3620_v1  ;;  %v11250_v56 = vld [vmem:[#allocation3 + $0x228] sm:$0xf0]  ;;  %v14680_v60 = vld [vmem:[#allocation12_spill] sm:$0xff] }
 0x39a   : > { %v3444_v38 = vpop.f32.mrf.mxu3  ;;  %v9137_v35 = vor.u32 %v11250_v56, %v9136_v41  ;;  %v11246_v1 = vld [vmem:[#allocation3 + $0x20c] sm:$0xf] }
 0x39b   : > { %v12789_v30 = vadd.f32 %v3709_v54, %v2399_v15  ;;  %v3445_v61 = vadd.f32 %v3444_v38, %v14668_v57  ;;  %v2315_v38 = vadd.f32 %v14676_v23, %v2226_v42  ;;  %v9125_v57 = vor.u32 %v11246_v1, %v9122_v9  ;;  %v14683_v1 = vld [vmem:[#allocation15_spill] sm:$0xff]  ;;  %v14684_v23 = vld [vmem:[#allocation78_spill] sm:$0xff] }
 0x39c   : > { %v12785_v52 = vpop.f32.mrf.mxu0 }
 0x39d   : > { %14667 = vst [vmem:[#allocation5_spill] sm:$0xff] %v12789_v30  ;;  %v3534_v31 = vadd.f32 %v14670_v53, %v3445_v61  ;;  %v2404_v53 = vadd.f32 %v14678_v12, %v2315_v38 }
 0x39e   : > { %v12787_v48 = vpop.f32.mrf.mxu1 }
 0x39f   : > { %v3623_v21 = vadd.f32 %v12596_v39, %v3534_v31  ;;  %v14675_v39 = vld [vmem:[#allocation70_spill] sm:$0xff] }
 0x3a0   : > { %v3713_v40 = vpop.f32.mrf.mxu2 }
 0x3a1   : > { %4906 = vmatmul.bf16.gmra.mxu1 %v9509_v2  ;;  %v3712_v36 = vadd.f32 %v3711_v5, %v3623_v21  ;;  %v9529_v21 = vor.u32 %v11329_v62, %v9528_v0  ;;  %v11513_v0 = vld [vmem:[%s14503_s2 + $0x3f8] sm:$0xff] }
 0x3a2   : > { %v3446_v7 = vpop.f32.mrf.mxu3  ;;  %6079 = vmatpush.bf16.msra.mxu0 %v11513_v0  ;;  %v14695_v0 = vld [vmem:[#allocation76_spill] sm:$0xff] }
 0x3a3   : > { %v12804_v15 = vadd.f32 %v3712_v36, %v2402_v58  ;;  %v3447_v54 = vadd.f32 %v3446_v7, %v14675_v39  ;;  %v9156_v58 = vld [vmem:[#allocation3 + $0x240] sm:$0xf]  ;;  %v11255_v36 = vld [vmem:[#allocation3 + $0x250] sm:$0xf0]  ;;  %v9702_v39 = vld [vmem:[#allocation3 + $0x26c] sm:$0xf0] }
 0x3a4   : > { %v12800_v33 = vpop.f32.mrf.mxu0  ;;  %v14682_v7 = vld [vmem:[#allocation13_spill] sm:$0xff] }
 0x3a5   : > { %3755 = vmatmul.bf16.gmra.mxu2 %v9137_v35  ;;  %14674 = vst [vmem:[#allocation7_spill] sm:$0xff] %v12804_v15  ;;  %v3536_v2 = vadd.f32 %v14677_v44, %v3447_v54  ;;  %v2318_v35 = vadd.f32 %v14680_v60, %v12411_v51  ;;  %v2142_v9 = vadd.f32 %v14683_v1, %v14682_v7  ;;  %v14685_v44 = vld [vmem:[#allocation42_spill] sm:$0xff]  ;;  %v11334_v1 = vld [vmem:[#allocation3 + $0x130] sm:$0xf0] }
 0x3a6   : > { %v12802_v26 = vpop.f32.mrf.mxu1  ;;  %v9157_v54 = vor.u32 %v11255_v36, %v9156_v58  ;;  %v11512_v36 = vld [vmem:[%s14503_s2 + $0x3f0] sm:$0xff]  ;;  %v14751_v15 = vld [vmem:[#allocation58_spill] sm:$0xff] }
 0x3a7   : > { %4862 = vmatmul.bf16.gmra.mxu0 %v9685_v43  ;;  %v3625_v61 = vadd.f32 %v12605_v49, %v3536_v2  ;;  %3488 = vmatmul.bf16.gmra.mxu3 %v9125_v57  ;;  %v11386_v49 = vld [vmem:[%s14503_s2 + $0x280] sm:$0xff]  ;;  %v2231_v38 = vadd.f32 %v14684_v23, %v2142_v9  ;;  %v2407_v2 = vadd.f32 %v14685_v44, %v2318_v35  ;;  %v11251_v57 = vld [vmem:[#allocation3 + $0x234] sm:$0xf]  ;;  %v14690_v9 = vld [vmem:[#allocation44_spill] sm:$0xff] }
 0x3a8   : > { %v3716_v5 = vpop.f32.mrf.mxu2  ;;  %4712 = vmatpush.bf16.msrb.mxu3 %v11386_v49  ;;  %v14688_v49 = vld [vmem:[#allocation14_spill] sm:$0xff]  ;;  %v14689_v35 = vld [vmem:[#allocation73_spill] sm:$0xff]  ;;  %6080 = vmatpush.bf16.msra.mxu0 %v11512_v36 }
 0x3a9   : > { %v3714_v31 = vadd.f32 %v3713_v40, %v3625_v61  ;;  %v14681_v40 = vld [vmem:[#allocation71_spill] sm:$0xff]  ;;  %v2320_v60 = vadd.f32 %v14688_v49, %v2231_v38  ;;  %v9548_v23 = vld [vmem:[#allocation3 + $0x120] sm:$0xf]  ;;  %v11415_v44 = vld [vmem:[%s14503_s2 + $0x368] sm:$0xff] }
 0x3aa   : > { %v3449_v27 = vpop.f32.mrf.mxu3  ;;  %v11414_v49 = vld [vmem:[%s14503_s2 + $0x360] sm:$0xff] }
 0x3ab   : > { %v12815_v14 = vadd.f32 %v3714_v31, %v2404_v53  ;;  %v3450_v3 = vadd.f32 %v3449_v27, %v12401_v25  ;;  %v11371_v25 = vld [vmem:[#allocation3 + $0x25c] sm:$0xf]  ;;  %v9142_v53 = vld [vmem:[#allocation3 + $0x244] sm:$0xf0] }
 0x3ac   : > { %v12811_v41 = vpop.f32.mrf.mxu0  ;;  %v9705_v31 = vor.u32 %v11371_v25, %v9702_v39 }
 0x3ad   : > { %14679 = vst [vmem:[#allocation66_spill] sm:$0xff] %v12815_v14  ;;  %v3539_v42 = vadd.f32 %v14681_v40, %v3450_v3  ;;  %v11416_v3 = vld [vmem:[%s14503_s2 + $0x370] sm:$0xff] }
 0x3ae   : > { %v12813_v56 = vpop.f32.mrf.mxu1  ;;  %v14733_v14 = vld [vmem:[#allocation55_spill] sm:$0xff] }
 0x3af   : > { %v3628_v43 = vadd.f32 %v12614_v10, %v3539_v42  ;;  %v11417_v10 = vld [vmem:[%s14503_s2 + $0x378] sm:$0xff]  ;;  %v9145_v42 = vor.u32 %v11251_v57, %v9142_v53  ;;  %v14692_v57 = vld [vmem:[#allocation79_spill] sm:$0xff]  ;;  %v14693_v53 = vld [vmem:[#allocation82_spill] sm:$0xff] }
 0x3b0   : > { %v3718_v4 = vpop.f32.mrf.mxu2  ;;  %4972 = vmatpush.bf16.msra.mxu2 %v11417_v10 }
 0x3b1   : > { %4911 = vmatmul.bf16.gmra.mxu1 %v9529_v21  ;;  %v3717_v51 = vadd.f32 %v3716_v5, %v3628_v43  ;;  %v14687_v5 = vld [vmem:[#allocation75_spill] sm:$0xff]  ;;  %v2409_v43 = vadd.f32 %v14690_v9, %v2320_v60  ;;  %v11510_v60 = vld [vmem:[%s14503_s2 + $0x3e0] sm:$0xff] }
 0x3b2   : > { %v3451_v12 = vpop.f32.mrf.mxu3 }
 0x3b3   : > { %v12839_v27 = vadd.f32 %v3717_v51, %v2407_v2  ;;  %v3452_v21 = vadd.f32 %v3451_v12, %v14687_v5  ;;  %v9549_v51 = vor.u32 %v11334_v1, %v9548_v23  ;;  %v9176_v12 = vld [vmem:[#allocation3 + $0x268] sm:$0xf]  ;;  %v9722_v1 = vld [vmem:[#allocation3 + $0x294] sm:$0xf0] }
 0x3b4   : > { %v12829_v61 = vpop.f32.mrf.mxu0  ;;  %4973 = vmatpush.bf16.msra.mxu2 %v11416_v3  ;;  %v11260_v3 = vld [vmem:[#allocation3 + $0x278] sm:$0xf0]  ;;  %v14699_v23 = vld [vmem:[#allocation46_spill] sm:$0xff] }
 0x3b5   : > { %3760 = vmatmul.bf16.gmra.mxu2 %v9157_v54  ;;  %14686 = vst [vmem:[#allocation34_spill] sm:$0xff] %v12839_v27  ;;  %v3541_v40 = vadd.f32 %v14689_v35, %v3452_v21  ;;  %v14696_v35 = vld [vmem:[#allocation17_spill] sm:$0xff]  ;;  %v9177_v9 = vor.u32 %v11260_v3, %v9176_v12  ;;  %v11509_v12 = vld [vmem:[%s14503_s2 + $0x3d8] sm:$0xff]  ;;  %v14702_v3 = vld [vmem:[#allocation18_spill] sm:$0xff] }
 0x3b6   : > { %v12831_v62 = vpop.f32.mrf.mxu1 }
 0x3b7   : > { %4867 = vmatmul.bf16.gmra.mxu0 %v9705_v31  ;;  %v3630_v7 = vadd.f32 %v12626_v24, %v3541_v40  ;;  %3493 = vmatmul.bf16.gmra.mxu3 %v9145_v42  ;;  %v11511_v24 = vld [vmem:[%s14503_s2 + $0x3e8] sm:$0xff]  ;;  %v14694_v31 = vld [vmem:[#allocation16_spill] sm:$0xff]  ;;  %v14697_v40 = vld [vmem:[#allocation19_spill] sm:$0xff] }
 0x3b8   : > { %v3721_v58 = vpop.f32.mrf.mxu2  ;;  %4974 = vmatpush.bf16.msra.mxu2 %v11415_v44  ;;  %v2323_v10 = vadd.f32 %v14694_v31, %v14693_v53  ;;  %6081 = vmatpush.bf16.msra.mxu0 %v11511_v24  ;;  %v2147_v42 = vadd.f32 %v14697_v40, %v14696_v35  ;;  %v11256_v24 = vld [vmem:[#allocation3 + $0x25c] sm:$0xf]  ;;  %v9162_v53 = vld [vmem:[#allocation3 + $0x26c] sm:$0xf0] }
 0x3b9   : > { %v3719_v25 = vadd.f32 %v3718_v4, %v3630_v7  ;;  %v11376_v7 = vld [vmem:[#allocation3 + $0x284] sm:$0xf]  ;;  %v9165_v40 = vor.u32 %v11256_v24, %v9162_v53 }
 0x3ba   : > { %v3454_v38 = vpop.f32.mrf.mxu3  ;;  %v9725_v31 = vor.u32 %v11376_v7, %v9722_v1  ;;  %v11339_v1 = vld [vmem:[#allocation3 + $0x158] sm:$0xf0] }
 0x3bb   : > { %v12862_v2 = vadd.f32 %v3719_v25, %v2409_v43  ;;  %v3455_v4 = vadd.f32 %v3454_v38, %v14692_v57  ;;  %v14698_v43 = vld [vmem:[#allocation86_spill] sm:$0xff]  ;;  %v2412_v38 = vadd.f32 %v14699_v23, %v2323_v10 }
 0x3bc   : > { %v12852_v39 = vpop.f32.mrf.mxu0  ;;  %4975 = vmatpush.bf16.msra.mxu2 %v11414_v49  ;;  %v2236_v25 = vadd.f32 %v14698_v43, %v2147_v42  ;;  %6082 = vmatpush.bf16.msra.mxu0 %v11510_v60  ;;  %v14703_v60 = vld [vmem:[#allocation80_spill] sm:$0xff] }
 0x3bd   : > { %14691 = vst [vmem:[#allocation63_spill] sm:$0xff] %v12862_v2  ;;  %v3544_v5 = vadd.f32 %v14695_v0, %v3455_v4  ;;  %v11261_v2 = vld [vmem:[#allocation3 + $0x284] sm:$0xf] }
 0x3be   : > { %v12854_v54 = vpop.f32.mrf.mxu1  ;;  %v2325_v49 = vadd.f32 %v14702_v3, %v2236_v25 }
 0x3bf   : > { %v3633_v36 = vadd.f32 %v12638_v29, %v3544_v5  ;;  %v11413_v29 = vld [vmem:[%s14503_s2 + $0x358] sm:$0xff]  ;;  %v11412_v5 = vld [vmem:[%s14503_s2 + $0x350] sm:$0xff] }
 0x3c0   : > { %v3723_v21 = vpop.f32.mrf.mxu2  ;;  %4976 = vmatpush.bf16.msra.mxu2 %v11413_v29  ;;  %6083 = vmatpush.bf16.msra.mxu0 %v11509_v12  ;;  %v14706_v29 = vld [vmem:[#allocation87_spill] sm:$0xff] }
 0x3c1   : > { %4916 = vmatmul.bf16.gmra.mxu1 %v9549_v51  ;;  %v3722_v44 = vadd.f32 %v3721_v58, %v3633_v36  ;;  %v14701_v58 = vld [vmem:[#allocation83_spill] sm:$0xff] }
 0x3c2   : > { %v3456_v4 = vpop.f32.mrf.mxu3  ;;  %v11508_v36 = vld [vmem:[%s14503_s2 + $0x3d0] sm:$0xff] }
 0x3c3   : > { %v12889_v10 = vadd.f32 %v3722_v44, %v2412_v38  ;;  %v3457_v0 = vadd.f32 %v3456_v4, %v14701_v58  ;;  %v9568_v44 = vld [vmem:[#allocation3 + $0x148] sm:$0xf]  ;;  %v9196_v12 = vld [vmem:[#allocation3 + $0x290] sm:$0xf]  ;;  %v11265_v58 = vld [vmem:[#allocation3 + $0x2a0] sm:$0xf0] }
 0x3c4   : > { %v12879_v51 = vpop.f32.mrf.mxu0  ;;  %4977 = vmatpush.bf16.msra.mxu2 %v11412_v5  ;;  %6084 = vmatpush.bf16.msra.mxu0 %v11508_v36  ;;  %v11411_v4 = vld [vmem:[%s14503_s2 + $0x348] sm:$0xff]  ;;  %v14708_v5 = vld [vmem:[#allocation20_spill] sm:$0xff]  ;;  %v11410_v36 = vld [vmem:[%s14503_s2 + $0x340] sm:$0xff] }
 0x3c5   : > { %3765 = vmatmul.bf16.gmra.mxu2 %v9177_v9  ;;  %14700 = vst [vmem:[#allocation6_spill] sm:$0xff] %v12889_v10  ;;  %v3546_v35 = vadd.f32 %v14703_v60, %v3457_v0  ;;  %v14704_v9 = vld [vmem:[#allocation48_spill] sm:$0xff]  ;;  %v14707_v0 = vld [vmem:[#allocation90_spill] sm:$0xff] }
 0x3c6   : > { %v12881_v57 = vpop.f32.mrf.mxu1  ;;  %v2414_v43 = vadd.f32 %v14704_v9, %v2325_v49  ;;  %v2328_v3 = vadd.f32 %v14708_v5, %v14707_v0  ;;  %v14709_v49 = vld [vmem:[#allocation84_spill] sm:$0xff]  ;;  %v14711_v9 = vld [vmem:[#allocation22_spill] sm:$0xff] }
 0x3c7   : > { %4872 = vmatmul.bf16.gmra.mxu0 %v9725_v31  ;;  %v3635_v7 = vadd.f32 %v12650_v63, %v3546_v35  ;;  %3498 = vmatmul.bf16.gmra.mxu3 %v9165_v40  ;;  %v11507_v63 = vld [vmem:[%s14503_s2 + $0x3c8] sm:$0xff]  ;;  %v9569_v31 = vor.u32 %v11339_v1, %v9568_v44  ;;  %v11425_v40 = vld [vmem:[%s14503_s2 + $0x3b8] sm:$0xff]  ;;  %v14710_v1 = vld [vmem:[#allocation21_spill] sm:$0xff] }
 0x3c8   : > { %v3726_v42 = vpop.f32.mrf.mxu2  ;;  %4978 = vmatpush.bf16.msra.mxu2 %v11411_v4  ;;  %6085 = vmatpush.bf16.msra.mxu0 %v11507_v63  ;;  %v9742_v4 = vld [vmem:[#allocation3 + $0x2bc] sm:$0xf0]  ;;  %v9197_v63 = vor.u32 %v11265_v58, %v9196_v12  ;;  %v11521_v58 = vld [vmem:[%s14503_s2 + $0x438] sm:$0xff] }
 0x3c9   : > { %v3724_v23 = vadd.f32 %v3723_v21, %v3635_v7  ;;  %v11506_v7 = vld [vmem:[%s14503_s2 + $0x3c0] sm:$0xff]  ;;  %5061 = vmatpush.bf16.msra.mxu3 %v11425_v40  ;;  %v14716_v40 = vld [vmem:[#allocation91_spill] sm:$0xff]  ;;  %6168 = vmatpush.bf16.msra.mxu1 %v11521_v58 }
 0x3ca   : > { %v3459_v24 = vpop.f32.mrf.mxu3 }
 0x3cb   : > { %v12912_v53 = vadd.f32 %v3724_v23, %v2414_v43  ;;  %v3460_v21 = vadd.f32 %v3459_v24, %v14706_v29  ;;  %v2152_v43 = vadd.f32 %v14711_v9, %v14710_v1  ;;  %v14712_v23 = vld [vmem:[#allocation141_spill] sm:$0xff]  ;;  %v11381_v24 = vld [vmem:[#allocation3 + $0x2ac] sm:$0xf]  ;;  %v9182_v1 = vld [vmem:[#allocation3 + $0x294] sm:$0xf0] }
 0x3cc   : > { %v12902_v38 = vpop.f32.mrf.mxu0  ;;  %4979 = vmatpush.bf16.msra.mxu2 %v11410_v36  ;;  %6086 = vmatpush.bf16.msra.mxu0 %v11506_v7  ;;  %v14718_v36 = vld [vmem:[#allocation88_spill] sm:$0xff] }
 0x3cd   : > { %14705 = vst [vmem:[#allocation61_spill] sm:$0xff] %v12912_v53  ;;  %v3549_v60 = vadd.f32 %v14709_v49, %v3460_v21  ;;  %v14714_v21 = vld [vmem:[#allocation50_spill] sm:$0xff] }
 0x3ce   : > { %v12904_v25 = vpop.f32.mrf.mxu1  ;;  %v2417_v0 = vadd.f32 %v14714_v21, %v2328_v3 }
 0x3cf   : > { %v3638_v44 = vadd.f32 %v14712_v23, %v3549_v60  ;;  %v9745_v60 = vor.u32 %v11381_v24, %v9742_v4  ;;  %v11344_v24 = vld [vmem:[#allocation3 + $0x180] sm:$0xf0]  ;;  %v14719_v4 = vld [vmem:[#allocation52_spill] sm:$0xff] }
 0x3d0   : > { %v3728_v35 = vpop.f32.mrf.mxu2 }
 0x3d1   : > { %4921 = vmatmul.bf16.gmra.mxu1 %v9569_v31  ;;  %v14713_v31 = vld [vmem:[#allocation94_spill] sm:$0xff]  ;;  %v3727_v5 = vadd.f32 %v3726_v42, %v3638_v44  ;;  %v14717_v42 = vld [vmem:[#allocation23_spill] sm:$0xff] }
 0x3d2   : > { %v2241_v29 = vadd.f32 %v14713_v31, %v2152_v43  ;;  %v3461_v10 = vpop.f32.mrf.mxu3  ;;  %v9185_v43 = vor.u32 %v11261_v2, %v9182_v1  ;;  %v14722_v1 = vld [vmem:[#allocation98_spill] sm:$0xff] }
 0x3d3   : > { %v12936_v9 = vadd.f32 %v3727_v5, %v2417_v0  ;;  %v3462_v12 = vadd.f32 %v3461_v10, %v14716_v40  ;;  %v9588_v0 = vld [vmem:[#allocation3 + $0x170] sm:$0xf] }
 0x3d4   : > { %v12932_v49 = vpop.f32.mrf.mxu0  ;;  %v2330_v3 = vadd.f32 %v14717_v42, %v2241_v29  ;;  %v9589_v29 = vor.u32 %v11344_v24, %v9588_v0  ;;  %v14721_v40 = vld [vmem:[#allocation95_spill] sm:$0xff]  ;;  %v14728_v0 = vld [vmem:[#allocation54_spill] sm:$0xff] }
 0x3d5   : > { %3770 = vmatmul.bf16.gmra.mxu2 %v9197_v63  ;;  %14715 = vst [vmem:[#allocation36_spill] sm:$0xff] %v12936_v9  ;;  %v3551_v7 = vadd.f32 %v14718_v36, %v3462_v12  ;;  %v14723_v12 = vld [vmem:[#allocation24_spill] sm:$0xff]  ;;  %v11428_v9 = vld [vmem:[#allocation3 + $0x88] sm:$0xf0] }
 0x3d6   : > { %v12934_v53 = vpop.f32.mrf.mxu1  ;;  %v2419_v63 = vadd.f32 %v14719_v4, %v2330_v3  ;;  %v2333_v58 = vadd.f32 %v14723_v12, %v14722_v1  ;;  %v11307_v3 = vld [vmem:[#allocation3 + $0x5c] sm:$0xf]  ;;  %v11308_v12 = vld [vmem:[#allocation3 + $0x60] sm:$0xf0] }
 0x3d7   : > { %4877 = vmatmul.bf16.gmra.mxu0 %v9745_v60  ;;  %v3640_v44 = vadd.f32 %v12680_v20, %v3551_v7  ;;  %3503 = vmatmul.bf16.gmra.mxu3 %v9185_v43  ;;  %v14724_v20 = vld [vmem:[#allocation92_spill] sm:$0xff]  ;;  %v14726_v43 = vld [vmem:[#allocation25_spill] sm:$0xff] }
 0x3d8   : > { %v3731_v23 = vpop.f32.mrf.mxu2  ;;  %v14725_v7 = vld [vmem:[#allocation28_spill] sm:$0xff] }
 0x3d9   : > { %v3729_v31 = vadd.f32 %v3728_v35, %v3640_v44  ;;  %v9450_v35 = vld [vmem:[#allocation3 + $0x6c] sm:$0xf0]  ;;  %v2157_v44 = vadd.f32 %v14726_v43, %v14725_v7  ;;  %v14732_v43 = vld [vmem:[#allocation96_spill] sm:$0xff] }
 0x3da   : > { %v3464_v5 = vpop.f32.mrf.mxu3  ;;  %v14730_v7 = vld [vmem:[#allocation99_spill] sm:$0xff] }
 0x3db   : > { %v12950_v60 = vadd.f32 %v3729_v31, %v2419_v63  ;;  %v3465_v2 = vadd.f32 %v3464_v5, %v14721_v40  ;;  %v9453_v63 = vor.u32 %v11307_v3, %v9450_v35  ;;  %v14727_v31 = vld [vmem:[#allocation102_spill] sm:$0xff]  ;;  %v2422_v5 = vadd.f32 %v14728_v0, %v2333_v58 }
 0x3dc   : > { %v12946_v10 = vpop.f32.mrf.mxu0  ;;  %v2246_v24 = vadd.f32 %v14727_v31, %v2157_v44  ;;  %v14731_v3 = vld [vmem:[#allocation26_spill] sm:$0xff]  ;;  %v9608_v31 = vld [vmem:[#allocation3 + $0x198] sm:$0xf] }
 0x3dd   : > { %14720 = vst [vmem:[#allocation67_spill] sm:$0xff] %v12950_v60  ;;  %v3554_v42 = vadd.f32 %v14724_v20, %v3465_v2  ;;  %v11349_v0 = vld [vmem:[#allocation3 + $0x1a8] sm:$0xf0] }
 0x3de   : > { %v12948_v21 = vpop.f32.mrf.mxu1  ;;  %v2335_v35 = vadd.f32 %v14731_v3, %v2246_v24  ;;  %v9609_v24 = vor.u32 %v11349_v0, %v9608_v31  ;;  %v14739_v31 = vld [vmem:[#allocation56_spill] sm:$0xff] }
 0x3df   : > { %v3643_v4 = vadd.f32 %v12689_v45, %v3554_v42  ;;  %v9440_v42 = vld [vmem:[#allocation3 + $0x50] sm:$0xf] }
 0x3e0   : > { %v3733_v36 = vpop.f32.mrf.mxu2 }
 0x3e1   : > { %4926 = vmatmul.bf16.gmra.mxu1 %v9589_v29  ;;  %v3732_v40 = vadd.f32 %v3731_v23, %v3643_v4  ;;  %v10000_v29 = vld [vmem:[#allocation3 + $0x78] sm:$0xf]  ;;  %v9441_v23 = vor.u32 %v11308_v12, %v9440_v42  ;;  %v14736_v12 = vld [vmem:[#allocation105_spill] sm:$0xff] }
 0x3e2   : > { %v3466_v2 = vpop.f32.mrf.mxu3  ;;  %v10001_v20 = vor.u32 %v11428_v9, %v10000_v29 }
 0x3e3   : > { %v12965_v27 = vadd.f32 %v3732_v40, %v2422_v5  ;;  %v3467_v45 = vadd.f32 %v3466_v2, %v14730_v7 }
 0x3e4   : > { %v12961_v60 = vpop.f32.mrf.mxu0 }
 0x3e5   : > { %4980 = vmatmul.bf16.vlgmr.msra.gmra.mxu2 %v9453_v63  ;;  %14729 = vst [vmem:[#allocation8_spill] sm:$0xff] %v12965_v27  ;;  %v3556_v58 = vadd.f32 %v14732_v43, %v3467_v45  ;;  %v2424_v63 = vadd.f32 %v14733_v14, %v2335_v35  ;;  %v14737_v45 = vld [vmem:[#allocation27_spill] sm:$0xff]  ;;  %v9470_v14 = vld [vmem:[#allocation3 + $0x94] sm:$0xf0] }
 0x3e6   : > { %v12963_v1 = vpop.f32.mrf.mxu1  ;;  %v2338_v42 = vadd.f32 %v14737_v45, %v14736_v12 }
 0x3e7   : > { %6087 = vmatmul.bf16.vlgmr.msra.gmra.mxu0 %v10001_v20  ;;  %v3645_v4 = vadd.f32 %v12698_v32, %v3556_v58  ;;  %4713 = vmatmul.bf16.vlgmr.msrb.gmra.mxu3 %v9441_v23  ;;  %v14735_v20 = vld [vmem:[#allocation103_spill] sm:$0xff]  ;;  %v14738_v32 = vld [vmem:[#allocation100_spill] sm:$0xff]  ;;  %v11312_v58 = vld [vmem:[#allocation3 + $0x84] sm:$0xf] }
 0x3e8   : > { %v3736_v44 = vpop.f32.mrf.mxu2  ;;  %v11433_v23 = vld [vmem:[#allocation3 + $0xb0] sm:$0xf0]  ;;  %v2427_v0 = vadd.f32 %v14739_v31, %v2338_v42  ;;  %v14743_v42 = vld [vmem:[#allocation29_spill] sm:$0xff] }
 0x3e9   : > { %v3734_v9 = vadd.f32 %v3733_v36, %v3645_v4  ;;  %v11424_v36 = vld [vmem:[%s14503_s2 + $0x3b0] sm:$0xff]  ;;  %v9473_v4 = vor.u32 %v11312_v58, %v9470_v14  ;;  %v14744_v14 = vld [vmem:[#allocation104_spill] sm:$0xff] }
 0x3ea   : > { %v3469_v29 = vpop.f32.mrf.mxu3  ;;  %5062 = vmatpush.bf16.msra.mxu3 %v11424_v36 }
 0x3eb   : > { %v12976_v2 = vadd.f32 %v3734_v9, %v2424_v63  ;;  %v3470_v7 = vadd.f32 %v3469_v29, %v14735_v20  ;;  %v10020_v29 = vld [vmem:[#allocation3 + $0xa0] sm:$0xf] }
 0x3ec   : > { %v12972_v5 = vpop.f32.mrf.mxu0  ;;  %v10021_v12 = vor.u32 %v11433_v23, %v10020_v29 }
 0x3ed   : > { %14734 = vst [vmem:[#allocation64_spill] sm:$0xff] %v12976_v2  ;;  %v3559_v3 = vadd.f32 %v14738_v32, %v3470_v7  ;;  %v11313_v7 = vld [vmem:[#allocation3 + $0x88] sm:$0xf0] }
 0x3ee   : > { %v12974_v40 = vpop.f32.mrf.mxu1  ;;  %v14741_v32 = vld [vmem:[#allocation106_spill] sm:$0xff] }
 0x3ef   : > { %v3648_v35 = vadd.f32 %v12705_v18, %v3559_v3  ;;  %v11520_v18 = vld [vmem:[%s14503_s2 + $0x430] sm:$0xff]  ;;  %v9460_v3 = vld [vmem:[#allocation3 + $0x78] sm:$0xf] }
 0x3f0   : > { %v3738_v43 = vpop.f32.mrf.mxu2  ;;  %6169 = vmatpush.bf16.msra.mxu1 %v11520_v18  ;;  %v14749_v18 = vld [vmem:[#allocation30_spill] sm:$0xff] }
 0x3f1   : > { %4931 = vmatmul.bf16.gmra.mxu1 %v9609_v24  ;;  %v3737_v63 = vadd.f32 %v3736_v44, %v3648_v35  ;;  %v14742_v44 = vld [vmem:[#allocation108_spill] sm:$0xff]  ;;  %v9461_v35 = vor.u32 %v11313_v7, %v9460_v3  ;;  %v14748_v3 = vld [vmem:[#allocation111_spill] sm:$0xff] }
 0x3f2   : > { %v3471_v20 = vpop.f32.mrf.mxu3  ;;  %v2340_v58 = vadd.f32 %v14743_v42, %v14742_v44  ;;  %v2343_v42 = vadd.f32 %v14749_v18, %v14748_v3  ;;  %v14753_v3 = vld [vmem:[#allocation112_spill] sm:$0xff] }
 0x3f3   : > { %v12991_v45 = vadd.f32 %v3737_v63, %v2427_v0  ;;  %v3472_v2 = vadd.f32 %v3471_v20, %v14741_v32  ;;  %v11354_v0 = vld [vmem:[#allocation3 + $0x1d0] sm:$0xf0]  ;;  %v14745_v63 = vld [vmem:[#allocation57_spill] sm:$0xff] }
 0x3f4   : > { %v12987_v9 = vpop.f32.mrf.mxu0  ;;  %v2429_v29 = vadd.f32 %v14745_v63, %v2340_v58  ;;  %v9490_v58 = vld [vmem:[#allocation3 + $0xbc] sm:$0xf0]  ;;  %v2432_v30 = vadd.f32 %v14751_v15, %v2343_v42  ;;  %v14756_v15 = vld [vmem:[#allocation110_spill] sm:$0xff] }
 0x3f5   : > { %4985 = vmatmul.bf16.gmra.mxu2 %v9473_v4  ;;  %14740 = vst [vmem:[#allocation9_spill] sm:$0xff] %v12991_v45  ;;  %v3561_v36 = vadd.f32 %v14744_v14, %v3472_v2  ;;  %v9628_v4 = vld [vmem:[#allocation3 + $0x1c0] sm:$0xf] }
 0x3f6   : > { %v12989_v24 = vpop.f32.mrf.mxu1  ;;  %v9629_v44 = vor.u32 %v11354_v0, %v9628_v4  ;;  %v14747_v2 = vld [vmem:[#allocation109_spill] sm:$0xff]  ;;  %v10040_v4 = vld [vmem:[#allocation3 + $0xc8] sm:$0xf] }
 0x3f7   : > { %6092 = vmatmul.bf16.gmra.mxu0 %v10021_v12  ;;  %v3650_v23 = vadd.f32 %v12721_v34, %v3561_v36  ;;  %4718 = vmatmul.bf16.gmra.mxu3 %v9461_v35  ;;  %v14750_v34 = vld [vmem:[#allocation107_spill] sm:$0xff]  ;;  %v11317_v35 = vld [vmem:[#allocation3 + $0xac] sm:$0xf] }
 0x3f8   : > { %v3741_v31 = vpop.f32.mrf.mxu2  ;;  %v9493_v63 = vor.u32 %v11317_v35, %v9490_v58 }
 0x3f9   : > { %v3739_v20 = vadd.f32 %v3738_v43, %v3650_v23  ;;  %v11438_v23 = vld [vmem:[#allocation3 + $0xd8] sm:$0xf0] }
 0x3fa   : > { %v3474_v12 = vpop.f32.mrf.mxu3 }
 0x3fb   : > { %v13006_v27 = vadd.f32 %v3739_v20, %v2429_v29  ;;  %v3475_v7 = vadd.f32 %v3474_v12, %v14747_v2  ;;  %v11318_v2 = vld [vmem:[#allocation3 + $0xb0] sm:$0xf0] }
 0x3fc   : > { %v13002_v32 = vpop.f32.mrf.mxu0 }
 0x3fd   : > { %14746 = vst [vmem:[#allocation11_spill] sm:$0xff] %v13006_v27  ;;  %v3564_v14 = vadd.f32 %v14750_v34, %v3475_v7  ;;  %v9480_v34 = vld [vmem:[#allocation3 + $0xa0] sm:$0xf]  ;;  %v9648_v27 = vld [vmem:[#allocation3 + $0x1e8] sm:$0xf] }
 0x3fe   : > { %v13004_v45 = vpop.f32.mrf.mxu1  ;;  %v9481_v42 = vor.u32 %v11318_v2, %v9480_v34  ;;  %v14760_v2 = vld [vmem:[#allocation117_spill] sm:$0xff]  ;;  %v14761_v34 = vld [vmem:[#allocation32_spill] sm:$0xff] }
 0x3ff   : > { %v3653_v43 = vadd.f32 %v12732_v47, %v3564_v14  ;;  %v14754_v47 = vld [vmem:[#allocation114_spill] sm:$0xff]  ;;  %v14755_v14 = vld [vmem:[#allocation31_spill] sm:$0xff] }
 0x400   : > { %v3743_v36 = vpop.f32.mrf.mxu2  ;;  %v2345_v35 = vadd.f32 %v14755_v14, %v14754_v47  ;;  %v14759_v47 = vld [vmem:[#allocation115_spill] sm:$0xff]  ;;  %v2348_v14 = vadd.f32 %v14761_v34, %v14760_v2  ;;  %v11323_v2 = vld [vmem:[#allocation3 + $0xd8] sm:$0xf0] }
 0x401   : > { %4936 = vmatmul.bf16.gmra.mxu1 %v9629_v44  ;;  %v3742_v29 = vadd.f32 %v3741_v31, %v3653_v43  ;;  %v10041_v44 = vor.u32 %v11438_v23, %v10040_v4 }
 0x402   : > { %v3476_v12 = vpop.f32.mrf.mxu3 }
 0x403   : > { %v13018_v7 = vadd.f32 %v3742_v29, %v2432_v30  ;;  %v3477_v18 = vadd.f32 %v3476_v12, %v14753_v3  ;;  %v9649_v3 = vor.u32 %v11359_v8, %v9648_v27  ;;  %v14763_v27 = vld [vmem:[#allocation62_spill] sm:$0xff] }
 0x404   : > { %v13014_v20 = vpop.f32.mrf.mxu0 }
 0x405   : > { %4990 = vmatmul.bf16.gmra.mxu2 %v9493_v63  ;;  %14752 = vst [vmem:[#allocation38_spill] sm:$0xff] %v13018_v7  ;;  %v3566_v31 = vadd.f32 %v14756_v15, %v3477_v18  ;;  %v14757_v63 = vld [vmem:[#allocation60_spill] sm:$0xff] }
 0x406   : > { %v13016_v0 = vpop.f32.mrf.mxu1  ;;  %v2434_v23 = vadd.f32 %v14757_v63, %v2345_v35  ;;  %v9510_v35 = vld [vmem:[#allocation3 + $0xe4] sm:$0xf0]  ;;  %v11443_v63 = vld [vmem:[#allocation3 + $0x100] sm:$0xf0] }
 0x407   : > { %6097 = vmatmul.bf16.gmra.mxu0 %v10041_v44  ;;  %v3655_v43 = vadd.f32 %v12747_v55, %v3566_v31  ;;  %4723 = vmatmul.bf16.gmra.mxu3 %v9481_v42  ;;  %v14762_v55 = vld [vmem:[#allocation113_spill] sm:$0xff]  ;;  %v11322_v42 = vld [vmem:[#allocation3 + $0xd4] sm:$0xf] }
 0x408   : > { %v3746_v58 = vpop.f32.mrf.mxu2  ;;  %v9513_v8 = vor.u32 %v11322_v42, %v9510_v35  ;;  %v14768_v35 = vld [vmem:[#allocation116_spill] sm:$0xff] }
 0x409   : > { %v3744_v30 = vadd.f32 %v3743_v36, %v3655_v43  ;;  %v11423_v36 = vld [vmem:[%s14503_s2 + $0x3a8] sm:$0xff] }
 0x40a   : > { %v3479_v12 = vpop.f32.mrf.mxu3  ;;  %5063 = vmatpush.bf16.msra.mxu3 %v11423_v36 }
 0x40b   : > { %v13030_v44 = vadd.f32 %v3744_v30, %v2434_v23  ;;  %v3480_v18 = vadd.f32 %v3479_v12, %v14759_v47  ;;  %v2437_v23 = vadd.f32 %v14763_v27, %v2348_v14  ;;  %v14767_v14 = vld [vmem:[#allocation33_spill] sm:$0xff] }
 0x40c   : > { %v13026_v29 = vpop.f32.mrf.mxu0 }
 0x40d   : > { %14758 = vst [vmem:[#allocation70_spill] sm:$0xff] %v13030_v44  ;;  %v3569_v15 = vadd.f32 %v14762_v55, %v3480_v18  ;;  %v14765_v44 = vld [vmem:[#allocation118_spill] sm:$0xff] }
 0x40e   : > { %v13028_v4 = vpop.f32.mrf.mxu1 }
 0x40f   : > { %v3658_v43 = vadd.f32 %v12758_v13, %v3569_v15  ;;  %v11519_v13 = vld [vmem:[%s14503_s2 + $0x428] sm:$0xff] }
 0x410   : > { %v3748_v31 = vpop.f32.mrf.mxu2  ;;  %v9500_v15 = vld [vmem:[#allocation3 + $0xc8] sm:$0xf]  ;;  %6170 = vmatpush.bf16.msra.mxu1 %v11519_v13  ;;  %v14773_v13 = vld [vmem:[#allocation35_spill] sm:$0xff] }
 0x411   : > { %4941 = vmatmul.bf16.gmra.mxu1 %v9649_v3  ;;  %v3747_v30 = vadd.f32 %v3746_v58, %v3658_v43  ;;  %v10060_v3 = vld [vmem:[#allocation3 + $0xf0] sm:$0xf]  ;;  %v14766_v58 = vld [vmem:[#allocation120_spill] sm:$0xff]  ;;  %v9501_v43 = vor.u32 %v11323_v2, %v9500_v15 }
 0x412   : > { %v3481_v18 = vpop.f32.mrf.mxu3  ;;  %v10061_v34 = vor.u32 %v11443_v63, %v10060_v3  ;;  %v2350_v42 = vadd.f32 %v14767_v14, %v14766_v58  ;;  %v14772_v15 = vld [vmem:[#allocation123_spill] sm:$0xff] }
 0x413   : > { %v13045_v55 = vadd.f32 %v3747_v30, %v2437_v23  ;;  %v3482_v7 = vadd.f32 %v3481_v18, %v14765_v44  ;;  %v11364_v23 = vld [vmem:[#allocation3 + $0x220] sm:$0xf0]  ;;  %v2353_v14 = vadd.f32 %v14773_v13, %v14772_v15  ;;  %v14777_v15 = vld [vmem:[#allocation124_spill] sm:$0xff] }
 0x414   : > { %v13041_v12 = vpop.f32.mrf.mxu0  ;;  %v14769_v44 = vld [vmem:[#allocation65_spill] sm:$0xff] }
 0x415   : > { %4995 = vmatmul.bf16.gmra.mxu2 %v9513_v8  ;;  %14764 = vst [vmem:[#allocation10_spill] sm:$0xff] %v13045_v55  ;;  %v3571_v36 = vadd.f32 %v14768_v35, %v3482_v7  ;;  %v9668_v8 = vld [vmem:[#allocation3 + $0x210] sm:$0xf]  ;;  %v2439_v30 = vadd.f32 %v14769_v44, %v2350_v42  ;;  %v14771_v7 = vld [vmem:[#allocation121_spill] sm:$0xff]  ;;  %v2442_v22 = vadd.f32 %v14775_v50, %v2353_v14  ;;  %v14780_v50 = vld [vmem:[#allocation122_spill] sm:$0xff] }
 0x416   : > { %v13043_v47 = vpop.f32.mrf.mxu1  ;;  %v9669_v58 = vor.u32 %v11364_v23, %v9668_v8  ;;  %v9530_v42 = vld [vmem:[#allocation3 + $0x10c] sm:$0xf0]  ;;  %v10080_v8 = vld [vmem:[#allocation3 + $0x118] sm:$0xf] }
 0x417   : > { %6102 = vmatmul.bf16.gmra.mxu0 %v10061_v34  ;;  %v3660_v63 = vadd.f32 %v12776_v37, %v3571_v36  ;;  %4728 = vmatmul.bf16.gmra.mxu3 %v9501_v43  ;;  %v14774_v37 = vld [vmem:[#allocation119_spill] sm:$0xff]  ;;  %v11327_v43 = vld [vmem:[#allocation3 + $0xfc] sm:$0xf] }
 0x418   : > { %v3751_v27 = vpop.f32.mrf.mxu2  ;;  %v9533_v44 = vor.u32 %v11327_v43, %v9530_v42 }
 0x419   : > { %v3749_v3 = vadd.f32 %v3748_v31, %v3660_v63  ;;  %v11448_v63 = vld [vmem:[#allocation3 + $0x128] sm:$0xf0] }
 0x41a   : > { %v3484_v34 = vpop.f32.mrf.mxu3 }
 0x41b   : > { %v13060_v16 = vadd.f32 %v3749_v3, %v2439_v30  ;;  %v3485_v2 = vadd.f32 %v3484_v34, %v14771_v7  ;;  %v11328_v7 = vld [vmem:[#allocation3 + $0x100] sm:$0xf0] }
 0x41c   : > { %v13056_v18 = vpop.f32.mrf.mxu0 }
 0x41d   : > { %14770 = vst [vmem:[#allocation68_spill] sm:$0xff] %v13060_v16  ;;  %v3574_v35 = vadd.f32 %v14774_v37, %v3485_v2  ;;  %v9520_v37 = vld [vmem:[#allocation3 + $0xf0] sm:$0xf]  ;;  %v9688_v16 = vld [vmem:[#allocation3 + $0x238] sm:$0xf] }
 0x41e   : > { %v13058_v55 = vpop.f32.mrf.mxu1  ;;  %v9521_v14 = vor.u32 %v11328_v7, %v9520_v37  ;;  %v14785_v7 = vld [vmem:[#allocation129_spill] sm:$0xff]  ;;  %v14786_v37 = vld [vmem:[#allocation39_spill] sm:$0xff] }
 0x41f   : > { %v3663_v31 = vadd.f32 %v12787_v48, %v3574_v35  ;;  %v14778_v48 = vld [vmem:[#allocation126_spill] sm:$0xff]  ;;  %v14779_v35 = vld [vmem:[#allocation37_spill] sm:$0xff] }
 0x420   : > { %v3753_v36 = vpop.f32.mrf.mxu2  ;;  %v2355_v43 = vadd.f32 %v14779_v35, %v14778_v48  ;;  %v14784_v48 = vld [vmem:[#allocation127_spill] sm:$0xff]  ;;  %v2358_v35 = vadd.f32 %v14786_v37, %v14785_v7  ;;  %v11333_v7 = vld [vmem:[#allocation3 + $0x128] sm:$0xf0] }
 0x421   : > { %4946 = vmatmul.bf16.gmra.mxu1 %v9669_v58  ;;  %v3752_v30 = vadd.f32 %v3751_v27, %v3663_v31  ;;  %v10081_v58 = vor.u32 %v11448_v63, %v10080_v8 }
 0x422   : > { %v3486_v34 = vpop.f32.mrf.mxu3 }
 0x423   : > { %v13072_v2 = vadd.f32 %v3752_v30, %v2442_v22  ;;  %v3487_v13 = vadd.f32 %v3486_v34, %v14777_v15  ;;  %v9689_v15 = vor.u32 %v11369_v11, %v9688_v16  ;;  %v14788_v16 = vld [vmem:[#allocation74_spill] sm:$0xff] }
 0x424   : > { %v13068_v3 = vpop.f32.mrf.mxu0 }
 0x425   : > { %5000 = vmatmul.bf16.gmra.mxu2 %v9533_v44  ;;  %14776 = vst [vmem:[#allocation40_spill] sm:$0xff] %v13072_v2  ;;  %v3576_v27 = vadd.f32 %v14780_v50, %v3487_v13  ;;  %v14781_v44 = vld [vmem:[#allocation72_spill] sm:$0xff] }
 0x426   : > { %v13070_v23 = vpop.f32.mrf.mxu1  ;;  %v2444_v63 = vadd.f32 %v14781_v44, %v2355_v43  ;;  %v9550_v43 = vld [vmem:[#allocation3 + $0x134] sm:$0xf0]  ;;  %v11453_v44 = vld [vmem:[#allocation3 + $0x150] sm:$0xf0] }
 0x427   : > { %6107 = vmatmul.bf16.gmra.mxu0 %v10081_v58  ;;  %v3665_v31 = vadd.f32 %v12802_v26, %v3576_v27  ;;  %4733 = vmatmul.bf16.gmra.mxu3 %v9521_v14  ;;  %v14787_v26 = vld [vmem:[#allocation125_spill] sm:$0xff] }
 0x428   : > { %v3756_v42 = vpop.f32.mrf.mxu2  ;;  %v11332_v14 = vld [vmem:[#allocation3 + $0x124] sm:$0xf] }
 0x429   : > { %v3754_v22 = vadd.f32 %v3753_v36, %v3665_v31  ;;  %v11422_v36 = vld [vmem:[%s14503_s2 + $0x3a0] sm:$0xff]  ;;  %v9553_v11 = vor.u32 %v11332_v14, %v9550_v43  ;;  %v14794_v43 = vld [vmem:[#allocation128_spill] sm:$0xff] }
 0x42a   : > { %v3489_v34 = vpop.f32.mrf.mxu3  ;;  %5064 = vmatpush.bf16.msra.mxu3 %v11422_v36 }
 0x42b   : > { %v13084_v58 = vadd.f32 %v3754_v22, %v2444_v63  ;;  %v3490_v13 = vadd.f32 %v3489_v34, %v14784_v48  ;;  %v2447_v63 = vadd.f32 %v14788_v16, %v2358_v35  ;;  %v14793_v35 = vld [vmem:[#allocation41_spill] sm:$0xff] }
 0x42c   : > { %v13080_v30 = vpop.f32.mrf.mxu0 }
 0x42d   : > { %14782 = vst [vmem:[#allocation12_spill] sm:$0xff] %v13080_v30  ;;  %v3579_v50 = vadd.f32 %v14787_v26, %v3490_v13  ;;  %v11384_v30 = vld [vmem:[#allocation3 + $0x2c0] sm:$0xf0] }
 0x42e   : > { %v13082_v8 = vpop.f32.mrf.mxu1  ;;  %14783 = vst [vmem:[#allocation71_spill] sm:$0xff] %v13084_v58  ;;  %v14791_v58 = vld [vmem:[#allocation130_spill] sm:$0xff] }
 0x42f   : > { %v3668_v31 = vadd.f32 %v12813_v56, %v3579_v50  ;;  %v11518_v56 = vld [vmem:[%s14503_s2 + $0x420] sm:$0xff]  ;;  %v9540_v50 = vld [vmem:[#allocation3 + $0x118] sm:$0xf] }
 0x430   : > { %v3758_v27 = vpop.f32.mrf.mxu2  ;;  %6171 = vmatpush.bf16.msra.mxu1 %v11518_v56  ;;  %v14800_v56 = vld [vmem:[#allocation43_spill] sm:$0xff] }
 0x431   : > { %4951 = vmatmul.bf16.gmra.mxu1 %v9689_v15  ;;  %v3757_v22 = vadd.f32 %v3756_v42, %v3668_v31  ;;  %v10100_v15 = vld [vmem:[#allocation3 + $0x140] sm:$0xf]  ;;  %v14792_v42 = vld [vmem:[#allocation132_spill] sm:$0xff]  ;;  %v9541_v31 = vor.u32 %v11333_v7, %v9540_v50  ;;  %v14799_v50 = vld [vmem:[#allocation135_spill] sm:$0xff] }
 0x432   : > { %v3491_v13 = vpop.f32.mrf.mxu3  ;;  %v10101_v37 = vor.u32 %v11453_v44, %v10100_v15  ;;  %v2360_v14 = vadd.f32 %v14793_v35, %v14792_v42  ;;  %v2363_v35 = vadd.f32 %v14800_v56, %v14799_v50  ;;  %v11338_v50 = vld [vmem:[#allocation3 + $0x150] sm:$0xf0] }
 0x433   : > { %v13099_v26 = vadd.f32 %v3757_v22, %v2447_v63  ;;  %v3492_v2 = vadd.f32 %v3491_v13, %v14791_v58  ;;  %v11374_v63 = vld [vmem:[#allocation3 + $0x270] sm:$0xf0]  ;;  %v14795_v58 = vld [vmem:[#allocation77_spill] sm:$0xff] }
 0x434   : > { %v13095_v34 = vpop.f32.mrf.mxu0  ;;  %v2449_v22 = vadd.f32 %v14795_v58, %v2360_v14  ;;  %v9570_v14 = vld [vmem:[#allocation3 + $0x15c] sm:$0xf0]  ;;  %v11458_v58 = vld [vmem:[#allocation3 + $0x178] sm:$0xf0] }
 0x435   : > { %14789 = vst [vmem:[#allocation13_spill] sm:$0xff] %v13095_v34  ;;  %5005 = vmatmul.bf16.gmra.mxu2 %v9553_v11  ;;  %v3581_v36 = vadd.f32 %v14794_v43, %v3492_v2  ;;  %v9708_v11 = vld [vmem:[#allocation3 + $0x260] sm:$0xf] }
 0x436   : > { %v13097_v48 = vpop.f32.mrf.mxu1  ;;  %14790 = vst [vmem:[#allocation15_spill] sm:$0xff] %v13099_v26  ;;  %v9709_v42 = vor.u32 %v11374_v63, %v9708_v11  ;;  %v14798_v2 = vld [vmem:[#allocation133_spill] sm:$0xff] }
 0x437   : > { %6112 = vmatmul.bf16.gmra.mxu0 %v10101_v37  ;;  %v3670_v44 = vadd.f32 %v12831_v62, %v3581_v36  ;;  %4738 = vmatmul.bf16.gmra.mxu3 %v9541_v31  ;;  %v14801_v62 = vld [vmem:[#allocation131_spill] sm:$0xff]  ;;  %v11337_v31 = vld [vmem:[#allocation3 + $0x14c] sm:$0xf]  ;;  %v14802_v63 = vld [vmem:[#allocation81_spill] sm:$0xff] }
 0x438   : > { %v3761_v16 = vpop.f32.mrf.mxu2  ;;  %v9573_v11 = vor.u32 %v11337_v31, %v9570_v14  ;;  %v9560_v14 = vld [vmem:[#allocation3 + $0x140] sm:$0xf] }
 0x439   : > { %v3759_v15 = vadd.f32 %v3758_v27, %v3670_v44  ;;  %v11517_v27 = vld [vmem:[%s14503_s2 + $0x418] sm:$0xff] }
 0x43a   : > { %v3494_v37 = vpop.f32.mrf.mxu3  ;;  %6172 = vmatpush.bf16.msra.mxu1 %v11517_v27  ;;  %v14807_v27 = vld [vmem:[#allocation45_spill] sm:$0xff] }
 0x43b   : > { %v13114_v34 = vadd.f32 %v3759_v15, %v2449_v22  ;;  %v3495_v7 = vadd.f32 %v3494_v37, %v14798_v2  ;;  %v2452_v22 = vadd.f32 %v14802_v63, %v2363_v35  ;;  %v14806_v35 = vld [vmem:[#allocation138_spill] sm:$0xff]  ;;  %v9561_v63 = vor.u32 %v11338_v50, %v9560_v14 }
 0x43c   : > { %v13110_v13 = vpop.f32.mrf.mxu0 }
 0x43d   : > { %14796 = vst [vmem:[#allocation78_spill] sm:$0xff] %v13110_v13  ;;  %v3584_v43 = vadd.f32 %v14801_v62, %v3495_v7  ;;  %v11516_v62 = vld [vmem:[%s14503_s2 + $0x410] sm:$0xff]  ;;  %v9580_v13 = vld [vmem:[#allocation3 + $0x168] sm:$0xf] }
 0x43e   : > { %v13112_v26 = vpop.f32.mrf.mxu1  ;;  %14797 = vst [vmem:[#allocation42_spill] sm:$0xff] %v13114_v34  ;;  %6173 = vmatpush.bf16.msra.mxu1 %v11516_v62 }
 0x43f   : > { %v3673_v44 = vadd.f32 %v12854_v54, %v3584_v43  ;;  %v14805_v43 = vld [vmem:[#allocation136_spill] sm:$0xff] }
 0x440   : > { %v3763_v36 = vpop.f32.mrf.mxu2 }
 0x441   : > { %4956 = vmatmul.bf16.gmra.mxu1 %v9709_v42  ;;  %v3762_v15 = vadd.f32 %v3761_v16, %v3673_v44  ;;  %v10120_v42 = vld [vmem:[#allocation3 + $0x168] sm:$0xf]  ;;  %v2365_v44 = vadd.f32 %v14807_v27, %v14806_v35 }
 0x442   : > { %v3496_v7 = vpop.f32.mrf.mxu3  ;;  %v10121_v56 = vor.u32 %v11458_v58, %v10120_v42  ;;  %v11515_v16 = vld [vmem:[%s14503_s2 + $0x408] sm:$0xff] }
 0x443   : > { %v13132_v54 = vadd.f32 %v3762_v15, %v2452_v22  ;;  %v3497_v31 = vadd.f32 %v3496_v7, %v14805_v43  ;;  %v9728_v22 = vld [vmem:[#allocation3 + $0x288] sm:$0xf]  ;;  %v11379_v15 = vld [vmem:[#allocation3 + $0x298] sm:$0xf0]  ;;  %6174 = vmatpush.bf16.msra.mxu1 %v11515_v16  ;;  %v14809_v7 = vld [vmem:[#allocation85_spill] sm:$0xff] }
 0x444   : > { %v13125_v37 = vpop.f32.mrf.mxu0  ;;  %v9729_v14 = vor.u32 %v11379_v15, %v9728_v22  ;;  %v11421_v16 = vld [vmem:[%s14503_s2 + $0x398] sm:$0xff]  ;;  %v10140_v22 = vld [vmem:[#allocation3 + $0x190] sm:$0xf]  ;;  %v11463_v15 = vld [vmem:[#allocation3 + $0x1a0] sm:$0xf0] }
 0x445   : > { %14803 = vst [vmem:[#allocation75_spill] sm:$0xff] %v13125_v37  ;;  %5010 = vmatmul.bf16.gmra.mxu2 %v9573_v11  ;;  %v14808_v11 = vld [vmem:[#allocation134_spill] sm:$0xff]  ;;  %5065 = vmatpush.bf16.msra.mxu3 %v11421_v16 }
 0x446   : > { %v13127_v2 = vpop.f32.mrf.mxu1  ;;  %14804 = vst [vmem:[#allocation14_spill] sm:$0xff] %v13132_v54  ;;  %v3586_v58 = vadd.f32 %v14808_v11, %v3497_v31  ;;  %v11514_v31 = vld [vmem:[%s14503_s2 + $0x400] sm:$0xff] }
 0x447   : > { %6117 = vmatmul.bf16.gmra.mxu0 %v10121_v56  ;;  %4743 = vmatmul.bf16.gmra.mxu3 %v9561_v63  ;;  %v2454_v56 = vadd.f32 %v14809_v7, %v2365_v44  ;;  %v14815_v44 = vld [vmem:[#allocation137_spill] sm:$0xff]  ;;  %v11342_v63 = vld [vmem:[#allocation3 + $0x174] sm:$0xf]  ;;  %v9590_v7 = vld [vmem:[#allocation3 + $0x184] sm:$0xf0] }
 0x448   : > { %v3766_v42 = vpop.f32.mrf.mxu2  ;;  %v3675_v34 = vadd.f32 %v12881_v57, %v3586_v58  ;;  %v14812_v57 = vld [vmem:[#allocation139_spill] sm:$0xff]  ;;  %6175 = vmatpush.bf16.msra.mxu1 %v11514_v31 }
 0x44a   : > { %v3764_v62 = vadd.f32 %v3763_v36, %v3675_v34  ;;  %v3499_v37 = vpop.f32.mrf.mxu3  ;;  %v14813_v34 = vld [vmem:[#allocation142_spill] sm:$0xff]  ;;  %v14814_v36 = vld [vmem:[#allocation47_spill] sm:$0xff] }
 0x44b   : > { %v3500_v35 = vadd.f32 %v3499_v37, %v14812_v57  ;;  %v2368_v27 = vadd.f32 %v14814_v36, %v14813_v34  ;;  %v9593_v37 = vor.u32 %v11342_v63, %v9590_v7  ;;  %v14822_v7 = vld [vmem:[#allocation140_spill] sm:$0xff] }
 0x44c   : > { %v13143_v43 = vpop.f32.mrf.mxu0  ;;  %v13150_v50 = vadd.f32 %v3764_v62, %v2454_v56  ;;  %v14816_v62 = vld [vmem:[#allocation89_spill] sm:$0xff] }
 0x44d   : > { %14810 = vst [vmem:[#allocation73_spill] sm:$0xff] %v13143_v43  ;;  %v3589_v11 = vadd.f32 %v14815_v44, %v3500_v35  ;;  %v2457_v57 = vadd.f32 %v14816_v62, %v2368_v27  ;;  %v10141_v35 = vor.u32 %v11463_v15, %v10140_v22  ;;  %v14819_v44 = vld [vmem:[#allocation143_spill] sm:$0xff] }
 0x44e   : > { %v13145_v54 = vpop.f32.mrf.mxu1  ;;  %14811 = vst [vmem:[#allocation44_spill] sm:$0xff] %v13150_v50 }
 0x44f   : > { %v3678_v56 = vadd.f32 %v12904_v25, %v3589_v11  ;;  %v14820_v25 = vld [vmem:[#allocation145_spill] sm:$0xff] }
 0x450   : > { %v3768_v58 = vpop.f32.mrf.mxu2  ;;  %v14821_v11 = vld [vmem:[#allocation49_spill] sm:$0xff] }
 0x451   : > { %4961 = vmatmul.bf16.gmra.mxu1 %v9729_v14  ;;  %v3767_v50 = vadd.f32 %v3766_v42, %v3678_v56  ;;  %v11343_v14 = vld [vmem:[#allocation3 + $0x178] sm:$0xf0]  ;;  %v2370_v63 = vadd.f32 %v14821_v11, %v14820_v25  ;;  %v14826_v25 = vld [vmem:[#allocation146_spill] sm:$0xff] }
 0x452   : > { %v3501_v34 = vpop.f32.mrf.mxu3  ;;  %v9581_v42 = vor.u32 %v11343_v14, %v9580_v13  ;;  %v14827_v13 = vld [vmem:[#allocation148_spill] sm:$0xff]  ;;  %v14828_v14 = vld [vmem:[#allocation51_spill] sm:$0xff] }
 0x453   : > { %v13165_v36 = vadd.f32 %v3767_v50, %v2457_v57  ;;  %v3502_v16 = vadd.f32 %v3501_v34, %v14819_v44  ;;  %v2373_v11 = vadd.f32 %v14828_v14, %v14827_v13  ;;  %v14833_v14 = vld [vmem:[#allocation149_spill] sm:$0xff] }
 0x454   : > { %v13161_v43 = vpop.f32.mrf.mxu0 }
 0x455   : > { %14817 = vst [vmem:[#allocation79_spill] sm:$0xff] %v13161_v43  ;;  %5015 = vmatmul.bf16.gmra.mxu2 %v9593_v37  ;;  %v3591_v27 = vadd.f32 %v14822_v7, %v3502_v16  ;;  %v9748_v43 = vld [vmem:[#allocation3 + $0x2b0] sm:$0xf]  ;;  %v14823_v37 = vld [vmem:[#allocation93_spill] sm:$0xff] }
 0x456   : > { %v13163_v31 = vpop.f32.mrf.mxu1  ;;  %14818 = vst [vmem:[#allocation82_spill] sm:$0xff] %v13165_v36  ;;  %v2459_v22 = vadd.f32 %v14823_v37, %v2370_v63  ;;  %v9749_v44 = vor.u32 %v11384_v30, %v9748_v43  ;;  %v9610_v63 = vld [vmem:[#allocation3 + $0x1ac] sm:$0xf0]  ;;  %v11468_v37 = vld [vmem:[#allocation3 + $0x1c8] sm:$0xf0] }
 0x457   : > { %6122 = vmatmul.bf16.gmra.mxu0 %v10141_v35  ;;  %v3680_v62 = vadd.f32 %v12934_v53, %v3591_v27  ;;  %4748 = vmatmul.bf16.gmra.mxu3 %v9581_v42  ;;  %v14829_v53 = vld [vmem:[#allocation144_spill] sm:$0xff] }
 0x458   : > { %v3771_v56 = vpop.f32.mrf.mxu2  ;;  %v11347_v42 = vld [vmem:[#allocation3 + $0x19c] sm:$0xf] }
 0x459   : > { %v3769_v50 = vadd.f32 %v3768_v58, %v3680_v62  ;;  %v10160_v62 = vld [vmem:[#allocation3 + $0x1b8] sm:$0xf]  ;;  %v9613_v36 = vor.u32 %v11347_v42, %v9610_v63  ;;  %v14835_v42 = vld [vmem:[#allocation147_spill] sm:$0xff] }
 0x45a   : > { %v3504_v34 = vpop.f32.mrf.mxu3 }
 0x45b   : > { %v13177_v35 = vadd.f32 %v3769_v50, %v2459_v22  ;;  %v3505_v16 = vadd.f32 %v3504_v34, %v14826_v25  ;;  %v9600_v25 = vld [vmem:[#allocation3 + $0x190] sm:$0xf] }
 0x45c   : > { %v13173_v15 = vpop.f32.mrf.mxu0 }
 0x45d   : > { %14824 = vst [vmem:[#allocation16_spill] sm:$0xff] %v13173_v15  ;;  %v3594_v7 = vadd.f32 %v14829_v53, %v3505_v16  ;;  %v14830_v15 = vld [vmem:[#allocation97_spill] sm:$0xff]  ;;  %v10161_v16 = vor.u32 %v11468_v37, %v10160_v62 }
 0x45e   : > { %v13175_v57 = vpop.f32.mrf.mxu1  ;;  %14825 = vst [vmem:[#allocation76_spill] sm:$0xff] %v13177_v35  ;;  %v2462_v22 = vadd.f32 %v14830_v15, %v2373_v11  ;;  %v14836_v35 = vld [vmem:[#allocation101_spill] sm:$0xff] }
 0x45f   : > { %v3683_v58 = vadd.f32 %v12948_v21, %v3594_v7  ;;  %v14834_v21 = vld [vmem:[#allocation53_spill] sm:$0xff] }
 0x460   : > { %v3773_v27 = vpop.f32.mrf.mxu2  ;;  %v2375_v7 = vadd.f32 %v14834_v21, %v12701_v6  ;;  %v11420_v6 = vld [vmem:[%s14503_s2 + $0x390] sm:$0xff]  ;;  %v10180_v21 = vld [vmem:[#allocation3 + $0x1e0] sm:$0xf] }
 0x461   : > { %4966 = vmatmul.bf16.gmra.mxu1 %v9749_v44  ;;  %v3772_v50 = vadd.f32 %v3771_v56, %v3683_v58  ;;  %v11348_v44 = vld [vmem:[#allocation3 + $0x1a0] sm:$0xf0]  ;;  %v10002_v58 = vld [vmem:[#allocation3 + $0x8c] sm:$0xf0]  ;;  %5066 = vmatpush.bf16.msra.mxu3 %v11420_v6 }
 0x462   : > { %v3506_v34 = vpop.f32.mrf.mxu3  ;;  %v9601_v56 = vor.u32 %v11348_v44, %v9600_v25  ;;  %v14838_v44 = vld [vmem:[#allocation150_spill] sm:$0xff] }
 0x463   : > { %v13189_v13 = vadd.f32 %v3772_v50, %v2462_v22  ;;  %v3507_v53 = vadd.f32 %v3506_v34, %v14833_v14  ;;  %v11426_v22 = vld [vmem:[#allocation3 + $0x7c] sm:$0xf]  ;;  %v9630_v14 = vld [vmem:[#allocation3 + $0x1d4] sm:$0xf0] }
 0x464   : > { %v13185_v30 = vpop.f32.mrf.mxu0  ;;  %v10005_v25 = vor.u32 %v11426_v22, %v10002_v58  ;;  %v11353_v58 = vld [vmem:[#allocation3 + $0x1c8] sm:$0xf0]  ;;  %v14839_v22 = vld [vmem:[#allocation151_spill] sm:$0xff] }
 0x465   : > { %14831 = vst [vmem:[#allocation17_spill] sm:$0xff] %v13185_v30  ;;  %5020 = vmatmul.bf16.gmra.mxu2 %v9613_v36  ;;  %v3596_v15 = vadd.f32 %v14835_v42, %v3507_v53  ;;  %v2464_v30 = vadd.f32 %v14836_v35, %v2375_v7  ;;  %v11473_v7 = vld [vmem:[#allocation3 + $0x1f0] sm:$0xf0] }
 0x466   : > { %v13187_v43 = vpop.f32.mrf.mxu1  ;;  %14832 = vst [vmem:[#allocation19_spill] sm:$0xff] %v13189_v13 }
 0x467   : > { %6127 = vmatmul.bf16.gmra.mxu0 %v10161_v16  ;;  %v3685_v63 = vadd.f32 %v12963_v1, %v3596_v15  ;;  %4753 = vmatmul.bf16.gmra.mxu3 %v9601_v56  ;;  %v11352_v16 = vld [vmem:[#allocation3 + $0x1c4] sm:$0xf] }
 0x468   : > { %v4981_v11 = vpop.f32.mrf.mxu2  ;;  %v9633_v42 = vor.u32 %v11352_v16, %v9630_v14  ;;  %v11431_v16 = vld [vmem:[#allocation3 + $0xa4] sm:$0xf] }
 0x469   : > { %v3774_v36 = vadd.f32 %v3773_v27, %v3685_v63  ;;  %v9620_v63 = vld [vmem:[#allocation3 + $0x1b8] sm:$0xf] }
 0x46a   : > { %v4714_v50 = vpop.f32.mrf.mxu3  ;;  %v9621_v6 = vor.u32 %v11353_v58, %v9620_v63  ;;  %v11478_v58 = vld [vmem:[#allocation3 + $0x218] sm:$0xf0] }
 0x46b   : > { %v13204_v34 = vadd.f32 %v3774_v36, %v2464_v30  ;;  %v4804_v1 = vadd.f32 %v14838_v44, %v4714_v50  ;;  %v10181_v36 = vor.u32 %v11473_v7, %v10180_v21  ;;  %v10022_v44 = vld [vmem:[#allocation3 + $0xb4] sm:$0xf0] }
 0x46c   : > { %v13197_v62 = vpop.f32.mrf.mxu0 }
 0x46d   : > { %14837 = vst [vmem:[#allocation86_spill] sm:$0xff] %v13204_v34  ;;  %v4893_v35 = vadd.f32 %v12974_v40, %v4804_v1  ;;  %v10025_v34 = vor.u32 %v11431_v16, %v10022_v44  ;;  %v11358_v44 = vld [vmem:[#allocation3 + $0x1f0] sm:$0xf0] }
 0x46e   : > { %v13199_v37 = vpop.f32.mrf.mxu1 }
 0x46f   : > { %v13208_v53 = vadd.f32 %v4981_v11, %v4893_v35 }
 0x470   : > { %v4983_v27 = vpop.f32.mrf.mxu2 }
 0x471   : > { %6176 = vmatmul.bf16.vlgmr.msra.gmra.mxu1 %v10005_v25 }
 0x472   : > { %v4716_v30 = vpop.f32.mrf.mxu3 }
 0x473   : > { %v4806_v50 = vadd.f32 %v14839_v22, %v4716_v30  ;;  %v9650_v30 = vld [vmem:[#allocation3 + $0x1fc] sm:$0xf0] }
 0x474   : > { %v13210_v15 = vpop.f32.mrf.mxu0 }
 0x475   : > { %5025 = vmatmul.bf16.gmra.mxu2 %v9633_v42  ;;  %v4895_v40 = vadd.f32 %v12989_v24, %v4806_v50  ;;  %v11357_v24 = vld [vmem:[#allocation3 + $0x1ec] sm:$0xf] }
 0x476   : > { %v13212_v56 = vpop.f32.mrf.mxu1 }
 0x477   : > { %6132 = vmatmul.bf16.gmra.mxu0 %v10181_v36  ;;  %v13216_v25 = vadd.f32 %v4983_v27, %v4895_v40  ;;  %4758 = vmatmul.bf16.gmra.mxu3 %v9621_v6  ;;  %v10200_v27 = vld [vmem:[#allocation3 + $0x208] sm:$0xf]  ;;  %v9653_v36 = vor.u32 %v11357_v24, %v9650_v30  ;;  %v9640_v6 = vld [vmem:[#allocation3 + $0x1e0] sm:$0xf]  ;;  %v11436_v30 = vld [vmem:[#allocation3 + $0xcc] sm:$0xf] }
 0x478   : > { %v4986_v11 = vpop.f32.mrf.mxu2  ;;  %v9641_v16 = vor.u32 %v11358_v44, %v9640_v6  ;;  %v10220_v44 = vld [vmem:[#allocation3 + $0x230] sm:$0xf] }
 0x47a   : > { %v4719_v14 = vpop.f32.mrf.mxu3 }
 0x47b   : > { %v4809_v21 = vadd.f32 %v12719_v59, %v4719_v14  ;;  %v10201_v59 = vor.u32 %v11478_v58, %v10200_v27  ;;  %v11419_v27 = vld [vmem:[%s14503_s2 + $0x388] sm:$0xff] }
 0x47c   : > { %v13218_v1 = vpop.f32.mrf.mxu0  ;;  %5067 = vmatpush.bf16.msra.mxu3 %v11419_v27 }
 0x47d   : > { %v4898_v7 = vadd.f32 %v13004_v45, %v4809_v21  ;;  %v10042_v21 = vld [vmem:[#allocation3 + $0xdc] sm:$0xf0] }
 0x47e   : > { %v13220_v35 = vpop.f32.mrf.mxu1 }
 0x47f   : > { %v13224_v63 = vadd.f32 %v4986_v11, %v4898_v7 }
 0x480   : > { %v4988_v42 = vpop.f32.mrf.mxu2 }
 0x481   : > { %6181 = vmatmul.bf16.gmra.mxu1 %v10025_v34 }
 0x482   : > { %v4721_v40 = vpop.f32.mrf.mxu3 }
 0x483   : > { %v4811_v34 = vadd.f32 %v12730_v17, %v4721_v40  ;;  %v10045_v17 = vor.u32 %v11436_v30, %v10042_v21  ;;  %v9670_v40 = vld [vmem:[#allocation3 + $0x224] sm:$0xf0]  ;;  %v11363_v30 = vld [vmem:[#allocation3 + $0x218] sm:$0xf0] }
 0x484   : > { %v13226_v22 = vpop.f32.mrf.mxu0  ;;  %v9660_v21 = vld [vmem:[#allocation3 + $0x208] sm:$0xf] }
 0x485   : > { %5030 = vmatmul.bf16.gmra.mxu2 %v9653_v36  ;;  %v4900_v45 = vadd.f32 %v13016_v0, %v4811_v34  ;;  %v11362_v36 = vld [vmem:[#allocation3 + $0x214] sm:$0xf]  ;;  %v9661_v27 = vor.u32 %v11363_v30, %v9660_v21  ;;  %v11488_v21 = vld [vmem:[#allocation3 + $0x268] sm:$0xf0] }
 0x486   : > { %v13228_v50 = vpop.f32.mrf.mxu1  ;;  %v9673_v34 = vor.u32 %v11362_v36, %v9670_v40  ;;  %v11441_v40 = vld [vmem:[#allocation3 + $0xf4] sm:$0xf] }
 0x487   : > { %6137 = vmatmul.bf16.gmra.mxu0 %v10201_v59  ;;  %v13232_v14 = vadd.f32 %v4988_v42, %v4900_v45  ;;  %4763 = vmatmul.bf16.gmra.mxu3 %v9641_v16  ;;  %v11483_v59 = vld [vmem:[#allocation3 + $0x240] sm:$0xf0] }
 0x488   : > { %v4991_v11 = vpop.f32.mrf.mxu2 }
 0x48a   : > { %v4724_v13 = vpop.f32.mrf.mxu3 }
 0x48b   : > { %v4814_v58 = vadd.f32 %v12745_v46, %v4724_v13  ;;  %v10221_v46 = vor.u32 %v11483_v59, %v10220_v44  ;;  %v9690_v59 = vld [vmem:[#allocation3 + $0x24c] sm:$0xf0] }
 0x48c   : > { %v13234_v7 = vpop.f32.mrf.mxu0 }
 0x48d   : > { %14840 = vst [vmem:[#allocation46_spill] sm:$0xff] %v13234_v7  ;;  %v4903_v0 = vadd.f32 %v13028_v4, %v4814_v58  ;;  %v10062_v58 = vld [vmem:[#allocation3 + $0x104] sm:$0xf0] }
 0x48e   : > { %v13236_v24 = vpop.f32.mrf.mxu1 }
 0x48f   : > { %v13243_v6 = vadd.f32 %v4991_v11, %v4903_v0 }
 0x490   : > { %v4993_v42 = vpop.f32.mrf.mxu2 }
 0x491   : > { %6186 = vmatmul.bf16.gmra.mxu1 %v10045_v17  ;;  %14841 = vst [vmem:[#allocation83_spill] sm:$0xff] %v13243_v6  ;;  %v10065_v6 = vor.u32 %v11441_v40, %v10062_v58  ;;  %v11368_v58 = vld [vmem:[#allocation3 + $0x240] sm:$0xf0] }
 0x492   : > { %v4726_v7 = vpop.f32.mrf.mxu3 }
 0x493   : > { %v4816_v13 = vadd.f32 %v12756_v28, %v4726_v7 }
 0x494   : > { %v13245_v45 = vpop.f32.mrf.mxu0 }
 0x495   : > { %14842 = vst [vmem:[#allocation18_spill] sm:$0xff] %v13245_v45  ;;  %5035 = vmatmul.bf16.gmra.mxu2 %v9673_v34  ;;  %v4905_v4 = vadd.f32 %v13043_v47, %v4816_v13  ;;  %v11367_v47 = vld [vmem:[#allocation3 + $0x23c] sm:$0xf] }
 0x496   : > { %v13247_v16 = vpop.f32.mrf.mxu1  ;;  %v9693_v30 = vor.u32 %v11367_v47, %v9690_v59  ;;  %v11446_v59 = vld [vmem:[#allocation3 + $0x11c] sm:$0xf] }
 0x497   : > { %6142 = vmatmul.bf16.gmra.mxu0 %v10221_v46  ;;  %v13251_v17 = vadd.f32 %v4993_v42, %v4905_v4  ;;  %4768 = vmatmul.bf16.gmra.mxu3 %v9661_v27  ;;  %v10240_v42 = vld [vmem:[#allocation3 + $0x258] sm:$0xf]  ;;  %v9680_v27 = vld [vmem:[#allocation3 + $0x230] sm:$0xf] }
 0x498   : > { %v4996_v11 = vpop.f32.mrf.mxu2 }
 0x49a   : > { %v4729_v45 = vpop.f32.mrf.mxu3 }
 0x49b   : > { %v4819_v44 = vadd.f32 %v12774_v19, %v4729_v45  ;;  %v10241_v19 = vor.u32 %v11488_v21, %v10240_v42  ;;  %v9681_v45 = vor.u32 %v11368_v58, %v9680_v27  ;;  %v11418_v42 = vld [vmem:[%s14503_s2 + $0x380] sm:$0xff] }
 0x49c   : > { %v13253_v0 = vpop.f32.mrf.mxu0  ;;  %5068 = vmatpush.bf16.msra.mxu3 %v11418_v42  ;;  %v10260_v58 = vld [vmem:[#allocation3 + $0x280] sm:$0xf]  ;;  %v11528_v42 = vld [vmem:[%s14503_s2 + $0x470] sm:$0xff] }
 0x49d   : > { %v4908_v28 = vadd.f32 %v13058_v55, %v4819_v44  ;;  %v10082_v44 = vld [vmem:[#allocation3 + $0x12c] sm:$0xf0] }
 0x49e   : > { %v13255_v36 = vpop.f32.mrf.mxu1 }
 0x49f   : > { %v13259_v34 = vadd.f32 %v4996_v11, %v4908_v28 }
 0x4a0   : > { %v4998_v7 = vpop.f32.mrf.mxu2 }
 0x4a1   : > { %6191 = vmatmul.bf16.gmra.mxu1 %v10065_v6 }
 0x4a2   : > { %v4731_v4 = vpop.f32.mrf.mxu3 }
 0x4a3   : > { %v4821_v6 = vadd.f32 %v12785_v52, %v4731_v4  ;;  %v10085_v52 = vor.u32 %v11446_v59, %v10082_v44  ;;  %v9710_v4 = vld [vmem:[#allocation3 + $0x274] sm:$0xf0]  ;;  %v11373_v59 = vld [vmem:[#allocation3 + $0x268] sm:$0xf0] }
 0x4a4   : > { %v13261_v46 = vpop.f32.mrf.mxu0 }
 0x4a5   : > { %14843 = vst [vmem:[#allocation80_spill] sm:$0xff] %v13261_v46  ;;  %5040 = vmatmul.bf16.gmra.mxu2 %v9693_v30  ;;  %v4910_v55 = vadd.f32 %v13070_v23, %v4821_v6  ;;  %v11372_v30 = vld [vmem:[#allocation3 + $0x264] sm:$0xf] }
 0x4a6   : > { %v13263_v13 = vpop.f32.mrf.mxu1  ;;  %v9713_v6 = vor.u32 %v11372_v30, %v9710_v4  ;;  %v11544_v30 = vld [vmem:[%s14503_s2 + $0x4f0] sm:$0xff] }
 0x4a7   : > { %6147 = vmatmul.bf16.gmra.mxu0 %v10241_v19  ;;  %v13267_v40 = vadd.f32 %v4998_v7, %v4910_v55  ;;  %4773 = vmatmul.bf16.gmra.mxu3 %v9681_v45  ;;  %v11493_v19 = vld [vmem:[#allocation3 + $0x290] sm:$0xf0]  ;;  %v9700_v55 = vld [vmem:[#allocation3 + $0x258] sm:$0xf] }
 0x4a8   : > { %v5001_v11 = vpop.f32.mrf.mxu2 }
 0x4aa   : > { %v4734_v46 = vpop.f32.mrf.mxu3 }
 0x4ab   : > { %v4824_v21 = vadd.f32 %v12800_v33, %v4734_v46  ;;  %v10261_v33 = vor.u32 %v11493_v19, %v10260_v58  ;;  %v11545_v46 = vld [vmem:[%s14503_s2 + $0x4f8] sm:$0xff] }
 0x4ac   : > { %v13269_v28 = vpop.f32.mrf.mxu0  ;;  %6435 = vmatpush.bf16.msrb.mxu0 %v11545_v46  ;;  %v10102_v58 = vld [vmem:[#allocation3 + $0x154] sm:$0xf0] }
 0x4ad   : > { %14844 = vst [vmem:[#allocation48_spill] sm:$0xff] %v13269_v28  ;;  %v4913_v23 = vadd.f32 %v13082_v8, %v4824_v21  ;;  %v11529_v8 = vld [vmem:[%s14503_s2 + $0x478] sm:$0xff]  ;;  %v9701_v21 = vor.u32 %v11373_v59, %v9700_v55  ;;  %v11543_v55 = vld [vmem:[%s14503_s2 + $0x4e8] sm:$0xff] }
 0x4ae   : > { %v13271_v47 = vpop.f32.mrf.mxu1  ;;  %6257 = vmatpush.bf16.msrb.mxu2 %v11529_v8 }
 0x4af   : > { %v13278_v27 = vadd.f32 %v5001_v11, %v4913_v23 }
 0x4b0   : > { %v5003_v7 = vpop.f32.mrf.mxu2  ;;  %6436 = vmatpush.bf16.msrb.mxu0 %v11544_v30 }
 0x4b1   : > { %6196 = vmatmul.bf16.gmra.mxu1 %v10085_v52 }
 0x4b2   : > { %v4736_v44 = vpop.f32.mrf.mxu3  ;;  %6258 = vmatpush.bf16.msrb.mxu2 %v11528_v42  ;;  %v11526_v42 = vld [vmem:[%s14503_s2 + $0x460] sm:$0xff] }
 0x4b3   : > { %v4826_v11 = vadd.f32 %v12811_v41, %v4736_v44 }
 0x4b4   : > { %v13280_v45 = vpop.f32.mrf.mxu0  ;;  %6437 = vmatpush.bf16.msrb.mxu0 %v11543_v55 }
 0x4b5   : > { %5045 = vmatmul.bf16.gmra.mxu2 %v9713_v6  ;;  %v4915_v52 = vadd.f32 %v13097_v48, %v4826_v11  ;;  %v11451_v6 = vld [vmem:[#allocation3 + $0x144] sm:$0xf]  ;;  %v11527_v48 = vld [vmem:[%s14503_s2 + $0x468] sm:$0xff]  ;;  %v9730_v11 = vld [vmem:[#allocation3 + $0x29c] sm:$0xf0] }
 0x4b6   : > { %v13282_v28 = vpop.f32.mrf.mxu1  ;;  %6259 = vmatpush.bf16.msrb.mxu2 %v11527_v48 }
 0x4b7   : > { %6152 = vmatmul.bf16.gmra.mxu0 %v10261_v33  ;;  %v13298_v4 = vadd.f32 %v5003_v7, %v4915_v52  ;;  %4778 = vmatmul.bf16.gmra.mxu3 %v9701_v21  ;;  %v10105_v7 = vor.u32 %v11451_v6, %v10102_v58  ;;  %v11377_v33 = vld [vmem:[#allocation3 + $0x28c] sm:$0xf]  ;;  %v11542_v52 = vld [vmem:[%s14503_s2 + $0x4e0] sm:$0xff]  ;;  %v11498_v6 = vld [vmem:[#allocation3 + $0x2b8] sm:$0xf0] }
 0x4b8   : > { %v5006_v23 = vpop.f32.mrf.mxu2  ;;  %v11787_v21 = vld [vmem:[#allocation2] sm:$0xff]  ;;  %6438 = vmatpush.bf16.msrb.mxu0 %v11542_v52 }
 0x4b9   : > { %v665_v30 = vpack.c.bf16 %v11787_v21, %v11787_v21 }
 0x4ba   : > { %v4739_v44 = vpop.f32.mrf.mxu3  ;;  %6260 = vmatpush.bf16.msrb.mxu2 %v11526_v42 }
 0x4bb   : > { %v4829_v59 = vadd.f32 %v12829_v61, %v4739_v44  ;;  %v10280_v61 = vld [vmem:[#allocation3 + $0x2a8] sm:$0xf]  ;;  %705 = vst [vmem:[#allocation3 + $0x2d0] sm:$0xf] %v665_v30  ;;  %v9733_v44 = vor.u32 %v11377_v33, %v9730_v11  ;;  %v11541_v33 = vld [vmem:[%s14503_s2 + $0x4d8] sm:$0xff]  ;;  %v11524_v11 = vld [vmem:[%s14503_s2 + $0x450] sm:$0xff] }
 0x4bc   : > { %v13300_v41 = vpop.f32.mrf.mxu0  ;;  %706 = vst [vmem:[#allocation3 + $0x2e4] sm:$0xf] %v665_v30  ;;  %6439 = vmatpush.bf16.msrb.mxu0 %v11541_v33  ;;  %v11540_v30 = vld [vmem:[%s14503_s2 + $0x4d0] sm:$0xff]  ;;  %v9750_v33 = vld [vmem:[#allocation3 + $0x2c4] sm:$0xf0] }
 0x4bd   : > { %14845 = vst [vmem:[#allocation87_spill] sm:$0xff] %v13300_v41  ;;  %v4918_v8 = vadd.f32 %v13112_v26, %v4829_v59  ;;  %v9720_v26 = vld [vmem:[#allocation3 + $0x280] sm:$0xf]  ;;  %v11378_v59 = vld [vmem:[#allocation3 + $0x290] sm:$0xf0]  ;;  %v10281_v41 = vor.u32 %v11498_v6, %v10280_v61 }
 0x4be   : > { %v13302_v19 = vpop.f32.mrf.mxu1  ;;  %v9721_v52 = vor.u32 %v11378_v59, %v9720_v26  ;;  %v10122_v6 = vld [vmem:[#allocation3 + $0x17c] sm:$0xf0]  ;;  %v11523_v59 = vld [vmem:[%s14503_s2 + $0x448] sm:$0xff] }
 0x4bf   : > { %v13318_v58 = vadd.f32 %v5006_v23, %v4918_v8  ;;  %v11525_v23 = vld [vmem:[%s14503_s2 + $0x458] sm:$0xff] }
 0x4c0   : > { %v5008_v46 = vpop.f32.mrf.mxu2  ;;  %6261 = vmatpush.bf16.msrb.mxu2 %v11525_v23  ;;  %6440 = vmatpush.bf16.msrb.mxu0 %v11540_v30  ;;  %v11382_v23 = vld [vmem:[#allocation3 + $0x2b4] sm:$0xf]  ;;  %v11522_v30 = vld [vmem:[%s14503_s2 + $0x440] sm:$0xff] }
 0x4c1   : > { %6201 = vmatmul.bf16.gmra.mxu1 %v10105_v7 }
 0x4c2   : > { %v4741_v7 = vpop.f32.mrf.mxu3 }
 0x4c3   : > { %v4831_v8 = vadd.f32 %v12852_v39, %v4741_v7 }
 0x4c4   : > { %v13320_v48 = vpop.f32.mrf.mxu0  ;;  %6262 = vmatpush.bf16.msrb.mxu2 %v11524_v11 }
 0x4c5   : > { %14846 = vst [vmem:[#allocation90_spill] sm:$0xff] %v13320_v48  ;;  %5050 = vmatmul.bf16.gmra.mxu2 %v9733_v44  ;;  %v4920_v42 = vadd.f32 %v13127_v2, %v4831_v8  ;;  %v11456_v44 = vld [vmem:[#allocation3 + $0x16c] sm:$0xf]  ;;  %v10300_v8 = vld [vmem:[#allocation3 + $0x2d0] sm:$0xf] }
 0x4c6   : > { %v13322_v55 = vpop.f32.mrf.mxu1  ;;  %v10125_v2 = vor.u32 %v11456_v44, %v10122_v6  ;;  %v11538_v6 = vld [vmem:[%s14503_s2 + $0x4c0] sm:$0xff]  ;;  %v11383_v48 = vld [vmem:[#allocation3 + $0x2b8] sm:$0xf0] }
 0x4c7   : > { %6157 = vmatmul.bf16.gmra.mxu0 %v10281_v41  ;;  %v13338_v61 = vadd.f32 %v5008_v46, %v4920_v42  ;;  %4783 = vmatmul.bf16.gmra.mxu3 %v9721_v52  ;;  %v11539_v46 = vld [vmem:[%s14503_s2 + $0x4c8] sm:$0xff]  ;;  %v11503_v52 = vld [vmem:[#allocation3 + $0x2e0] sm:$0xf0] }
 0x4c8   : > { %v5011_v21 = vpop.f32.mrf.mxu2  ;;  %6263 = vmatpush.bf16.msrb.mxu2 %v11523_v59  ;;  %6441 = vmatpush.bf16.msrb.mxu0 %v11539_v46 }
 0x4ca   : > { %v4744_v7 = vpop.f32.mrf.mxu3 }
 0x4cb   : > { %v4834_v26 = vadd.f32 %v12879_v51, %v4744_v7  ;;  %v11537_v51 = vld [vmem:[%s14503_s2 + $0x4b8] sm:$0xff]  ;;  %v10301_v7 = vor.u32 %v11503_v52, %v10300_v8  ;;  %v11461_v52 = vld [vmem:[#allocation3 + $0x194] sm:$0xf] }
 0x4cc   : > { %v13340_v39 = vpop.f32.mrf.mxu0  ;;  %6346 = vmatpush.bf16.msrb.mxu3 %v11537_v51  ;;  %6264 = vmatpush.bf16.msrb.mxu2 %v11522_v30  ;;  %v10142_v51 = vld [vmem:[#allocation3 + $0x1a4] sm:$0xf0] }
 0x4cd   : > { %14847 = vst [vmem:[#allocation20_spill] sm:$0xff] %v13340_v39  ;;  %v4923_v11 = vadd.f32 %v13145_v54, %v4834_v26  ;;  %v9753_v54 = vor.u32 %v11382_v23, %v9750_v33  ;;  %v9740_v39 = vld [vmem:[#allocation3 + $0x2a8] sm:$0xf]  ;;  %6442 = vmatpush.bf16.msrb.mxu0 %v11538_v6 }
 0x4ce   : > { %v13342_v41 = vpop.f32.mrf.mxu1  ;;  %v9741_v33 = vor.u32 %v11383_v48, %v9740_v39  ;;  %v11429_v48 = vld [vmem:[#allocation3 + $0x90] sm:$0xf0] }
 0x4cf   : > { %v13361_v44 = vadd.f32 %v5011_v21, %v4923_v11  ;;  %v11633_v21 = vld [vmem:[%s14503_s2 + $0x538] sm:$0xff] }
 0x4d0   : > { %v5013_v42 = vpop.f32.mrf.mxu2  ;;  %7453 = vmatpush.bf16.msrb.mxu1 %v11633_v21  ;;  %v11430_v21 = vld [vmem:[#allocation3 + $0x98] sm:$0xf0] }
 0x4d1   : > { %6206 = vmatmul.bf16.gmra.mxu1 %v10125_v2 }
 0x4d2   : > { %v4746_v59 = vpop.f32.mrf.mxu3 }
 0x4d3   : > { %v4836_v46 = vadd.f32 %v12902_v38, %v4746_v59 }
 0x4d4   : > { %v13363_v2 = vpop.f32.mrf.mxu0 }
 0x4d5   : > { %14848 = vst [vmem:[#allocation84_spill] sm:$0xff] %v13363_v2  ;;  %5055 = vmatmul.bf16.gmra.mxu2 %v9753_v54  ;;  %v4925_v23 = vadd.f32 %v13163_v31, %v4836_v46  ;;  %v10145_v54 = vor.u32 %v11461_v52, %v10142_v51  ;;  %v10016_v46 = vld [vmem:[#allocation3 + $0x88] sm:$0xf]  ;;  %v11310_v52 = vld [vmem:[#allocation3 + $0x70] sm:$0xf0] }
 0x4d6   : > { %v13365_v26 = vpop.f32.mrf.mxu1 }
 0x4d7   : > { %6162 = vmatmul.bf16.gmra.mxu0 %v10301_v7  ;;  %v13372_v11 = vadd.f32 %v5013_v42, %v4925_v23  ;;  %4788 = vmatmul.bf16.gmra.mxu3 %v9741_v33  ;;  %v10008_v42 = vld [vmem:[#allocation3 + $0x80] sm:$0xf] }
 0x4d8   : > { %v5016_v8 = vpop.f32.mrf.mxu2  ;;  %v10009_v23 = vor.u32 %v11429_v48, %v10008_v42 }
 0x4d9   : > { %14849 = vst [vmem:[#allocation21_spill] sm:$0xff] %v13372_v11  ;;  %v9456_v11 = vld [vmem:[#allocation3 + $0x60] sm:$0xf] }
 0x4da   : > { %v4749_v38 = vpop.f32.mrf.mxu3 }
 0x4db   : > { %v4839_v59 = vadd.f32 %v12932_v49, %v4749_v38  ;;  %v10017_v49 = vor.u32 %v11430_v21, %v10016_v46  ;;  %v10028_v21 = vld [vmem:[#allocation3 + $0xa8] sm:$0xf] }
 0x4dc   : > { %v13374_v30 = vpop.f32.mrf.mxu0 }
 0x4dd   : > { %14850 = vst [vmem:[#allocation22_spill] sm:$0xff] %v13374_v30  ;;  %v4928_v7 = vadd.f32 %v13175_v57, %v4839_v59  ;;  %v11466_v59 = vld [vmem:[#allocation3 + $0x1bc] sm:$0xf] }
 0x4de   : > { %v13376_v6 = vpop.f32.mrf.mxu1 }
 0x4df   : > { %v13380_v39 = vadd.f32 %v5016_v8, %v4928_v7  ;;  %v9457_v8 = vor.u32 %v11310_v52, %v9456_v11  ;;  %v10162_v7 = vld [vmem:[#allocation3 + $0x1cc] sm:$0xf0]  ;;  %v11435_v52 = vld [vmem:[#allocation3 + $0xc0] sm:$0xf0] }
 0x4e0   : > { %v5018_v31 = vpop.f32.mrf.mxu2  ;;  %v11536_v11 = vld [vmem:[%s14503_s2 + $0x4b0] sm:$0xff] }
 0x4e1   : > { %6211 = vmatmul.bf16.gmra.mxu1 %v10145_v54  ;;  %14851 = vst [vmem:[#allocation141_spill] sm:$0xff] %v13380_v39  ;;  %v10165_v39 = vor.u32 %v11466_v59, %v10162_v7  ;;  %6347 = vmatpush.bf16.msrb.mxu3 %v11536_v11  ;;  %v10182_v11 = vld [vmem:[#allocation3 + $0x1f4] sm:$0xf0] }
 0x4e2   : > { %v4751_v2 = vpop.f32.mrf.mxu3 }
 0x4e3   : > { %v4841_v51 = vadd.f32 %v12946_v10, %v4751_v2 }
 0x4e4   : > { %v13382_v33 = vpop.f32.mrf.mxu0 }
 0x4e5   : > { %14852 = vst [vmem:[#allocation94_spill] sm:$0xff] %v13382_v33  ;;  %6265 = vmatmul.bf16.vlgmr.msrb.gmra.mxu2 %v10009_v23  ;;  %v4930_v57 = vadd.f32 %v13187_v43, %v4841_v51  ;;  %v11434_v43 = vld [vmem:[#allocation3 + $0xb8] sm:$0xf0]  ;;  %v10036_v23 = vld [vmem:[#allocation3 + $0xb0] sm:$0xf] }
 0x4e6   : > { %v13384_v30 = vpop.f32.mrf.mxu1 }
 0x4e7   : > { %6443 = vmatmul.bf16.vlgmr.msrb.gmra.mxu0 %v10017_v49  ;;  %v13388_v54 = vadd.f32 %v5018_v31, %v4930_v57  ;;  %5069 = vmatmul.bf16.vlgmr.msra.gmra.mxu3 %v9457_v8  ;;  %v10029_v49 = vor.u32 %v11434_v43, %v10028_v21  ;;  %v11471_v43 = vld [vmem:[#allocation3 + $0x1e4] sm:$0xf] }
 0x4e8   : > { %v5021_v38 = vpop.f32.mrf.mxu2 }
 0x4ea   : > { %v4754_v33 = vpop.f32.mrf.mxu3 }
 0x4eb   : > { %v4844_v46 = vadd.f32 %v12961_v60, %v4754_v33  ;;  %v10037_v33 = vor.u32 %v11435_v52, %v10036_v23  ;;  %v10185_v52 = vor.u32 %v11471_v43, %v10182_v11  ;;  %v11320_v43 = vld [vmem:[#allocation3 + $0xc0] sm:$0xf0] }
 0x4ec   : > { %v13390_v48 = vpop.f32.mrf.mxu0 }
 0x4ed   : > { %v4933_v10 = vadd.f32 %v13199_v37, %v4844_v46  ;;  %v11315_v37 = vld [vmem:[#allocation3 + $0x98] sm:$0xf0] }
 0x4ee   : > { %v13392_v42 = vpop.f32.mrf.mxu1 }
 0x4ef   : > { %v13399_v31 = vadd.f32 %v5021_v38, %v4933_v10  ;;  %v11632_v38 = vld [vmem:[%s14503_s2 + $0x530] sm:$0xff] }
 0x4f0   : > { %v5023_v2 = vpop.f32.mrf.mxu2  ;;  %7454 = vmatpush.bf16.msrb.mxu1 %v11632_v38 }
 0x4f1   : > { %6216 = vmatmul.bf16.gmra.mxu1 %v10165_v39  ;;  %v9476_v39 = vld [vmem:[#allocation3 + $0x88] sm:$0xf] }
 0x4f2   : > { %v4756_v60 = vpop.f32.mrf.mxu3  ;;  %v9477_v7 = vor.u32 %v11315_v37, %v9476_v39  ;;  %v11439_v39 = vld [vmem:[#allocation3 + $0xe0] sm:$0xf0] }
 0x4f3   : > { %v4846_v8 = vadd.f32 %v12972_v5, %v4756_v60 }
 0x4f4   : > { %v13401_v51 = vpop.f32.mrf.mxu0 }
 0x4f5   : > { %14853 = vst [vmem:[#allocation50_spill] sm:$0xff] %v13401_v51  ;;  %6270 = vmatmul.bf16.gmra.mxu2 %v10029_v49  ;;  %v4935_v59 = vadd.f32 %v13212_v56, %v4846_v8  ;;  %v11440_v8 = vld [vmem:[#allocation3 + $0xe8] sm:$0xf0]  ;;  %v9496_v51 = vld [vmem:[#allocation3 + $0xb0] sm:$0xf] }
 0x4f6   : > { %v13403_v57 = vpop.f32.mrf.mxu1 }
 0x4f7   : > { %6448 = vmatmul.bf16.gmra.mxu0 %v10037_v33  ;;  %v13410_v10 = vadd.f32 %v5023_v2, %v4935_v59  ;;  %5074 = vmatmul.bf16.gmra.mxu3 %v9477_v7  ;;  %v10048_v2 = vld [vmem:[#allocation3 + $0xd0] sm:$0xf]  ;;  %v10056_v33 = vld [vmem:[#allocation3 + $0xd8] sm:$0xf] }
 0x4f8   : > { %v5026_v46 = vpop.f32.mrf.mxu2  ;;  %v10049_v38 = vor.u32 %v11439_v39, %v10048_v2 }
 0x4fa   : > { %v4759_v5 = vpop.f32.mrf.mxu3 }
 0x4fb   : > { %v4849_v49 = vadd.f32 %v12987_v9, %v4759_v5  ;;  %v10057_v9 = vor.u32 %v11440_v8, %v10056_v33  ;;  %v10068_v8 = vld [vmem:[#allocation3 + $0xf8] sm:$0xf] }
 0x4fc   : > { %v13412_v21 = vpop.f32.mrf.mxu0 }
 0x4fd   : > { %14854 = vst [vmem:[#allocation91_spill] sm:$0xff] %v13412_v21  ;;  %v4938_v60 = vadd.f32 %v13220_v35, %v4849_v49  ;;  %v11476_v49 = vld [vmem:[#allocation3 + $0x20c] sm:$0xf] }
 0x4fe   : > { %v13414_v23 = vpop.f32.mrf.mxu1 }
 0x4ff   : > { %v13418_v37 = vadd.f32 %v5026_v46, %v4938_v60  ;;  %v9497_v46 = vor.u32 %v11320_v43, %v9496_v51  ;;  %v10202_v60 = vld [vmem:[#allocation3 + $0x21c] sm:$0xf0]  ;;  %v11535_v51 = vld [vmem:[%s14503_s2 + $0x4a8] sm:$0xff]  ;;  %v11445_v43 = vld [vmem:[#allocation3 + $0x110] sm:$0xf0] }
 0x500   : > { %v5028_v56 = vpop.f32.mrf.mxu2  ;;  %6348 = vmatpush.bf16.msrb.mxu3 %v11535_v51  ;;  %v10222_v51 = vld [vmem:[#allocation3 + $0x244] sm:$0xf0] }
 0x501   : > { %6221 = vmatmul.bf16.gmra.mxu1 %v10185_v52  ;;  %14855 = vst [vmem:[#allocation23_spill] sm:$0xff] %v13418_v37  ;;  %v10205_v37 = vor.u32 %v11476_v49, %v10202_v60 }
 0x502   : > { %v4761_v21 = vpop.f32.mrf.mxu3 }
 0x503   : > { %v4851_v11 = vadd.f32 %v13002_v32, %v4761_v21 }
 0x504   : > { %v13420_v59 = vpop.f32.mrf.mxu0 }
 0x505   : > { %14856 = vst [vmem:[#allocation88_spill] sm:$0xff] %v13420_v59  ;;  %6275 = vmatmul.bf16.gmra.mxu2 %v10049_v38  ;;  %v4940_v35 = vadd.f32 %v13228_v50, %v4851_v11  ;;  %v11444_v50 = vld [vmem:[#allocation3 + $0x108] sm:$0xf0]  ;;  %v10076_v38 = vld [vmem:[#allocation3 + $0x100] sm:$0xf] }
 0x506   : > { %v13422_v7 = vpop.f32.mrf.mxu1 }
 0x507   : > { %6453 = vmatmul.bf16.gmra.mxu0 %v10057_v9  ;;  %v13426_v52 = vadd.f32 %v5028_v56, %v4940_v35  ;;  %5079 = vmatmul.bf16.gmra.mxu3 %v9497_v46  ;;  %v10069_v9 = vor.u32 %v11444_v50, %v10068_v8  ;;  %v11481_v50 = vld [vmem:[#allocation3 + $0x234] sm:$0xf] }
 0x508   : > { %v5031_v5 = vpop.f32.mrf.mxu2 }
 0x50a   : > { %v4764_v59 = vpop.f32.mrf.mxu3 }
 0x50b   : > { %v4854_v33 = vadd.f32 %v13014_v20, %v4764_v59  ;;  %v10077_v59 = vor.u32 %v11445_v43, %v10076_v38  ;;  %v10225_v43 = vor.u32 %v11481_v50, %v10222_v51  ;;  %v11330_v50 = vld [vmem:[#allocation3 + $0x110] sm:$0xf0] }
 0x50c   : > { %v13428_v39 = vpop.f32.mrf.mxu0 }
 0x50d   : > { %v4943_v32 = vadd.f32 %v13236_v24, %v4854_v33  ;;  %v11325_v24 = vld [vmem:[#allocation3 + $0xe8] sm:$0xf0] }
 0x50e   : > { %v13430_v2 = vpop.f32.mrf.mxu1 }
 0x50f   : > { %v13437_v56 = vadd.f32 %v5031_v5, %v4943_v32  ;;  %v11631_v5 = vld [vmem:[%s14503_s2 + $0x528] sm:$0xff] }
 0x510   : > { %v5033_v21 = vpop.f32.mrf.mxu2  ;;  %7455 = vmatpush.bf16.msrb.mxu1 %v11631_v5 }
 0x511   : > { %6226 = vmatmul.bf16.gmra.mxu1 %v10205_v37  ;;  %v9516_v37 = vld [vmem:[#allocation3 + $0xd8] sm:$0xf] }
 0x512   : > { %v4766_v20 = vpop.f32.mrf.mxu3  ;;  %v9517_v60 = vor.u32 %v11325_v24, %v9516_v37  ;;  %v11449_v37 = vld [vmem:[#allocation3 + $0x130] sm:$0xf0] }
 0x513   : > { %v4856_v46 = vadd.f32 %v13026_v29, %v4766_v20 }
 0x514   : > { %v13439_v11 = vpop.f32.mrf.mxu0 }
 0x515   : > { %14857 = vst [vmem:[#allocation52_spill] sm:$0xff] %v13439_v11  ;;  %6280 = vmatmul.bf16.gmra.mxu2 %v10069_v9  ;;  %v4945_v49 = vadd.f32 %v13247_v16, %v4856_v46  ;;  %v11450_v46 = vld [vmem:[#allocation3 + $0x138] sm:$0xf0]  ;;  %v9536_v11 = vld [vmem:[#allocation3 + $0x100] sm:$0xf] }
 0x516   : > { %v13441_v35 = vpop.f32.mrf.mxu1 }
 0x517   : > { %6458 = vmatmul.bf16.gmra.mxu0 %v10077_v59  ;;  %v13448_v32 = vadd.f32 %v5033_v21, %v4945_v49  ;;  %5084 = vmatmul.bf16.gmra.mxu3 %v9517_v60  ;;  %v10088_v21 = vld [vmem:[#allocation3 + $0x120] sm:$0xf]  ;;  %v10096_v59 = vld [vmem:[#allocation3 + $0x128] sm:$0xf] }
 0x518   : > { %v5036_v33 = vpop.f32.mrf.mxu2  ;;  %v10089_v5 = vor.u32 %v11449_v37, %v10088_v21 }
 0x51a   : > { %v4769_v29 = vpop.f32.mrf.mxu3 }
 0x51b   : > { %v4859_v9 = vadd.f32 %v13041_v12, %v4769_v29  ;;  %v10097_v12 = vor.u32 %v11450_v46, %v10096_v59  ;;  %v10108_v46 = vld [vmem:[#allocation3 + $0x148] sm:$0xf] }
 0x51c   : > { %v13450_v8 = vpop.f32.mrf.mxu0 }
 0x51d   : > { %14858 = vst [vmem:[#allocation95_spill] sm:$0xff] %v13450_v8  ;;  %v4948_v20 = vadd.f32 %v13255_v36, %v4859_v9  ;;  %v11486_v9 = vld [vmem:[#allocation3 + $0x25c] sm:$0xf] }
 0x51e   : > { %v13452_v38 = vpop.f32.mrf.mxu1 }
 0x51f   : > { %v13456_v24 = vadd.f32 %v5036_v33, %v4948_v20  ;;  %v9537_v33 = vor.u32 %v11330_v50, %v9536_v11  ;;  %v10242_v20 = vld [vmem:[#allocation3 + $0x26c] sm:$0xf0]  ;;  %v11534_v11 = vld [vmem:[%s14503_s2 + $0x4a0] sm:$0xff] }
 0x520   : > { %v5038_v16 = vpop.f32.mrf.mxu2  ;;  %v11455_v50 = vld [vmem:[#allocation3 + $0x160] sm:$0xf0]  ;;  %6349 = vmatpush.bf16.msrb.mxu3 %v11534_v11 }
 0x521   : > { %6231 = vmatmul.bf16.gmra.mxu1 %v10225_v43  ;;  %14859 = vst [vmem:[#allocation98_spill] sm:$0xff] %v13456_v24  ;;  %v10245_v24 = vor.u32 %v11486_v9, %v10242_v20  ;;  %v11491_v11 = vld [vmem:[#allocation3 + $0x284] sm:$0xf] }
 0x522   : > { %v4771_v8 = vpop.f32.mrf.mxu3 }
 0x523   : > { %v4861_v51 = vadd.f32 %v13056_v18, %v4771_v8 }
 0x524   : > { %v13458_v49 = vpop.f32.mrf.mxu0 }
 0x525   : > { %14860 = vst [vmem:[#allocation24_spill] sm:$0xff] %v13458_v49  ;;  %6285 = vmatmul.bf16.gmra.mxu2 %v10089_v5  ;;  %v4950_v36 = vadd.f32 %v13263_v13, %v4861_v51  ;;  %v11454_v13 = vld [vmem:[#allocation3 + $0x158] sm:$0xf0]  ;;  %v10116_v5 = vld [vmem:[#allocation3 + $0x150] sm:$0xf] }
 0x526   : > { %v13460_v60 = vpop.f32.mrf.mxu1 }
 0x527   : > { %6463 = vmatmul.bf16.gmra.mxu0 %v10097_v12  ;;  %v13464_v43 = vadd.f32 %v5038_v16, %v4950_v36  ;;  %5089 = vmatmul.bf16.gmra.mxu3 %v9537_v33  ;;  %v10109_v12 = vor.u32 %v11454_v13, %v10108_v46  ;;  %v14864_v33 = vld [vmem:[#allocation12_spill] sm:$0xff] }
 0x528   : > { %v5041_v29 = vpop.f32.mrf.mxu2  ;;  %v10262_v46 = vld [vmem:[#allocation3 + $0x294] sm:$0xf0] }
 0x52a   : > { %v4774_v49 = vpop.f32.mrf.mxu3 }
 0x52b   : > { %v4864_v59 = vadd.f32 %v13068_v3, %v4774_v49  ;;  %v10117_v49 = vor.u32 %v11455_v50, %v10116_v5 }
 0x52c   : > { %v13466_v37 = vpop.f32.mrf.mxu0 }
 0x52d   : > { %14861 = vst [vmem:[#allocation92_spill] sm:$0xff] %v13466_v37  ;;  %v4953_v18 = vadd.f32 %v13271_v47, %v4864_v59  ;;  %v11335_v47 = vld [vmem:[#allocation3 + $0x138] sm:$0xf0]  ;;  %v745_v37 = vld [vmem:[#allocation2 + $0x1b1] sm:$0xff] }
 0x52e   : > { %v13468_v21 = vpop.f32.mrf.mxu1 }
 0x52f   : > { %v13475_v16 = vadd.f32 %v5041_v29, %v4953_v18  ;;  %v11630_v29 = vld [vmem:[%s14503_s2 + $0x520] sm:$0xff] }
 0x530   : > { %v5043_v8 = vpop.f32.mrf.mxu2  ;;  %7456 = vmatpush.bf16.msrb.mxu1 %v11630_v29  ;;  %v10128_v29 = vld [vmem:[#allocation3 + $0x170] sm:$0xf] }
 0x531   : > { %6236 = vmatmul.bf16.gmra.mxu1 %v10245_v24  ;;  %14862 = vst [vmem:[#allocation28_spill] sm:$0xff] %v13475_v16  ;;  %v9556_v24 = vld [vmem:[#allocation3 + $0x128] sm:$0xf]  ;;  %v785_v16 = vpack.c.bf16 %v745_v37, %v745_v37 }
 0x532   : > { %v4776_v3 = vpop.f32.mrf.mxu3  ;;  %v9557_v59 = vor.u32 %v11335_v47, %v9556_v24  ;;  %v11459_v47 = vld [vmem:[#allocation3 + $0x180] sm:$0xf0] }
 0x533   : > { %v4866_v9 = vadd.f32 %v14864_v33, %v4776_v3  ;;  %v14867_v3 = vld [vmem:[#allocation13_spill] sm:$0xff]  ;;  %825 = vst [vmem:[#allocation3 + $0x2d4] sm:$0xf] %v785_v16  ;;  %v11628_v16 = vld [vmem:[%s14503_s2 + $0x510] sm:$0xff] }
 0x534   : > { %v13477_v51 = vpop.f32.mrf.mxu0 }
 0x535   : > { %14863 = vst [vmem:[#allocation25_spill] sm:$0xff] %v13477_v51  ;;  %6290 = vmatmul.bf16.gmra.mxu2 %v10109_v12  ;;  %v4955_v20 = vadd.f32 %v13282_v28, %v4866_v9  ;;  %v10265_v12 = vor.u32 %v11491_v11, %v10262_v46  ;;  %v11629_v9 = vld [vmem:[%s14503_s2 + $0x518] sm:$0xff]  ;;  %v11460_v11 = vld [vmem:[#allocation3 + $0x188] sm:$0xf0]  ;;  %v10129_v46 = vor.u32 %v11459_v47, %v10128_v29 }
 0x536   : > { %v13479_v36 = vpop.f32.mrf.mxu1  ;;  %7457 = vmatpush.bf16.msrb.mxu1 %v11629_v9  ;;  %v11627_v47 = vld [vmem:[%s14503_s2 + $0x508] sm:$0xff] }
 0x537   : > { %6468 = vmatmul.bf16.gmra.mxu0 %v10117_v49  ;;  %v13486_v13 = vadd.f32 %v5043_v8, %v4955_v20  ;;  %5094 = vmatmul.bf16.gmra.mxu3 %v9557_v59  ;;  %v746_v49 = vld [vmem:[#allocation2 + $0x1b9] sm:$0xff]  ;;  %v11496_v29 = vld [vmem:[#allocation3 + $0x2ac] sm:$0xf] }
 0x538   : > { %v5046_v18 = vpop.f32.mrf.mxu2  ;;  %v786_v28 = vpack.c.bf16 %v746_v49, %v746_v49  ;;  %v10136_v59 = vld [vmem:[#allocation3 + $0x178] sm:$0xf]  ;;  %v14870_v49 = vld [vmem:[#allocation78_spill] sm:$0xff] }
 0x539   : > { %14865 = vst [vmem:[#allocation102_spill] sm:$0xff] %v13486_v13 }
 0x53a   : > { %v4779_v50 = vpop.f32.mrf.mxu3  ;;  %826 = vst [vmem:[#allocation3 + $0x2e8] sm:$0xf] %v786_v28  ;;  %7458 = vmatpush.bf16.msrb.mxu1 %v11628_v16  ;;  %v10148_v16 = vld [vmem:[#allocation3 + $0x198] sm:$0xf] }
 0x53b   : > { %v4869_v33 = vadd.f32 %v14867_v3, %v4779_v50  ;;  %v11340_v3 = vld [vmem:[#allocation3 + $0x160] sm:$0xf0] }
 0x53c   : > { %v13488_v51 = vpop.f32.mrf.mxu0 }
 0x53d   : > { %14866 = vst [vmem:[#allocation54_spill] sm:$0xff] %v13488_v51  ;;  %v4958_v24 = vadd.f32 %v13302_v19, %v4869_v33  ;;  %v10137_v33 = vor.u32 %v11460_v11, %v10136_v59  ;;  %v10282_v59 = vld [vmem:[#allocation3 + $0x2bc] sm:$0xf0] }
 0x53e   : > { %v13490_v5 = vpop.f32.mrf.mxu1  ;;  %7459 = vmatpush.bf16.msrb.mxu1 %v11627_v47  ;;  %v10156_v47 = vld [vmem:[#allocation3 + $0x1a0] sm:$0xf] }
 0x53f   : > { %v13497_v20 = vadd.f32 %v5046_v18, %v4958_v24 }
 0x540   : > { %v5048_v8 = vpop.f32.mrf.mxu2 }
 0x541   : > { %6241 = vmatmul.bf16.gmra.mxu1 %v10265_v12  ;;  %14868 = vst [vmem:[#allocation99_spill] sm:$0xff] %v13497_v20  ;;  %v9576_v12 = vld [vmem:[#allocation3 + $0x150] sm:$0xf] }
 0x542   : > { %v4781_v19 = vpop.f32.mrf.mxu3  ;;  %v9577_v28 = vor.u32 %v11340_v3, %v9576_v12  ;;  %v11626_v12 = vld [vmem:[%s14503_s2 + $0x500] sm:$0xff] }
 0x543   : > { %v4871_v51 = vadd.f32 %v14870_v49, %v4781_v19  ;;  %7460 = vmatpush.bf16.msrb.mxu1 %v11626_v12 }
 0x544   : > { %v13499_v37 = vpop.f32.mrf.mxu0 }
 0x545   : > { %14869 = vst [vmem:[#allocation26_spill] sm:$0xff] %v13499_v37  ;;  %6295 = vmatmul.bf16.gmra.mxu2 %v10129_v46  ;;  %v4960_v18 = vadd.f32 %v13322_v55, %v4871_v51  ;;  %v14873_v55 = vld [vmem:[#allocation75_spill] sm:$0xff]  ;;  %v9596_v37 = vld [vmem:[#allocation3 + $0x178] sm:$0xf] }
 0x546   : > { %v13501_v50 = vpop.f32.mrf.mxu1 }
 0x547   : > { %6473 = vmatmul.bf16.gmra.mxu0 %v10137_v33  ;;  %v13511_v9 = vadd.f32 %v5048_v8, %v4960_v18  ;;  %5099 = vmatmul.bf16.gmra.mxu3 %v9577_v28  ;;  %v10285_v33 = vor.u32 %v11496_v29, %v10282_v59  ;;  %v11533_v8 = vld [vmem:[%s14503_s2 + $0x498] sm:$0xff]  ;;  %v11464_v18 = vld [vmem:[#allocation3 + $0x1a8] sm:$0xf0]  ;;  %v11465_v29 = vld [vmem:[#allocation3 + $0x1b0] sm:$0xf0] }
 0x548   : > { %v5051_v24 = vpop.f32.mrf.mxu2  ;;  %6350 = vmatpush.bf16.msrb.mxu3 %v11533_v8  ;;  %v10149_v59 = vor.u32 %v11464_v18, %v10148_v16 }
 0x549   : > { %14871 = vst [vmem:[#allocation96_spill] sm:$0xff] %v13511_v9  ;;  %v11345_v9 = vld [vmem:[#allocation3 + $0x188] sm:$0xf0] }
 0x54a   : > { %v4784_v19 = vpop.f32.mrf.mxu3  ;;  %v9597_v12 = vor.u32 %v11345_v9, %v9596_v37  ;;  %v11469_v37 = vld [vmem:[#allocation3 + $0x1d0] sm:$0xf0] }
 0x54b   : > { %v4874_v51 = vadd.f32 %v14873_v55, %v4784_v19 }
 0x54c   : > { %v13513_v11 = vpop.f32.mrf.mxu0 }
 0x54d   : > { %14872 = vst [vmem:[#allocation55_spill] sm:$0xff] %v13513_v11  ;;  %v4963_v3 = vadd.f32 %v13342_v41, %v4874_v51  ;;  %v14876_v41 = vld [vmem:[#allocation73_spill] sm:$0xff] }
 0x54e   : > { %v13515_v46 = vpop.f32.mrf.mxu1 }
 0x54f   : > { %v13525_v28 = vadd.f32 %v5051_v24, %v4963_v3  ;;  %v11501_v3 = vld [vmem:[#allocation3 + $0x2d4] sm:$0xf] }
 0x550   : > { %v5053_v49 = vpop.f32.mrf.mxu2 }
 0x551   : > { %6246 = vmatmul.bf16.gmra.mxu1 %v10285_v33  ;;  %14874 = vst [vmem:[#allocation103_spill] sm:$0xff] %v13525_v28  ;;  %v10157_v33 = vor.u32 %v11465_v29, %v10156_v47  ;;  %v10302_v28 = vld [vmem:[#allocation3 + $0x2e4] sm:$0xf0] }
 0x552   : > { %v4786_v11 = vpop.f32.mrf.mxu3  ;;  %v10305_v16 = vor.u32 %v11501_v3, %v10302_v28  ;;  %v11350_v3 = vld [vmem:[#allocation3 + $0x1b0] sm:$0xf0] }
 0x553   : > { %v4876_v51 = vadd.f32 %v14876_v41, %v4786_v11 }
 0x554   : > { %v13527_v19 = vpop.f32.mrf.mxu0 }
 0x555   : > { %14875 = vst [vmem:[#allocation105_spill] sm:$0xff] %v13527_v19  ;;  %6300 = vmatmul.bf16.gmra.mxu2 %v10149_v59  ;;  %v4965_v8 = vadd.f32 %v13365_v26, %v4876_v51  ;;  %v14878_v59 = vld [vmem:[#allocation79_spill] sm:$0xff]  ;;  %v10168_v26 = vld [vmem:[#allocation3 + $0x1c0] sm:$0xf] }
 0x556   : > { %v13529_v55 = vpop.f32.mrf.mxu1  ;;  %v10169_v41 = vor.u32 %v11469_v37, %v10168_v26 }
 0x557   : > { %6478 = vmatmul.bf16.gmra.mxu0 %v10157_v33  ;;  %v13533_v20 = vadd.f32 %v5053_v49, %v4965_v8  ;;  %5104 = vmatmul.bf16.gmra.mxu3 %v9597_v12  ;;  %v10176_v33 = vld [vmem:[#allocation3 + $0x1c8] sm:$0xf]  ;;  %v11470_v49 = vld [vmem:[#allocation3 + $0x1d8] sm:$0xf0]  ;;  %v9616_v12 = vld [vmem:[#allocation3 + $0x1a0] sm:$0xf] }
 0x558   : > { %v5056_v24 = vpop.f32.mrf.mxu2 }
 0x55a   : > { %v4789_v13 = vpop.f32.mrf.mxu3 }
 0x55b   : > { %v4879_v47 = vadd.f32 %v14878_v59, %v4789_v13  ;;  %v10177_v13 = vor.u32 %v11470_v49, %v10176_v33  ;;  %v10560_v33 = vld [vmem:[#allocation3 + $0xa0] sm:$0xf] }
 0x55c   : > { %v13535_v18 = vpop.f32.mrf.mxu0 }
 0x55d   : > { %14877 = vst [vmem:[#allocation27_spill] sm:$0xff] %v13535_v18  ;;  %v4968_v11 = vadd.f32 %v13376_v6, %v4879_v47  ;;  %v14882_v6 = vld [vmem:[#allocation17_spill] sm:$0xff] }
 0x55e   : > { %v13537_v19 = vpop.f32.mrf.mxu1  ;;  %v6178_v47 = vadd.f32 %v13392_v42, %v14882_v6  ;;  %v11475_v6 = vld [vmem:[#allocation3 + $0x200] sm:$0xf0] }
 0x55f   : > { %v13541_v9 = vadd.f32 %v5056_v24, %v4968_v11  ;;  %v9617_v11 = vor.u32 %v11350_v3, %v9616_v12 }
 0x560   : > { %v5058_v29 = vpop.f32.mrf.mxu2 }
 0x561   : > { %6251 = vmatmul.bf16.gmra.mxu1 %v10305_v16  ;;  %14879 = vst [vmem:[#allocation100_spill] sm:$0xff] %v13541_v9  ;;  %v14881_v16 = vld [vmem:[#allocation16_spill] sm:$0xff] }
 0x562   : > { %v4791_v8 = vpop.f32.mrf.mxu3 }
 0x563   : > { %v4881_v59 = vadd.f32 %v14881_v16, %v4791_v8  ;;  %v11474_v16 = vld [vmem:[#allocation3 + $0x1f8] sm:$0xf0] }
 0x564   : > { %v13543_v51 = vpop.f32.mrf.mxu0 }
 0x565   : > { %14880 = vst [vmem:[#allocation56_spill] sm:$0xff] %v13543_v51  ;;  %6305 = vmatmul.bf16.gmra.mxu2 %v10169_v41  ;;  %v4970_v24 = vadd.f32 %v13384_v30, %v4881_v59  ;;  %v11548_v51 = vld [vmem:[#allocation3 + $0xb0] sm:$0xf0] }
 0x566   : > { %v13545_v28 = vpop.f32.mrf.mxu1  ;;  %v10561_v8 = vor.u32 %v11548_v51, %v10560_v33  ;;  %v11532_v30 = vld [vmem:[%s14503_s2 + $0x490] sm:$0xff]  ;;  %v9636_v33 = vld [vmem:[#allocation3 + $0x1c8] sm:$0xf] }
 0x567   : > { %6483 = vmatmul.bf16.gmra.mxu0 %v10177_v13  ;;  %v13553_v37 = vadd.f32 %v5058_v29, %v4970_v24  ;;  %5109 = vmatmul.bf16.gmra.mxu3 %v9617_v11  ;;  %v14883_v29 = vld [vmem:[#allocation152_spill] sm:$0xff]  ;;  %v10188_v13 = vld [vmem:[#allocation3 + $0x1e8] sm:$0xf]  ;;  %v10196_v51 = vld [vmem:[#allocation3 + $0x1f0] sm:$0xf] }
 0x568   : > { %v6266_v18 = vpop.f32.mrf.mxu2  ;;  %6351 = vmatpush.bf16.msrb.mxu3 %v11532_v30 }
 0x569   : > { %v13551_v26 = vadd.f32 %v6266_v18, %v6178_v47  ;;  %v6180_v18 = vadd.f32 %v13403_v57, %v13197_v62  ;;  %v11355_v62 = vld [vmem:[#allocation3 + $0x1d8] sm:$0xf0]  ;;  %v10197_v57 = vor.u32 %v11475_v6, %v10196_v51  ;;  %v10580_v51 = vld [vmem:[#allocation3 + $0xc8] sm:$0xf] }
 0x56a   : > { %v5070_v49 = vpop.f32.mrf.mxu3 }
 0x56b   : > { %v5071_v42 = vadd.f32 %v5070_v49, %v13208_v53  ;;  %v10189_v53 = vor.u32 %v11474_v16, %v10188_v13  ;;  %v11553_v13 = vld [vmem:[#allocation3 + $0xd8] sm:$0xf0] }
 0x56c   : > { %v13555_v9 = vpop.f32.mrf.mxu0 }
 0x56d   : > { %v13566_v12 = vadd.f32 %v5071_v42, %v14883_v29  ;;  %v14885_v42 = vld [vmem:[#allocation153_spill] sm:$0xff] }
 0x56e   : > { %v13557_v41 = vpop.f32.mrf.mxu1 }
 0x570   : > { %v6268_v3 = vpop.f32.mrf.mxu2 }
 0x571   : > { %7461 = vmatmul.bf16.vlgmr.msrb.gmra.mxu1 %v10561_v8  ;;  %v13568_v59 = vadd.f32 %v6268_v3, %v6180_v18  ;;  %v6183_v8 = vadd.f32 %v13414_v23, %v13210_v15  ;;  %v9637_v18 = vor.u32 %v11355_v62, %v9636_v33  ;;  %v6185_v15 = vadd.f32 %v13422_v7, %v13218_v1  ;;  %v14887_v23 = vld [vmem:[#allocation154_spill] sm:$0xff]  ;;  %v10208_v62 = vld [vmem:[#allocation3 + $0x210] sm:$0xf] }
 0x572   : > { %v5072_v11 = vpop.f32.mrf.mxu3 }
 0x573   : > { %v5073_v49 = vadd.f32 %v5072_v11, %v13216_v25  ;;  %v10581_v25 = vor.u32 %v11553_v13, %v10580_v51  ;;  %v9656_v51 = vld [vmem:[#allocation3 + $0x1f0] sm:$0xf] }
 0x574   : > { %v13570_v47 = vpop.f32.mrf.mxu0 }
 0x575   : > { %14884 = vst [vmem:[#allocation106_spill] sm:$0xff] %v13570_v47  ;;  %6310 = vmatmul.bf16.gmra.mxu2 %v10189_v53  ;;  %v13578_v30 = vadd.f32 %v5073_v49, %v14885_v42  ;;  %v11480_v42 = vld [vmem:[#allocation3 + $0x228] sm:$0xf0] }
 0x576   : > { %v13572_v24 = vpop.f32.mrf.mxu1 }
 0x577   : > { %6488 = vmatmul.bf16.gmra.mxu0 %v10197_v57  ;;  %5114 = vmatmul.bf16.gmra.mxu3 %v9637_v18  ;;  %v11479_v57 = vld [vmem:[#allocation3 + $0x220] sm:$0xf0] }
 0x578   : > { %v6271_v29 = vpop.f32.mrf.mxu2  ;;  %v10209_v18 = vor.u32 %v11479_v57, %v10208_v62  ;;  %v11558_v57 = vld [vmem:[#allocation3 + $0x100] sm:$0xf0] }
 0x579   : > { %v13580_v3 = vadd.f32 %v6271_v29, %v6183_v8  ;;  %v10216_v8 = vld [vmem:[#allocation3 + $0x218] sm:$0xf] }
 0x57a   : > { %v5075_v6 = vpop.f32.mrf.mxu3  ;;  %v10217_v1 = vor.u32 %v11480_v42, %v10216_v8  ;;  %v10600_v8 = vld [vmem:[#allocation3 + $0xf0] sm:$0xf] }
 0x57b   : > { %v5076_v53 = vadd.f32 %v5075_v6, %v13224_v63  ;;  %v11360_v6 = vld [vmem:[#allocation3 + $0x200] sm:$0xf0] }
 0x57c   : > { %v13582_v16 = vpop.f32.mrf.mxu0 }
 0x57d   : > { %14886 = vst [vmem:[#allocation108_spill] sm:$0xff] %v13582_v16  ;;  %v13590_v11 = vadd.f32 %v5076_v53, %v14887_v23  ;;  %v14889_v53 = vld [vmem:[#allocation155_spill] sm:$0xff]  ;;  %v9657_v23 = vor.u32 %v11360_v6, %v9656_v51 }
 0x57e   : > { %v13584_v47 = vpop.f32.mrf.mxu1  ;;  %v14894_v6 = vld [vmem:[#allocation59_spill] sm:$0xff] }
 0x580   : > { %v6273_v33 = vpop.f32.mrf.mxu2 }
 0x581   : > { %7466 = vmatmul.bf16.gmra.mxu1 %v10581_v25  ;;  %v13592_v49 = vadd.f32 %v6273_v33, %v6185_v15  ;;  %v6188_v25 = vadd.f32 %v13430_v2, %v13226_v22  ;;  %v11531_v22 = vld [vmem:[%s14503_s2 + $0x488] sm:$0xff] }
 0x582   : > { %v5077_v63 = vpop.f32.mrf.mxu3  ;;  %v14893_v2 = vld [vmem:[#allocation46_spill] sm:$0xff]  ;;  %6352 = vmatpush.bf16.msrb.mxu3 %v11531_v22  ;;  %v14899_v22 = vld [vmem:[#allocation5_spill] sm:$0xff] }
 0x583   : > { %v5078_v7 = vadd.f32 %v5077_v63, %v13232_v14  ;;  %v10601_v14 = vor.u32 %v11558_v57, %v10600_v8  ;;  %v6190_v51 = vadd.f32 %v13441_v35, %v14893_v2  ;;  %v11485_v57 = vld [vmem:[#allocation3 + $0x250] sm:$0xf0]  ;;  %v11365_v35 = vld [vmem:[#allocation3 + $0x228] sm:$0xf0] }
 0x584   : > { %v13594_v29 = vpop.f32.mrf.mxu0  ;;  %v14898_v2 = vld [vmem:[#allocation18_spill] sm:$0xff] }
 0x585   : > { %14888 = vst [vmem:[#allocation29_spill] sm:$0xff] %v13594_v29  ;;  %6315 = vmatmul.bf16.gmra.mxu2 %v10209_v18  ;;  %v13602_v15 = vadd.f32 %v5078_v7, %v14889_v53  ;;  %v14892_v18 = vld [vmem:[#allocation83_spill] sm:$0xff]  ;;  %v11484_v53 = vld [vmem:[#allocation3 + $0x248] sm:$0xf0] }
 0x586   : > { %v13596_v13 = vpop.f32.mrf.mxu1 }
 0x587   : > { %6493 = vmatmul.bf16.gmra.mxu0 %v10217_v1  ;;  %5119 = vmatmul.bf16.gmra.mxu3 %v9657_v23 }
 0x588   : > { %v6276_v33 = vpop.f32.mrf.mxu2 }
 0x589   : > { %v13604_v62 = vadd.f32 %v6276_v33, %v6188_v25  ;;  %v10228_v25 = vld [vmem:[#allocation3 + $0x238] sm:$0xf]  ;;  %v10236_v33 = vld [vmem:[#allocation3 + $0x240] sm:$0xf] }
 0x58a   : > { %v5080_v42 = vpop.f32.mrf.mxu3  ;;  %v10229_v8 = vor.u32 %v11484_v53, %v10228_v25 }
 0x58b   : > { %14890 = vst [vmem:[#allocation104_spill] sm:$0xff] %v13604_v62  ;;  %v5081_v63 = vadd.f32 %v5080_v42, %v14892_v18  ;;  %v9676_v62 = vld [vmem:[#allocation3 + $0x218] sm:$0xf] }
 0x58c   : > { %v13606_v29 = vpop.f32.mrf.mxu0 }
 0x58d   : > { %14891 = vst [vmem:[#allocation57_spill] sm:$0xff] %v13606_v29  ;;  %v13617_v1 = vadd.f32 %v5081_v63, %v14894_v6  ;;  %v6193_v6 = vadd.f32 %v13452_v38, %v14898_v2  ;;  %v6195_v38 = vadd.f32 %v13460_v60, %v13253_v0  ;;  %v14903_v60 = vld [vmem:[#allocation80_spill] sm:$0xff] }
 0x58e   : > { %v13608_v16 = vpop.f32.mrf.mxu1 }
 0x58f   : > { %14895 = vst [vmem:[#allocation109_spill] sm:$0xff] %v13617_v1  ;;  %v10620_v1 = vld [vmem:[#allocation3 + $0x118] sm:$0xf] }
 0x590   : > { %v6278_v7 = vpop.f32.mrf.mxu2 }
 0x591   : > { %7471 = vmatmul.bf16.gmra.mxu1 %v10601_v14  ;;  %v13619_v23 = vadd.f32 %v6278_v7, %v6190_v51  ;;  %v10237_v14 = vor.u32 %v11485_v57, %v10236_v33  ;;  %v9677_v7 = vor.u32 %v11365_v35, %v9676_v62  ;;  %v14901_v57 = vld [vmem:[#allocation7_spill] sm:$0xff] }
 0x592   : > { %v5082_v29 = vpop.f32.mrf.mxu3 }
 0x593   : > { %14896 = vst [vmem:[#allocation111_spill] sm:$0xff] %v13619_v23  ;;  %v5083_v63 = vadd.f32 %v5082_v29, %v13251_v17 }
 0x594   : > { %v13621_v42 = vpop.f32.mrf.mxu0 }
 0x595   : > { %14897 = vst [vmem:[#allocation30_spill] sm:$0xff] %v13621_v42  ;;  %6320 = vmatmul.bf16.gmra.mxu2 %v10229_v8  ;;  %v13629_v51 = vadd.f32 %v5083_v63, %v14899_v22  ;;  %v11563_v42 = vld [vmem:[#allocation3 + $0x128] sm:$0xf0]  ;;  %v11489_v63 = vld [vmem:[#allocation3 + $0x270] sm:$0xf0] }
 0x596   : > { %v13623_v18 = vpop.f32.mrf.mxu1  ;;  %v10621_v33 = vor.u32 %v11563_v42, %v10620_v1  ;;  %v11490_v22 = vld [vmem:[#allocation3 + $0x278] sm:$0xf0]  ;;  %v9696_v42 = vld [vmem:[#allocation3 + $0x240] sm:$0xf] }
 0x597   : > { %6498 = vmatmul.bf16.gmra.mxu0 %v10237_v14  ;;  %5124 = vmatmul.bf16.gmra.mxu3 %v9677_v7  ;;  %v10248_v14 = vld [vmem:[#allocation3 + $0x260] sm:$0xf] }
 0x598   : > { %v6281_v25 = vpop.f32.mrf.mxu2  ;;  %v10249_v7 = vor.u32 %v11489_v63, %v10248_v14 }
 0x599   : > { %v13631_v53 = vadd.f32 %v6281_v25, %v6193_v6  ;;  %v10256_v6 = vld [vmem:[#allocation3 + $0x268] sm:$0xf]  ;;  %v11370_v25 = vld [vmem:[#allocation3 + $0x250] sm:$0xf0] }
 0x59a   : > { %v5085_v8 = vpop.f32.mrf.mxu3 }
 0x59b   : > { %v5086_v17 = vadd.f32 %v5085_v8, %v13259_v34  ;;  %v10257_v8 = vor.u32 %v11490_v22, %v10256_v6  ;;  %v10640_v6 = vld [vmem:[#allocation3 + $0x140] sm:$0xf] }
 0x59c   : > { %v13636_v29 = vpop.f32.mrf.mxu0 }
 0x59d   : > { %14900 = vst [vmem:[#allocation107_spill] sm:$0xff] %v13636_v29  ;;  %v13641_v62 = vadd.f32 %v5086_v17, %v14901_v57  ;;  %v14904_v17 = vld [vmem:[#allocation66_spill] sm:$0xff]  ;;  %v11568_v29 = vld [vmem:[#allocation3 + $0x150] sm:$0xf0] }
 0x59e   : > { %v13633_v23 = vpop.f32.mrf.mxu1 }
 0x5a0   : > { %v6283_v35 = vpop.f32.mrf.mxu2 }
 0x5a1   : > { %7476 = vmatmul.bf16.gmra.mxu1 %v10621_v33  ;;  %v13643_v2 = vadd.f32 %v6283_v35, %v6195_v38  ;;  %v6198_v33 = vadd.f32 %v13468_v21, %v14903_v60  ;;  %v9697_v38 = vor.u32 %v11370_v25, %v9696_v42  ;;  %v11530_v21 = vld [vmem:[%s14503_s2 + $0x480] sm:$0xff]  ;;  %v14907_v25 = vld [vmem:[#allocation34_spill] sm:$0xff] }
 0x5a2   : > { %v5087_v34 = vpop.f32.mrf.mxu3  ;;  %v10268_v60 = vld [vmem:[#allocation3 + $0x288] sm:$0xf]  ;;  %6353 = vmatpush.bf16.msrb.mxu3 %v11530_v21  ;;  %v11641_v21 = vld [vmem:[%s14503_s2 + $0x578] sm:$0xff] }
 0x5a3   : > { %14902 = vst [vmem:[#allocation58_spill] sm:$0xff] %v13643_v2  ;;  %v5088_v0 = vadd.f32 %v5087_v34, %v13267_v40  ;;  %v10641_v40 = vor.u32 %v11568_v29, %v10640_v6  ;;  %v14906_v34 = vld [vmem:[#allocation48_spill] sm:$0xff]  ;;  %7542 = vmatpush.bf16.msra.mxu2 %v11641_v21  ;;  %v11655_v21 = vld [vmem:[%s14503_s2 + $0x5e8] sm:$0xff] }
 0x5a4   : > { %v13653_v35 = vpop.f32.mrf.mxu0  ;;  %v6200_v42 = vadd.f32 %v13479_v36, %v14906_v34  ;;  %v11375_v36 = vld [vmem:[#allocation3 + $0x278] sm:$0xf0] }
 0x5a5   : > { %6325 = vmatmul.bf16.gmra.mxu2 %v10249_v7  ;;  %v13651_v57 = vadd.f32 %v5088_v0, %v14904_v17  ;;  %14905 = vst [vmem:[#allocation112_spill] sm:$0xff] %v13653_v35  ;;  %v9716_v35 = vld [vmem:[#allocation3 + $0x268] sm:$0xf]  ;;  %v11657_v34 = vld [vmem:[%s14503_s2 + $0x5f8] sm:$0xff] }
 0x5a6   : > { %v13645_v1 = vpop.f32.mrf.mxu1  ;;  %7720 = vmatpush.bf16.msra.mxu0 %v11657_v34  ;;  %v14915_v34 = vld [vmem:[#allocation87_spill] sm:$0xff] }
 0x5a7   : > { %6503 = vmatmul.bf16.gmra.mxu0 %v10257_v8  ;;  %5129 = vmatmul.bf16.gmra.mxu3 %v9697_v38  ;;  %v11495_v38 = vld [vmem:[#allocation3 + $0x2a0] sm:$0xf0] }
 0x5a8   : > { %v6286_v14 = vpop.f32.mrf.mxu2 }
 0x5a9   : > { %v13655_v63 = vadd.f32 %v6286_v14, %v6198_v33  ;;  %v11494_v33 = vld [vmem:[#allocation3 + $0x298] sm:$0xf0] }
 0x5aa   : > { %v5090_v22 = vpop.f32.mrf.mxu3  ;;  %v10269_v14 = vor.u32 %v11494_v33, %v10268_v60  ;;  %v9717_v60 = vor.u32 %v11375_v36, %v9716_v35 }
 0x5ab   : > { %v5091_v7 = vadd.f32 %v5090_v22, %v13278_v27  ;;  %v10276_v27 = vld [vmem:[#allocation3 + $0x290] sm:$0xf] }
 0x5ac   : > { %v13670_v29 = vpop.f32.mrf.mxu0 }
 0x5ad   : > { %v13666_v8 = vadd.f32 %v5091_v7, %v14907_v25  ;;  %14910 = vst [vmem:[#allocation110_spill] sm:$0xff] %v13670_v29  ;;  %v14911_v25 = vld [vmem:[#allocation63_spill] sm:$0xff] }
 0x5ae   : > { %v13657_v2 = vpop.f32.mrf.mxu1 }
 0x5af   : > { %14908 = vst [vmem:[#allocation114_spill] sm:$0xff] %v13666_v8  ;;  %v9736_v8 = vld [vmem:[#allocation3 + $0x290] sm:$0xf] }
 0x5b0   : > { %v6288_v0 = vpop.f32.mrf.mxu2 }
 0x5b1   : > { %7481 = vmatmul.bf16.gmra.mxu1 %v10641_v40  ;;  %v13668_v17 = vadd.f32 %v6288_v0, %v6200_v42  ;;  %v10277_v40 = vor.u32 %v11495_v38, %v10276_v27  ;;  %v6203_v42 = vadd.f32 %v13490_v5, %v13280_v45  ;;  %v11656_v27 = vld [vmem:[%s14503_s2 + $0x5f0] sm:$0xff]  ;;  %v11573_v45 = vld [vmem:[#allocation3 + $0x178] sm:$0xf0] }
 0x5b2   : > { %v5092_v22 = vpop.f32.mrf.mxu3  ;;  %7721 = vmatpush.bf16.msra.mxu0 %v11656_v27 }
 0x5b3   : > { %14909 = vst [vmem:[#allocation31_spill] sm:$0xff] %v13668_v17  ;;  %v5093_v7 = vadd.f32 %v5092_v22, %v13298_v4  ;;  %v11640_v4 = vld [vmem:[%s14503_s2 + $0x570] sm:$0xff] }
 0x5b4   : > { %v13694_v5 = vpop.f32.mrf.mxu0  ;;  %7543 = vmatpush.bf16.msra.mxu2 %v11640_v4 }
 0x5b5   : > { %6330 = vmatmul.bf16.gmra.mxu2 %v10269_v14  ;;  %v13684_v0 = vadd.f32 %v5093_v7, %v14911_v25  ;;  %14914 = vst [vmem:[#allocation117_spill] sm:$0xff] %v13694_v5  ;;  %v10660_v14 = vld [vmem:[#allocation3 + $0x168] sm:$0xf]  ;;  %v10288_v25 = vld [vmem:[#allocation3 + $0x2b0] sm:$0xf]  ;;  %v1106_v5 = vld [vmem:[#allocation2 + $0x1bc] sm:$0xff] }
 0x5b6   : > { %v13672_v6 = vpop.f32.mrf.mxu1  ;;  %v10661_v36 = vor.u32 %v11573_v45, %v10660_v14  ;;  %v11639_v7 = vld [vmem:[%s14503_s2 + $0x568] sm:$0xff]  ;;  %v11654_v45 = vld [vmem:[%s14503_s2 + $0x5e0] sm:$0xff]  ;;  %v865_v14 = vld [vmem:[#allocation2 + $0x1b2] sm:$0xff]  ;;  %7722 = vmatpush.bf16.msra.mxu0 %v11655_v21 }
 0x5b7   : > { %6508 = vmatmul.bf16.gmra.mxu0 %v10277_v40  ;;  %14912 = vst [vmem:[#allocation60_spill] sm:$0xff] %v13684_v0  ;;  %5134 = vmatmul.bf16.gmra.mxu3 %v9717_v60  ;;  %v11499_v60 = vld [vmem:[#allocation3 + $0x2c0] sm:$0xf0] }
 0x5b8   : > { %v6291_v33 = vpop.f32.mrf.mxu2  ;;  %7544 = vmatpush.bf16.msra.mxu2 %v11639_v7  ;;  %v10289_v0 = vor.u32 %v11499_v60, %v10288_v25  ;;  %v11653_v25 = vld [vmem:[%s14503_s2 + $0x5d8] sm:$0xff]  ;;  %v14918_v60 = vld [vmem:[#allocation90_spill] sm:$0xff] }
 0x5b9   : > { %v13692_v38 = vadd.f32 %v6291_v33, %v6203_v42  ;;  %v6205_v42 = vadd.f32 %v13501_v50, %v14915_v34  ;;  %v14916_v33 = vld [vmem:[#allocation6_spill] sm:$0xff]  ;;  %v866_v50 = vld [vmem:[#allocation2 + $0x1ba] sm:$0xff]  ;;  %v905_v34 = vpack.c.bf16 %v865_v14, %v865_v14 }
 0x5ba   : > { %v5095_v22 = vpop.f32.mrf.mxu3  ;;  %7723 = vmatpush.bf16.msra.mxu0 %v11654_v45 }
 0x5bb   : > { %14913 = vst [vmem:[#allocation115_spill] sm:$0xff] %v13692_v38  ;;  %v5096_v40 = vadd.f32 %v5095_v22, %v13318_v58  ;;  %v11638_v58 = vld [vmem:[%s14503_s2 + $0x560] sm:$0xff]  ;;  %v1146_v38 = vpack.c.bf16 %v1106_v5, %v1106_v5  ;;  %v11637_v5 = vld [vmem:[%s14503_s2 + $0x558] sm:$0xff] }
 0x5bc   : > { %945 = vst [vmem:[#allocation3 + $0x2d8] sm:$0xf] %v905_v34  ;;  %7545 = vmatpush.bf16.msra.mxu2 %v11638_v58  ;;  %v11578_v34 = vld [vmem:[#allocation3 + $0x1a0] sm:$0xf0] }
 0x5bd   : > { %v13708_v4 = vadd.f32 %v5096_v40, %v14916_v33  ;;  %v10296_v40 = vld [vmem:[#allocation3 + $0x2b8] sm:$0xf]  ;;  %v11500_v33 = vld [vmem:[#allocation3 + $0x2c8] sm:$0xf0]  ;;  %1186 = vst [vmem:[#allocation3 + $0x2f4] sm:$0xf] %v1146_v38 }
 0x5be   : > { %v13696_v35 = vpop.f32.mrf.mxu1  ;;  %v10297_v21 = vor.u32 %v11500_v33, %v10296_v40  ;;  %7724 = vmatpush.bf16.msra.mxu0 %v11653_v25  ;;  %v11652_v38 = vld [vmem:[%s14503_s2 + $0x5d0] sm:$0xff]  ;;  %v11635_v40 = vld [vmem:[%s14503_s2 + $0x548] sm:$0xff] }
 0x5bf   : > { %14917 = vst [vmem:[#allocation32_spill] sm:$0xff] %v13708_v4  ;;  %v906_v4 = vpack.c.bf16 %v866_v50, %v866_v50  ;;  %v11651_v33 = vld [vmem:[%s14503_s2 + $0x5c8] sm:$0xff] }
 0x5c0   : > { %v6293_v27 = vpop.f32.mrf.mxu2  ;;  %7546 = vmatpush.bf16.msra.mxu2 %v11637_v5  ;;  %v14920_v5 = vld [vmem:[#allocation20_spill] sm:$0xff] }
 0x5c1   : > { %7486 = vmatmul.bf16.gmra.mxu1 %v10661_v36  ;;  %v13716_v22 = vadd.f32 %v6293_v27, %v6205_v42  ;;  %v1105_v36 = vld [vmem:[#allocation2 + $0x1b4] sm:$0xff]  ;;  %946 = vst [vmem:[#allocation3 + $0x2ec] sm:$0xf] %v906_v4  ;;  %v11380_v42 = vld [vmem:[#allocation3 + $0x2a0] sm:$0xf0]  ;;  %v13720_v27 = vpop.f32.mrf.mxu0  ;;  %v6208_v4 = vadd.f32 %v13515_v46, %v14918_v60  ;;  %v6210_v25 = vadd.f32 %v13529_v55, %v14920_v5 }
 0x5c2   : > { %v1145_v7 = vpack.c.bf16 %v1105_v36, %v1105_v36  ;;  %v5097_v17 = vpop.f32.mrf.mxu3  ;;  %v9737_v45 = vor.u32 %v11380_v42, %v9736_v8  ;;  %v10680_v46 = vld [vmem:[#allocation3 + $0x190] sm:$0xf]  ;;  %7725 = vmatpush.bf16.msra.mxu0 %v11652_v38  ;;  %v11649_v38 = vld [vmem:[%s14503_s2 + $0x5b8] sm:$0xff]  ;;  %v11385_v5 = vld [vmem:[#allocation3 + $0x2c8] sm:$0xf0] }
 0x5c3   : > { %v5098_v14 = vadd.f32 %v5097_v17, %v13338_v61  ;;  %v11636_v61 = vld [vmem:[%s14503_s2 + $0x550] sm:$0xff]  ;;  %7631 = vmatpush.bf16.msra.mxu3 %v11649_v38 }
 0x5c4   : > { %1185 = vst [vmem:[#allocation3 + $0x2e0] sm:$0xf] %v1145_v7  ;;  %7547 = vmatpush.bf16.msra.mxu2 %v11636_v61  ;;  %v10681_v7 = vor.u32 %v11578_v34, %v10680_v46  ;;  %v11505_v61 = vld [vmem:[#allocation3 + $0x2f0] sm:$0xf0]  ;;  %v11650_v34 = vld [vmem:[%s14503_s2 + $0x5c0] sm:$0xff] }
 0x5c5   : > { %6335 = vmatmul.bf16.gmra.mxu2 %v10289_v0  ;;  %v14919_v0 = vld [vmem:[#allocation61_spill] sm:$0xff] }
 0x5c6   : > { %v13718_v29 = vpop.f32.mrf.mxu1  ;;  %v13732_v58 = vadd.f32 %v5098_v14, %v14919_v0  ;;  %v14922_v0 = vld [vmem:[#allocation36_spill] sm:$0xff]  ;;  %7726 = vmatpush.bf16.msra.mxu0 %v11651_v33 }
 0x5c7   : > { %6513 = vmatmul.bf16.gmra.mxu0 %v10297_v21  ;;  %5139 = vmatmul.bf16.gmra.mxu3 %v9737_v45  ;;  %v10308_v21 = vld [vmem:[#allocation3 + $0x2d8] sm:$0xf] }
 0x5c8   : > { %v6296_v50 = vpop.f32.mrf.mxu2  ;;  %v11504_v14 = vld [vmem:[#allocation3 + $0x2e8] sm:$0xf0]  ;;  %7548 = vmatpush.bf16.msra.mxu2 %v11635_v40 }
 0x5c9   : > { %v13737_v17 = vadd.f32 %v6296_v50, %v6208_v4  ;;  %v13753_v4 = vpop.f32.mrf.mxu0  ;;  %v10309_v55 = vor.u32 %v11504_v14, %v10308_v21  ;;  %v14925_v21 = vld [vmem:[#allocation21_spill] sm:$0xff]  ;;  %v14926_v14 = vld [vmem:[#allocation84_spill] sm:$0xff] }
 0x5ca   : > { %v5100_v8 = vpop.f32.mrf.mxu3  ;;  %14921 = vst [vmem:[#allocation113_spill] sm:$0xff] %v13753_v4  ;;  %7727 = vmatpush.bf16.msra.mxu0 %v11650_v34  ;;  %v10700_v34 = vld [vmem:[#allocation3 + $0x1b8] sm:$0xf]  ;;  %v14930_v4 = vld [vmem:[#allocation141_spill] sm:$0xff] }
 0x5cb   : > { %v5101_v42 = vadd.f32 %v5100_v8, %v13361_v44  ;;  %v10316_v60 = vld [vmem:[#allocation3 + $0x2e0] sm:$0xf] }
 0x5cc   : > { %v11634_v44 = vld [vmem:[%s14503_s2 + $0x540] sm:$0xff]  ;;  %v10317_v8 = vor.u32 %v11505_v61, %v10316_v60  ;;  %v14927_v60 = vld [vmem:[#allocation67_spill] sm:$0xff] }
 0x5cd   : > { %v13756_v45 = vadd.f32 %v5101_v42, %v14922_v0  ;;  %7549 = vmatpush.bf16.msra.mxu2 %v11634_v44  ;;  %v9756_v42 = vld [vmem:[#allocation3 + $0x2b8] sm:$0xf]  ;;  %v6213_v0 = vadd.f32 %v13537_v19, %v14926_v14 }
 0x5ce   : > { %v13742_v36 = vpop.f32.mrf.mxu1  ;;  %v9757_v61 = vor.u32 %v11385_v5, %v9756_v42  ;;  %v10562_v14 = vld [vmem:[#allocation3 + $0xb4] sm:$0xf0] }
 0x5cf   : > { %14923 = vst [vmem:[#allocation62_spill] sm:$0xff] %v13756_v45 }
 0x5d0   : > { %v6298_v50 = vpop.f32.mrf.mxu2 }
 0x5d1   : > { %7491 = vmatmul.bf16.gmra.mxu1 %v10681_v7  ;;  %v13764_v46 = vadd.f32 %v6298_v50, %v6210_v25  ;;  %v11665_v25 = vld [vmem:[%s14503_s2 + $0x638] sm:$0xff] }
 0x5d2   : > { %v5102_v7 = vpop.f32.mrf.mxu3  ;;  %7809 = vmatpush.bf16.msra.mxu1 %v11665_v25 }
 0x5d3   : > { %14924 = vst [vmem:[#allocation118_spill] sm:$0xff] %v13764_v46  ;;  %v5103_v33 = vadd.f32 %v5102_v7, %v14925_v21  ;;  %v11583_v46 = vld [vmem:[#allocation3 + $0x1c8] sm:$0xf0] }
 0x5d4   : > { %v10701_v21 = vor.u32 %v11583_v46, %v10700_v34  ;;  %v11427_v34 = vld [vmem:[#allocation3 + $0x84] sm:$0xf] }
 0x5d5   : > { %6340 = vmatmul.bf16.gmra.mxu2 %v10309_v55  ;;  %v13778_v50 = vadd.f32 %v5103_v33, %v14927_v60  ;;  %v13782_v55 = vpop.f32.mrf.mxu0  ;;  %v14932_v33 = vld [vmem:[#allocation8_spill] sm:$0xff]  ;;  %v11546_v60 = vld [vmem:[#allocation3 + $0xa4] sm:$0xf] }
 0x5d6   : > { %v13769_v40 = vpop.f32.mrf.mxu1 }
 0x5d7   : > { %6518 = vmatmul.bf16.gmra.mxu0 %v10317_v8  ;;  %14928 = vst [vmem:[#allocation120_spill] sm:$0xff] %v13778_v50  ;;  %5144 = vmatmul.bf16.gmra.mxu3 %v9757_v61  ;;  %v14931_v8 = vld [vmem:[#allocation22_spill] sm:$0xff] }
 0x5d8   : > { %v6301_v38 = vpop.f32.mrf.mxu2  ;;  %v6215_v25 = vadd.f32 %v13545_v28, %v14931_v8  ;;  %v11547_v61 = vld [vmem:[#allocation3 + $0xac] sm:$0xf] }
 0x5d9   : > { %v13780_v44 = vadd.f32 %v6301_v38, %v6213_v0  ;;  %v10570_v38 = vld [vmem:[#allocation3 + $0xbc] sm:$0xf0] }
 0x5da   : > { %v5105_v7 = vpop.f32.mrf.mxu3  ;;  %v10573_v28 = vor.u32 %v11547_v61, %v10570_v38 }
 0x5db   : > { %14929 = vst [vmem:[#allocation33_spill] sm:$0xff] %v13780_v44  ;;  %v5106_v19 = vadd.f32 %v5105_v7, %v14930_v4  ;;  %v10565_v44 = vor.u32 %v11546_v60, %v10562_v14  ;;  %v10010_v7 = vld [vmem:[#allocation3 + $0x94] sm:$0xf0] }
 0x5dd   : > { %v13790_v42 = vadd.f32 %v5106_v19, %v14932_v33  ;;  %v13794_v50 = vpop.f32.mrf.mxu0  ;;  %v14936_v19 = vld [vmem:[#allocation94_spill] sm:$0xff] }
 0x5de   : > { %v13784_v45 = vpop.f32.mrf.mxu1  ;;  %14935 = vst [vmem:[#allocation121_spill] sm:$0xff] %v13794_v50  ;;  %v6218_v8 = vadd.f32 %v13557_v41, %v14936_v19  ;;  %v6220_v41 = vadd.f32 %v13572_v24, %v13390_v48  ;;  %v11432_v24 = vld [vmem:[#allocation3 + $0xac] sm:$0xf] }
 0x5df   : > { %14933 = vst [vmem:[#allocation116_spill] sm:$0xff] %v13790_v42  ;;  %v11588_v42 = vld [vmem:[#allocation3 + $0x1f0] sm:$0xf0] }
 0x5e0   : > { %v6303_v5 = vpop.f32.mrf.mxu2 }
 0x5e1   : > { %7496 = vmatmul.bf16.gmra.mxu1 %v10701_v21  ;;  %v13792_v0 = vadd.f32 %v6303_v5, %v6215_v25  ;;  %v14937_v25 = vld [vmem:[#allocation64_spill] sm:$0xff]  ;;  %v10013_v5 = vor.u32 %v11427_v34, %v10010_v7 }
 0x5e2   : > { %v5107_v4 = vpop.f32.mrf.mxu3 }
 0x5e3   : > { %14934 = vst [vmem:[#allocation65_spill] sm:$0xff] %v13792_v0  ;;  %v5108_v21 = vadd.f32 %v5107_v4, %v13388_v54  ;;  %v10720_v0 = vld [vmem:[#allocation3 + $0x1e0] sm:$0xf] }
 0x5e4   : > { %v10721_v54 = vor.u32 %v11588_v42, %v10720_v0  ;;  %v14939_v4 = vld [vmem:[#allocation9_spill] sm:$0xff]  ;;  %v10590_v42 = vld [vmem:[#allocation3 + $0xe4] sm:$0xf0] }
 0x5e5   : > { %7550 = vmatmul.bf16.vlgmr.msra.gmra.mxu2 %v10565_v44  ;;  %v13802_v33 = vadd.f32 %v5108_v21, %v14937_v25  ;;  %v13808_v61 = vpop.f32.mrf.mxu0  ;;  %v11648_v21 = vld [vmem:[%s14503_s2 + $0x5b0] sm:$0xff] }
 0x5e6   : > { %v13796_v46 = vpop.f32.mrf.mxu1  ;;  %v11552_v25 = vld [vmem:[#allocation3 + $0xd4] sm:$0xf]  ;;  %7632 = vmatpush.bf16.msra.mxu3 %v11648_v21 }
 0x5e7   : > { %7728 = vmatmul.bf16.vlgmr.msra.gmra.mxu0 %v10573_v28  ;;  %6354 = vmatmul.bf16.vlgmr.msrb.gmra.mxu3 %v10013_v5  ;;  %v10582_v28 = vld [vmem:[#allocation3 + $0xdc] sm:$0xf0] }
 0x5e8   : > { %v6306_v14 = vpop.f32.mrf.mxu2  ;;  %v10030_v5 = vld [vmem:[#allocation3 + $0xbc] sm:$0xf0] }
 0x5e9   : > { %v13804_v60 = vadd.f32 %v6306_v14, %v6218_v8  ;;  %v11551_v8 = vld [vmem:[#allocation3 + $0xcc] sm:$0xf]  ;;  %v10593_v14 = vor.u32 %v11552_v25, %v10590_v42  ;;  %v10033_v21 = vor.u32 %v11432_v24, %v10030_v5  ;;  %v10740_v25 = vld [vmem:[#allocation3 + $0x208] sm:$0xf]  ;;  %v11593_v42 = vld [vmem:[#allocation3 + $0x218] sm:$0xf0] }
 0x5ea   : > { %v5110_v44 = vpop.f32.mrf.mxu3  ;;  %v10602_v5 = vld [vmem:[#allocation3 + $0x104] sm:$0xf0] }
 0x5eb   : > { %v5111_v38 = vadd.f32 %v5110_v44, %v13399_v31  ;;  %v10585_v31 = vor.u32 %v11551_v8, %v10582_v28  ;;  %v11664_v44 = vld [vmem:[%s14503_s2 + $0x630] sm:$0xff] }
 0x5ec   : > { %7810 = vmatpush.bf16.msra.mxu1 %v11664_v44 }
 0x5ed   : > { %v13814_v34 = vadd.f32 %v5111_v38, %v14939_v4  ;;  %v14941_v38 = vld [vmem:[#allocation50_spill] sm:$0xff]  ;;  %v13829_v4 = vpop.f32.mrf.mxu0 }
 0x5ee   : > { %v13806_v50 = vpop.f32.mrf.mxu1 }
 0x5ef   : > { %14938 = vst [vmem:[#allocation123_spill] sm:$0xff] %v13806_v50  ;;  %v14945_v50 = vld [vmem:[#allocation23_spill] sm:$0xff] }
 0x5f0   : > { %v6308_v7 = vpop.f32.mrf.mxu2 }
 0x5f1   : > { %7501 = vmatmul.bf16.gmra.mxu1 %v10721_v54  ;;  %v13819_v19 = vadd.f32 %v6308_v7, %v6220_v41  ;;  %v6223_v41 = vadd.f32 %v13584_v47, %v14941_v38  ;;  %v14942_v7 = vld [vmem:[#allocation11_spill] sm:$0xff]  ;;  %v14947_v38 = vld [vmem:[#allocation38_spill] sm:$0xff] }
 0x5f2   : > { %v5112_v48 = vpop.f32.mrf.mxu3 }
 0x5f3   : > { %v5113_v54 = vadd.f32 %v5112_v48, %v13410_v10  ;;  %v10741_v48 = vor.u32 %v11593_v42, %v10740_v25  ;;  %v11437_v42 = vld [vmem:[#allocation3 + $0xd4] sm:$0xf] }
 0x5f5   : > { %7555 = vmatmul.bf16.gmra.mxu2 %v10585_v31  ;;  %v13832_v28 = vadd.f32 %v5113_v54, %v14942_v7  ;;  %v13846_v7 = vpop.f32.mrf.mxu0 }
 0x5f6   : > { %v13821_v0 = vpop.f32.mrf.mxu1 }
 0x5f7   : > { %14940 = vst [vmem:[#allocation35_spill] sm:$0xff] %v13821_v0  ;;  %7733 = vmatmul.bf16.gmra.mxu0 %v10593_v14  ;;  %6359 = vmatmul.bf16.gmra.mxu3 %v10033_v21  ;;  %v14946_v14 = vld [vmem:[#allocation91_spill] sm:$0xff] }
 0x5f8   : > { %v6311_v8 = vpop.f32.mrf.mxu2  ;;  %v6225_v44 = vadd.f32 %v13596_v13, %v14946_v14  ;;  %v11556_v21 = vld [vmem:[#allocation3 + $0xf4] sm:$0xf] }
 0x5f9   : > { %v13834_v31 = vadd.f32 %v6311_v8, %v6223_v41  ;;  %v11557_v8 = vld [vmem:[#allocation3 + $0xfc] sm:$0xf] }
 0x5fa   : > { %v5115_v10 = vpop.f32.mrf.mxu3 }
 0x5fb   : > { %14943 = vst [vmem:[#allocation119_spill] sm:$0xff] %v13834_v31  ;;  %v5116_v47 = vadd.f32 %v5115_v10, %v14945_v50  ;;  %v10605_v31 = vor.u32 %v11556_v21, %v10602_v5  ;;  %v10050_v10 = vld [vmem:[#allocation3 + $0xe4] sm:$0xf0]  ;;  %v10760_v5 = vld [vmem:[#allocation3 + $0x230] sm:$0xf] }
 0x5fc   : > { %v11598_v21 = vld [vmem:[#allocation3 + $0x240] sm:$0xf0] }
 0x5fd   : > { %v13842_v54 = vadd.f32 %v5116_v47, %v14947_v38  ;;  %v14951_v47 = vld [vmem:[#allocation88_spill] sm:$0xff] }
 0x5fe   : > { %v13836_v0 = vpop.f32.mrf.mxu1  ;;  %v6228_v14 = vadd.f32 %v13608_v16, %v14951_v47  ;;  %v6230_v16 = vadd.f32 %v13623_v18, %v13428_v39  ;;  %v11561_v47 = vld [vmem:[#allocation3 + $0x11c] sm:$0xf] }
 0x5ff   : > { %14944 = vst [vmem:[#allocation69_spill] sm:$0xff] %v13836_v0  ;;  %v10610_v0 = vld [vmem:[#allocation3 + $0x10c] sm:$0xf0]  ;;  %v11442_v18 = vld [vmem:[#allocation3 + $0xfc] sm:$0xf] }
 0x600   : > { %14948 = vst [vmem:[#allocation124_spill] sm:$0xff] %v13842_v54  ;;  %v6313_v24 = vpop.f32.mrf.mxu2  ;;  %v10613_v13 = vor.u32 %v11557_v8, %v10610_v0 }
 0x601   : > { %7506 = vmatmul.bf16.gmra.mxu1 %v10741_v48  ;;  %v13844_v41 = vadd.f32 %v6313_v24, %v6225_v44  ;;  %v14952_v44 = vld [vmem:[#allocation70_spill] sm:$0xff]  ;;  %v10053_v24 = vor.u32 %v11437_v42, %v10050_v10  ;;  %v10622_v10 = vld [vmem:[#allocation3 + $0x12c] sm:$0xf0] }
 0x602   : > { %v5117_v50 = vpop.f32.mrf.mxu3 }
 0x603   : > { %14949 = vst [vmem:[#allocation126_spill] sm:$0xff] %v13844_v41  ;;  %v5118_v48 = vadd.f32 %v5117_v50, %v13426_v52  ;;  %v10761_v52 = vor.u32 %v11598_v21, %v10760_v5  ;;  %v14954_v50 = vld [vmem:[#allocation10_spill] sm:$0xff]  ;;  %v10070_v5 = vld [vmem:[#allocation3 + $0x10c] sm:$0xf0] }
 0x605   : > { %7560 = vmatmul.bf16.gmra.mxu2 %v10605_v31  ;;  %v13854_v38 = vadd.f32 %v5118_v48, %v14952_v44  ;;  %v10630_v44 = vld [vmem:[#allocation3 + $0x134] sm:$0xf0] }
 0x606   : > { %v13848_v25 = vpop.f32.mrf.mxu1 }
 0x607   : > { %14950 = vst [vmem:[#allocation37_spill] sm:$0xff] %v13848_v25  ;;  %7738 = vmatmul.bf16.gmra.mxu0 %v10613_v13  ;;  %6364 = vmatmul.bf16.gmra.mxu3 %v10053_v24  ;;  %v13858_v25 = vpop.f32.mrf.mxu0  ;;  %v11647_v13 = vld [vmem:[%s14503_s2 + $0x5a8] sm:$0xff] }
 0x608   : > { %v6316_v41 = vpop.f32.mrf.mxu2  ;;  %7633 = vmatpush.bf16.msra.mxu3 %v11647_v13  ;;  %v10073_v13 = vor.u32 %v11442_v18, %v10070_v5 }
 0x609   : > { %v13856_v54 = vadd.f32 %v6316_v41, %v6228_v14  ;;  %v11562_v14 = vld [vmem:[#allocation3 + $0x124] sm:$0xf] }
 0x60a   : > { %v5120_v0 = vpop.f32.mrf.mxu3  ;;  %v10633_v21 = vor.u32 %v11562_v14, %v10630_v44  ;;  %v10780_v14 = vld [vmem:[#allocation3 + $0x258] sm:$0xf]  ;;  %v11603_v44 = vld [vmem:[#allocation3 + $0x268] sm:$0xf0] }
 0x60b   : > { %v5121_v8 = vadd.f32 %v5120_v0, %v13437_v56  ;;  %v10625_v56 = vor.u32 %v11561_v47, %v10622_v10  ;;  %v11663_v0 = vld [vmem:[%s14503_s2 + $0x628] sm:$0xff] }
 0x60c   : > { %7811 = vmatpush.bf16.msra.mxu1 %v11663_v0  ;;  %v14963_v0 = vld [vmem:[#allocation40_spill] sm:$0xff] }
 0x60d   : > { %v13866_v42 = vadd.f32 %v5121_v8, %v14954_v50 }
 0x60e   : > { %v13860_v31 = vpop.f32.mrf.mxu1 }
 0x60f   : > { %14953 = vst [vmem:[#allocation122_spill] sm:$0xff] %v13860_v31 }
 0x610   : > { %14955 = vst [vmem:[#allocation72_spill] sm:$0xff] %v13866_v42  ;;  %v6318_v41 = vpop.f32.mrf.mxu2  ;;  %v14962_v42 = vld [vmem:[#allocation95_spill] sm:$0xff] }
 0x611   : > { %7511 = vmatmul.bf16.gmra.mxu1 %v10761_v52  ;;  %v13871_v48 = vadd.f32 %v6318_v41, %v6230_v16  ;;  %v13878_v52 = vpop.f32.mrf.mxu0  ;;  %v14958_v16 = vld [vmem:[#allocation52_spill] sm:$0xff] }
 0x612   : > { %v5122_v39 = vpop.f32.mrf.mxu3  ;;  %v6233_v50 = vadd.f32 %v13633_v23, %v14958_v16  ;;  %v14959_v41 = vld [vmem:[#allocation68_spill] sm:$0xff]  ;;  %v6235_v23 = vadd.f32 %v13645_v1, %v14962_v42 }
 0x613   : > { %14956 = vst [vmem:[#allocation127_spill] sm:$0xff] %v13871_v48  ;;  %v5123_v8 = vadd.f32 %v5122_v39, %v13448_v32  ;;  %v10781_v48 = vor.u32 %v11603_v44, %v10780_v14  ;;  %v14961_v32 = vld [vmem:[#allocation98_spill] sm:$0xff]  ;;  %v11447_v44 = vld [vmem:[#allocation3 + $0x124] sm:$0xf]  ;;  %v14965_v42 = vld [vmem:[#allocation24_spill] sm:$0xff] }
 0x615   : > { %7565 = vmatmul.bf16.gmra.mxu2 %v10625_v56  ;;  %v13884_v10 = vadd.f32 %v5123_v8, %v14959_v41  ;;  %v10642_v8 = vld [vmem:[#allocation3 + $0x154] sm:$0xf0]  ;;  %v11567_v41 = vld [vmem:[#allocation3 + $0x14c] sm:$0xf] }
 0x616   : > { %v13873_v24 = vpop.f32.mrf.mxu1 }
 0x617   : > { %14957 = vst [vmem:[#allocation129_spill] sm:$0xff] %v13873_v24  ;;  %7743 = vmatmul.bf16.gmra.mxu0 %v10633_v21  ;;  %6369 = vmatmul.bf16.gmra.mxu3 %v10073_v13  ;;  %v10650_v13 = vld [vmem:[#allocation3 + $0x15c] sm:$0xf0] }
 0x618   : > { %v6321_v47 = vpop.f32.mrf.mxu2 }
 0x619   : > { %v13886_v56 = vadd.f32 %v6321_v47, %v6233_v50  ;;  %v13893_v21 = vpop.f32.mrf.mxu0  ;;  %v11566_v50 = vld [vmem:[#allocation3 + $0x144] sm:$0xf] }
 0x61a   : > { %v5125_v24 = vpop.f32.mrf.mxu3  ;;  %v10645_v47 = vor.u32 %v11566_v50, %v10642_v8  ;;  %v10800_v50 = vld [vmem:[#allocation3 + $0x280] sm:$0xf] }
 0x61b   : > { %v5126_v39 = vadd.f32 %v5125_v24, %v14961_v32  ;;  %v10090_v24 = vld [vmem:[#allocation3 + $0x134] sm:$0xf0]  ;;  %v10653_v32 = vor.u32 %v11567_v41, %v10650_v13  ;;  %v11608_v41 = vld [vmem:[#allocation3 + $0x290] sm:$0xf0] }
 0x61d   : > { %v13896_v18 = vadd.f32 %v5126_v39, %v14963_v0  ;;  %v14967_v0 = vld [vmem:[#allocation71_spill] sm:$0xff] }
 0x61e   : > { %v13888_v31 = vpop.f32.mrf.mxu1 }
 0x61f   : > { %14960 = vst [vmem:[#allocation39_spill] sm:$0xff] %v13888_v31 }
 0x620   : > { %v6323_v5 = vpop.f32.mrf.mxu2 }
 0x621   : > { %7516 = vmatmul.bf16.gmra.mxu1 %v10781_v48  ;;  %v13898_v16 = vadd.f32 %v6323_v5, %v6235_v23  ;;  %v6238_v48 = vadd.f32 %v13657_v2, %v14965_v42  ;;  %v10093_v5 = vor.u32 %v11447_v44, %v10090_v24  ;;  %v13910_v8 = vpop.f32.mrf.mxu0  ;;  %v14971_v2 = vld [vmem:[#allocation92_spill] sm:$0xff]  ;;  %v14972_v42 = vld [vmem:[#allocation15_spill] sm:$0xff]  ;;  %v10662_v24 = vld [vmem:[#allocation3 + $0x17c] sm:$0xf0] }
 0x622   : > { %v5127_v14 = vpop.f32.mrf.mxu3 }
 0x623   : > { %14964 = vst [vmem:[#allocation125_spill] sm:$0xff] %v13898_v16  ;;  %v5128_v1 = vadd.f32 %v5127_v14, %v13464_v43  ;;  %v10801_v43 = vor.u32 %v11608_v41, %v10800_v50  ;;  %v11572_v50 = vld [vmem:[#allocation3 + $0x174] sm:$0xf]  ;;  %v10670_v41 = vld [vmem:[#allocation3 + $0x184] sm:$0xf0] }
 0x625   : > { %7570 = vmatmul.bf16.gmra.mxu2 %v10645_v47  ;;  %v13906_v23 = vadd.f32 %v5128_v1, %v14967_v0  ;;  %v14970_v47 = vld [vmem:[#allocation28_spill] sm:$0xff] }
 0x626   : > { %v13903_v39 = vpop.f32.mrf.mxu1 }
 0x627   : > { %7748 = vmatmul.bf16.gmra.mxu0 %v10653_v32  ;;  %14966 = vst [vmem:[#allocation74_spill] sm:$0xff] %v13903_v39  ;;  %6374 = vmatmul.bf16.gmra.mxu3 %v10093_v5  ;;  %v6240_v32 = vadd.f32 %v13672_v6, %v14971_v2  ;;  %v11571_v5 = vld [vmem:[#allocation3 + $0x16c] sm:$0xf]  ;;  %v10673_v2 = vor.u32 %v11572_v50, %v10670_v41  ;;  %v14977_v39 = vld [vmem:[#allocation25_spill] sm:$0xff]  ;;  %v10820_v50 = vld [vmem:[#allocation3 + $0x2a8] sm:$0xf] }
 0x628   : > { %14968 = vst [vmem:[#allocation130_spill] sm:$0xff] %v13906_v23  ;;  %v6326_v31 = vpop.f32.mrf.mxu2  ;;  %v11613_v41 = vld [vmem:[#allocation3 + $0x2b8] sm:$0xf0]  ;;  %v11788_v23 = vld [vmem:[#allocation2] sm:$0xff] }
 0x629   : > { %v13908_v16 = vadd.f32 %v6326_v31, %v6238_v48  ;;  %v11646_v31 = vld [vmem:[%s14503_s2 + $0x5a0] sm:$0xff]  ;;  %v13925_v6 = vpop.f32.mrf.mxu0 }
 0x62a   : > { %v5130_v13 = vpop.f32.mrf.mxu3  ;;  %7634 = vmatpush.bf16.msra.mxu3 %v11646_v31  ;;  %v14978_v31 = vld [vmem:[#allocation42_spill] sm:$0xff] }
 0x62b   : > { %14969 = vst [vmem:[#allocation132_spill] sm:$0xff] %v13908_v16  ;;  %v5131_v14 = vadd.f32 %v5130_v13, %v14970_v47  ;;  %v10665_v13 = vor.u32 %v11571_v5, %v10662_v24  ;;  %v11452_v47 = vld [vmem:[#allocation3 + $0x14c] sm:$0xf] }
 0x62d   : > { %v13916_v1 = vadd.f32 %v5131_v14, %v14972_v42  ;;  %v10110_v14 = vld [vmem:[#allocation3 + $0x15c] sm:$0xf0] }
 0x62e   : > { %v13923_v0 = vpop.f32.mrf.mxu1  ;;  %v11662_v42 = vld [vmem:[%s14503_s2 + $0x620] sm:$0xff]  ;;  %v10113_v5 = vor.u32 %v11452_v47, %v10110_v14  ;;  %v11576_v47 = vld [vmem:[#allocation3 + $0x194] sm:$0xf] }
 0x62f   : > { %14973 = vst [vmem:[#allocation41_spill] sm:$0xff] %v13916_v1  ;;  %7812 = vmatpush.bf16.msra.mxu1 %v11662_v42  ;;  %v14982_v42 = vld [vmem:[#allocation54_spill] sm:$0xff] }
 0x630   : > { %v6328_v44 = vpop.f32.mrf.mxu2  ;;  %14975 = vst [vmem:[#allocation77_spill] sm:$0xff] %v13923_v0  ;;  %v6243_v0 = vadd.f32 %v13696_v35, %v14977_v39  ;;  %v10821_v35 = vor.u32 %v11613_v41, %v10820_v50  ;;  %v14981_v39 = vld [vmem:[#allocation99_spill] sm:$0xff]  ;;  %v11577_v50 = vld [vmem:[#allocation3 + $0x19c] sm:$0xf] }
 0x631   : > { %7521 = vmatmul.bf16.gmra.mxu1 %v10801_v43  ;;  %v13921_v48 = vadd.f32 %v6328_v44, %v6240_v32  ;;  %v14976_v32 = vld [vmem:[#allocation102_spill] sm:$0xff] }
 0x632   : > { %v5132_v43 = vpop.f32.mrf.mxu3 }
 0x633   : > { %14974 = vst [vmem:[#allocation128_spill] sm:$0xff] %v13921_v48  ;;  %v5133_v44 = vadd.f32 %v5132_v43, %v14976_v32  ;;  %v667_v43 = vpack.c.bf16 %v11788_v23, %v11788_v23  ;;  %v13940_v32 = vpop.f32.mrf.mxu0  ;;  %v11661_v23 = vld [vmem:[%s14503_s2 + $0x618] sm:$0xff] }
 0x634   : > { %7813 = vmatpush.bf16.msra.mxu1 %v11661_v23 }
 0x635   : > { %7575 = vmatmul.bf16.gmra.mxu2 %v10665_v13  ;;  %v13934_v24 = vadd.f32 %v5133_v44, %v14978_v31  ;;  %v6245_v44 = vadd.f32 %v13718_v29, %v14982_v42  ;;  %707 = vst [vmem:[#allocation3 + $0x2f8] sm:$0xf] %v667_v43  ;;  %v10682_v31 = vld [vmem:[#allocation3 + $0x1a4] sm:$0xf0] }
 0x636   : > { %v13938_v13 = vpop.f32.mrf.mxu1  ;;  %708 = vst [vmem:[#allocation3 + $0x30c] sm:$0xf] %v667_v43  ;;  %v10685_v41 = vor.u32 %v11576_v47, %v10682_v31  ;;  %v10130_v42 = vld [vmem:[#allocation3 + $0x184] sm:$0xf0]  ;;  %v14989_v31 = vld [vmem:[#allocation44_spill] sm:$0xff] }
 0x637   : > { %7753 = vmatmul.bf16.gmra.mxu0 %v10673_v2  ;;  %6379 = vmatmul.bf16.gmra.mxu3 %v10113_v5  ;;  %14980 = vst [vmem:[#allocation135_spill] sm:$0xff] %v13938_v13  ;;  %v11659_v47 = vld [vmem:[%s14503_s2 + $0x608] sm:$0xff] }
 0x638   : > { %v6331_v48 = vpop.f32.mrf.mxu2 }
 0x639   : > { %v13936_v1 = vadd.f32 %v6331_v48, %v6243_v0  ;;  %v14983_v48 = vld [vmem:[#allocation14_spill] sm:$0xff] }
 0x63a   : > { %v5135_v16 = vpop.f32.mrf.mxu3 }
 0x63b   : > { %14979 = vst [vmem:[#allocation133_spill] sm:$0xff] %v13936_v1  ;;  %v5136_v2 = vadd.f32 %v5135_v16, %v14981_v39  ;;  %v10690_v16 = vld [vmem:[#allocation3 + $0x1ac] sm:$0xf0]  ;;  %v11457_v39 = vld [vmem:[#allocation3 + $0x174] sm:$0xf] }
 0x63d   : > { %v13946_v0 = vadd.f32 %v5136_v2, %v14983_v48  ;;  %v11660_v2 = vld [vmem:[%s14503_s2 + $0x610] sm:$0xff]  ;;  %v14987_v48 = vld [vmem:[#allocation96_spill] sm:$0xff] }
 0x63e   : > { %v13956_v43 = vpop.f32.mrf.mxu1  ;;  %7814 = vmatpush.bf16.msra.mxu1 %v11660_v2 }
 0x63f   : > { %14984 = vst [vmem:[#allocation43_spill] sm:$0xff] %v13946_v0  ;;  %v14988_v0 = vld [vmem:[#allocation26_spill] sm:$0xff] }
 0x640   : > { %v6333_v14 = vpop.f32.mrf.mxu2  ;;  %14986 = vst [vmem:[#allocation81_spill] sm:$0xff] %v13956_v43  ;;  %v11618_v43 = vld [vmem:[#allocation3 + $0x2e0] sm:$0xf0] }
 0x641   : > { %7526 = vmatmul.bf16.gmra.mxu1 %v10821_v35  ;;  %v13951_v5 = vadd.f32 %v6333_v14, %v6245_v44  ;;  %v10693_v35 = vor.u32 %v11577_v50, %v10690_v16  ;;  %v6248_v44 = vadd.f32 %v13742_v36, %v14988_v0  ;;  %v13964_v14 = vpop.f32.mrf.mxu0  ;;  %v10133_v50 = vor.u32 %v11457_v39, %v10130_v42  ;;  %v14993_v39 = vld [vmem:[#allocation55_spill] sm:$0xff] }
 0x642   : > { %v5137_v29 = vpop.f32.mrf.mxu3  ;;  %7815 = vmatpush.bf16.msra.mxu1 %v11659_v47  ;;  %v6250_v42 = vadd.f32 %v13769_v40, %v14993_v39  ;;  %v10150_v39 = vld [vmem:[#allocation3 + $0x1ac] sm:$0xf0] }
 0x643   : > { %14985 = vst [vmem:[#allocation131_spill] sm:$0xff] %v13951_v5  ;;  %v5138_v13 = vadd.f32 %v5137_v29, %v14987_v48  ;;  %v11658_v29 = vld [vmem:[%s14503_s2 + $0x600] sm:$0xff] }
 0x645   : > { %7580 = vmatmul.bf16.gmra.mxu2 %v10685_v41  ;;  %v13967_v23 = vadd.f32 %v5138_v13, %v14989_v31  ;;  %v10840_v41 = vld [vmem:[#allocation3 + $0x2d0] sm:$0xf]  ;;  %v11581_v31 = vld [vmem:[#allocation3 + $0x1bc] sm:$0xf] }
 0x646   : > { %v10841_v36 = vor.u32 %v11618_v43, %v10840_v41  ;;  %v14992_v13 = vld [vmem:[#allocation103_spill] sm:$0xff]  ;;  %7816 = vmatpush.bf16.msra.mxu1 %v11658_v29  ;;  %v13980_v48 = vpop.f32.mrf.mxu1  ;;  %v14995_v43 = vld [vmem:[#allocation82_spill] sm:$0xff] }
 0x647   : > { %7758 = vmatmul.bf16.gmra.mxu0 %v10693_v35  ;;  %14990 = vst [vmem:[#allocation136_spill] sm:$0xff] %v13967_v23  ;;  %6384 = vmatmul.bf16.gmra.mxu3 %v10133_v50  ;;  %v11645_v35 = vld [vmem:[%s14503_s2 + $0x598] sm:$0xff]  ;;  %v10702_v50 = vld [vmem:[#allocation3 + $0x1cc] sm:$0xf0]  ;;  %v14998_v23 = vld [vmem:[#allocation105_spill] sm:$0xff] }
 0x648   : > { %v6336_v16 = vpop.f32.mrf.mxu2  ;;  %7635 = vmatpush.bf16.msra.mxu3 %v11645_v35  ;;  %14994 = vst [vmem:[#allocation45_spill] sm:$0xff] %v13980_v48  ;;  %v6253_v40 = vadd.f32 %v13784_v45, %v14998_v23  ;;  %v11462_v35 = vld [vmem:[#allocation3 + $0x19c] sm:$0xf] }
 0x649   : > { %v13969_v5 = vadd.f32 %v6336_v16, %v6248_v44  ;;  %v13987_v41 = vpop.f32.mrf.mxu0 }
 0x64a   : > { %v5140_v0 = vpop.f32.mrf.mxu3 }
 0x64b   : > { %14991 = vst [vmem:[#allocation138_spill] sm:$0xff] %v13969_v5  ;;  %v5141_v2 = vadd.f32 %v5140_v0, %v14992_v13  ;;  %v11582_v5 = vld [vmem:[#allocation3 + $0x1c4] sm:$0xf]  ;;  %v10710_v0 = vld [vmem:[#allocation3 + $0x1d4] sm:$0xf0]  ;;  %v10705_v13 = vor.u32 %v11581_v31, %v10702_v50 }
 0x64d   : > { %v13983_v44 = vadd.f32 %v5141_v2, %v14995_v43  ;;  %v14999_v43 = vld [vmem:[#allocation76_spill] sm:$0xff] }
 0x64e   : > { %v13997_v31 = vpop.f32.mrf.mxu1 }
 0x64f   : > { %14996 = vst [vmem:[#allocation134_spill] sm:$0xff] %v13983_v44  ;;  %v11623_v44 = vld [vmem:[#allocation3 + $0x308] sm:$0xf0] }
 0x650   : > { %v6338_v47 = vpop.f32.mrf.mxu2  ;;  %15000 = vst [vmem:[#allocation139_spill] sm:$0xff] %v13997_v31 }
 0x651   : > { %7531 = vmatmul.bf16.gmra.mxu1 %v10841_v36  ;;  %v13985_v16 = vadd.f32 %v6338_v47, %v6250_v42  ;;  %v10713_v36 = vor.u32 %v11582_v5, %v10710_v0  ;;  %v10153_v42 = vor.u32 %v11462_v35, %v10150_v39  ;;  %v13999_v45 = vpop.f32.mrf.mxu0  ;;  %v15001_v5 = vld [vmem:[#allocation100_spill] sm:$0xff] }
 0x652   : > { %v5142_v29 = vpop.f32.mrf.mxu3 }
 0x653   : > { %14997 = vst [vmem:[#allocation85_spill] sm:$0xff] %v13985_v16  ;;  %v5143_v2 = vadd.f32 %v5142_v29, %v13533_v20  ;;  %v10860_v16 = vld [vmem:[#allocation3 + $0x2f8] sm:$0xf]  ;;  %v15002_v20 = vld [vmem:[#allocation27_spill] sm:$0xff] }
 0x654   : > { %v10861_v23 = vor.u32 %v11623_v44, %v10860_v16  ;;  %v15003_v29 = vld [vmem:[#allocation19_spill] sm:$0xff]  ;;  %v11467_v16 = vld [vmem:[#allocation3 + $0x1c4] sm:$0xf] }
 0x655   : > { %7585 = vmatmul.bf16.gmra.mxu2 %v10705_v13  ;;  %v13993_v48 = vadd.f32 %v5143_v2, %v14999_v43  ;;  %v6255_v13 = vadd.f32 %v13796_v46, %v15002_v20  ;;  %v11587_v43 = vld [vmem:[#allocation3 + $0x1ec] sm:$0xf] }
 0x656   : > { %v14009_v31 = vpop.f32.mrf.mxu1 }
 0x657   : > { %7763 = vmatmul.bf16.gmra.mxu0 %v10713_v36  ;;  %6389 = vmatmul.bf16.gmra.mxu3 %v10153_v42  ;;  %v11586_v36 = vld [vmem:[#allocation3 + $0x1e4] sm:$0xf]  ;;  %v10730_v42 = vld [vmem:[#allocation3 + $0x1fc] sm:$0xf0]  ;;  %15005 = vst [vmem:[#allocation47_spill] sm:$0xff] %v14009_v31 }
 0x658   : > { %v6341_v47 = vpop.f32.mrf.mxu2 }
 0x659   : > { %v13995_v1 = vadd.f32 %v6341_v47, %v6253_v40  ;;  %v10722_v40 = vld [vmem:[#allocation3 + $0x1f4] sm:$0xf0]  ;;  %v14011_v46 = vpop.f32.mrf.mxu0 }
 0x65a   : > { %v5145_v50 = vpop.f32.mrf.mxu3  ;;  %v10725_v47 = vor.u32 %v11586_v36, %v10722_v40  ;;  %v11644_v40 = vld [vmem:[%s14503_s2 + $0x590] sm:$0xff] }
 0x65b   : > { %v5146_v0 = vadd.f32 %v5145_v50, %v15001_v5  ;;  %v10170_v50 = vld [vmem:[#allocation3 + $0x1d4] sm:$0xf0]  ;;  %v10733_v5 = vor.u32 %v11587_v43, %v10730_v42  ;;  %7636 = vmatpush.bf16.msra.mxu3 %v11644_v40 }
 0x65d   : > { %v14005_v35 = vadd.f32 %v5146_v0, %v15003_v29  ;;  %v15006_v0 = vld [vmem:[#allocation86_spill] sm:$0xff]  ;;  %v10576_v29 = vld [vmem:[#allocation3 + $0xb0] sm:$0xf] }
 0x65e   : > { %v14020_v31 = vpop.f32.mrf.mxu1 }
 0x65f   : > { %15008 = vst [vmem:[#allocation89_spill] sm:$0xff] %v14020_v31  ;;  %v10190_v31 = vld [vmem:[#allocation3 + $0x1fc] sm:$0xf0] }
 0x660   : > { %v6343_v39 = vpop.f32.mrf.mxu2 }
 0x661   : > { %7536 = vmatmul.bf16.gmra.mxu1 %v10861_v23  ;;  %v14007_v2 = vadd.f32 %v6343_v39, %v6255_v13  ;;  %v10173_v13 = vor.u32 %v11467_v16, %v10170_v50  ;;  %v11550_v39 = vld [vmem:[#allocation3 + $0xc0] sm:$0xf0]  ;;  %v11591_v16 = vld [vmem:[#allocation3 + $0x20c] sm:$0xf]  ;;  %v10742_v50 = vld [vmem:[#allocation3 + $0x21c] sm:$0xf0] }
 0x662   : > { %v5147_v44 = vpop.f32.mrf.mxu3  ;;  %v10577_v43 = vor.u32 %v11550_v39, %v10576_v29 }
 0x663   : > { %15004 = vst [vmem:[#allocation142_spill] sm:$0xff] %v14007_v2  ;;  %v5148_v23 = vadd.f32 %v5147_v44, %v13553_v37  ;;  %v14023_v37 = vpop.f32.mrf.mxu0  ;;  %v11472_v2 = vld [vmem:[#allocation3 + $0x1ec] sm:$0xf] }
 0x664   : > { %v10193_v40 = vor.u32 %v11472_v2, %v10190_v31  ;;  %v11597_v31 = vld [vmem:[#allocation3 + $0x23c] sm:$0xf] }
 0x665   : > { %7590 = vmatmul.bf16.gmra.mxu2 %v10725_v47  ;;  %v14015_v20 = vadd.f32 %v5148_v23, %v15006_v0  ;;  %v15009_v47 = vld [vmem:[#allocation56_spill] sm:$0xff]  ;;  %v11592_v23 = vld [vmem:[#allocation3 + $0x214] sm:$0xf]  ;;  %v10750_v0 = vld [vmem:[#allocation3 + $0x224] sm:$0xf0] }
 0x666   : > { %v10753_v29 = vor.u32 %v11592_v23, %v10750_v0  ;;  %v14030_v39 = vpop.f32.mrf.mxu1  ;;  %v11596_v23 = vld [vmem:[#allocation3 + $0x234] sm:$0xf]  ;;  %v10762_v0 = vld [vmem:[#allocation3 + $0x244] sm:$0xf0] }
 0x667   : > { %7768 = vmatmul.bf16.gmra.mxu0 %v10733_v5  ;;  %15007 = vst [vmem:[#allocation137_spill] sm:$0xff] %v14015_v20  ;;  %6394 = vmatmul.bf16.gmra.mxu3 %v10173_v13  ;;  %v10745_v13 = vor.u32 %v11591_v16, %v10742_v50  ;;  %v10765_v2 = vor.u32 %v11596_v23, %v10762_v0  ;;  %v11643_v0 = vld [vmem:[%s14503_s2 + $0x588] sm:$0xff] }
 0x668   : > { %15010 = vst [vmem:[#allocation143_spill] sm:$0xff] %v14030_v39  ;;  %7637 = vmatpush.bf16.msra.mxu3 %v11643_v0  ;;  %v11482_v39 = vld [vmem:[#allocation3 + $0x23c] sm:$0xf] }
 0x66a   : > { %v6355_v36 = vpop.f32.mrf.mxu3 }
 0x66b   : > { %v6356_v42 = vadd.f32 %v6355_v36, %v13551_v26 }
 0x66d   : > { %v6445_v44 = vadd.f32 %v15009_v47, %v6356_v42  ;;  %v10596_v42 = vld [vmem:[#allocation3 + $0xd8] sm:$0xf]  ;;  %v11555_v47 = vld [vmem:[#allocation3 + $0xe8] sm:$0xf0] }
 0x66e   : > { %v10597_v16 = vor.u32 %v11555_v47, %v10596_v42  ;;  %v15014_v47 = vld [vmem:[#allocation108_spill] sm:$0xff] }
 0x66f   : > { %v14027_v5 = vadd.f32 %v6445_v44, %v13566_v12 }
 0x671   : > { %7817 = vmatmul.bf16.vlgmr.msra.gmra.mxu1 %v10577_v43  ;;  %v14033_v43 = vpop.f32.mrf.mxu0 }
 0x672   : > { %v6357_v20 = vpop.f32.mrf.mxu3 }
 0x673   : > { %v6358_v26 = vadd.f32 %v6357_v20, %v13568_v59  ;;  %v15011_v59 = vld [vmem:[#allocation106_spill] sm:$0xff] }
 0x675   : > { %7595 = vmatmul.bf16.gmra.mxu2 %v10745_v13  ;;  %v6447_v36 = vadd.f32 %v13555_v9, %v6358_v26  ;;  %v14040_v13 = vpop.f32.mrf.mxu1 }
 0x676   : > { %15012 = vst [vmem:[#allocation145_spill] sm:$0xff] %v14040_v13 }
 0x677   : > { %7773 = vmatmul.bf16.gmra.mxu0 %v10753_v29  ;;  %v14036_v12 = vadd.f32 %v6447_v36, %v13578_v30  ;;  %6399 = vmatmul.bf16.gmra.mxu3 %v10193_v40  ;;  %v10770_v30 = vld [vmem:[#allocation3 + $0x24c] sm:$0xf0]  ;;  %v11477_v36 = vld [vmem:[#allocation3 + $0x214] sm:$0xf]  ;;  %v10210_v40 = vld [vmem:[#allocation3 + $0x224] sm:$0xf0] }
 0x679   : > { %v14045_v29 = vpop.f32.mrf.mxu0 }
 0x67a   : > { %v6360_v44 = vpop.f32.mrf.mxu3 }
 0x67b   : > { %v6361_v50 = vadd.f32 %v6360_v44, %v13580_v3  ;;  %v10773_v3 = vor.u32 %v11597_v31, %v10770_v30  ;;  %v15017_v30 = vld [vmem:[#allocation104_spill] sm:$0xff] }
 0x67d   : > { %v6450_v20 = vadd.f32 %v15011_v59, %v6361_v50  ;;  %v11560_v59 = vld [vmem:[#allocation3 + $0x110] sm:$0xf0] }
 0x67f   : > { %v14043_v9 = vadd.f32 %v6450_v20, %v13590_v11  ;;  %v10616_v11 = vld [vmem:[#allocation3 + $0x100] sm:$0xf]  ;;  %v14052_v20 = vpop.f32.mrf.mxu1 }
 0x680   : > { %15016 = vst [vmem:[#allocation93_spill] sm:$0xff] %v14052_v20 }
 0x681   : > { %7822 = vmatmul.bf16.gmra.mxu1 %v10597_v16  ;;  %15013 = vst [vmem:[#allocation49_spill] sm:$0xff] %v14043_v9  ;;  %v10213_v16 = vor.u32 %v11477_v36, %v10210_v40  ;;  %v14057_v31 = vpop.f32.mrf.mxu0  ;;  %v11601_v40 = vld [vmem:[#allocation3 + $0x25c] sm:$0xf]  ;;  %v11492_v9 = vld [vmem:[#allocation3 + $0x28c] sm:$0xf] }
 0x682   : > { %v6362_v26 = vpop.f32.mrf.mxu3 }
 0x683   : > { %v6363_v42 = vadd.f32 %v6362_v26, %v13592_v49  ;;  %v10617_v49 = vor.u32 %v11560_v59, %v10616_v11  ;;  %v14060_v26 = vpop.f32.mrf.mxu2 }
 0x685   : > { %7600 = vmatmul.bf16.gmra.mxu2 %v10765_v2  ;;  %v6452_v44 = vadd.f32 %v15014_v47, %v6363_v42  ;;  %v15019_v42 = vld [vmem:[#allocation109_spill] sm:$0xff] }
 0x687   : > { %7778 = vmatmul.bf16.gmra.mxu0 %v10773_v3  ;;  %v14050_v50 = vadd.f32 %v6452_v44, %v13602_v15  ;;  %6404 = vmatmul.bf16.gmra.mxu3 %v10213_v16  ;;  %v15018_v15 = vld [vmem:[#allocation29_spill] sm:$0xff]  ;;  %v10782_v3 = vld [vmem:[#allocation3 + $0x26c] sm:$0xf0]  ;;  %v10790_v16 = vld [vmem:[#allocation3 + $0x274] sm:$0xf0]  ;;  %v14066_v59 = vpop.f32.mrf.mxu1 }
 0x688   : > { %v11602_v44 = vld [vmem:[#allocation3 + $0x264] sm:$0xf]  ;;  %v10785_v20 = vor.u32 %v11601_v40, %v10782_v3  ;;  %15021 = vst [vmem:[#allocation148_spill] sm:$0xff] %v14066_v59  ;;  %v10636_v40 = vld [vmem:[#allocation3 + $0x128] sm:$0xf] }
 0x689   : > { %15015 = vst [vmem:[#allocation140_spill] sm:$0xff] %v14050_v50  ;;  %v10230_v50 = vld [vmem:[#allocation3 + $0x24c] sm:$0xf0]  ;;  %v10793_v11 = vor.u32 %v11602_v44, %v10790_v16  ;;  %v11565_v3 = vld [vmem:[#allocation3 + $0x138] sm:$0xf0] }
 0x68a   : > { %v6365_v23 = vpop.f32.mrf.mxu3  ;;  %v10637_v44 = vor.u32 %v11565_v3, %v10636_v40  ;;  %v11487_v3 = vld [vmem:[#allocation3 + $0x264] sm:$0xf] }
 0x68b   : > { %v6366_v2 = vadd.f32 %v6365_v23, %v15017_v30  ;;  %v15022_v23 = vld [vmem:[#allocation111_spill] sm:$0xff]  ;;  %v15023_v30 = vld [vmem:[#allocation57_spill] sm:$0xff] }
 0x68d   : > { %v6455_v36 = vadd.f32 %v15018_v15, %v6366_v2  ;;  %v10233_v15 = vor.u32 %v11482_v39, %v10230_v50 }
 0x68f   : > { %v14064_v47 = vadd.f32 %v6455_v36, %v15019_v42  ;;  %v14072_v36 = vpop.f32.mrf.mxu2  ;;  %v14078_v59 = vpop.f32.mrf.mxu1 }
 0x690   : > { %15025 = vst [vmem:[#allocation144_spill] sm:$0xff] %v14078_v59 }
 0x691   : > { %7827 = vmatmul.bf16.gmra.mxu1 %v10617_v49  ;;  %15020 = vst [vmem:[#allocation146_spill] sm:$0xff] %v14064_v47  ;;  %v14069_v49 = vpop.f32.mrf.mxu0 }
 0x692   : > { %v6367_v13 = vpop.f32.mrf.mxu3 }
 0x693   : > { %v6368_v0 = vadd.f32 %v6367_v13, %v15022_v23  ;;  %v15026_v13 = vld [vmem:[#allocation30_spill] sm:$0xff]  ;;  %v11606_v23 = vld [vmem:[#allocation3 + $0x284] sm:$0xf] }
 0x695   : > { %7605 = vmatmul.bf16.gmra.mxu2 %v10785_v20  ;;  %v6457_v2 = vadd.f32 %v15023_v30, %v6368_v0  ;;  %v10802_v0 = vld [vmem:[#allocation3 + $0x294] sm:$0xf0]  ;;  %v10810_v30 = vld [vmem:[#allocation3 + $0x29c] sm:$0xf0] }
 0x697   : > { %7783 = vmatmul.bf16.gmra.mxu0 %v10793_v11  ;;  %v14075_v42 = vadd.f32 %v6457_v2, %v13629_v51  ;;  %6409 = vmatmul.bf16.gmra.mxu3 %v10233_v15  ;;  %v11607_v51 = vld [vmem:[#allocation3 + $0x28c] sm:$0xf]  ;;  %v14086_v2 = vpop.f32.mrf.mxu2  ;;  %v10805_v15 = vor.u32 %v11606_v23, %v10802_v0  ;;  %v14090_v47 = vpop.f32.mrf.mxu1 }
 0x698   : > { %15030 = vst [vmem:[#allocation149_spill] sm:$0xff] %v14090_v47 }
 0x699   : > { %15024 = vst [vmem:[#allocation51_spill] sm:$0xff] %v14075_v42  ;;  %v14081_v39 = vpop.f32.mrf.mxu0 }
 0x69a   : > { %v6370_v20 = vpop.f32.mrf.mxu3 }
 0x69b   : > { %v6371_v16 = vadd.f32 %v6370_v20, %v13631_v53  ;;  %v10250_v53 = vld [vmem:[#allocation3 + $0x274] sm:$0xf0]  ;;  %v10813_v20 = vor.u32 %v11607_v51, %v10810_v30  ;;  %v11642_v51 = vld [vmem:[%s14503_s2 + $0x580] sm:$0xff] }
 0x69c   : > { %v10253_v42 = vor.u32 %v11487_v3, %v10250_v53  ;;  %7638 = vmatpush.bf16.msra.mxu3 %v11642_v51  ;;  %v11611_v3 = vld [vmem:[#allocation3 + $0x2ac] sm:$0xf] }
 0x69d   : > { %v6460_v11 = vadd.f32 %v15026_v13, %v6371_v16  ;;  %v15029_v16 = vld [vmem:[#allocation107_spill] sm:$0xff]  ;;  %v15035_v53 = vld [vmem:[#allocation114_spill] sm:$0xff] }
 0x69f   : > { %v14084_v50 = vadd.f32 %v6460_v11, %v13641_v62  ;;  %v10656_v11 = vld [vmem:[#allocation3 + $0x150] sm:$0xf]  ;;  %v14097_v0 = vpop.f32.mrf.mxu2  ;;  %v14107_v47 = vpop.f32.mrf.mxu1 }
 0x6a0   : > { %15033 = vst [vmem:[#allocation101_spill] sm:$0xff] %v14097_v0  ;;  %v10270_v0 = vld [vmem:[#allocation3 + $0x29c] sm:$0xf0] }
 0x6a1   : > { %7832 = vmatmul.bf16.gmra.mxu1 %v10637_v44  ;;  %15027 = vst [vmem:[#allocation97_spill] sm:$0xff] %v14084_v50  ;;  %v15028_v44 = vld [vmem:[#allocation58_spill] sm:$0xff]  ;;  %v11570_v50 = vld [vmem:[#allocation3 + $0x160] sm:$0xf0]  ;;  %v14095_v23 = vpop.f32.mrf.mxu0 }
 0x6a2   : > { %v6372_v40 = vpop.f32.mrf.mxu3  ;;  %15032 = vst [vmem:[#allocation147_spill] sm:$0xff] %v14095_v23  ;;  %v10657_v30 = vor.u32 %v11570_v50, %v10656_v11 }
 0x6a3   : > { %v6373_v59 = vadd.f32 %v6372_v40, %v15028_v44  ;;  %v15034_v40 = vld [vmem:[#allocation112_spill] sm:$0xff]  ;;  %v11612_v44 = vld [vmem:[#allocation3 + $0x2b4] sm:$0xf]  ;;  %15037 = vst [vmem:[#allocation151_spill] sm:$0xff] %v14107_v47 }
 0x6a5   : > { %7610 = vmatmul.bf16.gmra.mxu2 %v10805_v15  ;;  %v6462_v13 = vadd.f32 %v15029_v16, %v6373_v59  ;;  %v10830_v16 = vld [vmem:[#allocation3 + $0x2c4] sm:$0xf0] }
 0x6a6   : > { %v10833_v50 = vor.u32 %v11612_v44, %v10830_v16  ;;  %v15045_v16 = vld [vmem:[#allocation115_spill] sm:$0xff] }
 0x6a7   : > { %7788 = vmatmul.bf16.gmra.mxu0 %v10813_v20  ;;  %v14093_v62 = vadd.f32 %v6462_v13, %v13651_v57  ;;  %6414 = vmatmul.bf16.gmra.mxu3 %v10253_v42  ;;  %v10822_v42 = vld [vmem:[#allocation3 + $0x2bc] sm:$0xf0]  ;;  %v14112_v51 = vpop.f32.mrf.mxu2  ;;  %v14118_v44 = vpop.f32.mrf.mxu1 }
 0x6a8   : > { %v10825_v13 = vor.u32 %v11611_v3, %v10822_v42  ;;  %15040 = vst [vmem:[#allocation13_spill] sm:$0xff] %v14112_v51  ;;  %v10676_v3 = vld [vmem:[#allocation3 + $0x178] sm:$0xf]  ;;  %v11575_v42 = vld [vmem:[#allocation3 + $0x188] sm:$0xf0] }
 0x6a9   : > { %15031 = vst [vmem:[#allocation53_spill] sm:$0xff] %v14093_v62  ;;  %v10842_v51 = vld [vmem:[#allocation3 + $0x2e4] sm:$0xf0] }
 0x6aa   : > { %v6375_v15 = vpop.f32.mrf.mxu3  ;;  %15044 = vst [vmem:[#allocation75_spill] sm:$0xff] %v14118_v44  ;;  %v748_v44 = vld [vmem:[#allocation2 + $0x1d1] sm:$0xff] }
 0x6ab   : > { %v6376_v59 = vadd.f32 %v6375_v15, %v13655_v63  ;;  %v15038_v63 = vld [vmem:[#allocation31_spill] sm:$0xff]  ;;  %v14110_v15 = vpop.f32.mrf.mxu0 }
 0x6ac   : > { %15039 = vst [vmem:[#allocation12_spill] sm:$0xff] %v14110_v15  ;;  %v11616_v15 = vld [vmem:[#allocation3 + $0x2d4] sm:$0xf] }
 0x6ad   : > { %v6465_v57 = vadd.f32 %v15034_v40, %v6376_v59  ;;  %v10273_v40 = vor.u32 %v11492_v9, %v10270_v0  ;;  %v15046_v9 = vld [vmem:[#allocation117_spill] sm:$0xff] }
 0x6af   : > { %v14105_v20 = vadd.f32 %v6465_v57, %v15035_v53  ;;  %v15042_v57 = vld [vmem:[#allocation60_spill] sm:$0xff] }
 0x6b1   : > { %7837 = vmatmul.bf16.gmra.mxu1 %v10657_v30  ;;  %15036 = vst [vmem:[#allocation150_spill] sm:$0xff] %v14105_v20  ;;  %v15041_v30 = vld [vmem:[#allocation110_spill] sm:$0xff]  ;;  %v985_v20 = vld [vmem:[#allocation2 + $0x1b3] sm:$0xff] }
 0x6b2   : > { %v6377_v62 = vpop.f32.mrf.mxu3 }
 0x6b3   : > { %v6378_v11 = vadd.f32 %v6377_v62, %v15038_v63  ;;  %v10677_v62 = vor.u32 %v11575_v42, %v10676_v3  ;;  %v788_v42 = vpack.c.bf16 %v748_v44, %v748_v44  ;;  %v10696_v44 = vld [vmem:[#allocation3 + $0x1a0] sm:$0xf] }
 0x6b5   : > { %7615 = vmatmul.bf16.gmra.mxu2 %v10825_v13  ;;  %v6467_v59 = vadd.f32 %v15041_v30, %v6378_v11  ;;  %v986_v13 = vld [vmem:[#allocation2 + $0x1bb] sm:$0xff]  ;;  %v14122_v11 = vpop.f32.mrf.mxu2  ;;  %v10845_v30 = vor.u32 %v11616_v15, %v10842_v51  ;;  %828 = vst [vmem:[#allocation3 + $0x310] sm:$0xf] %v788_v42 }
 0x6b6   : > { %v1026_v23 = vpack.c.bf16 %v986_v13, %v986_v13  ;;  %v14128_v13 = vpop.f32.mrf.mxu1 }
 0x6b7   : > { %7793 = vmatmul.bf16.gmra.mxu0 %v10833_v50  ;;  %v14116_v53 = vadd.f32 %v6467_v59, %v15042_v57  ;;  %6419 = vmatmul.bf16.gmra.mxu3 %v10273_v40  ;;  %v1025_v50 = vpack.c.bf16 %v985_v20, %v985_v20  ;;  %v15047_v59 = vld [vmem:[#allocation32_spill] sm:$0xff]  ;;  %v747_v57 = vld [vmem:[#allocation2 + $0x1c9] sm:$0xff]  ;;  %15048 = vst [vmem:[#allocation73_spill] sm:$0xff] %v14128_v13 }
 0x6b8   : > { %1066 = vst [vmem:[#allocation3 + $0x2f0] sm:$0xf] %v1026_v23  ;;  %v787_v3 = vpack.c.bf16 %v747_v57, %v747_v57  ;;  %v15056_v13 = vld [vmem:[#allocation116_spill] sm:$0xff] }
 0x6b9   : > { %15043 = vst [vmem:[#allocation78_spill] sm:$0xff] %v14116_v53  ;;  %v10290_v53 = vld [vmem:[#allocation3 + $0x2c4] sm:$0xf0] }
 0x6ba   : > { %v6380_v47 = vpop.f32.mrf.mxu3  ;;  %1065 = vst [vmem:[#allocation3 + $0x2dc] sm:$0xf] %v1025_v50 }
 0x6bb   : > { %v6381_v63 = vadd.f32 %v6380_v47, %v15045_v16  ;;  %v11497_v16 = vld [vmem:[#allocation3 + $0x2b4] sm:$0xf]  ;;  %827 = vst [vmem:[#allocation3 + $0x2fc] sm:$0xf] %v787_v3 }
 0x6bc   : > { %v10293_v23 = vor.u32 %v11497_v16, %v10290_v53  ;;  %v15051_v53 = vld [vmem:[#allocation62_spill] sm:$0xff] }
 0x6bd   : > { %v6470_v0 = vadd.f32 %v15046_v9, %v6381_v63  ;;  %v11580_v63 = vld [vmem:[#allocation3 + $0x1b0] sm:$0xf0] }
 0x6be   : > { %v10697_v9 = vor.u32 %v11580_v63, %v10696_v44  ;;  %v15053_v63 = vld [vmem:[#allocation120_spill] sm:$0xff] }
 0x6bf   : > { %v14125_v40 = vadd.f32 %v6470_v0, %v15047_v59  ;;  %v15049_v59 = vld [vmem:[#allocation113_spill] sm:$0xff] }
 0x6c1   : > { %7842 = vmatmul.bf16.gmra.mxu1 %v10677_v62  ;;  %v14134_v62 = vpop.f32.mrf.mxu2  ;;  %v11502_v42 = vld [vmem:[#allocation3 + $0x2dc] sm:$0xf] }
 0x6c2   : > { %v6382_v47 = vpop.f32.mrf.mxu3 }
 0x6c3   : > { %v6383_v20 = vadd.f32 %v6382_v47, %v13716_v22  ;;  %v10862_v22 = vld [vmem:[#allocation3 + $0x30c] sm:$0xf0] }
 0x6c4   : > { %v10310_v47 = vld [vmem:[#allocation3 + $0x2ec] sm:$0xf0] }
 0x6c5   : > { %7620 = vmatmul.bf16.gmra.mxu2 %v10845_v30  ;;  %v6472_v15 = vadd.f32 %v13720_v27, %v6383_v20  ;;  %v11621_v30 = vld [vmem:[#allocation3 + $0x2fc] sm:$0xf]  ;;  %v14138_v27 = vpop.f32.mrf.mxu1 }
 0x6c6   : > { %v10865_v3 = vor.u32 %v11621_v30, %v10862_v22  ;;  %15050 = vst [vmem:[#allocation79_spill] sm:$0xff] %v14138_v27  ;;  %v15055_v27 = vld [vmem:[#allocation121_spill] sm:$0xff] }
 0x6c7   : > { %v14132_v51 = vadd.f32 %v6472_v15, %v13732_v58  ;;  %6424 = vmatmul.bf16.gmra.mxu3 %v10293_v23  ;;  %v15052_v15 = vld [vmem:[#allocation118_spill] sm:$0xff] }
 0x6c9   : > { %v14143_v16 = vpop.f32.mrf.mxu2 }
 0x6ca   : > { %v6385_v50 = vpop.f32.mrf.mxu3 }
 0x6cb   : > { %v6386_v0 = vadd.f32 %v6385_v50, %v13737_v17  ;;  %v10313_v17 = vor.u32 %v11502_v42, %v10310_v47 }
 0x6cd   : > { %v6475_v57 = vadd.f32 %v15049_v59, %v6386_v0  ;;  %v11585_v0 = vld [vmem:[#allocation3 + $0x1d8] sm:$0xf0]  ;;  %v14150_v30 = vpop.f32.mrf.mxu1 }
 0x6cf   : > { %v14141_v58 = vadd.f32 %v6475_v57, %v15051_v53  ;;  %v15054_v57 = vld [vmem:[#allocation33_spill] sm:$0xff] }
 0x6d1   : > { %7847 = vmatmul.bf16.gmra.mxu1 %v10697_v9  ;;  %v10716_v9 = vld [vmem:[#allocation3 + $0x1c8] sm:$0xf] }
 0x6d2   : > { %v6387_v20 = vpop.f32.mrf.mxu3  ;;  %v10717_v59 = vor.u32 %v11585_v0, %v10716_v9  ;;  %v10736_v0 = vld [vmem:[#allocation3 + $0x1f0] sm:$0xf] }
 0x6d3   : > { %v6388_v23 = vadd.f32 %v6387_v20, %v15052_v15  ;;  %v15057_v15 = vld [vmem:[#allocation65_spill] sm:$0xff] }
 0x6d5   : > { %7625 = vmatmul.bf16.gmra.mxu2 %v10865_v3  ;;  %v6477_v44 = vadd.f32 %v13782_v55, %v6388_v23  ;;  %v11549_v55 = vld [vmem:[#allocation3 + $0xb8] sm:$0xf0]  ;;  %v14157_v47 = vpop.f32.mrf.mxu1 }
 0x6d7   : > { %v14148_v50 = vadd.f32 %v6477_v44, %v15053_v63  ;;  %6429 = vmatmul.bf16.gmra.mxu3 %v10313_v17  ;;  %v10568_v17 = vld [vmem:[#allocation3 + $0xa8] sm:$0xf] }
 0x6d8   : > { %v10569_v63 = vor.u32 %v11549_v55, %v10568_v17  ;;  %v10588_v55 = vld [vmem:[#allocation3 + $0xd0] sm:$0xf] }
 0x6da   : > { %v6390_v22 = vpop.f32.mrf.mxu3 }
 0x6db   : > { %v6391_v53 = vadd.f32 %v6390_v22, %v15054_v57  ;;  %v11590_v22 = vld [vmem:[#allocation3 + $0x200] sm:$0xf0] }
 0x6dd   : > { %v6480_v3 = vadd.f32 %v15055_v27, %v6391_v53  ;;  %v14165_v57 = vpop.f32.mrf.mxu1 }
 0x6df   : > { %v14155_v20 = vadd.f32 %v6480_v3, %v15056_v13 }
 0x6e1   : > { %7852 = vmatmul.bf16.gmra.mxu1 %v10717_v59  ;;  %v10737_v59 = vor.u32 %v11590_v22, %v10736_v0 }
 0x6e2   : > { %v6392_v42 = vpop.f32.mrf.mxu3 }
 0x6e3   : > { %v6393_v23 = vadd.f32 %v6392_v42, %v15057_v15  ;;  %v11554_v42 = vld [vmem:[#allocation3 + $0xe0] sm:$0xf0] }
 0x6e5   : > { %v6482_v44 = vadd.f32 %v13808_v61, %v6393_v23  ;;  %v10589_v23 = vor.u32 %v11554_v42, %v10588_v55  ;;  %v14173_v17 = vpop.f32.mrf.mxu1  ;;  %v10608_v42 = vld [vmem:[#allocation3 + $0xf8] sm:$0xf] }
 0x6e7   : > { %v14162_v9 = vadd.f32 %v6482_v44, %v13802_v33  ;;  %7639 = vmatmul.bf16.vlgmr.msra.gmra.mxu3 %v10569_v63  ;;  %v10756_v44 = vld [vmem:[#allocation3 + $0x218] sm:$0xf]  ;;  %v11595_v63 = vld [vmem:[#allocation3 + $0x228] sm:$0xf0] }
 0x6e8   : > { %v10757_v0 = vor.u32 %v11595_v63, %v10756_v44  ;;  %v11600_v44 = vld [vmem:[#allocation3 + $0x250] sm:$0xf0] }
 0x6ea   : > { %v6395_v27 = vpop.f32.mrf.mxu3 }
 0x6eb   : > { %v6396_v13 = vadd.f32 %v6395_v27, %v13804_v60 }
 0x6ed   : > { %v6485_v53 = vadd.f32 %v13829_v4, %v6396_v13 }
 0x6ef   : > { %v14169_v3 = vadd.f32 %v6485_v53, %v13814_v34  ;;  %v15058_v34 = vld [vmem:[#allocation119_spill] sm:$0xff]  ;;  %v11559_v53 = vld [vmem:[#allocation3 + $0x108] sm:$0xf0] }
 0x6f0   : > { %v10609_v55 = vor.u32 %v11559_v53, %v10608_v42  ;;  %v10628_v53 = vld [vmem:[#allocation3 + $0x120] sm:$0xf] }
 0x6f1   : > { %7857 = vmatmul.bf16.gmra.mxu1 %v10737_v59 }
 0x6f2   : > { %v6397_v61 = vpop.f32.mrf.mxu3 }
 0x6f3   : > { %v6398_v33 = vadd.f32 %v6397_v61, %v13819_v19  ;;  %v15059_v19 = vld [vmem:[#allocation124_spill] sm:$0xff]  ;;  %v15060_v61 = vld [vmem:[#allocation126_spill] sm:$0xff] }
 0x6f5   : > { %v6487_v15 = vadd.f32 %v13846_v7, %v6398_v33  ;;  %v14183_v7 = vpop.f32.mrf.mxu1 }
 0x6f7   : > { %v14176_v60 = vadd.f32 %v6487_v15, %v13832_v28  ;;  %7644 = vmatmul.bf16.gmra.mxu3 %v10589_v23  ;;  %v10776_v23 = vld [vmem:[#allocation3 + $0x240] sm:$0xf] }
 0x6fa   : > { %v6400_v4 = vpop.f32.mrf.mxu3 }
 0x6fb   : > { %v6401_v22 = vadd.f32 %v6400_v4, %v15058_v34  ;;  %v10777_v4 = vor.u32 %v11600_v44, %v10776_v23 }
 0x6fd   : > { %v6490_v27 = vadd.f32 %v13858_v25, %v6401_v22  ;;  %v14190_v63 = vpop.f32.mrf.mxu1  ;;  %v15061_v22 = vld [vmem:[#allocation72_spill] sm:$0xff] }
 0x6ff   : > { %v14181_v59 = vadd.f32 %v6490_v27, %v15059_v19  ;;  %v11564_v19 = vld [vmem:[#allocation3 + $0x130] sm:$0xf0] }
 0x700   : > { %v10629_v42 = vor.u32 %v11564_v19, %v10628_v53 }
 0x701   : > { %7862 = vmatmul.bf16.gmra.mxu1 %v10757_v0 }
 0x702   : > { %v6402_v13 = vpop.f32.mrf.mxu3 }
 0x703   : > { %v6403_v28 = vadd.f32 %v6402_v13, %v15060_v61  ;;  %v15062_v13 = vld [vmem:[#allocation127_spill] sm:$0xff] }
 0x705   : > { %v6492_v33 = vadd.f32 %v13878_v52, %v6403_v28  ;;  %v14198_v61 = vpop.f32.mrf.mxu1 }
 0x706   : > { %15063 = vst [vmem:[#allocation16_spill] sm:$0xff] %v14198_v61  ;;  %v15075_v61 = vld [vmem:[#allocation85_spill] sm:$0xff] }
 0x707   : > { %v14188_v15 = vadd.f32 %v6492_v33, %v13854_v38  ;;  %7649 = vmatmul.bf16.gmra.mxu3 %v10609_v55  ;;  %v11605_v55 = vld [vmem:[#allocation3 + $0x278] sm:$0xf0] }
 0x70a   : > { %v6405_v25 = vpop.f32.mrf.mxu3 }
 0x70b   : > { %v6406_v0 = vadd.f32 %v6405_v25, %v13856_v54  ;;  %v10796_v54 = vld [vmem:[#allocation3 + $0x268] sm:$0xf] }
 0x70c   : > { %v10797_v23 = vor.u32 %v11605_v55, %v10796_v54 }
 0x70d   : > { %v6495_v34 = vadd.f32 %v13893_v21, %v6406_v0 }
 0x70f   : > { %v14195_v27 = vadd.f32 %v6495_v34, %v15061_v22  ;;  %v11569_v34 = vld [vmem:[#allocation3 + $0x158] sm:$0xf0]  ;;  %v15064_v22 = vld [vmem:[#allocation125_spill] sm:$0xff] }
 0x711   : > { %7867 = vmatmul.bf16.gmra.mxu1 %v10777_v4  ;;  %v14206_v4 = vpop.f32.mrf.mxu1 }
 0x712   : > { %v6407_v52 = vpop.f32.mrf.mxu3 }
 0x713   : > { %v6408_v38 = vadd.f32 %v6407_v52, %v15062_v13  ;;  %v10648_v52 = vld [vmem:[#allocation3 + $0x148] sm:$0xf] }
 0x714   : > { %v10649_v13 = vor.u32 %v11569_v34, %v10648_v52  ;;  %v15068_v34 = vld [vmem:[#allocation128_spill] sm:$0xff] }
 0x715   : > { %v6497_v28 = vadd.f32 %v13910_v8, %v6408_v38  ;;  %v15065_v38 = vld [vmem:[#allocation130_spill] sm:$0xff] }
 0x717   : > { %v14202_v33 = vadd.f32 %v6497_v28, %v13884_v10  ;;  %7654 = vmatmul.bf16.gmra.mxu3 %v10629_v42  ;;  %v11610_v28 = vld [vmem:[#allocation3 + $0x2a0] sm:$0xf0] }
 0x71a   : > { %v6410_v21 = vpop.f32.mrf.mxu3 }
 0x71b   : > { %v6411_v44 = vadd.f32 %v6410_v21, %v13886_v56  ;;  %v10816_v56 = vld [vmem:[#allocation3 + $0x290] sm:$0xf] }
 0x71c   : > { %v10817_v54 = vor.u32 %v11610_v28, %v10816_v56  ;;  %v11615_v56 = vld [vmem:[#allocation3 + $0x2c8] sm:$0xf0] }
 0x71d   : > { %v6500_v25 = vadd.f32 %v13925_v6, %v6411_v44  ;;  %v14216_v6 = vpop.f32.mrf.mxu1 }
 0x71f   : > { %v14209_v0 = vadd.f32 %v6500_v25, %v13896_v18  ;;  %v15066_v18 = vld [vmem:[#allocation132_spill] sm:$0xff]  ;;  %v11574_v25 = vld [vmem:[#allocation3 + $0x180] sm:$0xf0] }
 0x721   : > { %7872 = vmatmul.bf16.gmra.mxu1 %v10797_v23  ;;  %v15067_v23 = vld [vmem:[#allocation41_spill] sm:$0xff] }
 0x722   : > { %v6412_v8 = vpop.f32.mrf.mxu3 }
 0x723   : > { %v6413_v10 = vadd.f32 %v6412_v8, %v15064_v22 }
 0x725   : > { %v6502_v19 = vadd.f32 %v13940_v32, %v6413_v10  ;;  %v14223_v8 = vpop.f32.mrf.mxu1  ;;  %v10668_v10 = vld [vmem:[#allocation3 + $0x170] sm:$0xf] }
 0x727   : > { %v14214_v53 = vadd.f32 %v6502_v19, %v15065_v38  ;;  %7659 = vmatmul.bf16.gmra.mxu3 %v10649_v13  ;;  %v10669_v19 = vor.u32 %v11574_v25, %v10668_v10  ;;  %v10836_v38 = vld [vmem:[#allocation3 + $0x2b8] sm:$0xf]  ;;  %v11579_v25 = vld [vmem:[#allocation3 + $0x1a8] sm:$0xf0] }
 0x728   : > { %v10837_v28 = vor.u32 %v11615_v56, %v10836_v38  ;;  %v15073_v56 = vld [vmem:[#allocation138_spill] sm:$0xff] }
 0x72a   : > { %v6415_v42 = vpop.f32.mrf.mxu3 }
 0x72b   : > { %v6416_v55 = vadd.f32 %v6415_v42, %v15066_v18  ;;  %v15069_v42 = vld [vmem:[#allocation133_spill] sm:$0xff] }
 0x72d   : > { %v6505_v21 = vadd.f32 %v13964_v14, %v6416_v55  ;;  %v14231_v18 = vpop.f32.mrf.mxu1 }
 0x72f   : > { %v14221_v44 = vadd.f32 %v6505_v21, %v15067_v23  ;;  %v15070_v21 = vld [vmem:[#allocation43_spill] sm:$0xff] }
 0x731   : > { %7877 = vmatmul.bf16.gmra.mxu1 %v10817_v54 }
 0x732   : > { %v6417_v32 = vpop.f32.mrf.mxu3 }
 0x733   : > { %v6418_v22 = vadd.f32 %v6417_v32, %v15068_v34  ;;  %v10688_v32 = vld [vmem:[#allocation3 + $0x198] sm:$0xf] }
 0x734   : > { %v10689_v10 = vor.u32 %v11579_v25, %v10688_v32 }
 0x735   : > { %v6507_v52 = vadd.f32 %v13987_v41, %v6418_v22 }
 0x737   : > { %v14228_v13 = vadd.f32 %v6507_v52, %v13934_v24  ;;  %7664 = vmatmul.bf16.gmra.mxu3 %v10669_v19  ;;  %v15071_v24 = vld [vmem:[#allocation131_spill] sm:$0xff]  ;;  %v15072_v52 = vld [vmem:[#allocation136_spill] sm:$0xff] }
 0x73a   : > { %v6420_v14 = vpop.f32.mrf.mxu3 }
 0x73b   : > { %v6421_v54 = vadd.f32 %v6420_v14, %v15069_v42 }
 0x73d   : > { %v6510_v55 = vadd.f32 %v13999_v45, %v6421_v54 }
 0x73f   : > { %v14235_v23 = vadd.f32 %v6510_v55, %v15070_v21  ;;  %v10708_v55 = vld [vmem:[#allocation3 + $0x1c0] sm:$0xf]  ;;  %v11584_v21 = vld [vmem:[#allocation3 + $0x1d0] sm:$0xf0] }
 0x740   : > { %v10709_v32 = vor.u32 %v11584_v21, %v10708_v55  ;;  %v15077_v55 = vld [vmem:[#allocation137_spill] sm:$0xff] }
 0x741   : > { %7882 = vmatmul.bf16.gmra.mxu1 %v10837_v28  ;;  %v15074_v28 = vld [vmem:[#allocation134_spill] sm:$0xff] }
 0x742   : > { %v6422_v41 = vpop.f32.mrf.mxu3 }
 0x743   : > { %v6423_v34 = vadd.f32 %v6422_v41, %v15071_v24  ;;  %v14252_v24 = vpop.f32.mrf.mxu0 }
 0x745   : > { %v6512_v22 = vadd.f32 %v14011_v46, %v6423_v34  ;;  %v14254_v34 = vpop.f32.mrf.mxu1 }
 0x747   : > { %v14240_v19 = vadd.f32 %v6512_v22, %v15072_v52  ;;  %7669 = vmatmul.bf16.gmra.mxu3 %v10689_v10 }
 0x74a   : > { %v6425_v38 = vpop.f32.mrf.mxu3 }
 0x74b   : > { %v6426_v14 = vadd.f32 %v6425_v38, %v15073_v56  ;;  %v10728_v38 = vld [vmem:[#allocation3 + $0x1e8] sm:$0xf]  ;;  %v11589_v56 = vld [vmem:[#allocation3 + $0x1f8] sm:$0xf0] }
 0x74d   : > { %v6515_v45 = vadd.f32 %v14023_v37, %v6426_v14 }
 0x74f   : > { %v14245_v42 = vadd.f32 %v6515_v45, %v15074_v28  ;;  %v14264_v45 = vpop.f32.mrf.mxu1 }
 0x752   : > { %v6427_v54 = vpop.f32.mrf.mxu3 }
 0x753   : > { %v6428_v41 = vadd.f32 %v6427_v54, %v15075_v61  ;;  %v14261_v61 = vpop.f32.mrf.mxu0  ;;  %v10729_v54 = vor.u32 %v11589_v56, %v10728_v38  ;;  %v10748_v56 = vld [vmem:[#allocation3 + $0x210] sm:$0xf] }
 0x755   : > { %v6517_v46 = vadd.f32 %v14033_v43, %v6428_v41 }
 0x757   : > { %v14250_v25 = vadd.f32 %v6517_v46, %v13993_v48  ;;  %7674 = vmatmul.bf16.gmra.mxu3 %v10709_v32  ;;  %v15076_v48 = vld [vmem:[#allocation142_spill] sm:$0xff] }
 0x75a   : > { %v6430_v37 = vpop.f32.mrf.mxu3 }
 0x75b   : > { %v6431_v22 = vadd.f32 %v6430_v37, %v13995_v1  ;;  %v15079_v1 = vld [vmem:[#allocation123_spill] sm:$0xff]  ;;  %v14272_v46 = vpop.f32.mrf.mxu0  ;;  %v14275_v37 = vpop.f32.mrf.mxu1 }
 0x75d   : > { %v6520_v10 = vadd.f32 %v14045_v29, %v6431_v22 }
 0x75f   : > { %v14259_v52 = vadd.f32 %v6520_v10, %v14005_v35  ;;  %v7552_v35 = vadd.f32 %v14060_v26, %v15079_v1  ;;  %v15080_v10 = vld [vmem:[#allocation35_spill] sm:$0xff]  ;;  %v14284_v26 = vld [vmem:[%s14504_s3] ss:$0 sm:$0xff] }
 0x762   : > { %v6432_v43 = vpop.f32.mrf.mxu3 }
 0x763   : > { %v6433_v14 = vadd.f32 %v6432_v43, %v15076_v48  ;;  %v11594_v48 = vld [vmem:[#allocation3 + $0x220] sm:$0xf0] }
 0x765   : > { %v6522_v28 = vadd.f32 %v14057_v31, %v6433_v14  ;;  %v7554_v31 = vadd.f32 %v14072_v36, %v15080_v10 }
 0x767   : > { %v14268_v21 = vadd.f32 %v6522_v28, %v15077_v55  ;;  %7679 = vmatmul.bf16.gmra.mxu3 %v10729_v54  ;;  %v10749_v28 = vor.u32 %v11594_v48, %v10748_v56  ;;  %v14287_v54 = vpop.f32.mrf.mxu0  ;;  %v15081_v55 = vld [vmem:[#allocation69_spill] sm:$0xff] }
 0x768   : > { %v7557_v1 = vadd.f32 %v14086_v2, %v15081_v55  ;;  %v15084_v56 = vld [vmem:[#allocation101_spill] sm:$0xff] }
 0x769   : > { %15078 = vst [vmem:[#allocation17_spill] sm:$0xff] %v14268_v21  ;;  %v11604_v21 = vld [vmem:[#allocation3 + $0x270] sm:$0xf0] }
 0x76a   : > { %v7640_v29 = vpop.f32.mrf.mxu3 }
 0x76b   : > { %v7641_v41 = vadd.f32 %v7640_v29, %v7552_v35 }
 0x76d   : > { %v7730_v32 = vadd.f32 %v14069_v49, %v7641_v41 }
 0x76f   : > { %v7819_v22 = vadd.f32 %v14206_v4, %v7730_v32  ;;  %v14289_v4 = vpop.f32.mrf.mxu2 }
 0x771   : > { %v7930_v43 = vadd.f32 %v7819_v22, %v14027_v5  ;;  %v14292_v5 = vpop.f32.mrf.mxu1 }
 0x772   : > { %v7642_v38 = vpop.f32.mrf.mxu3 }
 0x773   : > { %v7643_v14 = vadd.f32 %v7642_v38, %v7554_v31  ;;  %v8030_v35 = vadd.f32 %v14284_v26, %v7930_v43  ;;  %v15082_v31 = vld [vmem:[#allocation147_spill] sm:$0xff]  ;;  %v14308_v43 = vpop.f32.mrf.mxu0 }
 0x775   : > { %v7732_v49 = vadd.f32 %v14081_v39, %v7643_v14  ;;  %v8062_v22 = vmax.f32 %v8030_v35, 0.0  ;;  %v11599_v35 = vld [vmem:[#allocation3 + $0x248] sm:$0xf0] }
 0x777   : > { %v7821_v36 = vadd.f32 %v14216_v6, %v7732_v49  ;;  %7684 = vmatmul.bf16.gmra.mxu3 %v10749_v28  ;;  %v14312_v14 = vpop.f32.mrf.mxu2  ;;  %v15085_v49 = vld [vmem:[#allocation49_spill] sm:$0xff] }
 0x779   : > { %v7931_v29 = vadd.f32 %v7821_v36, %v14036_v12  ;;  %v15083_v12 = vld [vmem:[#allocation37_spill] sm:$0xff]  ;;  %v14316_v36 = vpop.f32.mrf.mxu1 }
 0x77a   : > { %v7645_v41 = vpop.f32.mrf.mxu3  ;;  %v7559_v48 = vadd.f32 %v15084_v56, %v15083_v12 }
 0x77b   : > { %v8031_v39 = vadd.f32 %v14284_v26, %v7931_v29  ;;  %v7646_v32 = vadd.f32 %v7645_v41, %v7557_v1  ;;  %v10768_v1 = vld [vmem:[#allocation3 + $0x238] sm:$0xf]  ;;  %v14324_v12 = vpop.f32.mrf.mxu0 }
 0x77c   : > { %v15086_v41 = vld [vmem:[#allocation12_spill] sm:$0xff] }
 0x77d   : > { %v8063_v10 = vmax.f32 %v8031_v39, 0.0  ;;  %v7735_v38 = vadd.f32 %v15082_v31, %v7646_v32  ;;  %v10769_v32 = vor.u32 %v11599_v35, %v10768_v1 }
 0x77f   : > { %v11669_v2 = vpack.c.bf16 %v8063_v10, %v8062_v22  ;;  %v7824_v6 = vadd.f32 %v14223_v8, %v7735_v38  ;;  %v15087_v22 = vld [vmem:[#allocation122_spill] sm:$0xff]  ;;  %v15088_v10 = vld [vmem:[#allocation13_spill] sm:$0xff] }
 0x780   : > { %v7562_v31 = vadd.f32 %v15088_v10, %v15087_v22 }
 0x781   : > { %11670 = vst [vmem:[%s14305_s27] sm:$0xff] %v11669_v2   ;;  %v7932_v28 = vadd.f32 %v7824_v6, %v15085_v49  ;;  %v15089_v2 = vld [vmem:[#allocation140_spill] sm:$0xff]  ;;  %v14326_v49 = vpop.f32.mrf.mxu2  ;;  %v14329_v1 = vpop.f32.mrf.mxu1 }
 0x782   : > { %v7647_v55 = vpop.f32.mrf.mxu3 }
 0x783   : > { %v7648_v29 = vadd.f32 %v7647_v55, %v7559_v48  ;;  %v8032_v38 = vadd.f32 %v14284_v26, %v7932_v28  ;;  %v15090_v28 = vld [vmem:[#allocation129_spill] sm:$0xff] }
 0x785   : > { %v7737_v39 = vadd.f32 %v15086_v41, %v7648_v29 }
 0x787   : > { %v7826_v8 = vadd.f32 %v14231_v18, %v7737_v39  ;;  %7689 = vmatmul.bf16.gmra.mxu3 %v10769_v32  ;;  %v8064_v18 = vmax.f32 %v8032_v38, 0.0  ;;  %v7564_v32 = vadd.f32 %v14122_v11, %v15090_v28  ;;  %v15092_v11 = vld [vmem:[#allocation39_spill] sm:$0xff] }
 0x789   : > { %v7933_v6 = vadd.f32 %v7826_v8, %v15089_v2  ;;  %v15091_v8 = vld [vmem:[#allocation146_spill] sm:$0xff]  ;;  %v10788_v2 = vld [vmem:[#allocation3 + $0x260] sm:$0xf] }
 0x78a   : > { %v7650_v56 = vpop.f32.mrf.mxu3 }
 0x78b   : > { %v8033_v48 = vadd.f32 %v14284_v26, %v7933_v6  ;;  %v7651_v55 = vadd.f32 %v7650_v56, %v7562_v31  ;;  %v14337_v31 = vpop.f32.mrf.mxu0  ;;  %v14339_v56 = vpop.f32.mrf.mxu2 }
 0x78d   : > { %v8065_v35 = vmax.f32 %v8033_v48, 0.0  ;;  %v7740_v29 = vadd.f32 %v14252_v24, %v7651_v55  ;;  %v10789_v24 = vor.u32 %v11604_v21, %v10788_v2  ;;  %v14342_v48 = vpop.f32.mrf.mxu1  ;;  %v7567_v55 = vadd.f32 %v14134_v62, %v15092_v11  ;;  %v10808_v11 = vld [vmem:[#allocation3 + $0x288] sm:$0xf] }
 0x78f   : > { %v11674_v41 = vpack.c.bf16 %v8065_v35, %v8064_v18  ;;  %v7829_v39 = vadd.f32 %v14254_v34, %v7740_v29  ;;  %v15093_v35 = vld [vmem:[#allocation51_spill] sm:$0xff] }
 0x791   : > { %11746 = vst [vmem:[%s14305_s27 + $0x8] sm:$0xff] %v11674_v41   ;;  %v7934_v22 = vadd.f32 %v7829_v39, %v15091_v8 }
 0x792   : > { %v7652_v10 = vpop.f32.mrf.mxu3 }
 0x793   : > { %v7653_v6 = vadd.f32 %v7652_v10, %v7564_v32  ;;  %v8034_v18 = vadd.f32 %v14284_v26, %v7934_v22  ;;  %v14351_v8 = vpop.f32.mrf.mxu0  ;;  %v15094_v22 = vld [vmem:[#allocation74_spill] sm:$0xff] }
 0x795   : > { %v7742_v38 = vadd.f32 %v14261_v61, %v7653_v6  ;;  %v8066_v32 = vmax.f32 %v8034_v18, 0.0  ;;  %v14356_v62 = vpop.f32.mrf.mxu1  ;;  %v7569_v6 = vadd.f32 %v14143_v16, %v15094_v22 }
 0x797   : > { %v7831_v34 = vadd.f32 %v14264_v45, %v7742_v38  ;;  %7694 = vmatmul.bf16.gmra.mxu3 %v10789_v24  ;;  %v14353_v45 = vpop.f32.mrf.mxu2  ;;  %v15095_v38 = vld [vmem:[#allocation97_spill] sm:$0xff] }
 0x799   : > { %v7935_v29 = vadd.f32 %v7831_v34, %v15093_v35 }
 0x79a   : > { %v7655_v41 = vpop.f32.mrf.mxu3 }
 0x79b   : > { %v8035_v39 = vadd.f32 %v14284_v26, %v7935_v29  ;;  %v7656_v28 = vadd.f32 %v7655_v41, %v7567_v55  ;;  %v11609_v55 = vld [vmem:[#allocation3 + $0x298] sm:$0xf0]  ;;  %v15096_v41 = vld [vmem:[#allocation77_spill] sm:$0xff] }
 0x79c   : > { %v10809_v35 = vor.u32 %v11609_v55, %v10808_v11  ;;  %v11614_v55 = vld [vmem:[#allocation3 + $0x2c0] sm:$0xf0] }
 0x79d   : > { %v8067_v61 = vmax.f32 %v8035_v39, 0.0  ;;  %v7745_v21 = vadd.f32 %v14272_v46, %v7656_v28  ;;  %v7572_v39 = vadd.f32 %v14289_v4, %v15096_v41  ;;  %v10856_v41 = vld [vmem:[#allocation3 + $0x2e0] sm:$0xf] }
 0x79f   : > { %v11679_v10 = vpack.c.bf16 %v8067_v61, %v8066_v32  ;;  %v7834_v2 = vadd.f32 %v14275_v37, %v7745_v21  ;;  %v14364_v37 = vpop.f32.mrf.mxu0  ;;  %v14368_v16 = vpop.f32.mrf.mxu2  ;;  %v15097_v32 = vld [vmem:[#allocation53_spill] sm:$0xff] }
 0x7a0   : > { %v14372_v21 = vpop.f32.mrf.mxu1 }
 0x7a1   : > { %11747 = vst [vmem:[%s14305_s27 + $0x10] sm:$0xff] %v11679_v10   ;;  %v7936_v24 = vadd.f32 %v7834_v2, %v15095_v38 }
 0x7a2   : > { %v7657_v34 = vpop.f32.mrf.mxu3 }
 0x7a3   : > { %v7658_v18 = vadd.f32 %v7657_v34, %v7569_v6  ;;  %v8036_v28 = vadd.f32 %v14284_v26, %v7936_v24  ;;  %v15098_v34 = vld [vmem:[#allocation135_spill] sm:$0xff] }
 0x7a4   : > { %v7574_v4 = vadd.f32 %v14312_v14, %v15098_v34  ;;  %v10828_v24 = vld [vmem:[#allocation3 + $0x2b0] sm:$0xf]  ;;  %v15099_v14 = vld [vmem:[#allocation150_spill] sm:$0xff] }
 0x7a5   : > { %v7747_v46 = vadd.f32 %v14287_v54, %v7658_v18  ;;  %v15101_v34 = vld [vmem:[#allocation78_spill] sm:$0xff] }
 0x7a7   : > { %v7836_v29 = vadd.f32 %v14292_v5, %v7747_v46  ;;  %7699 = vmatmul.bf16.gmra.mxu3 %v10809_v35  ;;  %v8068_v5 = vmax.f32 %v8036_v28, 0.0  ;;  %v14380_v18 = vpop.f32.mrf.mxu0  ;;  %v11617_v35 = vld [vmem:[#allocation3 + $0x2dc] sm:$0xf] }
 0x7a9   : > { %v7937_v61 = vadd.f32 %v7836_v29, %v15097_v32  ;;  %v10850_v29 = vld [vmem:[#allocation3 + $0x2ec] sm:$0xf0] }
 0x7aa   : > { %v7660_v10 = vpop.f32.mrf.mxu3  ;;  %v10853_v32 = vor.u32 %v11617_v35, %v10850_v29 }
 0x7ab   : > { %v8037_v54 = vadd.f32 %v14284_v26, %v7937_v61  ;;  %v7661_v2 = vadd.f32 %v7660_v10, %v7572_v39  ;;  %v14382_v39 = vpop.f32.mrf.mxu2  ;;  %v14384_v61 = vpop.f32.mrf.mxu1 }
 0x7ac   : > { %7798 = vmatmul.bf16.gmra.mxu0 %v10853_v32  ;;  %v11619_v32 = vld [vmem:[#allocation3 + $0x2e8] sm:$0xf0] }
 0x7ad   : > { %v8069_v22 = vmax.f32 %v8037_v54, 0.0  ;;  %v7750_v6 = vadd.f32 %v14308_v43, %v7661_v2  ;;  %v11620_v43 = vld [vmem:[#allocation3 + $0x2f0] sm:$0xf0]  ;;  %v10829_v2 = vor.u32 %v11614_v55, %v10828_v24 }
 0x7ae   : > { %v10857_v10 = vor.u32 %v11620_v43, %v10856_v41  ;;  %v15102_v43 = vld [vmem:[#allocation45_spill] sm:$0xff] }
 0x7af   : > { %v11684_v38 = vpack.c.bf16 %v8069_v22, %v8068_v5  ;;  %v7839_v11 = vadd.f32 %v14316_v36, %v7750_v6  ;;  %v15100_v22 = vld [vmem:[#allocation81_spill] sm:$0xff]  ;;  %v14394_v29 = vpop.f32.mrf.mxu0 }
 0x7b0   : > { %7887 = vmatmul.bf16.gmra.mxu1 %v10857_v10  ;;  %v7577_v6 = vadd.f32 %v14326_v49, %v15100_v22  ;;  %v7579_v10 = vadd.f32 %v14339_v56, %v15102_v43 }
 0x7b1   : > { %11748 = vst [vmem:[%s14305_s27 + $0x18] sm:$0xff] %v11684_v38   ;;  %v7938_v54 = vadd.f32 %v7839_v11, %v15099_v14 }
 0x7b2   : > { %v7662_v46 = vpop.f32.mrf.mxu3 }
 0x7b3   : > { %v7663_v28 = vadd.f32 %v7662_v46, %v7574_v4  ;;  %v8038_v38 = vadd.f32 %v14284_v26, %v7938_v54  ;;  %v14399_v41 = vpop.f32.mrf.mxu1  ;;  %v867_v54 = vld [vmem:[#allocation2 + $0x1ca] sm:$0xff] }
 0x7b4   : > { %v907_v22 = vpack.c.bf16 %v867_v54, %v867_v54 }
 0x7b5   : > { %v7752_v36 = vadd.f32 %v14324_v12, %v7663_v28  ;;  %v14396_v12 = vpop.f32.mrf.mxu2  ;;  %v8070_v24 = vmax.f32 %v8038_v38, 0.0  ;;  %v10848_v28 = vld [vmem:[#allocation3 + $0x2d8] sm:$0xf] }
 0x7b6   : > { %v988_v38 = vld [vmem:[#allocation2 + $0x1d3] sm:$0xff]  ;;  %947 = vst [vmem:[#allocation3 + $0x300] sm:$0xf] %v907_v22 }
 0x7b7   : > { %v7841_v5 = vadd.f32 %v14329_v1, %v7752_v36  ;;  %7704 = vmatmul.bf16.gmra.mxu3 %v10829_v2  ;;  %v868_v36 = vld [vmem:[#allocation2 + $0x1d2] sm:$0xff] }
 0x7b8   : > { %v987_v2 = vld [vmem:[#allocation2 + $0x1cb] sm:$0xff] }
 0x7b9   : > { %v7939_v4 = vadd.f32 %v7841_v5, %v15101_v34  ;;  %v1027_v34 = vpack.c.bf16 %v987_v2, %v987_v2 }
 0x7ba   : > { %v7665_v46 = vpop.f32.mrf.mxu3 }
 0x7bb   : > { %v8039_v35 = vadd.f32 %v14284_v26, %v7939_v4  ;;  %v7666_v11 = vadd.f32 %v7665_v46, %v7577_v6  ;;  %v908_v6 = vpack.c.bf16 %v868_v36, %v868_v36  ;;  %v1108_v4 = vld [vmem:[#allocation2 + $0x1d4] sm:$0xff]  ;;  %1067 = vst [vmem:[#allocation3 + $0x304] sm:$0xf] %v1027_v34 }
 0x7bd   : > { %v8071_v55 = vmax.f32 %v8039_v35, 0.0  ;;  %v7755_v1 = vadd.f32 %v14337_v31, %v7666_v11  ;;  %v1107_v31 = vld [vmem:[#allocation2 + $0x1cc] sm:$0xff]  ;;  %v10849_v35 = vor.u32 %v11619_v32, %v10848_v28  ;;  %v1028_v11 = vpack.c.bf16 %v988_v38, %v988_v38  ;;  %948 = vst [vmem:[#allocation3 + $0x314] sm:$0xf] %v908_v6 }
 0x7be   : > { %v15103_v28 = vld [vmem:[#allocation139_spill] sm:$0xff] }
 0x7bf   : > { %v11689_v49 = vpack.c.bf16 %v8071_v55, %v8070_v24  ;;  %v7844_v14 = vadd.f32 %v14342_v48, %v7755_v1  ;;  %v1147_v24 = vpack.c.bf16 %v1107_v31, %v1107_v31  ;;  %v1148_v48 = vpack.c.bf16 %v1108_v4, %v1108_v4  ;;  %v14407_v1 = vpop.f32.mrf.mxu0  ;;  %1068 = vst [vmem:[#allocation3 + $0x318] sm:$0xf] %v1028_v11  ;;  %v10868_v4 = vld [vmem:[#allocation3 + $0x300] sm:$0xf] }
 0x7c0   : > { %v7582_v32 = vadd.f32 %v14353_v45, %v15103_v28 }
 0x7c1   : > { %11749 = vst [vmem:[%s14305_s27 + $0x20] sm:$0xff] %v11689_v49   ;;  %v7940_v56 = vadd.f32 %v7844_v14, %v14125_v40  ;;  %v14409_v49 = vpop.f32.mrf.mxu2 }
 0x7c2   : > { %v7667_v5 = vpop.f32.mrf.mxu3  ;;  %1187 = vst [vmem:[#allocation3 + $0x308] sm:$0xf] %v1147_v24  ;;  %v11622_v22 = vld [vmem:[#allocation3 + $0x304] sm:$0xf] }
 0x7c3   : > { %v7668_v46 = vadd.f32 %v7667_v5, %v7579_v10  ;;  %v7855_v10 = vpop.f32.mrf.mxu1  ;;  %v8040_v40 = vadd.f32 %v14284_v26, %v7940_v56  ;;  %1188 = vst [vmem:[#allocation3 + $0x31c] sm:$0xf] %v1148_v48 }
 0x7c5   : > { %v7757_v55 = vadd.f32 %v14351_v8, %v7668_v46  ;;  %v8072_v2 = vmax.f32 %v8040_v40, 0.0  ;;  %v11624_v46 = vld [vmem:[#allocation3 + $0x310] sm:$0xf0] }
 0x7c6   : > { %v10870_v6 = vld [vmem:[#allocation3 + $0x314] sm:$0xf0]  ;;  %v10869_v28 = vor.u32 %v11624_v46, %v10868_v4 }
 0x7c7   : > { %v7846_v43 = vadd.f32 %v14356_v62, %v7757_v55  ;;  %7709 = vmatmul.bf16.gmra.mxu3 %v10849_v35  ;;  %v10873_v34 = vor.u32 %v11622_v22, %v10870_v6  ;;  %v7769_v45 = vpop.f32.mrf.mxu0 }
 0x7c9   : > { %v7941_v8 = vadd.f32 %v7846_v43, %v14132_v51  ;;  %v10876_v31 = vld [vmem:[#allocation3 + $0x308] sm:$0xf]  ;;  %v15104_v51 = vld [vmem:[#allocation47_spill] sm:$0xff]  ;;  %v7593_v24 = vpop.f32.mrf.mxu2  ;;  %7803 = vmatmul.bf16.gmra.mxu0 %v10873_v34 }
 0x7ca   : > { %v7670_v14 = vpop.f32.mrf.mxu3  ;;  %v11625_v35 = vld [vmem:[#allocation3 + $0x318] sm:$0xf0]  ;;  %v7584_v11 = vadd.f32 %v14368_v16, %v15104_v51  ;;  %v15105_v16 = vld [vmem:[#allocation89_spill] sm:$0xff]  ;;  %v15106_v34 = vld [vmem:[#allocation143_spill] sm:$0xff] }
 0x7cb   : > { %v8041_v54 = vadd.f32 %v14284_v26, %v7941_v8  ;;  %v7671_v36 = vadd.f32 %v7670_v14, %v7582_v32  ;;  %v10877_v55 = vor.u32 %v11625_v35, %v10876_v31  ;;  %v7858_v48 = vpop.f32.mrf.mxu1  ;;  %v7587_v14 = vadd.f32 %v14382_v39, %v15105_v16 }
 0x7cc   : > { %v7589_v31 = vadd.f32 %v14396_v12, %v15106_v34 }
 0x7cd   : > { %v8073_v5 = vmax.f32 %v8041_v54, 0.0  ;;  %v7760_v62 = vadd.f32 %v14364_v37, %v7671_v36  ;;  %7892 = vmatmul.bf16.gmra.mxu1 %v10877_v55 }
 0x7cf   : > { %v11694_v38 = vpack.c.bf16 %v8073_v5, %v8072_v2  ;;  %v7849_v56 = vadd.f32 %v14372_v21, %v7760_v62  ;;  %v7771_v36 = vpop.f32.mrf.mxu0 }
 0x7d1   : > { %11750 = vst [vmem:[%s14305_s27 + $0x28] sm:$0xff] %v11694_v38   ;;  %v7942_v32 = vadd.f32 %v7849_v56, %v14141_v58  ;;  %v7596_v5 = vpop.f32.mrf.mxu2 }
 0x7d2   : > { %v7672_v37 = vpop.f32.mrf.mxu3 }
 0x7d3   : > { %v7673_v43 = vadd.f32 %v7672_v37, %v7584_v11  ;;  %v8042_v21 = vadd.f32 %v14284_v26, %v7942_v32  ;;  %v7860_v58 = vpop.f32.mrf.mxu1  ;;  %v15107_v37 = vld [vmem:[#allocation145_spill] sm:$0xff] }
 0x7d5   : > { %v7762_v40 = vadd.f32 %v14380_v18, %v7673_v43  ;;  %v8074_v6 = vmax.f32 %v8042_v21, 0.0 }
 0x7d7   : > { %v7851_v8 = vadd.f32 %v14384_v61, %v7762_v40  ;;  %7714 = vmatmul.bf16.gmra.mxu3 %v10869_v28  ;;  %v7774_v46 = vpop.f32.mrf.mxu0 }
 0x7d9   : > { %v7943_v54 = vadd.f32 %v7851_v8, %v14148_v50  ;;  %v7598_v35 = vpop.f32.mrf.mxu2 }
 0x7da   : > { %v7675_v2 = vpop.f32.mrf.mxu3 }
 0x7db   : > { %v8043_v62 = vadd.f32 %v14284_v26, %v7943_v54  ;;  %v7676_v22 = vadd.f32 %v7675_v2, %v7587_v14  ;;  %v7863_v56 = vpop.f32.mrf.mxu1  ;;  %v15108_v54 = vld [vmem:[#allocation93_spill] sm:$0xff] }
 0x7dd   : > { %v8075_v18 = vmax.f32 %v8043_v62, 0.0  ;;  %v7765_v61 = vadd.f32 %v14394_v29, %v7676_v22  ;;  %v7592_v29 = vadd.f32 %v14409_v49, %v15107_v37 }
 0x7df   : > { %v11699_v38 = vpack.c.bf16 %v8075_v18, %v8074_v6  ;;  %v7854_v39 = vadd.f32 %v14399_v41, %v7765_v61  ;;  %v15109_v61 = vld [vmem:[#allocation148_spill] sm:$0xff] }
 0x7e1   : > { %11751 = vst [vmem:[%s14305_s27 + $0x30] sm:$0xff] %v11699_v38   ;;  %v7944_v51 = vadd.f32 %v7854_v39, %v14155_v20  ;;  %v7776_v20 = vpop.f32.mrf.mxu0  ;;  %v7601_v14 = vpop.f32.mrf.mxu2  ;;  %v7597_v38 = vadd.f32 %v7596_v5, %v15109_v61 }
 0x7e2   : > { %v7677_v4 = vpop.f32.mrf.mxu3 }
 0x7e3   : > { %v7678_v50 = vadd.f32 %v7677_v4, %v7589_v31  ;;  %v8044_v43 = vadd.f32 %v14284_v26, %v7944_v51  ;;  %v7865_v21 = vpop.f32.mrf.mxu1 }
 0x7e5   : > { %v7767_v11 = vadd.f32 %v14407_v1, %v7678_v50  ;;  %v8076_v40 = vmax.f32 %v8044_v43, 0.0 }
 0x7e7   : > { %v7856_v55 = vadd.f32 %v7855_v10, %v7767_v11  ;;  %v7594_v10 = vadd.f32 %v7593_v24, %v15108_v54 }
 0x7e9   : > { %v7945_v12 = vadd.f32 %v7856_v55, %v14162_v9  ;;  %v7779_v18 = vpop.f32.mrf.mxu0  ;;  %v7603_v34 = vpop.f32.mrf.mxu2 }
 0x7ea   : > { %v7680_v28 = vpop.f32.mrf.mxu3 }
 0x7eb   : > { %v8045_v41 = vadd.f32 %v14284_v26, %v7945_v12  ;;  %v7681_v32 = vadd.f32 %v7680_v28, %v7592_v29  ;;  %v7868_v39 = vpop.f32.mrf.mxu1 }
 0x7ed   : > { %v8077_v8 = vmax.f32 %v8045_v41, 0.0  ;;  %v7770_v16 = vadd.f32 %v7769_v45, %v7681_v32  ;;  %v15111_v32 = vld [vmem:[#allocation149_spill] sm:$0xff] }
 0x7ef   : > { %v11704_v1 = vpack.c.bf16 %v8077_v8, %v8076_v40  ;;  %v7859_v2 = vadd.f32 %v7858_v48, %v7770_v16  ;;  %v7602_v40 = vadd.f32 %v7601_v14, %v15111_v32 }
 0x7f1   : > { %11752 = vst [vmem:[%s14305_s27 + $0x38] sm:$0xff] %v11704_v1   ;;  %v7946_v22 = vadd.f32 %v7859_v2, %v14169_v3  ;;  %v7781_v37 = vpop.f32.mrf.mxu0  ;;  %v7606_v29 = vpop.f32.mrf.mxu2 }
 0x7f2   : > { %v7682_v49 = vpop.f32.mrf.mxu3 }
 0x7f3   : > { %v7683_v62 = vadd.f32 %v7682_v49, %v7594_v10  ;;  %v8046_v45 = vadd.f32 %v14284_v26, %v7946_v22  ;;  %v7870_v12 = vpop.f32.mrf.mxu1 }
 0x7f5   : > { %v7772_v9 = vadd.f32 %v7771_v36, %v7683_v62  ;;  %v8078_v50 = vmax.f32 %v8046_v45, 0.0  ;;  %v15110_v36 = vld [vmem:[#allocation144_spill] sm:$0xff] }
 0x7f6   : > { %v7599_v55 = vadd.f32 %v7598_v35, %v15110_v36 }
 0x7f7   : > { %v7861_v6 = vadd.f32 %v7860_v58, %v7772_v9 }
 0x7f9   : > { %v7947_v31 = vadd.f32 %v7861_v6, %v14176_v60  ;;  %v7784_v1 = vpop.f32.mrf.mxu0  ;;  %v7608_v54 = vpop.f32.mrf.mxu2 }
 0x7fa   : > { %v7685_v4 = vpop.f32.mrf.mxu3 }
 0x7fb   : > { %v8047_v24 = vadd.f32 %v14284_v26, %v7947_v31  ;;  %v7686_v48 = vadd.f32 %v7685_v4, %v7597_v38  ;;  %v7873_v62 = vpop.f32.mrf.mxu1  ;;  %v15113_v4 = vld [vmem:[#allocation75_spill] sm:$0xff] }
 0x7fd   : > { %v8079_v51 = vmax.f32 %v8047_v24, 0.0  ;;  %v7775_v11 = vadd.f32 %v7774_v46, %v7686_v48  ;;  %v7607_v24 = vadd.f32 %v7606_v29, %v15113_v4 }
 0x7ff   : > { %v11709_v3 = vpack.c.bf16 %v8079_v51, %v8078_v50  ;;  %v7864_v58 = vadd.f32 %v7863_v56, %v7775_v11 }
 0x801   : > { %11753 = vst [vmem:[%s14305_s27 + $0x40] sm:$0xff] %v11709_v3   ;;  %v7948_v60 = vadd.f32 %v7864_v58, %v14181_v59  ;;  %v7786_v61 = vpop.f32.mrf.mxu0  ;;  %v7611_v38 = vpop.f32.mrf.mxu2 }
 0x802   : > { %v7687_v5 = vpop.f32.mrf.mxu3 }
 0x803   : > { %v7688_v43 = vadd.f32 %v7687_v5, %v7599_v55  ;;  %v8048_v8 = vadd.f32 %v14284_v26, %v7948_v60  ;;  %v7875_v31 = vpop.f32.mrf.mxu1  ;;  %v15114_v55 = vld [vmem:[#allocation73_spill] sm:$0xff] }
 0x804   : > { %v7609_v58 = vadd.f32 %v7608_v54, %v15114_v55 }
 0x805   : > { %v7777_v28 = vadd.f32 %v7776_v20, %v7688_v43  ;;  %v8080_v10 = vmax.f32 %v8048_v8, 0.0  ;;  %v15112_v20 = vld [vmem:[#allocation151_spill] sm:$0xff] }
 0x806   : > { %v7604_v22 = vadd.f32 %v7603_v34, %v15112_v20 }
 0x807   : > { %v7866_v41 = vadd.f32 %v7865_v21, %v7777_v28 }
 0x809   : > { %v7949_v46 = vadd.f32 %v7866_v41, %v14188_v15  ;;  %v7789_v36 = vpop.f32.mrf.mxu0  ;;  %v15115_v41 = vld [vmem:[#allocation79_spill] sm:$0xff] }
 0x80a   : > { %v7690_v16 = vpop.f32.mrf.mxu3  ;;  %v7612_v32 = vadd.f32 %v7611_v38, %v15115_v41 }
 0x80b   : > { %v8049_v35 = vadd.f32 %v14284_v26, %v7949_v46  ;;  %v7691_v56 = vadd.f32 %v7690_v16, %v7602_v40  ;;  %v7878_v43 = vpop.f32.mrf.mxu1 }
 0x80d   : > { %v8081_v2 = vmax.f32 %v8049_v35, 0.0  ;;  %v7780_v49 = vadd.f32 %v7779_v18, %v7691_v56 }
 0x80f   : > { %v11714_v59 = vpack.c.bf16 %v8081_v2, %v8080_v10  ;;  %v7869_v21 = vadd.f32 %v7868_v39, %v7780_v49 }
 0x811   : > { %11754 = vst [vmem:[%s14305_s27 + $0x48] sm:$0xff] %v11714_v59   ;;  %v7950_v6 = vadd.f32 %v7869_v21, %v14195_v27  ;;  %v7791_v46 = vpop.f32.mrf.mxu0 }
 0x812   : > { %v7692_v14 = vpop.f32.mrf.mxu3 }
 0x813   : > { %v7693_v9 = vadd.f32 %v7692_v14, %v7604_v22  ;;  %v8050_v18 = vadd.f32 %v14284_v26, %v7950_v6  ;;  %v7880_v54 = vpop.f32.mrf.mxu1 }
 0x815   : > { %v7782_v15 = vadd.f32 %v7781_v37, %v7693_v9  ;;  %v8082_v51 = vmax.f32 %v8050_v18, 0.0  ;;  %v7613_v37 = vpop.f32.mrf.mxu2 }
 0x817   : > { %v7871_v45 = vadd.f32 %v7870_v12, %v7782_v15 }
 0x819   : > { %v7951_v48 = vadd.f32 %v7871_v45, %v14202_v33  ;;  %v7794_v21 = vpop.f32.mrf.mxu0 }
 0x81a   : > { %v7695_v50 = vpop.f32.mrf.mxu3 }
 0x81b   : > { %v8051_v34 = vadd.f32 %v14284_v26, %v7951_v48  ;;  %v7696_v39 = vadd.f32 %v7695_v50, %v7607_v24  ;;  %v7883_v6 = vpop.f32.mrf.mxu1 }
 0x81d   : > { %v8083_v11 = vmax.f32 %v8051_v34, 0.0  ;;  %v7785_v3 = vadd.f32 %v7784_v1, %v7696_v39  ;;  %v7616_v1 = vpop.f32.mrf.mxu2 }
 0x81f   : > { %v11719_v27 = vpack.c.bf16 %v8083_v11, %v8082_v51  ;;  %v7874_v5 = vadd.f32 %v7873_v62, %v7785_v3  ;;  %v7614_v62 = vadd.f32 %v7613_v37, %v14150_v30 }
 0x821   : > { %11755 = vst [vmem:[%s14305_s27 + $0x50] sm:$0xff] %v11719_v27   ;;  %v7952_v60 = vadd.f32 %v7874_v5, %v14209_v0  ;;  %v7796_v50 = vpop.f32.mrf.mxu0 }
 0x822   : > { %v7697_v29 = vpop.f32.mrf.mxu3 }
 0x823   : > { %v7698_v12 = vadd.f32 %v7697_v29, %v7609_v58  ;;  %v8052_v40 = vadd.f32 %v14284_v26, %v7952_v60  ;;  %v7885_v39 = vpop.f32.mrf.mxu1 }
 0x825   : > { %v7787_v33 = vadd.f32 %v7786_v61, %v7698_v12  ;;  %v8084_v10 = vmax.f32 %v8052_v40, 0.0  ;;  %v7618_v9 = vpop.f32.mrf.mxu2  ;;  %v7617_v61 = vadd.f32 %v7616_v1, %v14157_v47 }
 0x826   : > { %v7619_v51 = vadd.f32 %v7618_v9, %v14165_v57 }
 0x827   : > { %v7876_v28 = vadd.f32 %v7875_v31, %v7787_v33 }
 0x829   : > { %v7953_v8 = vadd.f32 %v7876_v28, %v14214_v53 }
 0x82a   : > { %v7700_v16 = vpop.f32.mrf.mxu3 }
 0x82b   : > { %v8053_v35 = vadd.f32 %v14284_v26, %v7953_v8  ;;  %v7701_v56 = vadd.f32 %v7700_v16, %v7612_v32 }
 0x82d   : > { %v8085_v2 = vmax.f32 %v8053_v35, 0.0  ;;  %v7790_v49 = vadd.f32 %v7789_v36, %v7701_v56  ;;  %v7621_v34 = vpop.f32.mrf.mxu2  ;;  %v7799_v36 = vpop.f32.mrf.mxu0 }
 0x82e   : > { %v7888_v58 = vpop.f32.mrf.mxu1  ;;  %v7622_v37 = vadd.f32 %v7621_v34, %v14173_v17 }
 0x82f   : > { %v11724_v0 = vpack.c.bf16 %v8085_v2, %v8084_v10  ;;  %v7879_v59 = vadd.f32 %v7878_v43, %v7790_v49 }
 0x831   : > { %11756 = vst [vmem:[%s14305_s27 + $0x58] sm:$0xff] %v11724_v0   ;;  %v7954_v53 = vadd.f32 %v7879_v59, %v14221_v44 }
 0x832   : > { %v7702_v20 = vpop.f32.mrf.mxu3 }
 0x833   : > { %v7703_v22 = vadd.f32 %v7702_v20, %v7614_v62  ;;  %v8054_v38 = vadd.f32 %v14284_v26, %v7954_v53 }
 0x835   : > { %v7792_v14 = vadd.f32 %v7791_v46, %v7703_v22  ;;  %v8086_v24 = vmax.f32 %v8054_v38, 0.0  ;;  %v7623_v29 = vpop.f32.mrf.mxu2  ;;  %v7801_v32 = vpop.f32.mrf.mxu0 }
 0x836   : > { %v7624_v40 = vadd.f32 %v7623_v29, %v14183_v7  ;;  %v7890_v46 = vpop.f32.mrf.mxu1 }
 0x837   : > { %v7881_v15 = vadd.f32 %v7880_v54, %v7792_v14  ;;  %v15116_v14 = vld [vmem:[#allocation16_spill] sm:$0xff] }
 0x839   : > { %v7955_v45 = vadd.f32 %v7881_v15, %v14228_v13 }
 0x83a   : > { %v7705_v31 = vpop.f32.mrf.mxu3 }
 0x83b   : > { %v8055_v30 = vadd.f32 %v14284_v26, %v7955_v45  ;;  %v7706_v4 = vadd.f32 %v7705_v31, %v7617_v61 }
 0x83d   : > { %v8087_v18 = vmax.f32 %v8055_v30, 0.0  ;;  %v7795_v48 = vadd.f32 %v7794_v21, %v7706_v4  ;;  %v7626_v35 = vpop.f32.mrf.mxu2  ;;  %v15117_v4 = vld [vmem:[#allocation17_spill] sm:$0xff] }
 0x83e   : > { %v7627_v54 = vadd.f32 %v7626_v35, %v14190_v63 }
 0x83f   : > { %v11729_v44 = vpack.c.bf16 %v8087_v18, %v8086_v24  ;;  %v7884_v11 = vadd.f32 %v7883_v6, %v7795_v48 }
 0x841   : > { %11757 = vst [vmem:[%s14305_s27 + $0x60] sm:$0xff] %v11729_v44   ;;  %v7956_v27 = vadd.f32 %v7884_v11, %v14235_v23 }
 0x842   : > { %v7707_v47 = vpop.f32.mrf.mxu3 }
 0x843   : > { %v7708_v3 = vadd.f32 %v7707_v47, %v7619_v51  ;;  %v8056_v5 = vadd.f32 %v14284_v26, %v7956_v27 }
 0x845   : > { %v7797_v13 = vadd.f32 %v7796_v50, %v7708_v3  ;;  %v8088_v33 = vmax.f32 %v8056_v5, 0.0  ;;  %v7628_v53 = vpop.f32.mrf.mxu2 }
 0x846   : > { %v7804_v49 = vpop.f32.mrf.mxu0  ;;  %v7629_v9 = vadd.f32 %v7628_v53, %v15116_v14 }
 0x847   : > { %v7886_v55 = vadd.f32 %v7885_v39, %v7797_v13 }
 0x849   : > { %v7957_v43 = vadd.f32 %v7886_v55, %v14240_v19 }
 0x84a   : > { %v7710_v12 = vpop.f32.mrf.mxu3  ;;  %v7893_v59 = vpop.f32.mrf.mxu1 }
 0x84b   : > { %v8057_v57 = vadd.f32 %v14284_v26, %v7957_v43  ;;  %v7711_v60 = vadd.f32 %v7710_v12, %v7622_v37 }
 0x84d   : > { %v8089_v28 = vmax.f32 %v8057_v57, 0.0  ;;  %v7800_v41 = vadd.f32 %v7799_v36, %v7711_v60 }
 0x84e   : > { %v7806_v61 = vpop.f32.mrf.mxu0 }
 0x84f   : > { %v11734_v23 = vpack.c.bf16 %v8089_v28, %v8088_v33  ;;  %v7889_v8 = vadd.f32 %v7888_v58, %v7800_v41 }
 0x851   : > { %11758 = vst [vmem:[%s14305_s27 + $0x68] sm:$0xff] %v11734_v23   ;;  %v7958_v19 = vadd.f32 %v7889_v8, %v14245_v42 }
 0x852   : > { %v7712_v17 = vpop.f32.mrf.mxu3  ;;  %v7895_v45 = vpop.f32.mrf.mxu1 }
 0x853   : > { %v7713_v16 = vadd.f32 %v7712_v17, %v7624_v40  ;;  %v8058_v10 = vadd.f32 %v14284_v26, %v7958_v19 }
 0x855   : > { %v7802_v56 = vadd.f32 %v7801_v32, %v7713_v16  ;;  %v8090_v20 = vmax.f32 %v8058_v10, 0.0 }
 0x857   : > { %v7891_v1 = vadd.f32 %v7890_v46, %v7802_v56 }
 0x859   : > { %v7959_v2 = vadd.f32 %v7891_v1, %v14250_v25 }
 0x85a   : > { %v7715_v0 = vpop.f32.mrf.mxu3 }
 0x85b   : > { %v8059_v7 = vadd.f32 %v14284_v26, %v7959_v2  ;;  %v7716_v62 = vadd.f32 %v7715_v0, %v7627_v54 }
 0x85d   : > { %v8091_v22 = vmax.f32 %v8059_v7, 0.0  ;;  %v7805_v21 = vadd.f32 %v7804_v49, %v7716_v62 }
 0x85f   : > { %v11739_v42 = vpack.c.bf16 %v8091_v22, %v8090_v20  ;;  %v7894_v63 = vadd.f32 %v7893_v59, %v7805_v21 }
 0x861   : > { %11759 = vst [vmem:[%s14305_s27 + $0x70] sm:$0xff] %v11739_v42   ;;  %v7960_v25 = vadd.f32 %v7894_v63, %v14259_v52 }
 0x862   : > { %v7717_v6 = vpop.f32.mrf.mxu3 }
 0x863   : > { %v7718_v15 = vadd.f32 %v7717_v6, %v7629_v9  ;;  %v8060_v30 = vadd.f32 %v14284_v26, %v7960_v25 }
 0x865   : > { %v7807_v38 = vadd.f32 %v7806_v61, %v7718_v15  ;;  %v8092_v48 = vmax.f32 %v8060_v30, 0.0 }
 0x867   : > { %v7896_v31 = vadd.f32 %v7895_v45, %v7807_v38 }
 0x869   : > { %v7961_v24 = vadd.f32 %v7896_v31, %v15117_v4 }
 0x86b   : > { %v8061_v18 = vadd.f32 %v14284_v26, %v7961_v24 }
 0x86d   : > { %v8093_v50 = vmax.f32 %v8061_v18, 0.0 }
 0x86f   : > { %v11744_v44 = vpack.c.bf16 %v8093_v50, %v8092_v48 }
 0x871   : > { %11760 = vst [vmem:[%s14305_s27 + $0x78] sm:$0xff] %v11744_v44  }
 0x872 PF: > { %s14_s15 = sadd.s32 1, %s11795_s15  }
 0x873   : > { %p11_p4 = scmp.ge.s32.totalorder %s14_s15, 4  }
 0x875   :  { %13 = sbr.rel (!%p11_p4) target bundleno = 1 (0x1), region = 72 }

</bundles_post_ra>
